<compile_context>
chip_gen: v5e
topology: v5e:2x2
jax: 0.10.0
libtpu: 0.0.40
codegen_flags: <defaults>
</compile_context>

<pallas_src>
import functools
import numpy as np
import jax
import jax.numpy as jnp
from jax.experimental import pallas as pl
from jax.experimental.pallas import tpu as pltpu

JP_VOCAB_SIZE = 64       # synthetic vocab (real module uses the JP vocab size)
N_EMBD = 128             # config.n_embd
HIDDEN = 256             # config.hidden_size
SUBLANE = 8              # f32 sublane count; batch is padded to a multiple of this
MAX_BATCH_BLOCK = 128    # batch rows per grid step when B is large
MAX_UNROLL_T = 16        # static Python unroll up to this T, fori_loop beyond


def _sigmoid_via_tanh(x):
    # sigmoid(x) = 0.5 * (1 + tanh(x/2)): one EUP op instead of exp + reciprocal.
    return 0.5 * jnp.tanh(0.5 * x) + 0.5


def _encoder_lstm_kernel(lens_ref, x_ref, wih_ref, whh_ref, b_ref,
                         out_ref, hn_ref, cn_ref, gx_ref):
    T, Bb, E = x_ref.shape
    H = whh_ref.shape[0]

    # ---- hoisted input projection: one bf16 MXU matmul for ALL timesteps -> VMEM scratch ----
    x_flat = x_ref[...].reshape(T * Bb, E).astype(jnp.bfloat16)       # time-major, contiguous
    gx = jnp.dot(x_flat, wih_ref[...], preferred_element_type=jnp.float32)
    gx_ref[...] = (gx + b_ref[...]).reshape(T, Bb, 4 * H)

    lens = lens_ref[...]                                              # (Bb, 1) int32

    def step(t, h, c):
        # h @ W_hh^T in bf16 on the MXU; gates / c-state stay f32.
        gates = gx_ref[t] + jnp.dot(h.astype(jnp.bfloat16), whh_ref[...],
                                    preferred_element_type=jnp.float32)   # (Bb, 4H)
        i_g = _sigmoid_via_tanh(gates[:, 0 * H:1 * H])
        f_g = _sigmoid_via_tanh(gates[:, 1 * H:2 * H])
        g_g = jnp.tanh(gates[:, 2 * H:3 * H])
        o_g = _sigmoid_via_tanh(gates[:, 3 * H:4 * H])

        c_new = f_g * c + i_g * g_g
        h_new = o_g * jnp.tanh(c_new)

        mask = lens > t                                               # (Bb, 1), broadcasts over H
        out_ref[t] = jnp.where(mask, h_new, 0.0)                      # lane-dense (Bb, H) store
        return jnp.where(mask, h_new, h), jnp.where(mask, c_new, c)   # freeze state past seq_len

    h = jnp.zeros((Bb, H), jnp.float32)
    c = jnp.zeros((Bb, H), jnp.float32)
    if T <= MAX_UNROLL_T:
        for t in range(T):
            h, c = step(t, h, c)
    else:
        h, c = jax.lax.fori_loop(0, T, lambda t, hc: step(t, *hc), (h, c), unroll=2)

    # final states written exactly once
    hn_ref[...] = h
    cn_ref[...] = c


def lstm_pallas(x_bte, seq_lens, w_ih_t, w_hh_t, bias):
    """x_bte: (B, T, E) f32 embedded inputs; seq_lens: (B,) int32.
    Returns out (B, T, H), h_n (B, H), c_n (B, H)."""
    B, T, E = x_bte.shape
    H = w_hh_t.shape[0]

    # Pad batch to a sublane multiple (small B) or a multiple of the batch block (large B).
    if B <= MAX_BATCH_BLOCK:
        Bp = ((B + SUBLANE - 1) // SUBLANE) * SUBLANE
        BB = Bp
    else:
        BB = MAX_BATCH_BLOCK
        Bp = ((B + BB - 1) // BB) * BB

    # Padded rows get seq_len = 0 -> never update state, outputs stay zero.
    x_p = jnp.pad(x_bte.astype(jnp.float32), ((0, Bp - B), (0, 0), (0, 0)))
    x_tm = jnp.transpose(x_p, (1, 0, 2))                              # (T, Bp, E) time-major
    lens_p = jnp.pad(seq_lens.astype(jnp.int32), (0, Bp - B)).reshape(Bp, 1)
    bias2d = bias.reshape(1, 4 * H).astype(jnp.float32)
    w_ih_b = w_ih_t.astype(jnp.bfloat16)                              # bf16 MXU inputs
    w_hh_b = w_hh_t.astype(jnp.bfloat16)

    out_shapes = (
        jax.ShapeDtypeStruct((T, Bp, H), jnp.float32),                # per-step outputs, time-major
        jax.ShapeDtypeStruct((Bp, H), jnp.float32),                   # h_n
        jax.ShapeDtypeStruct((Bp, H), jnp.float32),                   # c_n
    )
    grid_spec = pltpu.PrefetchScalarGridSpec(
        num_scalar_prefetch=0,
        grid=(Bp // BB,),                                             # batch blocks (1 at toy size)
        in_specs=[
            pl.BlockSpec((BB, 1), lambda b: (b, 0)),                  # seq_lens
            pl.BlockSpec((T, BB, E), lambda b: (0, b, 0)),            # x, time-major
            pl.BlockSpec((E, 4 * H), lambda b: (0, 0)),               # W_ih^T (resident)
            pl.BlockSpec((H, 4 * H), lambda b: (0, 0)),               # W_hh^T (resident)
            pl.BlockSpec((1, 4 * H), lambda b: (0, 0)),               # bias (b_ih + b_hh)
        ],
        out_specs=[
            pl.BlockSpec((T, BB, H), lambda b: (0, b, 0)),
            pl.BlockSpec((BB, H), lambda b: (b, 0)),
            pl.BlockSpec((BB, H), lambda b: (b, 0)),
        ],
        scratch_shapes=[pltpu.VMEM((T, BB, 4 * H), jnp.float32)],     # hoisted projection gx
    )
    out_tm, h_n, c_n = pl.pallas_call(
        _encoder_lstm_kernel,
        out_shape=out_shapes,
        grid_spec=grid_spec,
        compiler_params=pltpu.CompilerParams(
            dimension_semantics=("parallel",)),                       # batch blocks are independent
    )(lens_p, x_tm, w_ih_b, w_hh_b, bias2d)

    out = jnp.transpose(out_tm, (1, 0, 2))[:B]                        # back to batch-first
    return out, h_n[:B], c_n[:B]


def init_params(key, vocab=JP_VOCAB_SIZE, n_embd=N_EMBD, hidden=HIDDEN):
    k_emb, k_wih, k_whh, k_bih, k_bhh = jax.random.split(key, 5)
    bound = 1.0 / np.sqrt(hidden)
    return {
        "embedding": jax.random.normal(k_emb, (vocab, n_embd), jnp.float32),
        # stored pre-transposed: (E, 4H) and (H, 4H); PyTorch gate order i,f,g,o
        "w_ih_t": jax.random.uniform(k_wih, (n_embd, 4 * hidden), jnp.float32, -bound, bound),
        "w_hh_t": jax.random.uniform(k_whh, (hidden, 4 * hidden), jnp.float32, -bound, bound),
        "b_ih": jax.random.uniform(k_bih, (4 * hidden,), jnp.float32, -bound, bound),
        "b_hh": jax.random.uniform(k_bhh, (4 * hidden,), jnp.float32, -bound, bound),
    }


def encoder_rnn_forward(params, tokens, seq_lens, max_len=None):
    """tokens: (B, T) int32; seq_lens: (B,) int32; max_len: optional *static* int equal to
    max(seq_lens) for the pad_packed_sequence-style truncation (avoids a device->host sync).
    Returns (output [B, max_len or T, H], (h_n [1,B,H], c_n [1,B,H]))."""
    # TODO(synk): fuse the embedding gather into the kernel (32 KiB table fits VMEM easily).
    x = jnp.take(params["embedding"], tokens, axis=0)                 # (B, T, E)
    bias = params["b_ih"] + params["b_hh"]
    out, h_n, c_n = lstm_pallas(x, seq_lens, params["w_ih_t"], params["w_hh_t"], bias)
    if max_len is not None:
        out = out[:, :max_len]
    return out, (h_n[None], c_n[None])


def _reference(params, tokens, seq_lens):
    """Pure-JAX f32 reference (masked LSTM scan) for correctness check."""
    x = jnp.take(params["embedding"], tokens, axis=0)
    x_tm = jnp.transpose(x, (1, 0, 2))
    T, B, E = x_tm.shape
    H = params["w_hh_t"].shape[0]
    b = params["b_ih"] + params["b_hh"]

    def step(carry, inp):
        h, c = carry
        x_t, t = inp
        gates = x_t @ params["w_ih_t"] + h @ params["w_hh_t"] + b
        i = jax.nn.sigmoid(gates[:, :H]); f = jax.nn.sigmoid(gates[:, H:2 * H])
        g = jnp.tanh(gates[:, 2 * H:3 * H]); o = jax.nn.sigmoid(gates[:, 3 * H:])
        c_new = f * c + i * g
        h_new = o * jnp.tanh(c_new)
        valid = (t < seq_lens)[:, None].astype(jnp.float32)
        return (valid * h_new + (1 - valid) * h,
                valid * c_new + (1 - valid) * c), valid * h_new

    (h, c), out_tm = jax.lax.scan(step,
                                  (jnp.zeros((B, H), jnp.float32), jnp.zeros((B, H), jnp.float32)),
                                  (x_tm, jnp.arange(T)))
    return jnp.transpose(out_tm, (1, 0, 2)), h, c


if __name__ == "__main__":
    B, T = 4, 8
    key = jax.random.PRNGKey(0)
    k_p, k_tok = jax.random.split(key)
    params = init_params(k_p)
    tokens = jax.random.randint(k_tok, (B, T), 0, JP_VOCAB_SIZE, dtype=jnp.int32)
    seq_lens_py = [8, 5, 3, 7]                       # known on the host -> static max_len
    seq_lens = jnp.array(seq_lens_py, dtype=jnp.int32)
    t_max = max(seq_lens_py)                         # no device->host sync

    fwd = jax.jit(functools.partial(encoder_rnn_forward, max_len=t_max))
    out, (h_n, c_n) = fwd(params, tokens, seq_lens)
    jax.block_until_ready((out, h_n, c_n))

    ref_out, ref_h, ref_c = _reference(params, tokens, seq_lens)
    # bf16 MXU inputs in the kernel vs f32 reference -> relaxed tolerance
    np.testing.assert_allclose(np.asarray(out), np.asarray(ref_out[:, :t_max]),
                               rtol=2e-2, atol=2e-2)
    np.testing.assert_allclose(np.asarray(h_n[0]), np.asarray(ref_h), rtol=2e-2, atol=2e-2)
    np.testing.assert_allclose(np.asarray(c_n[0]), np.asarray(ref_c), rtol=2e-2, atol=2e-2)

    print("KERNEL_OK")
</pallas_src>

<mosaic_0001>
module attributes {stable_mosaic.version = 11 : i64} {
  func.func @_encoder_lstm_kernel(%arg0: i32, %arg1: memref<8x1xi32, #tpu.memory_space<vmem>>, %arg2: memref<8x8x128xf32, #tpu.memory_space<vmem>>, %arg3: memref<128x1024xbf16, #tpu.memory_space<vmem>>, %arg4: memref<256x1024xbf16, #tpu.memory_space<vmem>>, %arg5: memref<1x1024xf32, #tpu.memory_space<vmem>>, %arg6: memref<8x8x256xf32, #tpu.memory_space<vmem>>, %arg7: memref<8x256xf32, #tpu.memory_space<vmem>>, %arg8: memref<8x256xf32, #tpu.memory_space<vmem>>, %arg9: memref<8x8x1024xf32, #tpu.memory_space<vmem>>) attributes {dimension_semantics = [#tpu.dimension_semantics<parallel>], iteration_bounds = array<i64: 1>, scalar_prefetch = 0 : i64, scratch_operands = 1 : i64, tpu.core_type = #tpu.core_type<tc>, window_params = [{transform_indices = @transform_0, window_bounds = array<i64: 8, 1>}, {transform_indices = @transform_1, window_bounds = array<i64: 8, 8, 128>}, {pipeline_mode = #tpu.pipeline_mode<synchronous>, transform_indices = @transform_2, window_bounds = array<i64: 128, 1024>}, {pipeline_mode = #tpu.pipeline_mode<synchronous>, transform_indices = @transform_3, window_bounds = array<i64: 256, 1024>}, {pipeline_mode = #tpu.pipeline_mode<synchronous>, transform_indices = @transform_4, window_bounds = array<i64: 1, 1024>}, {transform_indices = @transform_5, window_bounds = array<i64: 8, 8, 256>}, {transform_indices = @transform_6, window_bounds = array<i64: 8, 256>}, {transform_indices = @transform_7, window_bounds = array<i64: 8, 256>}]} {
    %c0 = arith.constant 0 : index
    %c0_0 = arith.constant 0 : index
    %c0_1 = arith.constant 0 : index
    %0 = vector.load %arg2[%c0, %c0_0, %c0_1] : memref<8x8x128xf32, #tpu.memory_space<vmem>>, vector<8x8x128xf32>
    %1 = vector.shape_cast %0 : vector<8x8x128xf32> to vector<64x128xf32>
    %2 = arith.truncf %1 : vector<64x128xf32> to vector<64x128xbf16>
    %c0_2 = arith.constant 0 : index
    %c0_3 = arith.constant 0 : index
    %3 = vector.load %arg3[%c0_2, %c0_3] : memref<128x1024xbf16, #tpu.memory_space<vmem>>, vector<128x1024xbf16>
    %cst = arith.constant dense<0.000000e+00> : vector<64x1024xf32>
    %4 = tpu.matmul %2, %3, %cst {dimension_numbers = #tpu.dot_dimension_numbers<[1], [0], [0], [1], [0, 0, 1, 1], [], []>} : vector<64x128xbf16>, vector<128x1024xbf16>, vector<64x1024xf32> -> vector<64x1024xf32>
    %c0_4 = arith.constant 0 : index
    %c0_5 = arith.constant 0 : index
    %5 = vector.load %arg5[%c0_4, %c0_5] : memref<1x1024xf32, #tpu.memory_space<vmem>>, vector<1x1024xf32>
    %6 = vector.broadcast %5 : vector<1x1024xf32> to vector<64x1024xf32>
    %7 = arith.addf %4, %6 : vector<64x1024xf32>
    %8 = vector.shape_cast %7 : vector<64x1024xf32> to vector<8x8x1024xf32>
    %c0_6 = arith.constant 0 : index
    %c0_7 = arith.constant 0 : index
    %c0_8 = arith.constant 0 : index
    %9 = vector.load %arg9[%c0_6, %c0_7, %c0_8] : memref<8x8x1024xf32, #tpu.memory_space<vmem>>, vector<8x8x1024xf32>
    tpu.vector_store %arg9[%c0_6, %c0_7, %c0_8], %8 {strides = array<i32>} : memref<8x8x1024xf32, #tpu.memory_space<vmem>>, vector<8x8x1024xf32>,
    %c0_9 = arith.constant 0 : index
    %c0_10 = arith.constant 0 : index
    %10 = vector.load %arg1[%c0_9, %c0_10] : memref<8x1xi32, #tpu.memory_space<vmem>>, vector<8x1xi32>
    %cst_11 = arith.constant 0.000000e+00 : f32
    %11 = vector.broadcast %cst_11 : f32 to vector<8x256xf32>
    %cst_12 = arith.constant 0.000000e+00 : f32
    %12 = vector.broadcast %cst_12 : f32 to vector<8x256xf32>
    %c0_13 = arith.constant 0 : index
    %c0_14 = arith.constant 0 : index
    %c0_15 = arith.constant 0 : index
    %13 = vector.load %arg9[%c0_13, %c0_14, %c0_15] : memref<8x8x1024xf32, #tpu.memory_space<vmem>>, vector<1x8x1024xf32>
    %14 = vector.shape_cast %13 : vector<1x8x1024xf32> to vector<8x1024xf32>
    %15 = arith.truncf %11 : vector<8x256xf32> to vector<8x256xbf16>
    %c0_16 = arith.constant 0 : index
    %c0_17 = arith.constant 0 : index
    %16 = vector.load %arg4[%c0_16, %c0_17] : memref<256x1024xbf16, #tpu.memory_space<vmem>>, vector<256x1024xbf16>
    %cst_18 = arith.constant dense<0.000000e+00> : vector<8x1024xf32>
    %17 = tpu.matmul %15, %16, %cst_18 {dimension_numbers = #tpu.dot_dimension_numbers<[1], [0], [0], [1], [0, 0, 1, 1], [], []>} : vector<8x256xbf16>, vector<256x1024xbf16>, vector<8x1024xf32> -> vector<8x1024xf32>
    %18 = arith.addf %14, %17 : vector<8x1024xf32>
    %19 = vector.extract_strided_slice %18 {offsets = [0, 0], sizes = [8, 256], strides = [1, 1]} : vector<8x1024xf32> to vector<8x256xf32>
    %cst_19 = arith.constant 5.000000e-01 : f32
    %20 = vector.broadcast %cst_19 : f32 to vector<8x256xf32>
    %21 = arith.mulf %20, %19 : vector<8x256xf32>
    %22 = math.tanh %21 : vector<8x256xf32>
    %cst_20 = arith.constant 5.000000e-01 : f32
    %23 = vector.broadcast %cst_20 : f32 to vector<8x256xf32>
    %24 = arith.mulf %23, %22 : vector<8x256xf32>
    %cst_21 = arith.constant 5.000000e-01 : f32
    %25 = vector.broadcast %cst_21 : f32 to vector<8x256xf32>
    %26 = arith.addf %24, %25 : vector<8x256xf32>
    %27 = vector.extract_strided_slice %18 {offsets = [0, 256], sizes = [8, 256], strides = [1, 1]} : vector<8x1024xf32> to vector<8x256xf32>
    %cst_22 = arith.constant 5.000000e-01 : f32
    %28 = vector.broadcast %cst_22 : f32 to vector<8x256xf32>
    %29 = arith.mulf %28, %27 : vector<8x256xf32>
    %30 = math.tanh %29 : vector<8x256xf32>
    %cst_23 = arith.constant 5.000000e-01 : f32
    %31 = vector.broadcast %cst_23 : f32 to vector<8x256xf32>
    %32 = arith.mulf %31, %30 : vector<8x256xf32>
    %cst_24 = arith.constant 5.000000e-01 : f32
    %33 = vector.broadcast %cst_24 : f32 to vector<8x256xf32>
    %34 = arith.addf %32, %33 : vector<8x256xf32>
    %35 = vector.extract_strided_slice %18 {offsets = [0, 512], sizes = [8, 256], strides = [1, 1]} : vector<8x1024xf32> to vector<8x256xf32>
    %36 = math.tanh %35 : vector<8x256xf32>
    %37 = vector.extract_strided_slice %18 {offsets = [0, 768], sizes = [8, 256], strides = [1, 1]} : vector<8x1024xf32> to vector<8x256xf32>
    %cst_25 = arith.constant 5.000000e-01 : f32
    %38 = vector.broadcast %cst_25 : f32 to vector<8x256xf32>
    %39 = arith.mulf %38, %37 : vector<8x256xf32>
    %40 = math.tanh %39 : vector<8x256xf32>
    %cst_26 = arith.constant 5.000000e-01 : f32
    %41 = vector.broadcast %cst_26 : f32 to vector<8x256xf32>
    %42 = arith.mulf %41, %40 : vector<8x256xf32>
    %cst_27 = arith.constant 5.000000e-01 : f32
    %43 = vector.broadcast %cst_27 : f32 to vector<8x256xf32>
    %44 = arith.addf %42, %43 : vector<8x256xf32>
    %45 = arith.mulf %34, %12 : vector<8x256xf32>
    %46 = arith.mulf %26, %36 : vector<8x256xf32>
    %47 = arith.addf %45, %46 : vector<8x256xf32>
    %48 = math.tanh %47 : vector<8x256xf32>
    %49 = arith.mulf %44, %48 : vector<8x256xf32>
    %c0_i32 = arith.constant 0 : i32
    %50 = vector.broadcast %c0_i32 : i32 to vector<8x1xi32>
    %51 = arith.cmpi sgt, %10, %50 : vector<8x1xi32>
    %cst_28 = arith.constant 0.000000e+00 : f32
    %52 = vector.shape_cast %51 : vector<8x1xi1> to vector<8x1xi1>
    %53 = vector.broadcast %52 : vector<8x1xi1> to vector<8x256xi1>
    %54 = vector.broadcast %cst_28 : f32 to vector<8x256xf32>
    %55 = arith.select %53, %49, %54 : vector<8x256xi1>, vector<8x256xf32>
    %c0_29 = arith.constant 0 : index
    %c0_30 = arith.constant 0 : index
    %c0_31 = arith.constant 0 : index
    %56 = vector.load %arg6[%c0_29, %c0_30, %c0_31] : memref<8x8x256xf32, #tpu.memory_space<vmem>>, vector<1x8x256xf32>
    %57 = vector.shape_cast %56 : vector<1x8x256xf32> to vector<8x256xf32>
    %58 = vector.shape_cast %55 : vector<8x256xf32> to vector<1x8x256xf32>
    tpu.vector_store %arg6[%c0_29, %c0_30, %c0_31], %58 {strides = array<i32>} : memref<8x8x256xf32, #tpu.memory_space<vmem>>, vector<1x8x256xf32>,
    %59 = vector.shape_cast %51 : vector<8x1xi1> to vector<8x1xi1>
    %60 = vector.broadcast %59 : vector<8x1xi1> to vector<8x256xi1>
    %61 = arith.select %60, %49, %11 : vector<8x256xi1>, vector<8x256xf32>
    %62 = vector.shape_cast %51 : vector<8x1xi1> to vector<8x1xi1>
    %63 = vector.broadcast %62 : vector<8x1xi1> to vector<8x256xi1>
    %64 = arith.select %63, %47, %12 : vector<8x256xi1>, vector<8x256xf32>
    %c1 = arith.constant 1 : index
    %c0_32 = arith.constant 0 : index
    %c0_33 = arith.constant 0 : index
    %65 = vector.load %arg9[%c1, %c0_32, %c0_33] : memref<8x8x1024xf32, #tpu.memory_space<vmem>>, vector<1x8x1024xf32>
    %66 = vector.shape_cast %65 : vector<1x8x1024xf32> to vector<8x1024xf32>
    %67 = arith.truncf %61 : vector<8x256xf32> to vector<8x256xbf16>
    %c0_34 = arith.constant 0 : index
    %c0_35 = arith.constant 0 : index
    %68 = vector.load %arg4[%c0_34, %c0_35] : memref<256x1024xbf16, #tpu.memory_space<vmem>>, vector<256x1024xbf16>
    %cst_36 = arith.constant dense<0.000000e+00> : vector<8x1024xf32>
    %69 = tpu.matmul %67, %68, %cst_36 {dimension_numbers = #tpu.dot_dimension_numbers<[1], [0], [0], [1], [0, 0, 1, 1], [], []>} : vector<8x256xbf16>, vector<256x1024xbf16>, vector<8x1024xf32> -> vector<8x1024xf32>
    %70 = arith.addf %66, %69 : vector<8x1024xf32>
    %71 = vector.extract_strided_slice %70 {offsets = [0, 0], sizes = [8, 256], strides = [1, 1]} : vector<8x1024xf32> to vector<8x256xf32>
    %cst_37 = arith.constant 5.000000e-01 : f32
    %72 = vector.broadcast %cst_37 : f32 to vector<8x256xf32>
    %73 = arith.mulf %72, %71 : vector<8x256xf32>
    %74 = math.tanh %73 : vector<8x256xf32>
    %cst_38 = arith.constant 5.000000e-01 : f32
    %75 = vector.broadcast %cst_38 : f32 to vector<8x256xf32>
    %76 = arith.mulf %75, %74 : vector<8x256xf32>
    %cst_39 = arith.constant 5.000000e-01 : f32
    %77 = vector.broadcast %cst_39 : f32 to vector<8x256xf32>
    %78 = arith.addf %76, %77 : vector<8x256xf32>
    %79 = vector.extract_strided_slice %70 {offsets = [0, 256], sizes = [8, 256], strides = [1, 1]} : vector<8x1024xf32> to vector<8x256xf32>
    %cst_40 = arith.constant 5.000000e-01 : f32
    %80 = vector.broadcast %cst_40 : f32 to vector<8x256xf32>
    %81 = arith.mulf %80, %79 : vector<8x256xf32>
    %82 = math.tanh %81 : vector<8x256xf32>
    %cst_41 = arith.constant 5.000000e-01 : f32
    %83 = vector.broadcast %cst_41 : f32 to vector<8x256xf32>
    %84 = arith.mulf %83, %82 : vector<8x256xf32>
    %cst_42 = arith.constant 5.000000e-01 : f32
    %85 = vector.broadcast %cst_42 : f32 to vector<8x256xf32>
    %86 = arith.addf %84, %85 : vector<8x256xf32>
    %87 = vector.extract_strided_slice %70 {offsets = [0, 512], sizes = [8, 256], strides = [1, 1]} : vector<8x1024xf32> to vector<8x256xf32>
    %88 = math.tanh %87 : vector<8x256xf32>
    %89 = vector.extract_strided_slice %70 {offsets = [0, 768], sizes = [8, 256], strides = [1, 1]} : vector<8x1024xf32> to vector<8x256xf32>
    %cst_43 = arith.constant 5.000000e-01 : f32
    %90 = vector.broadcast %cst_43 : f32 to vector<8x256xf32>
    %91 = arith.mulf %90, %89 : vector<8x256xf32>
    %92 = math.tanh %91 : vector<8x256xf32>
    %cst_44 = arith.constant 5.000000e-01 : f32
    %93 = vector.broadcast %cst_44 : f32 to vector<8x256xf32>
    %94 = arith.mulf %93, %92 : vector<8x256xf32>
    %cst_45 = arith.constant 5.000000e-01 : f32
    %95 = vector.broadcast %cst_45 : f32 to vector<8x256xf32>
    %96 = arith.addf %94, %95 : vector<8x256xf32>
    %97 = arith.mulf %86, %64 : vector<8x256xf32>
    %98 = arith.mulf %78, %88 : vector<8x256xf32>
    %99 = arith.addf %97, %98 : vector<8x256xf32>
    %100 = math.tanh %99 : vector<8x256xf32>
    %101 = arith.mulf %96, %100 : vector<8x256xf32>
    %c1_i32 = arith.constant 1 : i32
    %102 = vector.broadcast %c1_i32 : i32 to vector<8x1xi32>
    %103 = arith.cmpi sgt, %10, %102 : vector<8x1xi32>
    %cst_46 = arith.constant 0.000000e+00 : f32
    %104 = vector.shape_cast %103 : vector<8x1xi1> to vector<8x1xi1>
    %105 = vector.broadcast %104 : vector<8x1xi1> to vector<8x256xi1>
    %106 = vector.broadcast %cst_46 : f32 to vector<8x256xf32>
    %107 = arith.select %105, %101, %106 : vector<8x256xi1>, vector<8x256xf32>
    %c1_47 = arith.constant 1 : index
    %c0_48 = arith.constant 0 : index
    %c0_49 = arith.constant 0 : index
    %108 = vector.load %arg6[%c1_47, %c0_48, %c0_49] : memref<8x8x256xf32, #tpu.memory_space<vmem>>, vector<1x8x256xf32>
    %109 = vector.shape_cast %108 : vector<1x8x256xf32> to vector<8x256xf32>
    %110 = vector.shape_cast %107 : vector<8x256xf32> to vector<1x8x256xf32>
    tpu.vector_store %arg6[%c1_47, %c0_48, %c0_49], %110 {strides = array<i32>} : memref<8x8x256xf32, #tpu.memory_space<vmem>>, vector<1x8x256xf32>,
    %111 = vector.shape_cast %103 : vector<8x1xi1> to vector<8x1xi1>
    %112 = vector.broadcast %111 : vector<8x1xi1> to vector<8x256xi1>
    %113 = arith.select %112, %101, %61 : vector<8x256xi1>, vector<8x256xf32>
    %114 = vector.shape_cast %103 : vector<8x1xi1> to vector<8x1xi1>
    %115 = vector.broadcast %114 : vector<8x1xi1> to vector<8x256xi1>
    %116 = arith.select %115, %99, %64 : vector<8x256xi1>, vector<8x256xf32>
    %c2 = arith.constant 2 : index
    %c0_50 = arith.constant 0 : index
    %c0_51 = arith.constant 0 : index
    %117 = vector.load %arg9[%c2, %c0_50, %c0_51] : memref<8x8x1024xf32, #tpu.memory_space<vmem>>, vector<1x8x1024xf32>
    %118 = vector.shape_cast %117 : vector<1x8x1024xf32> to vector<8x1024xf32>
    %119 = arith.truncf %113 : vector<8x256xf32> to vector<8x256xbf16>
    %c0_52 = arith.constant 0 : index
    %c0_53 = arith.constant 0 : index
    %120 = vector.load %arg4[%c0_52, %c0_53] : memref<256x1024xbf16, #tpu.memory_space<vmem>>, vector<256x1024xbf16>
    %cst_54 = arith.constant dense<0.000000e+00> : vector<8x1024xf32>
    %121 = tpu.matmul %119, %120, %cst_54 {dimension_numbers = #tpu.dot_dimension_numbers<[1], [0], [0], [1], [0, 0, 1, 1], [], []>} : vector<8x256xbf16>, vector<256x1024xbf16>, vector<8x1024xf32> -> vector<8x1024xf32>
    %122 = arith.addf %118, %121 : vector<8x1024xf32>
    %123 = vector.extract_strided_slice %122 {offsets = [0, 0], sizes = [8, 256], strides = [1, 1]} : vector<8x1024xf32> to vector<8x256xf32>
    %cst_55 = arith.constant 5.000000e-01 : f32
    %124 = vector.broadcast %cst_55 : f32 to vector<8x256xf32>
    %125 = arith.mulf %124, %123 : vector<8x256xf32>
    %126 = math.tanh %125 : vector<8x256xf32>
    %cst_56 = arith.constant 5.000000e-01 : f32
    %127 = vector.broadcast %cst_56 : f32 to vector<8x256xf32>
    %128 = arith.mulf %127, %126 : vector<8x256xf32>
    %cst_57 = arith.constant 5.000000e-01 : f32
    %129 = vector.broadcast %cst_57 : f32 to vector<8x256xf32>
    %130 = arith.addf %128, %129 : vector<8x256xf32>
    %131 = vector.extract_strided_slice %122 {offsets = [0, 256], sizes = [8, 256], strides = [1, 1]} : vector<8x1024xf32> to vector<8x256xf32>
    %cst_58 = arith.constant 5.000000e-01 : f32
    %132 = vector.broadcast %cst_58 : f32 to vector<8x256xf32>
    %133 = arith.mulf %132, %131 : vector<8x256xf32>
    %134 = math.tanh %133 : vector<8x256xf32>
    %cst_59 = arith.constant 5.000000e-01 : f32
    %135 = vector.broadcast %cst_59 : f32 to vector<8x256xf32>
    %136 = arith.mulf %135, %134 : vector<8x256xf32>
    %cst_60 = arith.constant 5.000000e-01 : f32
    %137 = vector.broadcast %cst_60 : f32 to vector<8x256xf32>
    %138 = arith.addf %136, %137 : vector<8x256xf32>
    %139 = vector.extract_strided_slice %122 {offsets = [0, 512], sizes = [8, 256], strides = [1, 1]} : vector<8x1024xf32> to vector<8x256xf32>
    %140 = math.tanh %139 : vector<8x256xf32>
    %141 = vector.extract_strided_slice %122 {offsets = [0, 768], sizes = [8, 256], strides = [1, 1]} : vector<8x1024xf32> to vector<8x256xf32>
    %cst_61 = arith.constant 5.000000e-01 : f32
    %142 = vector.broadcast %cst_61 : f32 to vector<8x256xf32>
    %143 = arith.mulf %142, %141 : vector<8x256xf32>
    %144 = math.tanh %143 : vector<8x256xf32>
    %cst_62 = arith.constant 5.000000e-01 : f32
    %145 = vector.broadcast %cst_62 : f32 to vector<8x256xf32>
    %146 = arith.mulf %145, %144 : vector<8x256xf32>
    %cst_63 = arith.constant 5.000000e-01 : f32
    %147 = vector.broadcast %cst_63 : f32 to vector<8x256xf32>
    %148 = arith.addf %146, %147 : vector<8x256xf32>
    %149 = arith.mulf %138, %116 : vector<8x256xf32>
    %150 = arith.mulf %130, %140 : vector<8x256xf32>
    %151 = arith.addf %149, %150 : vector<8x256xf32>
    %152 = math.tanh %151 : vector<8x256xf32>
    %153 = arith.mulf %148, %152 : vector<8x256xf32>
    %c2_i32 = arith.constant 2 : i32
    %154 = vector.broadcast %c2_i32 : i32 to vector<8x1xi32>
    %155 = arith.cmpi sgt, %10, %154 : vector<8x1xi32>
    %cst_64 = arith.constant 0.000000e+00 : f32
    %156 = vector.shape_cast %155 : vector<8x1xi1> to vector<8x1xi1>
    %157 = vector.broadcast %156 : vector<8x1xi1> to vector<8x256xi1>
    %158 = vector.broadcast %cst_64 : f32 to vector<8x256xf32>
    %159 = arith.select %157, %153, %158 : vector<8x256xi1>, vector<8x256xf32>
    %c2_65 = arith.constant 2 : index
    %c0_66 = arith.constant 0 : index
    %c0_67 = arith.constant 0 : index
    %160 = vector.load %arg6[%c2_65, %c0_66, %c0_67] : memref<8x8x256xf32, #tpu.memory_space<vmem>>, vector<1x8x256xf32>
    %161 = vector.shape_cast %160 : vector<1x8x256xf32> to vector<8x256xf32>
    %162 = vector.shape_cast %159 : vector<8x256xf32> to vector<1x8x256xf32>
    tpu.vector_store %arg6[%c2_65, %c0_66, %c0_67], %162 {strides = array<i32>} : memref<8x8x256xf32, #tpu.memory_space<vmem>>, vector<1x8x256xf32>,
    %163 = vector.shape_cast %155 : vector<8x1xi1> to vector<8x1xi1>
    %164 = vector.broadcast %163 : vector<8x1xi1> to vector<8x256xi1>
    %165 = arith.select %164, %153, %113 : vector<8x256xi1>, vector<8x256xf32>
    %166 = vector.shape_cast %155 : vector<8x1xi1> to vector<8x1xi1>
    %167 = vector.broadcast %166 : vector<8x1xi1> to vector<8x256xi1>
    %168 = arith.select %167, %151, %116 : vector<8x256xi1>, vector<8x256xf32>
    %c3 = arith.constant 3 : index
    %c0_68 = arith.constant 0 : index
    %c0_69 = arith.constant 0 : index
    %169 = vector.load %arg9[%c3, %c0_68, %c0_69] : memref<8x8x1024xf32, #tpu.memory_space<vmem>>, vector<1x8x1024xf32>
    %170 = vector.shape_cast %169 : vector<1x8x1024xf32> to vector<8x1024xf32>
    %171 = arith.truncf %165 : vector<8x256xf32> to vector<8x256xbf16>
    %c0_70 = arith.constant 0 : index
    %c0_71 = arith.constant 0 : index
    %172 = vector.load %arg4[%c0_70, %c0_71] : memref<256x1024xbf16, #tpu.memory_space<vmem>>, vector<256x1024xbf16>
    %cst_72 = arith.constant dense<0.000000e+00> : vector<8x1024xf32>
    %173 = tpu.matmul %171, %172, %cst_72 {dimension_numbers = #tpu.dot_dimension_numbers<[1], [0], [0], [1], [0, 0, 1, 1], [], []>} : vector<8x256xbf16>, vector<256x1024xbf16>, vector<8x1024xf32> -> vector<8x1024xf32>
    %174 = arith.addf %170, %173 : vector<8x1024xf32>
    %175 = vector.extract_strided_slice %174 {offsets = [0, 0], sizes = [8, 256], strides = [1, 1]} : vector<8x1024xf32> to vector<8x256xf32>
    %cst_73 = arith.constant 5.000000e-01 : f32
    %176 = vector.broadcast %cst_73 : f32 to vector<8x256xf32>
    %177 = arith.mulf %176, %175 : vector<8x256xf32>
    %178 = math.tanh %177 : vector<8x256xf32>
    %cst_74 = arith.constant 5.000000e-01 : f32
    %179 = vector.broadcast %cst_74 : f32 to vector<8x256xf32>
    %180 = arith.mulf %179, %178 : vector<8x256xf32>
    %cst_75 = arith.constant 5.000000e-01 : f32
    %181 = vector.broadcast %cst_75 : f32 to vector<8x256xf32>
    %182 = arith.addf %180, %181 : vector<8x256xf32>
    %183 = vector.extract_strided_slice %174 {offsets = [0, 256], sizes = [8, 256], strides = [1, 1]} : vector<8x1024xf32> to vector<8x256xf32>
    %cst_76 = arith.constant 5.000000e-01 : f32
    %184 = vector.broadcast %cst_76 : f32 to vector<8x256xf32>
    %185 = arith.mulf %184, %183 : vector<8x256xf32>
    %186 = math.tanh %185 : vector<8x256xf32>
    %cst_77 = arith.constant 5.000000e-01 : f32
    %187 = vector.broadcast %cst_77 : f32 to vector<8x256xf32>
    %188 = arith.mulf %187, %186 : vector<8x256xf32>
    %cst_78 = arith.constant 5.000000e-01 : f32
    %189 = vector.broadcast %cst_78 : f32 to vector<8x256xf32>
    %190 = arith.addf %188, %189 : vector<8x256xf32>
    %191 = vector.extract_strided_slice %174 {offsets = [0, 512], sizes = [8, 256], strides = [1, 1]} : vector<8x1024xf32> to vector<8x256xf32>
    %192 = math.tanh %191 : vector<8x256xf32>
    %193 = vector.extract_strided_slice %174 {offsets = [0, 768], sizes = [8, 256], strides = [1, 1]} : vector<8x1024xf32> to vector<8x256xf32>
    %cst_79 = arith.constant 5.000000e-01 : f32
    %194 = vector.broadcast %cst_79 : f32 to vector<8x256xf32>
    %195 = arith.mulf %194, %193 : vector<8x256xf32>
    %196 = math.tanh %195 : vector<8x256xf32>
    %cst_80 = arith.constant 5.000000e-01 : f32
    %197 = vector.broadcast %cst_80 : f32 to vector<8x256xf32>
    %198 = arith.mulf %197, %196 : vector<8x256xf32>
    %cst_81 = arith.constant 5.000000e-01 : f32
    %199 = vector.broadcast %cst_81 : f32 to vector<8x256xf32>
    %200 = arith.addf %198, %199 : vector<8x256xf32>
    %201 = arith.mulf %190, %168 : vector<8x256xf32>
    %202 = arith.mulf %182, %192 : vector<8x256xf32>
    %203 = arith.addf %201, %202 : vector<8x256xf32>
    %204 = math.tanh %203 : vector<8x256xf32>
    %205 = arith.mulf %200, %204 : vector<8x256xf32>
    %c3_i32 = arith.constant 3 : i32
    %206 = vector.broadcast %c3_i32 : i32 to vector<8x1xi32>
    %207 = arith.cmpi sgt, %10, %206 : vector<8x1xi32>
    %cst_82 = arith.constant 0.000000e+00 : f32
    %208 = vector.shape_cast %207 : vector<8x1xi1> to vector<8x1xi1>
    %209 = vector.broadcast %208 : vector<8x1xi1> to vector<8x256xi1>
    %210 = vector.broadcast %cst_82 : f32 to vector<8x256xf32>
    %211 = arith.select %209, %205, %210 : vector<8x256xi1>, vector<8x256xf32>
    %c3_83 = arith.constant 3 : index
    %c0_84 = arith.constant 0 : index
    %c0_85 = arith.constant 0 : index
    %212 = vector.load %arg6[%c3_83, %c0_84, %c0_85] : memref<8x8x256xf32, #tpu.memory_space<vmem>>, vector<1x8x256xf32>
    %213 = vector.shape_cast %212 : vector<1x8x256xf32> to vector<8x256xf32>
    %214 = vector.shape_cast %211 : vector<8x256xf32> to vector<1x8x256xf32>
    tpu.vector_store %arg6[%c3_83, %c0_84, %c0_85], %214 {strides = array<i32>} : memref<8x8x256xf32, #tpu.memory_space<vmem>>, vector<1x8x256xf32>,
    %215 = vector.shape_cast %207 : vector<8x1xi1> to vector<8x1xi1>
    %216 = vector.broadcast %215 : vector<8x1xi1> to vector<8x256xi1>
    %217 = arith.select %216, %205, %165 : vector<8x256xi1>, vector<8x256xf32>
    %218 = vector.shape_cast %207 : vector<8x1xi1> to vector<8x1xi1>
    %219 = vector.broadcast %218 : vector<8x1xi1> to vector<8x256xi1>
    %220 = arith.select %219, %203, %168 : vector<8x256xi1>, vector<8x256xf32>
    %c4 = arith.constant 4 : index
    %c0_86 = arith.constant 0 : index
    %c0_87 = arith.constant 0 : index
    %221 = vector.load %arg9[%c4, %c0_86, %c0_87] : memref<8x8x1024xf32, #tpu.memory_space<vmem>>, vector<1x8x1024xf32>
    %222 = vector.shape_cast %221 : vector<1x8x1024xf32> to vector<8x1024xf32>
    %223 = arith.truncf %217 : vector<8x256xf32> to vector<8x256xbf16>
    %c0_88 = arith.constant 0 : index
    %c0_89 = arith.constant 0 : index
    %224 = vector.load %arg4[%c0_88, %c0_89] : memref<256x1024xbf16, #tpu.memory_space<vmem>>, vector<256x1024xbf16>
    %cst_90 = arith.constant dense<0.000000e+00> : vector<8x1024xf32>
    %225 = tpu.matmul %223, %224, %cst_90 {dimension_numbers = #tpu.dot_dimension_numbers<[1], [0], [0], [1], [0, 0, 1, 1], [], []>} : vector<8x256xbf16>, vector<256x1024xbf16>, vector<8x1024xf32> -> vector<8x1024xf32>
    %226 = arith.addf %222, %225 : vector<8x1024xf32>
    %227 = vector.extract_strided_slice %226 {offsets = [0, 0], sizes = [8, 256], strides = [1, 1]} : vector<8x1024xf32> to vector<8x256xf32>
    %cst_91 = arith.constant 5.000000e-01 : f32
    %228 = vector.broadcast %cst_91 : f32 to vector<8x256xf32>
    %229 = arith.mulf %228, %227 : vector<8x256xf32>
    %230 = math.tanh %229 : vector<8x256xf32>
    %cst_92 = arith.constant 5.000000e-01 : f32
    %231 = vector.broadcast %cst_92 : f32 to vector<8x256xf32>
    %232 = arith.mulf %231, %230 : vector<8x256xf32>
    %cst_93 = arith.constant 5.000000e-01 : f32
    %233 = vector.broadcast %cst_93 : f32 to vector<8x256xf32>
    %234 = arith.addf %232, %233 : vector<8x256xf32>
    %235 = vector.extract_strided_slice %226 {offsets = [0, 256], sizes = [8, 256], strides = [1, 1]} : vector<8x1024xf32> to vector<8x256xf32>
    %cst_94 = arith.constant 5.000000e-01 : f32
    %236 = vector.broadcast %cst_94 : f32 to vector<8x256xf32>
    %237 = arith.mulf %236, %235 : vector<8x256xf32>
    %238 = math.tanh %237 : vector<8x256xf32>
    %cst_95 = arith.constant 5.000000e-01 : f32
    %239 = vector.broadcast %cst_95 : f32 to vector<8x256xf32>
    %240 = arith.mulf %239, %238 : vector<8x256xf32>
    %cst_96 = arith.constant 5.000000e-01 : f32
    %241 = vector.broadcast %cst_96 : f32 to vector<8x256xf32>
    %242 = arith.addf %240, %241 : vector<8x256xf32>
    %243 = vector.extract_strided_slice %226 {offsets = [0, 512], sizes = [8, 256], strides = [1, 1]} : vector<8x1024xf32> to vector<8x256xf32>
    %244 = math.tanh %243 : vector<8x256xf32>
    %245 = vector.extract_strided_slice %226 {offsets = [0, 768], sizes = [8, 256], strides = [1, 1]} : vector<8x1024xf32> to vector<8x256xf32>
    %cst_97 = arith.constant 5.000000e-01 : f32
    %246 = vector.broadcast %cst_97 : f32 to vector<8x256xf32>
    %247 = arith.mulf %246, %245 : vector<8x256xf32>
    %248 = math.tanh %247 : vector<8x256xf32>
    %cst_98 = arith.constant 5.000000e-01 : f32
    %249 = vector.broadcast %cst_98 : f32 to vector<8x256xf32>
    %250 = arith.mulf %249, %248 : vector<8x256xf32>
    %cst_99 = arith.constant 5.000000e-01 : f32
    %251 = vector.broadcast %cst_99 : f32 to vector<8x256xf32>
    %252 = arith.addf %250, %251 : vector<8x256xf32>
    %253 = arith.mulf %242, %220 : vector<8x256xf32>
    %254 = arith.mulf %234, %244 : vector<8x256xf32>
    %255 = arith.addf %253, %254 : vector<8x256xf32>
    %256 = math.tanh %255 : vector<8x256xf32>
    %257 = arith.mulf %252, %256 : vector<8x256xf32>
    %c4_i32 = arith.constant 4 : i32
    %258 = vector.broadcast %c4_i32 : i32 to vector<8x1xi32>
    %259 = arith.cmpi sgt, %10, %258 : vector<8x1xi32>
    %cst_100 = arith.constant 0.000000e+00 : f32
    %260 = vector.shape_cast %259 : vector<8x1xi1> to vector<8x1xi1>
    %261 = vector.broadcast %260 : vector<8x1xi1> to vector<8x256xi1>
    %262 = vector.broadcast %cst_100 : f32 to vector<8x256xf32>
    %263 = arith.select %261, %257, %262 : vector<8x256xi1>, vector<8x256xf32>
    %c4_101 = arith.constant 4 : index
    %c0_102 = arith.constant 0 : index
    %c0_103 = arith.constant 0 : index
    %264 = vector.load %arg6[%c4_101, %c0_102, %c0_103] : memref<8x8x256xf32, #tpu.memory_space<vmem>>, vector<1x8x256xf32>
    %265 = vector.shape_cast %264 : vector<1x8x256xf32> to vector<8x256xf32>
    %266 = vector.shape_cast %263 : vector<8x256xf32> to vector<1x8x256xf32>
    tpu.vector_store %arg6[%c4_101, %c0_102, %c0_103], %266 {strides = array<i32>} : memref<8x8x256xf32, #tpu.memory_space<vmem>>, vector<1x8x256xf32>,
    %267 = vector.shape_cast %259 : vector<8x1xi1> to vector<8x1xi1>
    %268 = vector.broadcast %267 : vector<8x1xi1> to vector<8x256xi1>
    %269 = arith.select %268, %257, %217 : vector<8x256xi1>, vector<8x256xf32>
    %270 = vector.shape_cast %259 : vector<8x1xi1> to vector<8x1xi1>
    %271 = vector.broadcast %270 : vector<8x1xi1> to vector<8x256xi1>
    %272 = arith.select %271, %255, %220 : vector<8x256xi1>, vector<8x256xf32>
    %c5 = arith.constant 5 : index
    %c0_104 = arith.constant 0 : index
    %c0_105 = arith.constant 0 : index
    %273 = vector.load %arg9[%c5, %c0_104, %c0_105] : memref<8x8x1024xf32, #tpu.memory_space<vmem>>, vector<1x8x1024xf32>
    %274 = vector.shape_cast %273 : vector<1x8x1024xf32> to vector<8x1024xf32>
    %275 = arith.truncf %269 : vector<8x256xf32> to vector<8x256xbf16>
    %c0_106 = arith.constant 0 : index
    %c0_107 = arith.constant 0 : index
    %276 = vector.load %arg4[%c0_106, %c0_107] : memref<256x1024xbf16, #tpu.memory_space<vmem>>, vector<256x1024xbf16>
    %cst_108 = arith.constant dense<0.000000e+00> : vector<8x1024xf32>
    %277 = tpu.matmul %275, %276, %cst_108 {dimension_numbers = #tpu.dot_dimension_numbers<[1], [0], [0], [1], [0, 0, 1, 1], [], []>} : vector<8x256xbf16>, vector<256x1024xbf16>, vector<8x1024xf32> -> vector<8x1024xf32>
    %278 = arith.addf %274, %277 : vector<8x1024xf32>
    %279 = vector.extract_strided_slice %278 {offsets = [0, 0], sizes = [8, 256], strides = [1, 1]} : vector<8x1024xf32> to vector<8x256xf32>
    %cst_109 = arith.constant 5.000000e-01 : f32
    %280 = vector.broadcast %cst_109 : f32 to vector<8x256xf32>
    %281 = arith.mulf %280, %279 : vector<8x256xf32>
    %282 = math.tanh %281 : vector<8x256xf32>
    %cst_110 = arith.constant 5.000000e-01 : f32
    %283 = vector.broadcast %cst_110 : f32 to vector<8x256xf32>
    %284 = arith.mulf %283, %282 : vector<8x256xf32>
    %cst_111 = arith.constant 5.000000e-01 : f32
    %285 = vector.broadcast %cst_111 : f32 to vector<8x256xf32>
    %286 = arith.addf %284, %285 : vector<8x256xf32>
    %287 = vector.extract_strided_slice %278 {offsets = [0, 256], sizes = [8, 256], strides = [1, 1]} : vector<8x1024xf32> to vector<8x256xf32>
    %cst_112 = arith.constant 5.000000e-01 : f32
    %288 = vector.broadcast %cst_112 : f32 to vector<8x256xf32>
    %289 = arith.mulf %288, %287 : vector<8x256xf32>
    %290 = math.tanh %289 : vector<8x256xf32>
    %cst_113 = arith.constant 5.000000e-01 : f32
    %291 = vector.broadcast %cst_113 : f32 to vector<8x256xf32>
    %292 = arith.mulf %291, %290 : vector<8x256xf32>
    %cst_114 = arith.constant 5.000000e-01 : f32
    %293 = vector.broadcast %cst_114 : f32 to vector<8x256xf32>
    %294 = arith.addf %292, %293 : vector<8x256xf32>
    %295 = vector.extract_strided_slice %278 {offsets = [0, 512], sizes = [8, 256], strides = [1, 1]} : vector<8x1024xf32> to vector<8x256xf32>
    %296 = math.tanh %295 : vector<8x256xf32>
    %297 = vector.extract_strided_slice %278 {offsets = [0, 768], sizes = [8, 256], strides = [1, 1]} : vector<8x1024xf32> to vector<8x256xf32>
    %cst_115 = arith.constant 5.000000e-01 : f32
    %298 = vector.broadcast %cst_115 : f32 to vector<8x256xf32>
    %299 = arith.mulf %298, %297 : vector<8x256xf32>
    %300 = math.tanh %299 : vector<8x256xf32>
    %cst_116 = arith.constant 5.000000e-01 : f32
    %301 = vector.broadcast %cst_116 : f32 to vector<8x256xf32>
    %302 = arith.mulf %301, %300 : vector<8x256xf32>
    %cst_117 = arith.constant 5.000000e-01 : f32
    %303 = vector.broadcast %cst_117 : f32 to vector<8x256xf32>
    %304 = arith.addf %302, %303 : vector<8x256xf32>
    %305 = arith.mulf %294, %272 : vector<8x256xf32>
    %306 = arith.mulf %286, %296 : vector<8x256xf32>
    %307 = arith.addf %305, %306 : vector<8x256xf32>
    %308 = math.tanh %307 : vector<8x256xf32>
    %309 = arith.mulf %304, %308 : vector<8x256xf32>
    %c5_i32 = arith.constant 5 : i32
    %310 = vector.broadcast %c5_i32 : i32 to vector<8x1xi32>
    %311 = arith.cmpi sgt, %10, %310 : vector<8x1xi32>
    %cst_118 = arith.constant 0.000000e+00 : f32
    %312 = vector.shape_cast %311 : vector<8x1xi1> to vector<8x1xi1>
    %313 = vector.broadcast %312 : vector<8x1xi1> to vector<8x256xi1>
    %314 = vector.broadcast %cst_118 : f32 to vector<8x256xf32>
    %315 = arith.select %313, %309, %314 : vector<8x256xi1>, vector<8x256xf32>
    %c5_119 = arith.constant 5 : index
    %c0_120 = arith.constant 0 : index
    %c0_121 = arith.constant 0 : index
    %316 = vector.load %arg6[%c5_119, %c0_120, %c0_121] : memref<8x8x256xf32, #tpu.memory_space<vmem>>, vector<1x8x256xf32>
    %317 = vector.shape_cast %316 : vector<1x8x256xf32> to vector<8x256xf32>
    %318 = vector.shape_cast %315 : vector<8x256xf32> to vector<1x8x256xf32>
    tpu.vector_store %arg6[%c5_119, %c0_120, %c0_121], %318 {strides = array<i32>} : memref<8x8x256xf32, #tpu.memory_space<vmem>>, vector<1x8x256xf32>,
    %319 = vector.shape_cast %311 : vector<8x1xi1> to vector<8x1xi1>
    %320 = vector.broadcast %319 : vector<8x1xi1> to vector<8x256xi1>
    %321 = arith.select %320, %309, %269 : vector<8x256xi1>, vector<8x256xf32>
    %322 = vector.shape_cast %311 : vector<8x1xi1> to vector<8x1xi1>
    %323 = vector.broadcast %322 : vector<8x1xi1> to vector<8x256xi1>
    %324 = arith.select %323, %307, %272 : vector<8x256xi1>, vector<8x256xf32>
    %c6 = arith.constant 6 : index
    %c0_122 = arith.constant 0 : index
    %c0_123 = arith.constant 0 : index
    %325 = vector.load %arg9[%c6, %c0_122, %c0_123] : memref<8x8x1024xf32, #tpu.memory_space<vmem>>, vector<1x8x1024xf32>
    %326 = vector.shape_cast %325 : vector<1x8x1024xf32> to vector<8x1024xf32>
    %327 = arith.truncf %321 : vector<8x256xf32> to vector<8x256xbf16>
    %c0_124 = arith.constant 0 : index
    %c0_125 = arith.constant 0 : index
    %328 = vector.load %arg4[%c0_124, %c0_125] : memref<256x1024xbf16, #tpu.memory_space<vmem>>, vector<256x1024xbf16>
    %cst_126 = arith.constant dense<0.000000e+00> : vector<8x1024xf32>
    %329 = tpu.matmul %327, %328, %cst_126 {dimension_numbers = #tpu.dot_dimension_numbers<[1], [0], [0], [1], [0, 0, 1, 1], [], []>} : vector<8x256xbf16>, vector<256x1024xbf16>, vector<8x1024xf32> -> vector<8x1024xf32>
    %330 = arith.addf %326, %329 : vector<8x1024xf32>
    %331 = vector.extract_strided_slice %330 {offsets = [0, 0], sizes = [8, 256], strides = [1, 1]} : vector<8x1024xf32> to vector<8x256xf32>
    %cst_127 = arith.constant 5.000000e-01 : f32
    %332 = vector.broadcast %cst_127 : f32 to vector<8x256xf32>
    %333 = arith.mulf %332, %331 : vector<8x256xf32>
    %334 = math.tanh %333 : vector<8x256xf32>
    %cst_128 = arith.constant 5.000000e-01 : f32
    %335 = vector.broadcast %cst_128 : f32 to vector<8x256xf32>
    %336 = arith.mulf %335, %334 : vector<8x256xf32>
    %cst_129 = arith.constant 5.000000e-01 : f32
    %337 = vector.broadcast %cst_129 : f32 to vector<8x256xf32>
    %338 = arith.addf %336, %337 : vector<8x256xf32>
    %339 = vector.extract_strided_slice %330 {offsets = [0, 256], sizes = [8, 256], strides = [1, 1]} : vector<8x1024xf32> to vector<8x256xf32>
    %cst_130 = arith.constant 5.000000e-01 : f32
    %340 = vector.broadcast %cst_130 : f32 to vector<8x256xf32>
    %341 = arith.mulf %340, %339 : vector<8x256xf32>
    %342 = math.tanh %341 : vector<8x256xf32>
    %cst_131 = arith.constant 5.000000e-01 : f32
    %343 = vector.broadcast %cst_131 : f32 to vector<8x256xf32>
    %344 = arith.mulf %343, %342 : vector<8x256xf32>
    %cst_132 = arith.constant 5.000000e-01 : f32
    %345 = vector.broadcast %cst_132 : f32 to vector<8x256xf32>
    %346 = arith.addf %344, %345 : vector<8x256xf32>
    %347 = vector.extract_strided_slice %330 {offsets = [0, 512], sizes = [8, 256], strides = [1, 1]} : vector<8x1024xf32> to vector<8x256xf32>
    %348 = math.tanh %347 : vector<8x256xf32>
    %349 = vector.extract_strided_slice %330 {offsets = [0, 768], sizes = [8, 256], strides = [1, 1]} : vector<8x1024xf32> to vector<8x256xf32>
    %cst_133 = arith.constant 5.000000e-01 : f32
    %350 = vector.broadcast %cst_133 : f32 to vector<8x256xf32>
    %351 = arith.mulf %350, %349 : vector<8x256xf32>
    %352 = math.tanh %351 : vector<8x256xf32>
    %cst_134 = arith.constant 5.000000e-01 : f32
    %353 = vector.broadcast %cst_134 : f32 to vector<8x256xf32>
    %354 = arith.mulf %353, %352 : vector<8x256xf32>
    %cst_135 = arith.constant 5.000000e-01 : f32
    %355 = vector.broadcast %cst_135 : f32 to vector<8x256xf32>
    %356 = arith.addf %354, %355 : vector<8x256xf32>
    %357 = arith.mulf %346, %324 : vector<8x256xf32>
    %358 = arith.mulf %338, %348 : vector<8x256xf32>
    %359 = arith.addf %357, %358 : vector<8x256xf32>
    %360 = math.tanh %359 : vector<8x256xf32>
    %361 = arith.mulf %356, %360 : vector<8x256xf32>
    %c6_i32 = arith.constant 6 : i32
    %362 = vector.broadcast %c6_i32 : i32 to vector<8x1xi32>
    %363 = arith.cmpi sgt, %10, %362 : vector<8x1xi32>
    %cst_136 = arith.constant 0.000000e+00 : f32
    %364 = vector.shape_cast %363 : vector<8x1xi1> to vector<8x1xi1>
    %365 = vector.broadcast %364 : vector<8x1xi1> to vector<8x256xi1>
    %366 = vector.broadcast %cst_136 : f32 to vector<8x256xf32>
    %367 = arith.select %365, %361, %366 : vector<8x256xi1>, vector<8x256xf32>
    %c6_137 = arith.constant 6 : index
    %c0_138 = arith.constant 0 : index
    %c0_139 = arith.constant 0 : index
    %368 = vector.load %arg6[%c6_137, %c0_138, %c0_139] : memref<8x8x256xf32, #tpu.memory_space<vmem>>, vector<1x8x256xf32>
    %369 = vector.shape_cast %368 : vector<1x8x256xf32> to vector<8x256xf32>
    %370 = vector.shape_cast %367 : vector<8x256xf32> to vector<1x8x256xf32>
    tpu.vector_store %arg6[%c6_137, %c0_138, %c0_139], %370 {strides = array<i32>} : memref<8x8x256xf32, #tpu.memory_space<vmem>>, vector<1x8x256xf32>,
    %371 = vector.shape_cast %363 : vector<8x1xi1> to vector<8x1xi1>
    %372 = vector.broadcast %371 : vector<8x1xi1> to vector<8x256xi1>
    %373 = arith.select %372, %361, %321 : vector<8x256xi1>, vector<8x256xf32>
    %374 = vector.shape_cast %363 : vector<8x1xi1> to vector<8x1xi1>
    %375 = vector.broadcast %374 : vector<8x1xi1> to vector<8x256xi1>
    %376 = arith.select %375, %359, %324 : vector<8x256xi1>, vector<8x256xf32>
    %c7 = arith.constant 7 : index
    %c0_140 = arith.constant 0 : index
    %c0_141 = arith.constant 0 : index
    %377 = vector.load %arg9[%c7, %c0_140, %c0_141] : memref<8x8x1024xf32, #tpu.memory_space<vmem>>, vector<1x8x1024xf32>
    %378 = vector.shape_cast %377 : vector<1x8x1024xf32> to vector<8x1024xf32>
    %379 = arith.truncf %373 : vector<8x256xf32> to vector<8x256xbf16>
    %c0_142 = arith.constant 0 : index
    %c0_143 = arith.constant 0 : index
    %380 = vector.load %arg4[%c0_142, %c0_143] : memref<256x1024xbf16, #tpu.memory_space<vmem>>, vector<256x1024xbf16>
    %cst_144 = arith.constant dense<0.000000e+00> : vector<8x1024xf32>
    %381 = tpu.matmul %379, %380, %cst_144 {dimension_numbers = #tpu.dot_dimension_numbers<[1], [0], [0], [1], [0, 0, 1, 1], [], []>} : vector<8x256xbf16>, vector<256x1024xbf16>, vector<8x1024xf32> -> vector<8x1024xf32>
    %382 = arith.addf %378, %381 : vector<8x1024xf32>
    %383 = vector.extract_strided_slice %382 {offsets = [0, 0], sizes = [8, 256], strides = [1, 1]} : vector<8x1024xf32> to vector<8x256xf32>
    %cst_145 = arith.constant 5.000000e-01 : f32
    %384 = vector.broadcast %cst_145 : f32 to vector<8x256xf32>
    %385 = arith.mulf %384, %383 : vector<8x256xf32>
    %386 = math.tanh %385 : vector<8x256xf32>
    %cst_146 = arith.constant 5.000000e-01 : f32
    %387 = vector.broadcast %cst_146 : f32 to vector<8x256xf32>
    %388 = arith.mulf %387, %386 : vector<8x256xf32>
    %cst_147 = arith.constant 5.000000e-01 : f32
    %389 = vector.broadcast %cst_147 : f32 to vector<8x256xf32>
    %390 = arith.addf %388, %389 : vector<8x256xf32>
    %391 = vector.extract_strided_slice %382 {offsets = [0, 256], sizes = [8, 256], strides = [1, 1]} : vector<8x1024xf32> to vector<8x256xf32>
    %cst_148 = arith.constant 5.000000e-01 : f32
    %392 = vector.broadcast %cst_148 : f32 to vector<8x256xf32>
    %393 = arith.mulf %392, %391 : vector<8x256xf32>
    %394 = math.tanh %393 : vector<8x256xf32>
    %cst_149 = arith.constant 5.000000e-01 : f32
    %395 = vector.broadcast %cst_149 : f32 to vector<8x256xf32>
    %396 = arith.mulf %395, %394 : vector<8x256xf32>
    %cst_150 = arith.constant 5.000000e-01 : f32
    %397 = vector.broadcast %cst_150 : f32 to vector<8x256xf32>
    %398 = arith.addf %396, %397 : vector<8x256xf32>
    %399 = vector.extract_strided_slice %382 {offsets = [0, 512], sizes = [8, 256], strides = [1, 1]} : vector<8x1024xf32> to vector<8x256xf32>
    %400 = math.tanh %399 : vector<8x256xf32>
    %401 = vector.extract_strided_slice %382 {offsets = [0, 768], sizes = [8, 256], strides = [1, 1]} : vector<8x1024xf32> to vector<8x256xf32>
    %cst_151 = arith.constant 5.000000e-01 : f32
    %402 = vector.broadcast %cst_151 : f32 to vector<8x256xf32>
    %403 = arith.mulf %402, %401 : vector<8x256xf32>
    %404 = math.tanh %403 : vector<8x256xf32>
    %cst_152 = arith.constant 5.000000e-01 : f32
    %405 = vector.broadcast %cst_152 : f32 to vector<8x256xf32>
    %406 = arith.mulf %405, %404 : vector<8x256xf32>
    %cst_153 = arith.constant 5.000000e-01 : f32
    %407 = vector.broadcast %cst_153 : f32 to vector<8x256xf32>
    %408 = arith.addf %406, %407 : vector<8x256xf32>
    %409 = arith.mulf %398, %376 : vector<8x256xf32>
    %410 = arith.mulf %390, %400 : vector<8x256xf32>
    %411 = arith.addf %409, %410 : vector<8x256xf32>
    %412 = math.tanh %411 : vector<8x256xf32>
    %413 = arith.mulf %408, %412 : vector<8x256xf32>
    %c7_i32 = arith.constant 7 : i32
    %414 = vector.broadcast %c7_i32 : i32 to vector<8x1xi32>
    %415 = arith.cmpi sgt, %10, %414 : vector<8x1xi32>
    %cst_154 = arith.constant 0.000000e+00 : f32
    %416 = vector.shape_cast %415 : vector<8x1xi1> to vector<8x1xi1>
    %417 = vector.broadcast %416 : vector<8x1xi1> to vector<8x256xi1>
    %418 = vector.broadcast %cst_154 : f32 to vector<8x256xf32>
    %419 = arith.select %417, %413, %418 : vector<8x256xi1>, vector<8x256xf32>
    %c7_155 = arith.constant 7 : index
    %c0_156 = arith.constant 0 : index
    %c0_157 = arith.constant 0 : index
    %420 = vector.load %arg6[%c7_155, %c0_156, %c0_157] : memref<8x8x256xf32, #tpu.memory_space<vmem>>, vector<1x8x256xf32>
    %421 = vector.shape_cast %420 : vector<1x8x256xf32> to vector<8x256xf32>
    %422 = vector.shape_cast %419 : vector<8x256xf32> to vector<1x8x256xf32>
    tpu.vector_store %arg6[%c7_155, %c0_156, %c0_157], %422 {strides = array<i32>} : memref<8x8x256xf32, #tpu.memory_space<vmem>>, vector<1x8x256xf32>,
    %423 = vector.shape_cast %415 : vector<8x1xi1> to vector<8x1xi1>
    %424 = vector.broadcast %423 : vector<8x1xi1> to vector<8x256xi1>
    %425 = arith.select %424, %413, %373 : vector<8x256xi1>, vector<8x256xf32>
    %426 = vector.shape_cast %415 : vector<8x1xi1> to vector<8x1xi1>
    %427 = vector.broadcast %426 : vector<8x1xi1> to vector<8x256xi1>
    %428 = arith.select %427, %411, %376 : vector<8x256xi1>, vector<8x256xf32>
    %c0_158 = arith.constant 0 : index
    %c0_159 = arith.constant 0 : index
    %429 = vector.load %arg7[%c0_158, %c0_159] : memref<8x256xf32, #tpu.memory_space<vmem>>, vector<8x256xf32>
    tpu.vector_store %arg7[%c0_158, %c0_159], %425 {strides = array<i32>} : memref<8x256xf32, #tpu.memory_space<vmem>>, vector<8x256xf32>,
    %c0_160 = arith.constant 0 : index
    %c0_161 = arith.constant 0 : index
    %430 = vector.load %arg8[%c0_160, %c0_161] : memref<8x256xf32, #tpu.memory_space<vmem>>, vector<8x256xf32>
    tpu.vector_store %arg8[%c0_160, %c0_161], %428 {strides = array<i32>} : memref<8x256xf32, #tpu.memory_space<vmem>>, vector<8x256xf32>,
    return
  }
  func.func @transform_0(%arg0: i32) -> (i32, i32) {
    %c0_i32 = arith.constant 0 : i32
    %c0_i32_0 = arith.constant 0 : i32
    return %arg0, %c0_i32 : i32, i32
  }
  func.func @transform_1(%arg0: i32) -> (i32, i32, i32) {
    %c0_i32 = arith.constant 0 : i32
    %c0_i32_0 = arith.constant 0 : i32
    %c0_i32_1 = arith.constant 0 : i32
    return %c0_i32, %arg0, %c0_i32_0 : i32, i32, i32
  }
  func.func @transform_2(%arg0: i32) -> (i32, i32) {
    %c0_i32 = arith.constant 0 : i32
    %c0_i32_0 = arith.constant 0 : i32
    %c0_i32_1 = arith.constant 0 : i32
    return %c0_i32, %c0_i32_0 : i32, i32
  }
  func.func @transform_3(%arg0: i32) -> (i32, i32) {
    %c0_i32 = arith.constant 0 : i32
    %c0_i32_0 = arith.constant 0 : i32
    %c0_i32_1 = arith.constant 0 : i32
    return %c0_i32, %c0_i32_0 : i32, i32
  }
  func.func @transform_4(%arg0: i32) -> (i32, i32) {
    %c0_i32 = arith.constant 0 : i32
    %c0_i32_0 = arith.constant 0 : i32
    %c0_i32_1 = arith.constant 0 : i32
    return %c0_i32, %c0_i32_0 : i32, i32
  }
  func.func @transform_5(%arg0: i32) -> (i32, i32, i32) {
    %c0_i32 = arith.constant 0 : i32
    %c0_i32_0 = arith.constant 0 : i32
    %c0_i32_1 = arith.constant 0 : i32
    return %c0_i32, %arg0, %c0_i32_0 : i32, i32, i32
  }
  func.func @transform_6(%arg0: i32) -> (i32, i32) {
    %c0_i32 = arith.constant 0 : i32
    %c0_i32_0 = arith.constant 0 : i32
    return %arg0, %c0_i32 : i32, i32
  }
  func.func @transform_7(%arg0: i32) -> (i32, i32) {
    %c0_i32 = arith.constant 0 : i32
    %c0_i32_0 = arith.constant 0 : i32
    return %arg0, %c0_i32 : i32, i32
  }
}

</mosaic_0001>

<bundles_post_ra>
// kernel: encoder_rnn_forward.1
= control target key start
LH: loop header
LB: loop body
LE: loop exit
PB: predicated region body
PF: predicated region fallthrough
CT: control target
= control target key end

     0   :  { %s22334_s2 = inlined_call_operand.vmem [shape: bf16[128,1024], index: 2, kind: input, shape index: {}]   ;;  %s22335_s1 = inlined_call_operand.vmem [shape: f32[8,8,128], index: 1, kind: input, shape index: {}]   ;;  %s22336_s3 = inlined_call_operand.vmem [shape: bf16[256,1024], index: 3, kind: input, shape index: {}]   ;;  %s22337_s4 = inlined_call_operand.vmem [shape: f32[1,1024], index: 4, kind: input, shape index: {}]   ;;  %s22338_s0 = inlined_call_operand.vmem [shape: s32[8,1], index: 0, kind: input, shape index: {}]   ;;  %s22339_s5 = inlined_call_operand.vmem [shape: f32[8,8,256], index: 5, kind: output, shape index: {0}]   ;;  %s22340_s7 = inlined_call_operand.vmem [shape: f32[8,256], index: 7, kind: output, shape index: {2}]   ;;  %s22341_s6 = inlined_call_operand.vmem [shape: f32[8,256], index: 6, kind: output, shape index: {1}]  }
   0x1   :  { %v9339_v0 = vld [vmem:[%s22334_s2 + $0x1c0] sm:$0xf]  ;;  %v13583_v2 = vld [vmem:[%s22334_s2 + $0x1c4] sm:$0xf]  ;;  %v9347_v5 = vld [vmem:[%s22334_s2 + $0x1c8] sm:$0xf] }
   0x2   :  { %v13587_v1 = vld [vmem:[%s22334_s2 + $0x1dc] sm:$0xf0]  ;;  %v9341_v4 = vld [vmem:[%s22334_s2 + $0x1e0] sm:$0xf0]  ;;  %v13588_v6 = vld [vmem:[%s22334_s2 + $0x1e4] sm:$0xf0] }
   0x3   :  { %v9340_v3 = vor.u32 %v13587_v1, %v9339_v0  ;;  %v9344_v7 = vor.u32 %v13583_v2, %v9341_v4  ;;  %v9348_v8 = vor.u32 %v13588_v6, %v9347_v5  ;;  %v13584_v9 = vld [vmem:[%s22334_s2 + $0x1cc] sm:$0xf]  ;;  %v9307_v11 = vld [vmem:[%s22334_s2 + $0x180] sm:$0xf]  ;;  %v13575_v14 = vld [vmem:[%s22334_s2 + $0x184] sm:$0xf] }
   0x4   :  { %v9349_v10 = vld [vmem:[%s22334_s2 + $0x1e8] sm:$0xf0]  ;;  %v13579_v13 = vld [vmem:[%s22334_s2 + $0x19c] sm:$0xf0]  ;;  %v9309_v15 = vld [vmem:[%s22334_s2 + $0x1a0] sm:$0xf0] }
   0x5   :  { %438 = vmatpush.bf16.msra.mxu0 %v9340_v3  ;;  %v9352_v12 = vor.u32 %v13584_v9, %v9349_v10  ;;  %467 = vmatpush.bf16.msra.mxu1 %v9344_v7  ;;  %v9308_v16 = vor.u32 %v13579_v13, %v9307_v11  ;;  %v9312_v17 = vor.u32 %v13575_v14, %v9309_v15  ;;  %v9315_v18 = vld [vmem:[%s22334_s2 + $0x188] sm:$0xf]  ;;  %v13576_v20 = vld [vmem:[%s22334_s2 + $0x18c] sm:$0xf]  ;;  %v9275_v23 = vld [vmem:[%s22334_s2 + $0x140] sm:$0xf] }
   0x6   :  { %496 = vmatpush.bf16.msra.mxu2 %v9348_v8  ;;  %v13580_v19 = vld [vmem:[%s22334_s2 + $0x1a4] sm:$0xf0]  ;;  %v9317_v22 = vld [vmem:[%s22334_s2 + $0x1a8] sm:$0xf0]  ;;  %v13571_v24 = vld [vmem:[%s22334_s2 + $0x15c] sm:$0xf0] }
   0x7   :  { %525 = vmatpush.bf16.msra.mxu3 %v9352_v12  ;;  %v9316_v21 = vor.u32 %v13580_v19, %v9315_v18  ;;  %v9320_v25 = vor.u32 %v13576_v20, %v9317_v22  ;;  %v13567_v26 = vld [vmem:[%s22334_s2 + $0x144] sm:$0xf]  ;;  %v9283_v28 = vld [vmem:[%s22334_s2 + $0x148] sm:$0xf]  ;;  %v9276_v29 = vor.u32 %v13571_v24, %v9275_v23  ;;  %v13568_v31 = vld [vmem:[%s22334_s2 + $0x14c] sm:$0xf] }
   0x8   :  { %v9277_v27 = vld [vmem:[%s22334_s2 + $0x160] sm:$0xf0]  ;;  %v13572_v30 = vld [vmem:[%s22334_s2 + $0x164] sm:$0xf0]  ;;  %v9285_v32 = vld [vmem:[%s22334_s2 + $0x168] sm:$0xf0] }
   0x9   :  { %439 = vmatpush.bf16.msra.mxu0 %v9308_v16  ;;  %468 = vmatpush.bf16.msra.mxu1 %v9312_v17  ;;  %v9280_v33 = vor.u32 %v13567_v26, %v9277_v27  ;;  %v9284_v34 = vor.u32 %v13572_v30, %v9283_v28  ;;  %v9243_v35 = vld [vmem:[%s22334_s2 + $0x100] sm:$0xf]  ;;  %v13559_v37 = vld [vmem:[%s22334_s2 + $0x104] sm:$0xf]  ;;  %v9288_v38 = vor.u32 %v13568_v31, %v9285_v32  ;;  %v9251_v40 = vld [vmem:[%s22334_s2 + $0x108] sm:$0xf] }
   0xa   :  { %497 = vmatpush.bf16.msra.mxu2 %v9316_v21  ;;  %v13563_v36 = vld [vmem:[%s22334_s2 + $0x11c] sm:$0xf0]  ;;  %v9245_v39 = vld [vmem:[%s22334_s2 + $0x120] sm:$0xf0]  ;;  %v13564_v41 = vld [vmem:[%s22334_s2 + $0x124] sm:$0xf0] }
   0xb   :  { %526 = vmatpush.bf16.msra.mxu3 %v9320_v25  ;;  %v13560_v42 = vld [vmem:[%s22334_s2 + $0x10c] sm:$0xf]  ;;  %v9244_v44 = vor.u32 %v13563_v36, %v9243_v35  ;;  %v9248_v45 = vor.u32 %v13559_v37, %v9245_v39  ;;  %v9252_v46 = vor.u32 %v13564_v41, %v9251_v40  ;;  %v9211_v47 = vld [vmem:[%s22334_s2 + $0xc0] sm:$0xf]  ;;  %v13551_v49 = vld [vmem:[%s22334_s2 + $0xc4] sm:$0xf] }
   0xc   :  { %v9253_v43 = vld [vmem:[%s22334_s2 + $0x128] sm:$0xf0]  ;;  %v13555_v48 = vld [vmem:[%s22334_s2 + $0xdc] sm:$0xf0]  ;;  %v9213_v51 = vld [vmem:[%s22334_s2 + $0xe0] sm:$0xf0] }
   0xd   :  { %440 = vmatpush.bf16.msra.mxu0 %v9276_v29  ;;  %469 = vmatpush.bf16.msra.mxu1 %v9280_v33  ;;  %v9256_v50 = vor.u32 %v13560_v42, %v9253_v43  ;;  %v9219_v52 = vld [vmem:[%s22334_s2 + $0xc8] sm:$0xf]  ;;  %v13552_v54 = vld [vmem:[%s22334_s2 + $0xcc] sm:$0xf]  ;;  %v9212_v56 = vor.u32 %v13555_v48, %v9211_v47  ;;  %v9216_v57 = vor.u32 %v13551_v49, %v9213_v51  ;;  %v9179_v59 = vld [vmem:[%s22334_s2 + $0x80] sm:$0xf] }
   0xe   :  { %498 = vmatpush.bf16.msra.mxu2 %v9284_v34  ;;  %v13556_v53 = vld [vmem:[%s22334_s2 + $0xe4] sm:$0xf0]  ;;  %v9221_v55 = vld [vmem:[%s22334_s2 + $0xe8] sm:$0xf0]  ;;  %v13547_v60 = vld [vmem:[%s22334_s2 + $0x9c] sm:$0xf0] }
   0xf   :  { %527 = vmatpush.bf16.msra.mxu3 %v9288_v38  ;;  %v9220_v58 = vor.u32 %v13556_v53, %v9219_v52  ;;  %v13543_v61 = vld [vmem:[%s22334_s2 + $0x84] sm:$0xf]  ;;  %v9224_v62 = vor.u32 %v13552_v54, %v9221_v55  ;;  %v9187_v0 = vld [vmem:[%s22334_s2 + $0x88] sm:$0xf]  ;;  %v13544_v2 = vld [vmem:[%s22334_s2 + $0x8c] sm:$0xf]  ;;  %v9180_v4 = vor.u32 %v13547_v60, %v9179_v59 }
  0x10   :  { %v9181_v63 = vld [vmem:[%s22334_s2 + $0xa0] sm:$0xf0]  ;;  %v13548_v1 = vld [vmem:[%s22334_s2 + $0xa4] sm:$0xf0]  ;;  %v9189_v3 = vld [vmem:[%s22334_s2 + $0xa8] sm:$0xf0] }
  0x11   :  { %441 = vmatpush.bf16.msra.mxu0 %v9244_v44  ;;  %470 = vmatpush.bf16.msra.mxu1 %v9248_v45  ;;  %v9184_v5 = vor.u32 %v13543_v61, %v9181_v63  ;;  %v9188_v6 = vor.u32 %v13548_v1, %v9187_v0  ;;  %v9147_v7 = vld [vmem:[%s22334_s2 + $0x40] sm:$0xf]  ;;  %v13535_v9 = vld [vmem:[%s22334_s2 + $0x44] sm:$0xf]  ;;  %v9192_v10 = vor.u32 %v13544_v2, %v9189_v3  ;;  %v9155_v12 = vld [vmem:[%s22334_s2 + $0x48] sm:$0xf] }
  0x12   :  { %499 = vmatpush.bf16.msra.mxu2 %v9252_v46  ;;  %v13539_v8 = vld [vmem:[%s22334_s2 + $0x5c] sm:$0xf0]  ;;  %v9149_v11 = vld [vmem:[%s22334_s2 + $0x60] sm:$0xf0]  ;;  %v13540_v13 = vld [vmem:[%s22334_s2 + $0x64] sm:$0xf0] }
  0x13   :  { %528 = vmatpush.bf16.msra.mxu3 %v9256_v50  ;;  %v13536_v14 = vld [vmem:[%s22334_s2 + $0x4c] sm:$0xf]  ;;  %v9148_v16 = vor.u32 %v13539_v8, %v9147_v7  ;;  %v9152_v17 = vor.u32 %v13535_v9, %v9149_v11  ;;  %v9156_v18 = vor.u32 %v13540_v13, %v9155_v12  ;;  %v9115_v19 = vld [vmem:[%s22334_s2] sm:$0xf]  ;;  %v13527_v21 = vld [vmem:[%s22334_s2 + $0x4] sm:$0xf] }
  0x14   :  { %v9157_v15 = vld [vmem:[%s22334_s2 + $0x68] sm:$0xf0]  ;;  %v13531_v20 = vld [vmem:[%s22334_s2 + $0x1c] sm:$0xf0]  ;;  %v9117_v23 = vld [vmem:[%s22334_s2 + $0x20] sm:$0xf0] }
  0x15   :  { %442 = vmatpush.bf16.msra.mxu0 %v9212_v56  ;;  %471 = vmatpush.bf16.msra.mxu1 %v9216_v57  ;;  %v9160_v22 = vor.u32 %v13536_v14, %v9157_v15  ;;  %v9123_v24 = vld [vmem:[%s22334_s2 + $0x8] sm:$0xf]  ;;  %v13528_v26 = vld [vmem:[%s22334_s2 + $0xc] sm:$0xf]  ;;  %v9116_v28 = vor.u32 %v13531_v20, %v9115_v19  ;;  %v24_v29 = vld [vmem:[%s22335_s1] sm:$0xff]  ;;  %v9120_v31 = vor.u32 %v13527_v21, %v9117_v23 }
  0x16   :  { %500 = vmatpush.bf16.msra.mxu2 %v9220_v58  ;;  %v13532_v25 = vld [vmem:[%s22334_s2 + $0x24] sm:$0xf0]  ;;  %v9125_v27 = vld [vmem:[%s22334_s2 + $0x28] sm:$0xf0]  ;;  %v9355_v35 = vld [vmem:[%s22334_s2 + $0x1d0] sm:$0xf] }
  0x17   :  { %529 = vmatpush.bf16.msra.mxu3 %v9224_v62  ;;  %v25_v30 = vld [vmem:[%s22335_s1 + $0x8] sm:$0xff]  ;;  %v9124_v32 = vor.u32 %v13532_v25, %v9123_v24  ;;  %v9128_v33 = vor.u32 %v13528_v26, %v9125_v27  ;;  %v13589_v36 = vld [vmem:[%s22334_s2 + $0x1ec] sm:$0xf0]  ;;  %v13585_v37 = vld [vmem:[%s22334_s2 + $0x1d4] sm:$0xf] }
  0x18   :  { %v15022_v34 = vpack.c.bf16 %v25_v30, %v24_v29  ;;  %v9356_v38 = vor.u32 %v13589_v36, %v9355_v35  ;;  %v9357_v39 = vld [vmem:[%s22334_s2 + $0x1f0] sm:$0xf0]  ;;  %v9363_v40 = vld [vmem:[%s22334_s2 + $0x1d8] sm:$0xf]  ;;  %v13586_v44 = vld [vmem:[%s22334_s2 + $0x1dc] sm:$0xf] }
  0x19   :  { %443 = vmatpush.bf16.msra.mxu0 %v9180_v4  ;;  %472 = vmatpush.bf16.msra.mxu1 %v9184_v5  ;;  %v13590_v41 = vld [vmem:[%s22334_s2 + $0x1f4] sm:$0xf0]  ;;  %v9360_v42 = vor.u32 %v13585_v37, %v9357_v39  ;;  %v9365_v45 = vld [vmem:[%s22334_s2 + $0x1f8] sm:$0xf0]  ;;  %v9323_v46 = vld [vmem:[%s22334_s2 + $0x190] sm:$0xf] }
  0x1a   :  { %501 = vmatpush.bf16.msra.mxu2 %v9188_v6  ;;  %v9364_v43 = vor.u32 %v13590_v41, %v9363_v40  ;;  %v9368_v47 = vor.u32 %v13586_v44, %v9365_v45  ;;  %v13581_v48 = vld [vmem:[%s22334_s2 + $0x1ac] sm:$0xf0]  ;;  %v13577_v49 = vld [vmem:[%s22334_s2 + $0x194] sm:$0xf]  ;;  %v9331_v53 = vld [vmem:[%s22334_s2 + $0x198] sm:$0xf] }
  0x1b   :  { %530 = vmatpush.bf16.msra.mxu3 %v9192_v10  ;;  %v9325_v50 = vld [vmem:[%s22334_s2 + $0x1b0] sm:$0xf0]  ;;  %v9324_v51 = vor.u32 %v13581_v48, %v9323_v46  ;;  %v13582_v54 = vld [vmem:[%s22334_s2 + $0x1b4] sm:$0xf0]  ;;  %v13578_v55 = vld [vmem:[%s22334_s2 + $0x19c] sm:$0xf] }
  0x1c   :  { %v9328_v52 = vor.u32 %v13577_v49, %v9325_v50  ;;  %v9332_v56 = vor.u32 %v13582_v54, %v9331_v53  ;;  %v9333_v57 = vld [vmem:[%s22334_s2 + $0x1b8] sm:$0xf0]  ;;  %v9291_v58 = vld [vmem:[%s22334_s2 + $0x150] sm:$0xf]  ;;  %v13569_v61 = vld [vmem:[%s22334_s2 + $0x154] sm:$0xf] }
  0x1d   :  { %444 = vmatpush.bf16.msra.mxu0 %v9148_v16  ;;  %473 = vmatpush.bf16.msra.mxu1 %v9152_v17  ;;  %v13573_v59 = vld [vmem:[%s22334_s2 + $0x16c] sm:$0xf0]  ;;  %v9336_v60 = vor.u32 %v13578_v55, %v9333_v57  ;;  %v9293_v62 = vld [vmem:[%s22334_s2 + $0x170] sm:$0xf0]  ;;  %v9299_v63 = vld [vmem:[%s22334_s2 + $0x158] sm:$0xf] }
  0x1e   :  { %502 = vmatpush.bf16.msra.mxu2 %v9156_v18  ;;  %v9292_v0 = vor.u32 %v13573_v59, %v9291_v58  ;;  %v13574_v1 = vld [vmem:[%s22334_s2 + $0x174] sm:$0xf0]  ;;  %v13570_v2 = vld [vmem:[%s22334_s2 + $0x15c] sm:$0xf]  ;;  %v26_v4 = vld [vmem:[%s22335_s1 + $0x10] sm:$0xff]  ;;  %v9296_v5 = vor.u32 %v13569_v61, %v9293_v62 }
  0x1f   :  { %531 = vmatpush.bf16.msra.mxu3 %v9160_v22  ;;  %v9301_v3 = vld [vmem:[%s22334_s2 + $0x178] sm:$0xf0]  ;;  %v9300_v6 = vor.u32 %v13574_v1, %v9299_v63  ;;  %v9259_v7 = vld [vmem:[%s22334_s2 + $0x110] sm:$0xf]  ;;  %v13561_v11 = vld [vmem:[%s22334_s2 + $0x114] sm:$0xf] }
  0x20   :  { %v13565_v8 = vld [vmem:[%s22334_s2 + $0x12c] sm:$0xf0]  ;;  %v27_v9 = vld [vmem:[%s22335_s1 + $0x18] sm:$0xff]  ;;  %v9304_v10 = vor.u32 %v13570_v2, %v9301_v3  ;;  %v9261_v12 = vld [vmem:[%s22334_s2 + $0x130] sm:$0xf0] }
  0x21   :  { %445 = vmatpush.bf16.msra.mxu0 %v9116_v28  ;;  %474 = vmatpush.bf16.msra.mxu1 %v9120_v31  ;;  %v9260_v13 = vor.u32 %v13565_v8, %v9259_v7  ;;  %v9267_v14 = vld [vmem:[%s22334_s2 + $0x118] sm:$0xf]  ;;  %v15124_v16 = vpack.c.bf16 %v27_v9, %v26_v4  ;;  %v9264_v17 = vor.u32 %v13561_v11, %v9261_v12  ;;  %v13562_v18 = vld [vmem:[%s22334_s2 + $0x11c] sm:$0xf]  ;;  %v9227_v22 = vld [vmem:[%s22334_s2 + $0xd0] sm:$0xf] }
  0x22   :  { %503 = vmatpush.bf16.msra.mxu2 %v9124_v32  ;;  %v13566_v15 = vld [vmem:[%s22334_s2 + $0x134] sm:$0xf0]  ;;  %v9269_v19 = vld [vmem:[%s22334_s2 + $0x138] sm:$0xf0]  ;;  %v13557_v23 = vld [vmem:[%s22334_s2 + $0xec] sm:$0xf0] }
  0x23   :  { %532 = vmatpush.bf16.msra.mxu3 %v9128_v33  ;;  %v9268_v20 = vor.u32 %v13566_v15, %v9267_v14  ;;  %v9272_v21 = vor.u32 %v13562_v18, %v9269_v19  ;;  %v13553_v24 = vld [vmem:[%s22334_s2 + $0xd4] sm:$0xf]  ;;  %v9228_v25 = vor.u32 %v13557_v23, %v9227_v22  ;;  %v9235_v27 = vld [vmem:[%s22334_s2 + $0xd8] sm:$0xf]  ;;  %v13554_v31 = vld [vmem:[%s22334_s2 + $0xdc] sm:$0xf] }
  0x24   :  { %446 = vmatmul.bf16.vlgmr.msra.gmra.mxu0 %v15022_v34  ;;  %475 = vmatmul.bf16.vlgmr.msra.gmra.mxu1 %v15022_v34  ;;  %v9229_v26 = vld [vmem:[%s22334_s2 + $0xf0] sm:$0xf0]  ;;  %v13558_v28 = vld [vmem:[%s22334_s2 + $0xf4] sm:$0xf0]  ;;  %v9237_v32 = vld [vmem:[%s22334_s2 + $0xf8] sm:$0xf0] }
  0x25   :  { %504 = vmatmul.bf16.vlgmr.msra.gmra.mxu2 %v15022_v34  ;;  %554 = vmatpush.bf16.msrb.mxu0 %v9356_v38  ;;  %v9232_v29 = vor.u32 %v13553_v24, %v9229_v26  ;;  %v9236_v30 = vor.u32 %v13558_v28, %v9235_v27  ;;  %v9195_v33 = vld [vmem:[%s22334_s2 + $0x90] sm:$0xf]  ;;  %v9240_v35 = vor.u32 %v13554_v31, %v9237_v32  ;;  %v13545_v37 = vld [vmem:[%s22334_s2 + $0x94] sm:$0xf]  ;;  %v9203_v41 = vld [vmem:[%s22334_s2 + $0x98] sm:$0xf] }
  0x26   :  { %533 = vmatmul.bf16.vlgmr.msra.gmra.mxu3 %v15022_v34  ;;  %583 = vmatpush.bf16.msrb.mxu1 %v9360_v42  ;;  %v13549_v36 = vld [vmem:[%s22334_s2 + $0xac] sm:$0xf0]  ;;  %v9197_v38 = vld [vmem:[%s22334_s2 + $0xb0] sm:$0xf0]  ;;  %v13550_v42 = vld [vmem:[%s22334_s2 + $0xb4] sm:$0xf0] }
  0x27   :  { %612 = vmatpush.bf16.msrb.mxu2 %v9364_v43  ;;  %641 = vmatpush.bf16.msrb.mxu3 %v9368_v47  ;;  %v9196_v39 = vor.u32 %v13549_v36, %v9195_v33  ;;  %v9200_v40 = vor.u32 %v13545_v37, %v9197_v38  ;;  %v13546_v43 = vld [vmem:[%s22334_s2 + $0x9c] sm:$0xf]  ;;  %v9163_v45 = vld [vmem:[%s22334_s2 + $0x50] sm:$0xf]  ;;  %v9204_v47 = vor.u32 %v13550_v42, %v9203_v41  ;;  %v13537_v48 = vld [vmem:[%s22334_s2 + $0x54] sm:$0xf] }
  0x28   :  { %v9205_v44 = vld [vmem:[%s22334_s2 + $0xb8] sm:$0xf0]  ;;  %v13541_v46 = vld [vmem:[%s22334_s2 + $0x6c] sm:$0xf0]  ;;  %v9165_v49 = vld [vmem:[%s22334_s2 + $0x70] sm:$0xf0] }
  0x29   :  { %555 = vmatpush.bf16.msrb.mxu0 %v9324_v51  ;;  %v28_v50 = vld [vmem:[%s22335_s1 + $0x20] sm:$0xff]  ;;  %v9208_v51 = vor.u32 %v13546_v43, %v9205_v44  ;;  %v9171_v53 = vld [vmem:[%s22334_s2 + $0x58] sm:$0xf]  ;;  %v13538_v55 = vld [vmem:[%s22334_s2 + $0x5c] sm:$0xf] }
  0x2a   :  { %584 = vmatpush.bf16.msrb.mxu1 %v9328_v52  ;;  %v9164_v52 = vor.u32 %v13541_v46, %v9163_v45  ;;  %v13542_v54 = vld [vmem:[%s22334_s2 + $0x74] sm:$0xf0]  ;;  %v9173_v57 = vld [vmem:[%s22334_s2 + $0x78] sm:$0xf0]  ;;  %v9131_v58 = vld [vmem:[%s22334_s2 + $0x10] sm:$0xf] }
  0x2b   :  { %613 = vmatpush.bf16.msrb.mxu2 %v9332_v56  ;;  %642 = vmatpush.bf16.msrb.mxu3 %v9336_v60  ;;  %v9168_v56 = vor.u32 %v13537_v48, %v9165_v49  ;;  %v13533_v59 = vld [vmem:[%s22334_s2 + $0x2c] sm:$0xf0]  ;;  %v29_v60 = vld [vmem:[%s22335_s1 + $0x28] sm:$0xff]  ;;  %v13529_v61 = vld [vmem:[%s22334_s2 + $0x14] sm:$0xf]  ;;  %v9172_v63 = vor.u32 %v13542_v54, %v9171_v53 }
  0x2c   :  { %v9133_v62 = vld [vmem:[%s22334_s2 + $0x30] sm:$0xf0]  ;;  %v9132_v1 = vor.u32 %v13533_v59, %v9131_v58  ;;  %v9139_v2 = vld [vmem:[%s22334_s2 + $0x18] sm:$0xf]  ;;  %v15232_v4 = vpack.c.bf16 %v29_v60, %v28_v50  ;;  %v9141_v7 = vld [vmem:[%s22334_s2 + $0x38] sm:$0xf0] }
  0x2d   :  { %556 = vmatpush.bf16.msrb.mxu0 %v9292_v0  ;;  %v9176_v0 = vor.u32 %v13538_v55, %v9173_v57  ;;  %v13534_v3 = vld [vmem:[%s22334_s2 + $0x34] sm:$0xf0]  ;;  %v13651_v11 = vld [vmem:[%s22336_s3 + $0x1dc] sm:$0xf0]  ;;  %v13647_v15 = vld [vmem:[%s22336_s3 + $0x1c4] sm:$0xf] }
  0x2e   :  { %585 = vmatpush.bf16.msrb.mxu1 %v9296_v5  ;;  %v9136_v5 = vor.u32 %v13529_v61, %v9133_v62  ;;  %v9140_v8 = vor.u32 %v13534_v3, %v9139_v2  ;;  %v9851_v12 = vld [vmem:[%s22336_s3 + $0x3c0] sm:$0xf]  ;;  %v13703_v31 = vld [vmem:[%s22336_s3 + $0x384] sm:$0xf]  ;;  %v30_v32 = vld [vmem:[%s22335_s1 + $0x30] sm:$0xff] }
  0x2f   :  { %614 = vmatpush.bf16.msrb.mxu2 %v9300_v6  ;;  %643 = vmatpush.bf16.msrb.mxu3 %v9304_v10  ;;  %v13530_v6 = vld [vmem:[%s22334_s2 + $0x1c] sm:$0xf]  ;;  %v9595_v10 = vld [vmem:[%s22336_s3 + $0x1c0] sm:$0xf]  ;;  %v9821_v36 = vld [vmem:[%s22336_s3 + $0x3a0] sm:$0xf0] }
  0x30   :  { %v9144_v9 = vor.u32 %v13530_v6, %v9141_v7  ;;  %v13715_v14 = vld [vmem:[%s22336_s3 + $0x3dc] sm:$0xf0]  ;;  %v31_v33 = vld [vmem:[%s22335_s1 + $0x38] sm:$0xff]  ;;  %v13631_v42 = vld [vmem:[%s22336_s3 + $0x144] sm:$0xf] }
  0x31   :  { %557 = vmatpush.bf16.msrb.mxu0 %v9260_v13  ;;  %v9596_v13 = vor.u32 %v13651_v11, %v9595_v10  ;;  %v9852_v18 = vor.u32 %v13715_v14, %v9851_v12  ;;  %v9563_v22 = vld [vmem:[%s22336_s3 + $0x180] sm:$0xf]  ;;  %v9533_v44 = vld [vmem:[%s22336_s3 + $0x160] sm:$0xf0]  ;;  %v15322_v50 = vpack.c.bf16 %v31_v33, %v30_v32 }
  0x32   :  { %586 = vmatpush.bf16.msrb.mxu1 %v9264_v17  ;;  %v9597_v17 = vld [vmem:[%s22336_s3 + $0x1e0] sm:$0xf0]  ;;  %v13643_v24 = vld [vmem:[%s22336_s3 + $0x19c] sm:$0xf0]  ;;  %v9536_v48 = vor.u32 %v13631_v42, %v9533_v44 }
  0x33   :  { %615 = vmatpush.bf16.msrb.mxu2 %v9268_v20  ;;  %644 = vmatpush.bf16.msrb.mxu3 %v9272_v21  ;;  %v9600_v19 = vor.u32 %v13647_v15, %v9597_v17  ;;  %v13711_v20 = vld [vmem:[%s22336_s3 + $0x3c4] sm:$0xf]  ;;  %v13707_v26 = vld [vmem:[%s22336_s3 + $0x39c] sm:$0xf0]  ;;  %v9564_v27 = vor.u32 %v13643_v24, %v9563_v22 }
  0x34   :  { %451 = vmatmul.bf16.gmra.mxu0 %v15124_v16  ;;  %480 = vmatmul.bf16.gmra.mxu1 %v15124_v16  ;;  %v9853_v21 = vld [vmem:[%s22336_s3 + $0x3e0] sm:$0xf0]  ;;  %v9531_v37 = vld [vmem:[%s22336_s3 + $0x140] sm:$0xf] }
  0x35   :  { %509 = vmatmul.bf16.gmra.mxu2 %v15124_v16  ;;  %558 = vmatpush.bf16.msrb.mxu0 %v9228_v25  ;;  %v9856_v23 = vor.u32 %v13711_v20, %v9853_v21  ;;  %v9819_v25 = vld [vmem:[%s22336_s3 + $0x380] sm:$0xf]  ;;  %v13695_v45 = vld [vmem:[%s22336_s3 + $0x344] sm:$0xf] }
  0x36   :  { %538 = vmatmul.bf16.gmra.mxu3 %v15124_v16  ;;  %587 = vmatpush.bf16.msrb.mxu1 %v9232_v29  ;;  %v9820_v28 = vor.u32 %v13707_v26, %v9819_v25  ;;  %v13639_v29 = vld [vmem:[%s22336_s3 + $0x184] sm:$0xf]  ;;  %v13635_v38 = vld [vmem:[%s22336_s3 + $0x15c] sm:$0xf0] }
  0x37   :  { %616 = vmatpush.bf16.msrb.mxu2 %v9236_v30  ;;  %645 = vmatpush.bf16.msrb.mxu3 %v9240_v35  ;;  %v9565_v30 = vld [vmem:[%s22336_s3 + $0x1a0] sm:$0xf0]  ;;  %v13699_v41 = vld [vmem:[%s22336_s3 + $0x35c] sm:$0xf0]  ;;  %v9532_v43 = vor.u32 %v13635_v38, %v9531_v37 }
  0x38   :  { %v9568_v35 = vor.u32 %v13639_v29, %v9565_v30  ;;  %v9789_v46 = vld [vmem:[%s22336_s3 + $0x360] sm:$0xf0]  ;;  %v9755_v53 = vld [vmem:[%s22336_s3 + $0x300] sm:$0xf] }
  0x39   :  { %559 = vmatpush.bf16.msrb.mxu0 %v9196_v39  ;;  %v9824_v39 = vor.u32 %v13703_v31, %v9821_v36  ;;  %v9792_v49 = vor.u32 %v13695_v45, %v9789_v46  ;;  %v13691_v55 = vld [vmem:[%s22336_s3 + $0x31c] sm:$0xf0]  ;;  %v9501_v57 = vld [vmem:[%s22336_s3 + $0x120] sm:$0xf0] }
  0x3a   :  { %588 = vmatpush.bf16.msrb.mxu1 %v9200_v40  ;;  %v9787_v40 = vld [vmem:[%s22336_s3 + $0x340] sm:$0xf]  ;;  %v9756_v58 = vor.u32 %v13691_v55, %v9755_v53  ;;  %v13687_v60 = vld [vmem:[%s22336_s3 + $0x304] sm:$0xf]  ;;  %v13716_v53 = vld [vmem:[%s22336_s3 + $0x3e4] sm:$0xf0] }
  0x3b   :  { %617 = vmatpush.bf16.msrb.mxu2 %v9204_v47  ;;  %646 = vmatpush.bf16.msrb.mxu3 %v9208_v51  ;;  %v9788_v47 = vor.u32 %v13699_v41, %v9787_v40  ;;  %v9499_v51 = vld [vmem:[%s22336_s3 + $0x100] sm:$0xf]  ;;  %v9757_v61 = vld [vmem:[%s22336_s3 + $0x320] sm:$0xf0] }
  0x3c   :  { %v9467_v62 = vld [vmem:[%s22336_s3 + $0xc0] sm:$0xf]  ;;  %v13615_v6 = vld [vmem:[%s22336_s3 + $0xc4] sm:$0xf] }
  0x3d   :  { %560 = vmatpush.bf16.msrb.mxu0 %v9164_v52  ;;  %v13627_v52 = vld [vmem:[%s22336_s3 + $0x11c] sm:$0xf0]  ;;  %v9469_v7 = vld [vmem:[%s22336_s3 + $0xe0] sm:$0xf0] }
  0x3e   :  { %589 = vmatpush.bf16.msrb.mxu1 %v9168_v56  ;;  %v9500_v54 = vor.u32 %v13627_v52, %v9499_v51  ;;  %v13623_v56 = vld [vmem:[%s22336_s3 + $0x104] sm:$0xf]  ;;  %v13683_v2 = vld [vmem:[%s22336_s3 + $0x2dc] sm:$0xf0]  ;;  %v13652_v51 = vld [vmem:[%s22336_s3 + $0x1e4] sm:$0xf0] }
  0x3f   :  { %618 = vmatpush.bf16.msrb.mxu2 %v9172_v63  ;;  %647 = vmatpush.bf16.msrb.mxu3 %v9176_v0  ;;  %v9504_v59 = vor.u32 %v13623_v56, %v9501_v57  ;;  %v9760_v63 = vor.u32 %v13687_v60, %v9757_v61  ;;  %v13619_v0 = vld [vmem:[%s22336_s3 + $0xdc] sm:$0xf0]  ;;  %v9725_v10 = vld [vmem:[%s22336_s3 + $0x2e0] sm:$0xf0]  ;;  %v9859_v52 = vld [vmem:[%s22336_s3 + $0x3c8] sm:$0xf] }
  0x40   :  { %v9468_v3 = vor.u32 %v13619_v0, %v9467_v62  ;;  %v9435_v11 = vld [vmem:[%s22336_s3 + $0x80] sm:$0xf]  ;;  %v13607_v17 = vld [vmem:[%s22336_s3 + $0x84] sm:$0xf]  ;;  %v9860_v55 = vor.u32 %v13716_v53, %v9859_v52  ;;  %v13648_v56 = vld [vmem:[%s22336_s3 + $0x1cc] sm:$0xf] }
  0x41   :  { %561 = vmatpush.bf16.msrb.mxu0 %v9132_v1  ;;  %v9723_v1 = vld [vmem:[%s22336_s3 + $0x2c0] sm:$0xf]  ;;  %v13671_v20 = vld [vmem:[%s22336_s3 + $0x284] sm:$0xf]  ;;  %v9605_v57 = vld [vmem:[%s22336_s3 + $0x1e8] sm:$0xf0] }
  0x42   :  { %590 = vmatpush.bf16.msrb.mxu1 %v9136_v5  ;;  %v9724_v5 = vor.u32 %v13683_v2, %v9723_v1  ;;  %v13611_v12 = vld [vmem:[%s22336_s3 + $0x9c] sm:$0xf0]  ;;  %v9693_v21 = vld [vmem:[%s22336_s3 + $0x2a0] sm:$0xf0]  ;;  %v9861_v60 = vld [vmem:[%s22336_s3 + $0x3e8] sm:$0xf0] }
  0x43   :  { %619 = vmatpush.bf16.msrb.mxu2 %v9140_v8  ;;  %648 = vmatpush.bf16.msrb.mxu3 %v9144_v9  ;;  %v13679_v8 = vld [vmem:[%s22336_s3 + $0x2c4] sm:$0xf]  ;;  %v9472_v9 = vor.u32 %v13615_v6, %v9469_v7  ;;  %v9691_v14 = vld [vmem:[%s22336_s3 + $0x280] sm:$0xf]  ;;  %v9696_v24 = vor.u32 %v13671_v20, %v9693_v21  ;;  %v9571_v61 = vld [vmem:[%s22336_s3 + $0x188] sm:$0xf] }
  0x44   :  { %456 = vmatmul.bf16.gmra.mxu0 %v15232_v4  ;;  %485 = vmatmul.bf16.gmra.mxu1 %v15232_v4  ;;  %v13675_v15 = vld [vmem:[%s22336_s3 + $0x29c] sm:$0xf0]  ;;  %v13599_v29 = vld [vmem:[%s22336_s3 + $0x44] sm:$0xf]  ;;  %v13644_v62 = vld [vmem:[%s22336_s3 + $0x1a4] sm:$0xf0] }
  0x45   :  { %514 = vmatmul.bf16.gmra.mxu2 %v15232_v4  ;;  %1511 = vmatpush.bf16.msra.mxu0 %v9596_v13  ;;  %v9728_v13 = vor.u32 %v13679_v8, %v9725_v10  ;;  %v9692_v22 = vor.u32 %v13675_v15, %v9691_v14  ;;  %v9403_v25 = vld [vmem:[%s22336_s3 + $0x40] sm:$0xf]  ;;  %v9405_v30 = vld [vmem:[%s22336_s3 + $0x60] sm:$0xf0]  ;;  %v9827_v0 = vld [vmem:[%s22336_s3 + $0x388] sm:$0xf] }
  0x46   :  { %543 = vmatmul.bf16.gmra.mxu3 %v15232_v4  ;;  %1524 = vmatpush.bf16.msra.mxu1 %v9852_v18  ;;  %v9436_v18 = vor.u32 %v13611_v12, %v9435_v11  ;;  %v13603_v26 = vld [vmem:[%s22336_s3 + $0x5c] sm:$0xf0]  ;;  %v13663_v31 = vld [vmem:[%s22336_s3 + $0x244] sm:$0xf]  ;;  %v9408_v36 = vor.u32 %v13599_v29, %v9405_v30  ;;  %v13708_v1 = vld [vmem:[%s22336_s3 + $0x3a4] sm:$0xf0] }
  0x47   :  { %1537 = vmatpush.bf16.msra.mxu2 %v9600_v19  ;;  %1550 = vmatpush.bf16.msra.mxu3 %v9856_v23  ;;  %v9437_v19 = vld [vmem:[%s22336_s3 + $0xa0] sm:$0xf0]  ;;  %v9404_v33 = vor.u32 %v13603_v26, %v9403_v25  ;;  %v9371_v38 = vld [vmem:[%s22336_s3] sm:$0xf]  ;;  %v13640_v2 = vld [vmem:[%s22336_s3 + $0x18c] sm:$0xf]  ;;  %v9828_v8 = vor.u32 %v13708_v1, %v9827_v0 }
  0x48   :  { %v9440_v23 = vor.u32 %v13607_v17, %v9437_v19  ;;  %v9661_v32 = vld [vmem:[%s22336_s3 + $0x260] sm:$0xf0]  ;;  %v9627_v40 = vld [vmem:[%s22336_s3 + $0x200] sm:$0xf]  ;;  %v13704_v6 = vld [vmem:[%s22336_s3 + $0x38c] sm:$0xf] }
  0x49   :  { %1512 = vmatpush.bf16.msra.mxu0 %v9564_v27  ;;  %v9659_v27 = vld [vmem:[%s22336_s3 + $0x240] sm:$0xf]  ;;  %v9664_v37 = vor.u32 %v13663_v31, %v9661_v32  ;;  %v9373_v44 = vld [vmem:[%s22336_s3 + $0x20] sm:$0xf0]  ;;  %v9829_v7 = vld [vmem:[%s22336_s3 + $0x3a8] sm:$0xf0] }
  0x4a   :  { %1525 = vmatpush.bf16.msra.mxu1 %v9820_v28  ;;  %v13667_v28 = vld [vmem:[%s22336_s3 + $0x25c] sm:$0xf0]  ;;  %v9832_v10 = vor.u32 %v13704_v6, %v9829_v7  ;;  %v9539_v11 = vld [vmem:[%s22336_s3 + $0x148] sm:$0xf]  ;;  %v13632_v15 = vld [vmem:[%s22336_s3 + $0x14c] sm:$0xf] }
  0x4b   :  { %1538 = vmatpush.bf16.msra.mxu2 %v9568_v35  ;;  %1551 = vmatpush.bf16.msra.mxu3 %v9824_v39  ;;  %v9660_v35 = vor.u32 %v13667_v28, %v9659_v27  ;;  %v13595_v39 = vld [vmem:[%s22336_s3 + $0x1c] sm:$0xf0]  ;;  %v13636_v12 = vld [vmem:[%s22336_s3 + $0x164] sm:$0xf0]  ;;  %v9541_v17 = vld [vmem:[%s22336_s3 + $0x168] sm:$0xf0] }
  0x4c   :  { %v9372_v41 = vor.u32 %v13595_v39, %v9371_v38  ;;  %v13659_v42 = vld [vmem:[%s22336_s3 + $0x21c] sm:$0xf0]  ;;  %v13700_v14 = vld [vmem:[%s22336_s3 + $0x364] sm:$0xf0]  ;;  %v9797_v19 = vld [vmem:[%s22336_s3 + $0x368] sm:$0xf0]  ;;  %v9540_v20 = vor.u32 %v13636_v12, %v9539_v11 }
  0x4d   :  { %1513 = vmatpush.bf16.msra.mxu0 %v9532_v43  ;;  %v13591_v43 = vld [vmem:[%s22336_s3 + $0x4] sm:$0xf]  ;;  %v9628_v45 = vor.u32 %v13659_v42, %v9627_v40  ;;  %v9763_v25 = vld [vmem:[%s22336_s3 + $0x308] sm:$0xf]  ;;  %v13624_v28 = vld [vmem:[%s22336_s3 + $0x10c] sm:$0xf] }
  0x4e   :  { %1526 = vmatpush.bf16.msra.mxu1 %v9788_v47  ;;  %v9376_v46 = vor.u32 %v13591_v43, %v9373_v44  ;;  %v9629_v47 = vld [vmem:[%s22336_s3 + $0x220] sm:$0xf0]  ;;  %v13692_v27 = vld [vmem:[%s22336_s3 + $0x324] sm:$0xf0]  ;;  %v9509_v29 = vld [vmem:[%s22336_s3 + $0x128] sm:$0xf0] }
  0x4f   :  { %1539 = vmatpush.bf16.msra.mxu2 %v9536_v48  ;;  %1552 = vmatpush.bf16.msra.mxu3 %v9792_v49  ;;  %v9603_v48 = vld [vmem:[%s22336_s3 + $0x1c8] sm:$0xf]  ;;  %v13688_v30 = vld [vmem:[%s22336_s3 + $0x30c] sm:$0xf] }
  0x50   :  { %v9765_v31 = vld [vmem:[%s22336_s3 + $0x328] sm:$0xf0]  ;;  %v9731_v38 = vld [vmem:[%s22336_s3 + $0x2c8] sm:$0xf] }
  0x51   :  { %1514 = vmatpush.bf16.msra.mxu0 %v9500_v54  ;;  %v9604_v54 = vor.u32 %v13652_v51, %v9603_v48  ;;  %v13684_v39 = vld [vmem:[%s22336_s3 + $0x2e4] sm:$0xf0]  ;;  %v13616_v40 = vld [vmem:[%s22336_s3 + $0xcc] sm:$0xf] }
  0x52   :  { %1527 = vmatpush.bf16.msra.mxu1 %v9756_v58  ;;  %v13712_v58 = vld [vmem:[%s22336_s3 + $0x3cc] sm:$0xf]  ;;  %v9699_v48 = vld [vmem:[%s22336_s3 + $0x288] sm:$0xf] }
  0x53   :  { %1540 = vmatpush.bf16.msra.mxu2 %v9504_v59  ;;  %1553 = vmatpush.bf16.msra.mxu3 %v9760_v63  ;;  %v9608_v59 = vor.u32 %v13648_v56, %v9605_v57  ;;  %v9864_v63 = vor.u32 %v13712_v58, %v9861_v60  ;;  %v13680_v42 = vld [vmem:[%s22336_s3 + $0x2cc] sm:$0xf]  ;;  %v13676_v51 = vld [vmem:[%s22336_s3 + $0x2a4] sm:$0xf0] }
  0x54   :  { %461 = vmatmul.bf16.gmra.mxu0 %v15322_v50  ;;  %490 = vmatmul.bf16.gmra.mxu1 %v15322_v50  ;;  %v9733_v43 = vld [vmem:[%s22336_s3 + $0x2e8] sm:$0xf0]  ;;  %v9700_v57 = vor.u32 %v13676_v51, %v9699_v48  ;;  %v13604_v60 = vld [vmem:[%s22336_s3 + $0x64] sm:$0xf0]  ;;  %v13701_v51 = vld [vmem:[%s22336_s3 + $0x36c] sm:$0xf0] }
  0x55   :  { %519 = vmatmul.bf16.gmra.mxu2 %v15322_v50  ;;  %1515 = vmatpush.bf16.msra.mxu0 %v9468_v3  ;;  %v9572_v3 = vor.u32 %v13644_v62, %v9571_v61  ;;  %v13608_v52 = vld [vmem:[%s22336_s3 + $0x8c] sm:$0xf]  ;;  %v9667_v61 = vld [vmem:[%s22336_s3 + $0x248] sm:$0xf] }
  0x56   :  { %548 = vmatmul.bf16.gmra.mxu3 %v15322_v50  ;;  %1528 = vmatpush.bf16.msra.mxu1 %v9724_v5  ;;  %v9573_v5 = vld [vmem:[%s22336_s3 + $0x1a8] sm:$0xf0]  ;;  %v13660_v12 = vld [vmem:[%s22336_s3 + $0x224] sm:$0xf0] }
  0x57   :  { %1541 = vmatpush.bf16.msra.mxu2 %v9472_v9  ;;  %1554 = vmatpush.bf16.msra.mxu3 %v9728_v13  ;;  %v9576_v9 = vor.u32 %v13640_v2, %v9573_v5  ;;  %v9795_v13 = vld [vmem:[%s22336_s3 + $0x348] sm:$0xf]  ;;  %v9445_v53 = vld [vmem:[%s22336_s3 + $0xa8] sm:$0xf0] }
  0x58   :  { %v9796_v21 = vor.u32 %v13700_v14, %v9795_v13  ;;  %v9448_v58 = vor.u32 %v13608_v52, %v9445_v53  ;;  %v13600_v0 = vld [vmem:[%s22336_s3 + $0x4c] sm:$0xf]  ;;  %v13633_v52 = vld [vmem:[%s22336_s3 + $0x154] sm:$0xf] }
  0x59   :  { %1516 = vmatpush.bf16.msra.mxu0 %v9436_v18  ;;  %v13696_v18 = vld [vmem:[%s22336_s3 + $0x34c] sm:$0xf]  ;;  %v9549_v53 = vld [vmem:[%s22336_s3 + $0x170] sm:$0xf0] }
  0x5a   :  { %1529 = vmatpush.bf16.msra.mxu1 %v9692_v22  ;;  %v9544_v22 = vor.u32 %v13632_v15, %v9541_v17  ;;  %v9800_v26 = vor.u32 %v13696_v18, %v9797_v19  ;;  %v9413_v1 = vld [vmem:[%s22336_s3 + $0x68] sm:$0xf0] }
  0x5b   :  { %1542 = vmatpush.bf16.msra.mxu2 %v9440_v23  ;;  %1555 = vmatpush.bf16.msra.mxu3 %v9696_v24  ;;  %v9507_v23 = vld [vmem:[%s22336_s3 + $0x108] sm:$0xf]  ;;  %v13664_v2 = vld [vmem:[%s22336_s3 + $0x24c] sm:$0xf]  ;;  %v9416_v7 = vor.u32 %v13600_v0, %v9413_v1  ;;  %v13629_v0 = vld [vmem:[%s22336_s3 + $0x12c] sm:$0xf0] }
  0x5c   :  { %v13628_v24 = vld [vmem:[%s22336_s3 + $0x124] sm:$0xf0]  ;;  %v13592_v13 = vld [vmem:[%s22336_s3 + $0xc] sm:$0xf]  ;;  %v9771_v1 = vld [vmem:[%s22336_s3 + $0x310] sm:$0xf] }
  0x5d   :  { %1517 = vmatpush.bf16.msra.mxu0 %v9404_v33  ;;  %v9508_v32 = vor.u32 %v13628_v24, %v9507_v23  ;;  %v9764_v33 = vor.u32 %v13692_v27, %v9763_v25  ;;  %v9381_v14 = vld [vmem:[%s22336_s3 + $0x28] sm:$0xf0]  ;;  %v13653_v23 = vld [vmem:[%s22336_s3 + $0x1ec] sm:$0xf0] }
  0x5e   :  { %1530 = vmatpush.bf16.msra.mxu1 %v9660_v35  ;;  %v9512_v35 = vor.u32 %v13624_v28, %v9509_v29  ;;  %v13656_v15 = vld [vmem:[%s22336_s3 + $0x20c] sm:$0xf]  ;;  %v9867_v24 = vld [vmem:[%s22336_s3 + $0x3d0] sm:$0xf]  ;;  %v13713_v28 = vld [vmem:[%s22336_s3 + $0x3d4] sm:$0xf] }
  0x5f   :  { %1543 = vmatpush.bf16.msra.mxu2 %v9408_v36  ;;  %1556 = vmatpush.bf16.msra.mxu3 %v9664_v37  ;;  %v9475_v36 = vld [vmem:[%s22336_s3 + $0xc8] sm:$0xf]  ;;  %v9637_v17 = vld [vmem:[%s22336_s3 + $0x228] sm:$0xf0]  ;;  %v13717_v25 = vld [vmem:[%s22336_s3 + $0x3ec] sm:$0xf0] }
  0x60   :  { %v13620_v37 = vld [vmem:[%s22336_s3 + $0xe4] sm:$0xf0]  ;;  %v9869_v29 = vld [vmem:[%s22336_s3 + $0x3f0] sm:$0xf0] }
  0x61   :  { %1518 = vmatpush.bf16.msra.mxu0 %v9372_v41  ;;  %v9477_v41 = vld [vmem:[%s22336_s3 + $0xe8] sm:$0xf0]  ;;  %v9476_v44 = vor.u32 %v13620_v37, %v9475_v36  ;;  %v13645_v36 = vld [vmem:[%s22336_s3 + $0x1ac] sm:$0xf0] }
  0x62   :  { %1531 = vmatpush.bf16.msra.mxu1 %v9628_v45  ;;  %v9732_v45 = vor.u32 %v13684_v39, %v9731_v38  ;;  %v9835_v37 = vld [vmem:[%s22336_s3 + $0x390] sm:$0xf]  ;;  %v9872_v38 = vor.u32 %v13713_v28, %v9869_v29  ;;  %v13641_v39 = vld [vmem:[%s22336_s3 + $0x194] sm:$0xf] }
  0x63   :  { %1544 = vmatpush.bf16.msra.mxu2 %v9376_v46  ;;  %v9480_v46 = vor.u32 %v13616_v40, %v9477_v41  ;;  %v9581_v40 = vld [vmem:[%s22336_s3 + $0x1b0] sm:$0xf0] }
  0x64   :  { %562 = vmatmul.bf16.vlgmr.msrb.gmra.mxu0 %v15022_v34  ;;  %591 = vmatmul.bf16.vlgmr.msrb.gmra.mxu1 %v15022_v34  ;;  %v13705_v41 = vld [vmem:[%s22336_s3 + $0x394] sm:$0xf] }
  0x65   :  { %620 = vmatmul.bf16.vlgmr.msrb.gmra.mxu2 %v15022_v34  ;;  %1563 = vmatpush.bf16.msrb.mxu0 %v9604_v54  ;;  %v13672_v54 = vld [vmem:[%s22336_s3 + $0x28c] sm:$0xf] }
  0x66   :  { %649 = vmatmul.bf16.vlgmr.msrb.gmra.mxu3 %v15022_v34  ;;  %v13655_v34 = vld [vmem:[%s22336_s3 + $0x204] sm:$0xf]  ;;  %1576 = vmatpush.bf16.msrb.mxu1 %v9860_v55  ;;  %v9701_v55 = vld [vmem:[%s22336_s3 + $0x2a8] sm:$0xf0] }
  0x67   :  { %v9632_v49 = vor.u32 %v13655_v34, %v9629_v47  ;;  %1589 = vmatpush.bf16.msrb.mxu2 %v9608_v59  ;;  %v9443_v34 = vld [vmem:[%s22336_s3 + $0x88] sm:$0xf]  ;;  %v9704_v62 = vor.u32 %v13672_v54, %v9701_v55 }
  0x68   :  { %v13612_v47 = vld [vmem:[%s22336_s3 + $0xa4] sm:$0xf0] }
  0x69   :  { %1557 = vmatpush.bf16.msra.mxu3 %v9632_v49  ;;  %1564 = vmatpush.bf16.msrb.mxu0 %v9572_v3  ;;  %v9736_v49 = vor.u32 %v13680_v42, %v9733_v43  ;;  %v9444_v56 = vor.u32 %v13612_v47, %v9443_v34  ;;  %v9411_v59 = vld [vmem:[%s22336_s3 + $0x48] sm:$0xf]  ;;  %v9669_v3 = vld [vmem:[%s22336_s3 + $0x268] sm:$0xf0]  ;;  %v9837_v42 = vld [vmem:[%s22336_s3 + $0x3b0] sm:$0xf0] }
  0x6a   :  { %1577 = vmatpush.bf16.msrb.mxu1 %v9828_v8  ;;  %v9412_v5 = vor.u32 %v13604_v60, %v9411_v59  ;;  %v9379_v8 = vld [vmem:[%s22336_s3 + $0x8] sm:$0xf]  ;;  %v9672_v11 = vor.u32 %v13664_v2, %v9669_v3  ;;  %v13637_v34 = vld [vmem:[%s22336_s3 + $0x16c] sm:$0xf0] }
  0x6b   :  { %1590 = vmatpush.bf16.msrb.mxu2 %v9576_v9  ;;  %v13596_v9 = vld [vmem:[%s22336_s3 + $0x24] sm:$0xf0]  ;;  %v9803_v47 = vld [vmem:[%s22336_s3 + $0x350] sm:$0xf] }
  0x6c   :  { %v9380_v18 = vor.u32 %v13596_v9, %v9379_v8  ;;  %v13693_v3 = vld [vmem:[%s22336_s3 + $0x32c] sm:$0xf0]  ;;  %v9773_v8 = vld [vmem:[%s22336_s3 + $0x330] sm:$0xf0] }
  0x6d   :  { %1602 = vmatpush.bf16.msrb.mxu3 %v9864_v63  ;;  %1565 = vmatpush.bf16.msrb.mxu0 %v9540_v20  ;;  %v13668_v63 = vld [vmem:[%s22336_s3 + $0x264] sm:$0xf0]  ;;  %v9384_v20 = vor.u32 %v13592_v13, %v9381_v14  ;;  %v9483_v13 = vld [vmem:[%s22336_s3 + $0xd0] sm:$0xf] }
  0x6e   :  { %1578 = vmatpush.bf16.msrb.mxu1 %v9796_v21  ;;  %v9668_v6 = vor.u32 %v13668_v63, %v9667_v61  ;;  %v9640_v21 = vor.u32 %v13656_v15, %v9637_v17  ;;  %v9804_v61 = vor.u32 %v13701_v51, %v9803_v47  ;;  %v9515_v63 = vld [vmem:[%s22336_s3 + $0x110] sm:$0xf] }
  0x6f   :  { %1591 = vmatpush.bf16.msrb.mxu2 %v9544_v22  ;;  %v22342_v22 = vmov 0   ;;  %v13621_v14 = vld [vmem:[%s22336_s3 + $0xec] sm:$0xf0] }
  0x70   :  { %14616 = vset.pattern.permute.xlu0 %v22342_v22  ;;  %14617 = vset.pattern.permute.xlu1 %v22342_v22  ;;  %v9739_v15 = vld [vmem:[%s22336_s3 + $0x2d0] sm:$0xf]  ;;  %v9484_v29 = vor.u32 %v13621_v14, %v9483_v13  ;;  %v13593_v13 = vld [vmem:[%s22336_s3 + $0x14] sm:$0xf] }
  0x71   :  { %1603 = vmatpush.bf16.msrb.mxu3 %v9832_v10  ;;  %1566 = vmatpush.bf16.msrb.mxu0 %v9508_v32  ;;  %v9635_v10 = vld [vmem:[%s22336_s3 + $0x208] sm:$0xf]  ;;  %v9868_v32 = vor.u32 %v13717_v25, %v9867_v24  ;;  %v13681_v25 = vld [vmem:[%s22336_s3 + $0x2d4] sm:$0xf]  ;;  %v9419_v47 = vld [vmem:[%s22336_s3 + $0x50] sm:$0xf] }
  0x72   :  { %1579 = vmatpush.bf16.msrb.mxu1 %v9764_v33  ;;  %v9636_v19 = vor.u32 %v13660_v12, %v9635_v10  ;;  %14618 = vset.pattern.permute.xlu2 %v22342_v22  ;;  %v9516_v10 = vor.u32 %v13629_v0, %v9515_v63  ;;  %v9675_v51 = vld [vmem:[%s22336_s3 + $0x250] sm:$0xf]  ;;  %v13665_v0 = vld [vmem:[%s22336_s3 + $0x254] sm:$0xf] }
  0x73   :  { %1592 = vmatpush.bf16.msrb.mxu2 %v9512_v35  ;;  %v9579_v35 = vld [vmem:[%s22336_s3 + $0x190] sm:$0xf] }
  0x74   :  { %567 = vmatmul.bf16.gmra.mxu0 %v15124_v16  ;;  %596 = vmatmul.bf16.gmra.mxu1 %v15124_v16  ;;  %v9580_v43 = vor.u32 %v13645_v36, %v9579_v35  ;;  %v9451_v35 = vld [vmem:[%s22336_s3 + $0x90] sm:$0xf] }
  0x75   :  { %625 = vmatmul.bf16.gmra.mxu2 %v15124_v16  ;;  %1604 = vmatpush.bf16.msrb.mxu3 %v9800_v26  ;;  %v9613_v26 = vld [vmem:[%s22336_s3 + $0x1f0] sm:$0xf0]  ;;  %v13613_v36 = vld [vmem:[%s22336_s3 + $0xac] sm:$0xf0] }
  0x76   :  { %654 = vmatmul.bf16.gmra.mxu3 %v15124_v16  ;;  %v9768_v16 = vor.u32 %v13688_v30, %v9765_v31  ;;  %1567 = vmatpush.bf16.msrb.mxu0 %v9476_v44 }
  0x77   :  { %1580 = vmatpush.bf16.msrb.mxu1 %v9732_v45  ;;  %1593 = vmatpush.bf16.msrb.mxu2 %v9480_v46  ;;  %v9584_v45 = vor.u32 %v13641_v39, %v9581_v40  ;;  %v9547_v46 = vld [vmem:[%s22336_s3 + $0x150] sm:$0xf]  ;;  %v13609_v39 = vld [vmem:[%s22336_s3 + $0x94] sm:$0xf] }
  0x78   :  { %v9548_v60 = vor.u32 %v13637_v34, %v9547_v46  ;;  %v9453_v40 = vld [vmem:[%s22336_s3 + $0xb0] sm:$0xf0] }
  0x79   :  { %1605 = vmatpush.bf16.msrb.mxu3 %v9768_v16  ;;  %v13709_v16 = vld [vmem:[%s22336_s3 + $0x3ac] sm:$0xf0]  ;;  %v9456_v34 = vor.u32 %v13609_v39, %v9453_v40  ;;  %v9587_v39 = vld [vmem:[%s22336_s3 + $0x198] sm:$0xf] }
  0x7a   :  { %1568 = vmatpush.bf16.msrb.mxu0 %v9444_v56  ;;  %v9836_v44 = vor.u32 %v13709_v16, %v9835_v37  ;;  %v13697_v56 = vld [vmem:[%s22336_s3 + $0x354] sm:$0xf]  ;;  %v9707_v37 = vld [vmem:[%s22336_s3 + $0x290] sm:$0xf] }
  0x7b   :  { %1581 = vmatpush.bf16.msrb.mxu1 %v9700_v57  ;;  %1594 = vmatpush.bf16.msrb.mxu2 %v9448_v58  ;;  %v9805_v57 = vld [vmem:[%s22336_s3 + $0x370] sm:$0xf0]  ;;  %v15748_v58 = vld [vmem:[%s22337_s4] sm:$0xff]  ;;  %v13677_v16 = vld [vmem:[%s22336_s3 + $0x2ac] sm:$0xf0] }
  0x7c   :  { %v9808_v2 = vor.u32 %v13697_v56, %v9805_v57  ;;  %v15777_v9 = vperm.slane %v15748_v58, 0  ;;  %v9708_v46 = vor.u32 %v13677_v16, %v9707_v37  ;;  %v13669_v56 = vld [vmem:[%s22336_s3 + $0x26c] sm:$0xf0]  ;;  %v13601_v57 = vld [vmem:[%s22336_s3 + $0x54] sm:$0xf] }
  0x7d   :  { %1606 = vmatpush.bf16.msrb.mxu3 %v9736_v49  ;;  %v9840_v49 = vor.u32 %v13705_v41, %v9837_v42  ;;  %v13673_v41 = vld [vmem:[%s22336_s3 + $0x294] sm:$0xf] }
  0x7e   :  { %1569 = vmatpush.bf16.msrb.mxu0 %v9412_v5  ;;  %v13625_v5 = vld [vmem:[%s22336_s3 + $0x114] sm:$0xf] }
  0x7f   :  { %1582 = vmatpush.bf16.msrb.mxu1 %v9668_v6  ;;  %1595 = vmatpush.bf16.msrb.mxu2 %v9416_v7  ;;  %v9517_v6 = vld [vmem:[%s22336_s3 + $0x130] sm:$0xf0] }
  0x80   :  { %v13689_v7 = vld [vmem:[%s22336_s3 + $0x314] sm:$0xf]  ;;  %v9520_v12 = vor.u32 %v13625_v5, %v9517_v6  ;;  %v9387_v6 = vld [vmem:[%s22336_s3 + $0x10] sm:$0xf] }
  0x81   :  { %1607 = vmatpush.bf16.msrb.mxu3 %v9704_v62  ;;  %v9552_v62 = vor.u32 %v13633_v52, %v9549_v53  ;;  %v9709_v42 = vld [vmem:[%s22336_s3 + $0x2b0] sm:$0xf0] }
  0x82   :  { %1570 = vmatpush.bf16.msrb.mxu0 %v9380_v18  ;;  %v9776_v18 = vor.u32 %v13689_v7, %v9773_v8  ;;  %v9712_v53 = vor.u32 %v13673_v41, %v9709_v42  ;;  %v13597_v7 = vld [vmem:[%s22336_s3 + $0x2c] sm:$0xf0]  ;;  %v9676_v8 = vor.u32 %v13669_v56, %v9675_v51  ;;  %v13642_v56 = vld [vmem:[%s22336_s3 + $0x19c] sm:$0xf] }
  0x83   :  { %1583 = vmatpush.bf16.msrb.mxu1 %v9636_v19  ;;  %1596 = vmatpush.bf16.msrb.mxu2 %v9384_v20  ;;  %v13685_v19 = vld [vmem:[%s22336_s3 + $0x2ec] sm:$0xf0]  ;;  %v13617_v20 = vld [vmem:[%s22336_s3 + $0xd4] sm:$0xf] }
  0x84   :  { %572 = vmatmul.bf16.gmra.mxu0 %v15232_v4  ;;  %601 = vmatmul.bf16.gmra.mxu1 %v15232_v4 }
  0x85   :  { %630 = vmatmul.bf16.gmra.mxu2 %v15232_v4  ;;  %1608 = vmatpush.bf16.msrb.mxu3 %v9672_v11  ;;  %v9772_v11 = vor.u32 %v13693_v3, %v9771_v1  ;;  %v9677_v1 = vld [vmem:[%s22336_s3 + $0x270] sm:$0xf0] }
  0x86   :  { %659 = vmatmul.bf16.gmra.mxu3 %v15232_v4  ;;  %v9611_v4 = vld [vmem:[%s22336_s3 + $0x1d0] sm:$0xf]  ;;  %v9680_v14 = vor.u32 %v13665_v0, %v9677_v1  ;;  %v9845_v0 = vld [vmem:[%s22336_s3 + $0x3b8] sm:$0xf0] }
  0x87   :  { %v9612_v31 = vor.u32 %v13653_v23, %v9611_v4  ;;  %v15800_v4 = vperm.slane %v15748_v58, 1 }
  0x89   :  { %1609 = vmatpush.bf16.msrb.mxu3 %v9640_v21  ;;  %v9485_v21 = vld [vmem:[%s22336_s3 + $0xf0] sm:$0xf0] }
  0x94   :  { %577 = vmatmul.bf16.gmra.mxu0 %v15322_v50  ;;  %606 = vmatmul.bf16.gmra.mxu1 %v15322_v50 }
  0x95   :  { %635 = vmatmul.bf16.gmra.mxu2 %v15322_v50 }
  0x96   :  { %664 = vmatmul.bf16.gmra.mxu3 %v15322_v50  ;;  %v13649_v50 = vld [vmem:[%s22336_s3 + $0x1d4] sm:$0xf] }
  0x97   :  { %v9616_v33 = vor.u32 %v13649_v50, %v9613_v26  ;;  %v9741_v50 = vld [vmem:[%s22336_s3 + $0x2f0] sm:$0xf0] }
  0xa1   :  { %v15677_v27 = vpop.f32.mrf.mxu0  ;;  %v15685_v30 = vpop.f32.mrf.mxu1 }
  0xa4   :  { %1519 = vmatmul.bf16.vlgmr.msra.gmra.mxu0 %v22342_v22  ;;  %1532 = vmatmul.bf16.vlgmr.msra.gmra.mxu1 %v22342_v22 }
  0xa5   :  { %1545 = vmatmul.bf16.vlgmr.msra.gmra.mxu2 %v22342_v22  ;;  %1615 = vmatpush.bf16.msra.mxu0 %v9612_v31 }
  0xa6   :  { %1558 = vmatmul.bf16.vlgmr.msra.gmra.mxu3 %v22342_v22  ;;  %1628 = vmatpush.bf16.msra.mxu1 %v9868_v32  ;;  %v9740_v32 = vor.u32 %v13685_v19, %v9739_v15  ;;  %v9389_v15 = vld [vmem:[%s22336_s3 + $0x30] sm:$0xf0] }
  0xa7   :  { %1641 = vmatpush.bf16.msra.mxu2 %v9616_v33  ;;  %1654 = vmatpush.bf16.msra.mxu3 %v9872_v38  ;;  %v9488_v33 = vor.u32 %v13617_v20, %v9485_v21  ;;  %v9744_v38 = vor.u32 %v13681_v25, %v9741_v50  ;;  %v9645_v19 = vld [vmem:[%s22336_s3 + $0x230] sm:$0xf0]  ;;  %v9619_v20 = vld [vmem:[%s22336_s3 + $0x1d8] sm:$0xf]  ;;  %v9388_v25 = vor.u32 %v13597_v7, %v9387_v6 }
  0xa8   :  { %v15724_v48 = vpop.f32.mrf.mxu2  ;;  %v13654_v21 = vld [vmem:[%s22336_s3 + $0x1f4] sm:$0xf0] }
  0xa9   :  { %v15735_v54 = vpop.f32.mrf.mxu3  ;;  %v15737_v55 = vpop.f32.mrf.mxu0  ;;  %1616 = vmatpush.bf16.msra.mxu0 %v9580_v43  ;;  %v15844_v43 = vperm.slane %v15748_v58, 2  ;;  %v13718_v50 = vld [vmem:[%s22336_s3 + $0x3f4] sm:$0xf0]  ;;  %v9620_v16 = vor.u32 %v13654_v21, %v9619_v20 }
  0xaa   :  { %v15750_v59 = vpop.f32.mrf.mxu1  ;;  %1629 = vmatpush.bf16.msra.mxu1 %v9836_v44  ;;  %v15847_v44 = vperm.slane %v15748_v58, 3  ;;  %v9555_v7 = vld [vmem:[%s22336_s3 + $0x158] sm:$0xf] }
  0xab   :  { %1642 = vmatpush.bf16.msra.mxu2 %v9584_v45  ;;  %1655 = vmatpush.bf16.msra.mxu3 %v9840_v49  ;;  %v9452_v45 = vor.u32 %v13613_v36, %v9451_v35  ;;  %v13605_v49 = vld [vmem:[%s22336_s3 + $0x6c] sm:$0xf0]  ;;  %v13714_v35 = vld [vmem:[%s22336_s3 + $0x3dc] sm:$0xf] }
  0xac   :  { %v9420_v5 = vor.u32 %v13605_v49, %v9419_v47  ;;  %v9877_v36 = vld [vmem:[%s22336_s3 + $0x3f8] sm:$0xf0]  ;;  %v15948_v47 = vld [vmem:[%s22338_s0] sm:$0xff] }
  0xad   :  { %1617 = vmatpush.bf16.msra.mxu0 %v9548_v60  ;;  %v9421_v60 = vld [vmem:[%s22336_s3 + $0x70] sm:$0xf0]  ;;  %vm1763_vm0 = vcmp.gt.s32.totalorder %v15948_v47, 0  ;;  %vm2806_vm1 = vcmp.gt.s32.totalorder %v15948_v47, 1  ;;  %vm8036_vm2 = vcmp.gt.s32.totalorder %v15948_v47, 6 }
  0xae   :  { %1630 = vmatpush.bf16.msra.mxu1 %v9804_v61 }
  0xaf   :  { %1643 = vmatpush.bf16.msra.mxu2 %v9552_v62  ;;  %1656 = vmatpush.bf16.msra.mxu3 %v9808_v2 }
  0xb0   :  { %v15788_v17 = vpop.f32.mrf.mxu2 }
  0xb1   :  { %v15802_v23 = vpop.f32.mrf.mxu3  ;;  %v452_v24 = vpop.f32.mrf.mxu0  ;;  %1618 = vmatpush.bf16.msra.mxu0 %v9516_v10  ;;  %v9424_v10 = vor.u32 %v13601_v57, %v9421_v60  ;;  %v9589_v57 = vld [vmem:[%s22336_s3 + $0x1b8] sm:$0xf0] }
  0xb2   :  { %v15811_v26 = vadd.f32 %v452_v24, %v15777_v9  ;;  %v481_v28 = vpop.f32.mrf.mxu1  ;;  %1631 = vmatpush.bf16.msra.mxu1 %v9772_v11  ;;  %v9643_v11 = vld [vmem:[%s22336_s3 + $0x210] sm:$0xf]  ;;  %v9875_v24 = vld [vmem:[%s22336_s3 + $0x3d8] sm:$0xf]  ;;  %v9592_v6 = vor.u32 %v13642_v56, %v9589_v57 }
  0xb3   :  { %1644 = vmatpush.bf16.msra.mxu2 %v9520_v12  ;;  %v15814_v31 = vadd.f32 %v481_v28, %v15800_v4  ;;  %1657 = vmatpush.bf16.msra.mxu3 %v9776_v18  ;;  %v13661_v12 = vld [vmem:[%s22336_s3 + $0x22c] sm:$0xf0]  ;;  %v13657_v18 = vld [vmem:[%s22336_s3 + $0x214] sm:$0xf]  ;;  %v13650_v28 = vld [vmem:[%s22336_s3 + $0x1dc] sm:$0xf]  ;;  %v9876_v42 = vor.u32 %v13718_v50, %v9875_v24 }
  0xb4   :  { %1571 = vmatmul.bf16.vlgmr.msrb.gmra.mxu0 %v22342_v22  ;;  %1584 = vmatmul.bf16.vlgmr.msrb.gmra.mxu1 %v22342_v22  ;;  %v13622_v56 = vld [vmem:[%s22336_s3 + $0xf4] sm:$0xf0] }
  0xb5   :  { %1597 = vmatmul.bf16.vlgmr.msrb.gmra.mxu2 %v22342_v22  ;;  %1619 = vmatpush.bf16.msra.mxu0 %v9484_v29  ;;  %v9621_v29 = vld [vmem:[%s22336_s3 + $0x1f8] sm:$0xf0]  ;;  %v9747_v57 = vld [vmem:[%s22336_s3 + $0x2d8] sm:$0xf] }
  0xb6   :  { %1610 = vmatmul.bf16.vlgmr.msrb.gmra.mxu3 %v22342_v22  ;;  %1632 = vmatpush.bf16.msra.mxu1 %v9740_v32  ;;  %v9644_v32 = vor.u32 %v13661_v12, %v9643_v11  ;;  %v13702_v12 = vld [vmem:[%s22336_s3 + $0x374] sm:$0xf0] }
  0xb7   :  { %1645 = vmatpush.bf16.msra.mxu2 %v9488_v33  ;;  %1658 = vmatpush.bf16.msra.mxu3 %v9744_v38  ;;  %v9392_v33 = vor.u32 %v13593_v13, %v9389_v15  ;;  %v9648_v38 = vor.u32 %v13657_v18, %v9645_v19  ;;  %v13634_v13 = vld [vmem:[%s22336_s3 + $0x15c] sm:$0xf]  ;;  %v1764_v19 = vsel %vm1763_vm0, 1, %v22342_v22 }
  0xb8   :  { %v510_v52 = vpop.f32.mrf.mxu2  ;;  %v13698_v15 = vld [vmem:[%s22336_s3 + $0x35c] sm:$0xf]  ;;  %1766 = vperm.xlu0 %14616, %v1764_v19   ;;  %v9715_v19 = vld [vmem:[%s22336_s3 + $0x298] sm:$0xf] }
  0xb9   :  { %v15869_v61 = vadd.f32 %v510_v52, %v15844_v43  ;;  %v539_v62 = vpop.f32.mrf.mxu3  ;;  %v15871_v63 = vpop.f32.mrf.mxu0  ;;  %1620 = vmatpush.bf16.msra.mxu0 %v9452_v45  ;;  %v9624_v45 = vor.u32 %v13650_v28, %v9621_v29  ;;  %v9880_v52 = vor.u32 %v13714_v35, %v9877_v36  ;;  %v9813_v18 = vld [vmem:[%s22336_s3 + $0x378] sm:$0xf0]  ;;  %v9779_v35 = vld [vmem:[%s22336_s3 + $0x318] sm:$0xf] }
  0xba   :  { %v15880_v2 = vadd.f32 %v539_v62, %v15847_v44  ;;  %v15882_v3 = vpop.f32.mrf.mxu1  ;;  %1633 = vmatpush.bf16.msra.mxu1 %v9708_v46  ;;  %v13646_v46 = vld [vmem:[%s22336_s3 + $0x1b4] sm:$0xf0]  ;;  %v13706_v62 = vld [vmem:[%s22336_s3 + $0x39c] sm:$0xf] }
  0xbb   :  { %1646 = vmatpush.bf16.msra.mxu2 %v9456_v34  ;;  %1659 = vmatpush.bf16.msra.mxu3 %v9712_v53  ;;  %v9843_v34 = vld [vmem:[%s22336_s3 + $0x398] sm:$0xf]  ;;  %v9588_v1 = vor.u32 %v13646_v46, %v9587_v39  ;;  %v9848_v11 = vor.u32 %v13706_v62, %v9845_v0  ;;  %v9781_v46 = vld [vmem:[%s22336_s3 + $0x338] sm:$0xf0] }
  0xbc   :  { %v13710_v53 = vld [vmem:[%s22336_s3 + $0x3b4] sm:$0xf0] }
  0xbd   :  { %1621 = vmatpush.bf16.msra.mxu0 %v9420_v5  ;;  %v9844_v5 = vor.u32 %v13710_v53, %v9843_v34  ;;  %v13694_v39 = vld [vmem:[%s22336_s3 + $0x334] sm:$0xf0] }
  0xbe   :  { %1634 = vmatpush.bf16.msra.mxu1 %v9676_v8  ;;  %v13638_v8 = vld [vmem:[%s22336_s3 + $0x174] sm:$0xf0] }
  0xbf   :  { %1647 = vmatpush.bf16.msra.mxu2 %v9424_v10  ;;  %1660 = vmatpush.bf16.msra.mxu3 %v9680_v14  ;;  %v9811_v10 = vld [vmem:[%s22336_s3 + $0x358] sm:$0xf]  ;;  %v9557_v14 = vld [vmem:[%s22336_s3 + $0x178] sm:$0xf0]  ;;  %v9556_v21 = vor.u32 %v13638_v8, %v9555_v7 }
  0xc0   :  { %v15932_v37 = vpop.f32.mrf.mxu2  ;;  %v9812_v28 = vor.u32 %v13702_v12, %v9811_v10  ;;  %v9560_v29 = vor.u32 %v13634_v13, %v9557_v14  ;;  %v9491_v53 = vld [vmem:[%s22336_s3 + $0xd8] sm:$0xf]  ;;  %v9749_v7 = vld [vmem:[%s22336_s3 + $0x2f8] sm:$0xf0] }
  0xc1   :  { %v15937_v40 = vpop.f32.mrf.mxu3  ;;  %v457_v41 = vpop.f32.mrf.mxu0  ;;  %1622 = vmatpush.bf16.msra.mxu0 %v9388_v25  ;;  %v13686_v0 = vld [vmem:[%s22336_s3 + $0x2f4] sm:$0xf0]  ;;  %v9492_v10 = vor.u32 %v13622_v56, %v9491_v53  ;;  %v13602_v53 = vld [vmem:[%s22336_s3 + $0x5c] sm:$0xf] }
  0xc2   :  { %v15951_v49 = vadd.f32 %v457_v41, %v15777_v9  ;;  %v486_v51 = vpop.f32.mrf.mxu1  ;;  %1635 = vmatpush.bf16.msra.mxu1 %v9644_v32  ;;  %v9523_v32 = vld [vmem:[%s22336_s3 + $0x118] sm:$0xf]  ;;  %v13626_v41 = vld [vmem:[%s22336_s3 + $0x11c] sm:$0xf]  ;;  %v9748_v13 = vor.u32 %v13686_v0, %v9747_v57 }
  0xc3   :  { %1648 = vmatpush.bf16.msra.mxu2 %v9392_v33  ;;  %v15963_v60 = vadd.f32 %v486_v51, %v15800_v4  ;;  %1661 = vmatpush.bf16.msra.mxu3 %v9648_v38  ;;  %v13630_v33 = vld [vmem:[%s22336_s3 + $0x134] sm:$0xf0]  ;;  %v9780_v51 = vor.u32 %v13694_v39, %v9779_v35  ;;  %v13674_v35 = vld [vmem:[%s22336_s3 + $0x29c] sm:$0xf] }
  0xc4   :  { %1623 = vmatmul.bf16.vlgmr.msra.gmra.mxu0 %v22342_v22  ;;  %v9524_v34 = vor.u32 %v13630_v33, %v9523_v32  ;;  %v9461_v32 = vld [vmem:[%s22336_s3 + $0xb8] sm:$0xf0] }
  0xc5   :  { %1667 = vmatpush.bf16.msrb.mxu0 %v9620_v16  ;;  %1636 = vmatmul.bf16.vlgmr.msra.gmra.mxu1 %v22342_v22  ;;  %v9816_v16 = vor.u32 %v13698_v15, %v9813_v18  ;;  %v9459_v15 = vld [vmem:[%s22336_s3 + $0x98] sm:$0xf]  ;;  %v9429_v56 = vld [vmem:[%s22336_s3 + $0x78] sm:$0xf0] }
  0xc6   :  { %1680 = vmatpush.bf16.msrb.mxu1 %v9876_v42  ;;  %1649 = vmatmul.bf16.vlgmr.msra.gmra.mxu2 %v22342_v22  ;;  %v9525_v42 = vld [vmem:[%s22336_s3 + $0x138] sm:$0xf0]  ;;  %v13614_v18 = vld [vmem:[%s22336_s3 + $0xb4] sm:$0xf0] }
  0xc7   :  { %1693 = vmatpush.bf16.msrb.mxu2 %v9624_v45  ;;  %1706 = vmatpush.bf16.msrb.mxu3 %v9880_v52  ;;  %v13690_v45 = vld [vmem:[%s22336_s3 + $0x31c] sm:$0xf]  ;;  %v9528_v52 = vor.u32 %v13626_v41, %v9525_v42  ;;  %v9460_v39 = vor.u32 %v13614_v18, %v9459_v15  ;;  %v9651_v15 = vld [vmem:[%s22336_s3 + $0x218] sm:$0xf] }
  0xc8   :  { %1662 = vmatmul.bf16.vlgmr.msra.gmra.mxu3 %v22342_v22  ;;  %v515_v20 = vpop.f32.mrf.mxu2  ;;  %v9784_v62 = vor.u32 %v13690_v45, %v9781_v46  ;;  %v9427_v45 = vld [vmem:[%s22336_s3 + $0x58] sm:$0xf]  ;;  %v13666_v57 = vld [vmem:[%s22336_s3 + $0x25c] sm:$0xf] }
  0xc9   :  { %1668 = vmatpush.bf16.msrb.mxu0 %v9588_v1  ;;  %v16004_v24 = vadd.f32 %v515_v20, %v15844_v43  ;;  %v544_v25 = vpop.f32.mrf.mxu3  ;;  %v16006_v50 = vpop.f32.mrf.mxu0  ;;  %v13618_v1 = vld [vmem:[%s22336_s3 + $0xdc] sm:$0xf]  ;;  %v13606_v46 = vld [vmem:[%s22336_s3 + $0x74] sm:$0xf0] }
  0xca   :  { %1681 = vmatpush.bf16.msrb.mxu1 %v9844_v5  ;;  %22344 = vst [vmem:[#allocation3_spill] sm:$0xff] %v16006_v50  ;;  %v16018_v36 = vadd.f32 %v544_v25, %v15847_v44  ;;  %v16020_v38 = vpop.f32.mrf.mxu1  ;;  %v9493_v5 = vld [vmem:[%s22336_s3 + $0xf8] sm:$0xf0] }
  0xcb   :  { %1694 = vmatpush.bf16.msrb.mxu2 %v9592_v6  ;;  %1707 = vmatpush.bf16.msrb.mxu3 %v9848_v11  ;;  %22345 = vst [vmem:[#allocation4_spill] sm:$0xff] %v16020_v38  ;;  %v13682_v6 = vld [vmem:[%s22336_s3 + $0x2dc] sm:$0xf]  ;;  %v9496_v14 = vor.u32 %v13618_v1, %v9493_v5  ;;  %v9428_v1 = vor.u32 %v13606_v46, %v9427_v45  ;;  %v13759_v38 = vld [vmem:[%s22336_s3 + $0x144] sm:$0xf] }
  0xcc   :  { %v9752_v25 = vor.u32 %v13682_v6, %v9749_v7 }
  0xcd   :  { %1669 = vmatpush.bf16.msrb.mxu0 %v9556_v21 }
  0xce   :  { %1682 = vmatpush.bf16.msrb.mxu1 %v9812_v28  ;;  %v13678_v28 = vld [vmem:[%s22336_s3 + $0x2b4] sm:$0xf0] }
  0xcf   :  { %1695 = vmatpush.bf16.msrb.mxu2 %v9560_v29  ;;  %1708 = vmatpush.bf16.msrb.mxu3 %v9816_v16  ;;  %v13610_v29 = vld [vmem:[%s22336_s3 + $0x9c] sm:$0xf]  ;;  %v9716_v41 = vor.u32 %v13678_v28, %v9715_v19 }
  0xd0   :  { %v16061_v8 = vpop.f32.mrf.mxu2  ;;  %v9717_v16 = vld [vmem:[%s22336_s3 + $0x2b8] sm:$0xf0]  ;;  %v9464_v42 = vor.u32 %v13610_v29, %v9461_v32 }
  0xd1   :  { %1670 = vmatpush.bf16.msrb.mxu0 %v9524_v34  ;;  %22346 = vst [vmem:[#allocation5_spill] sm:$0xff] %v16061_v8  ;;  %v16063_v11 = vpop.f32.mrf.mxu3  ;;  %v462_v12 = vpop.f32.mrf.mxu0  ;;  %v9683_v34 = vld [vmem:[%s22336_s3 + $0x258] sm:$0xf]  ;;  %v13594_v28 = vld [vmem:[%s22336_s3 + $0x1c] sm:$0xf] }
  0xd2   :  { %1683 = vmatpush.bf16.msrb.mxu1 %v9780_v51  ;;  %22347 = vst [vmem:[#allocation6_spill] sm:$0xff] %v16063_v11  ;;  %v16075_v20 = vadd.f32 %v462_v12, %v15777_v9  ;;  %v491_v21 = vpop.f32.mrf.mxu1  ;;  %v9720_v51 = vor.u32 %v13674_v35, %v9717_v16  ;;  %v9432_v12 = vor.u32 %v13602_v53, %v9429_v56  ;;  %v9397_v29 = vld [vmem:[%s22336_s3 + $0x38] sm:$0xf0]  ;;  %v8037_v53 = vsel %vm8036_vm2, 1, %v22342_v22 }
  0xd3   :  { %1696 = vmatpush.bf16.msrb.mxu2 %v9528_v52  ;;  %1709 = vmatpush.bf16.msrb.mxu3 %v9784_v62  ;;  %v16087_v33 = vadd.f32 %v491_v21, %v15800_v4  ;;  %v13670_v52 = vld [vmem:[%s22336_s3 + $0x274] sm:$0xf0]  ;;  %v9685_v62 = vld [vmem:[%s22336_s3 + $0x278] sm:$0xf0] }
  0xd4   :  { %22348 = vst [vmem:[#allocation7_spill] sm:$0xff] %v16075_v20  ;;  %v9688_v21 = vor.u32 %v13666_v57, %v9685_v62  ;;  %v13658_v32 = vld [vmem:[%s22336_s3 + $0x21c] sm:$0xf] }
  0xd5   :  { %22349 = vst [vmem:[#allocation8_spill] sm:$0xff] %v16087_v33  ;;  %1671 = vmatpush.bf16.msrb.mxu0 %v9492_v10  ;;  %v9684_v10 = vor.u32 %v13670_v52, %v9683_v34  ;;  %v9653_v35 = vld [vmem:[%s22336_s3 + $0x238] sm:$0xf0] }
  0xd6   :  { %1684 = vmatpush.bf16.msrb.mxu1 %v9748_v13  ;;  %v9395_v13 = vld [vmem:[%s22336_s3 + $0x18] sm:$0xf]  ;;  %v9656_v45 = vor.u32 %v13658_v32, %v9653_v35 }
  0xd7   :  { %1697 = vmatpush.bf16.msrb.mxu2 %v9496_v14  ;;  %1710 = vmatpush.bf16.msrb.mxu3 %v9752_v25  ;;  %v13598_v14 = vld [vmem:[%s22336_s3 + $0x34] sm:$0xf0] }
  0xd8   :  { %v520_v0 = vpop.f32.mrf.mxu2  ;;  %v13662_v25 = vld [vmem:[%s22336_s3 + $0x234] sm:$0xf0]  ;;  %v9396_v16 = vor.u32 %v13598_v14, %v9395_v13 }
  0xd9   :  { %1672 = vmatpush.bf16.msrb.mxu0 %v9460_v39  ;;  %v16120_v5 = vadd.f32 %v520_v0, %v15844_v43  ;;  %v549_v6 = vpop.f32.mrf.mxu3  ;;  %v16122_v7 = vpop.f32.mrf.mxu0  ;;  %v2807_v39 = vsel %vm2806_vm1, 1, %v22342_v22 }
  0xda   :  { %1685 = vmatpush.bf16.msrb.mxu1 %v9716_v41  ;;  %22351 = vst [vmem:[#allocation10_spill] sm:$0xff] %v16122_v7  ;;  %v16134_v18 = vadd.f32 %v549_v6, %v15847_v44  ;;  %v16136_v19 = vpop.f32.mrf.mxu1  ;;  %v9652_v41 = vor.u32 %v13662_v25, %v9651_v15  ;;  %2809 = vperm.xlu0 %14616, %v2807_v39   ;;  %v16183_v6 = vperm.slane %v15748_v58, 5  ;;  %v16197_v25 = vperm.slane %v15748_v58, 7 }
  0xdb   :  { %1698 = vmatpush.bf16.msrb.mxu2 %v9464_v42  ;;  %22350 = vst [vmem:[#allocation9_spill] sm:$0xff] %v16120_v5  ;;  %1711 = vmatpush.bf16.msrb.mxu3 %v9720_v51  ;;  %v9400_v42 = vor.u32 %v13594_v28, %v9397_v29 }
  0xdc   :  { %22352 = vst [vmem:[#allocation11_spill] sm:$0xff] %v16134_v18 }
  0xdd   :  { %22353 = vst [vmem:[#allocation12_spill] sm:$0xff] %v16136_v19  ;;  %1673 = vmatpush.bf16.msrb.mxu0 %v9428_v1  ;;  %v16178_v1 = vperm.slane %v15748_v58, 4 }
  0xde   :  { %1686 = vmatpush.bf16.msrb.mxu1 %v9684_v10 }
  0xdf   :  { %1699 = vmatpush.bf16.msrb.mxu2 %v9432_v12  ;;  %1712 = vmatpush.bf16.msrb.mxu3 %v9688_v21  ;;  %v16194_v21 = vperm.slane %v15748_v58, 6 }
  0xe0   :  { %v16155_v46 = vpop.f32.mrf.mxu2 }
  0xe1   :  { %1674 = vmatpush.bf16.msrb.mxu0 %v9396_v16  ;;  %22354 = vst [vmem:[#allocation13_spill] sm:$0xff] %v16155_v46  ;;  %v16157_v34 = vpop.f32.mrf.mxu3  ;;  %v16159_v51 = vpop.f32.mrf.mxu0 }
  0xe2   :  { %1687 = vmatpush.bf16.msrb.mxu1 %v9652_v41  ;;  %22355 = vst [vmem:[#allocation14_spill] sm:$0xff] %v16157_v34  ;;  %v16161_v52 = vpop.f32.mrf.mxu1  ;;  %8039 = vperm.xlu0 %14616, %v8037_v53  }
  0xe3   :  { %1700 = vmatpush.bf16.msrb.mxu2 %v9400_v42  ;;  %1713 = vmatpush.bf16.msrb.mxu3 %v9656_v45 }
  0xe4   :  { %1675 = vmatmul.bf16.vlgmr.msrb.gmra.mxu0 %v22342_v22 }
  0xe5   :  { %1688 = vmatmul.bf16.vlgmr.msrb.gmra.mxu1 %v22342_v22 }
  0xe6   :  { %1701 = vmatmul.bf16.vlgmr.msrb.gmra.mxu2 %v22342_v22  ;;  %1714 = vmatmul.bf16.vlgmr.msrb.gmra.mxu3 %v22342_v22 }
  0xe8   :  { %v16169_v56 = vpop.f32.mrf.mxu2 }
  0xe9   :  { %v16171_v57 = vpop.f32.mrf.mxu3  ;;  %v16173_v62 = vpop.f32.mrf.mxu0 }
  0xea   :  { %v16175_v0 = vpop.f32.mrf.mxu1 }
  0xf0   :  { %v16180_v47 = vpop.f32.mrf.mxu2 }
  0xf1   :  { %v16185_v10 = vpop.f32.mrf.mxu3  ;;  %v568_v12 = vpop.f32.mrf.mxu0 }
  0xf2   :  { %v16188_v13 = vadd.f32 %v568_v12, %v16178_v1  ;;  %v597_v14 = vpop.f32.mrf.mxu1 }
  0xf3   :  { %v16191_v15 = vadd.f32 %v597_v14, %v16183_v6 }
  0xf8   :  { %v626_v28 = vpop.f32.mrf.mxu2 }
  0xf9   :  { %v16200_v29 = vadd.f32 %v626_v28, %v16194_v21  ;;  %v655_v32 = vpop.f32.mrf.mxu3  ;;  %v16202_v35 = vpop.f32.mrf.mxu0 }
  0xfa   :  { %v16205_v16 = vadd.f32 %v655_v32, %v16197_v25  ;;  %v16207_v39 = vpop.f32.mrf.mxu1 }
 0x100   :  { %v16209_v41 = vpop.f32.mrf.mxu2 }
 0x101   :  { %v16211_v42 = vpop.f32.mrf.mxu3  ;;  %v573_v45 = vpop.f32.mrf.mxu0 }
 0x102   :  { %v16214_v58 = vadd.f32 %v573_v45, %v16178_v1  ;;  %v602_v53 = vpop.f32.mrf.mxu1 }
 0x103   :  { %v16217_v12 = vadd.f32 %v602_v53, %v16183_v6 }
 0x104   :  { %22356 = vst [vmem:[#allocation15_spill] sm:$0xff] %v16214_v58  ;;  %v13770_v58 = vld [vmem:[%s22336_s3 + $0x19c] sm:$0xf] }
 0x105   :  { %22357 = vst [vmem:[#allocation16_spill] sm:$0xff] %v16217_v12  ;;  %v13774_v12 = vld [vmem:[%s22336_s3 + $0x1b4] sm:$0xf0] }
 0x108   :  { %v631_v14 = vpop.f32.mrf.mxu2 }
 0x109   :  { %v16220_v28 = vadd.f32 %v631_v14, %v16194_v21  ;;  %v660_v32 = vpop.f32.mrf.mxu3  ;;  %v16222_v22 = vpop.f32.mrf.mxu0 }
 0x10a   :  { %22359 = vst [vmem:[#allocation18_spill] sm:$0xff] %v16222_v22  ;;  %v16225_v19 = vadd.f32 %v660_v32, %v16197_v25  ;;  %v16227_v34 = vpop.f32.mrf.mxu1  ;;  %v13763_v22 = vld [vmem:[%s22336_s3 + $0x15c] sm:$0xf0] }
 0x10b   :  { %22358 = vst [vmem:[#allocation17_spill] sm:$0xff] %v16220_v28 }
 0x10c   :  { %22360 = vst [vmem:[#allocation19_spill] sm:$0xff] %v16225_v19  ;;  %v10235_v19 = vld [vmem:[%s22336_s3 + $0x2c0] sm:$0xf] }
 0x10d   :  { %22361 = vst [vmem:[#allocation20_spill] sm:$0xff] %v16227_v34 }
 0x110   :  { %v16229_v7 = vpop.f32.mrf.mxu2 }
 0x111   :  { %22362 = vst [vmem:[#allocation21_spill] sm:$0xff] %v16229_v7  ;;  %v16231_v45 = vpop.f32.mrf.mxu3  ;;  %v578_v46 = vpop.f32.mrf.mxu0 }
 0x112   :  { %22363 = vst [vmem:[#allocation22_spill] sm:$0xff] %v16231_v45  ;;  %v16234_v53 = vadd.f32 %v578_v46, %v16178_v1  ;;  %v607_v33 = vpop.f32.mrf.mxu1  ;;  %v10107_v46 = vld [vmem:[%s22336_s3 + $0x1c0] sm:$0xf] }
 0x113   :  { %v16237_v14 = vadd.f32 %v607_v33, %v16183_v6  ;;  %v13779_v33 = vld [vmem:[%s22336_s3 + $0x1dc] sm:$0xf0] }
 0x114   :  { %22364 = vst [vmem:[#allocation23_spill] sm:$0xff] %v16234_v53  ;;  %v10363_v53 = vld [vmem:[%s22336_s3 + $0x3c0] sm:$0xf] }
 0x115   :  { %22365 = vst [vmem:[#allocation24_spill] sm:$0xff] %v16237_v14  ;;  %v13767_v14 = vld [vmem:[%s22336_s3 + $0x184] sm:$0xf]  ;;  %v13843_v45 = vld [vmem:[%s22336_s3 + $0x3dc] sm:$0xf0] }
 0x118   :  { %v636_v18 = vpop.f32.mrf.mxu2 }
 0x119   :  { %v16240_v5 = vadd.f32 %v636_v18, %v16194_v21  ;;  %v665_v32 = vpop.f32.mrf.mxu3  ;;  %v16242_v20 = vpop.f32.mrf.mxu0  ;;  %v13775_v18 = vld [vmem:[%s22336_s3 + $0x1c4] sm:$0xf] }
 0x11a   :  { %22367 = vst [vmem:[#allocation26_spill] sm:$0xff] %v16242_v20  ;;  %v16245_v34 = vadd.f32 %v665_v32, %v16197_v25  ;;  %v16247_v7 = vpop.f32.mrf.mxu1  ;;  %v10109_v32 = vld [vmem:[%s22336_s3 + $0x1e0] sm:$0xf0] }
 0x11b   :  { %22366 = vst [vmem:[#allocation25_spill] sm:$0xff] %v16240_v5  ;;  %v10108_v5 = vor.u32 %v13779_v33, %v10107_v46  ;;  %v10112_v20 = vor.u32 %v13775_v18, %v10109_v32 }
 0x11c   :  { %22368 = vst [vmem:[#allocation27_spill] sm:$0xff] %v16245_v34  ;;  %v13771_v34 = vld [vmem:[%s22336_s3 + $0x19c] sm:$0xf0] }
 0x11d   :  { %22369 = vst [vmem:[#allocation28_spill] sm:$0xff] %v16247_v7  ;;  %2554 = vmatpush.bf16.msra.mxu0 %v10108_v5  ;;  %2580 = vmatpush.bf16.msra.mxu2 %v10112_v20  ;;  %v10075_v7 = vld [vmem:[%s22336_s3 + $0x180] sm:$0xf]  ;;  %v10077_v5 = vld [vmem:[%s22336_s3 + $0x1a0] sm:$0xf0] }
 0x11e   :  { %v10076_v33 = vor.u32 %v13771_v34, %v10075_v7  ;;  %v10080_v32 = vor.u32 %v13767_v14, %v10077_v5  ;;  %v13839_v7 = vld [vmem:[%s22336_s3 + $0x3c4] sm:$0xf] }
 0x11f   :  { %v10365_v14 = vld [vmem:[%s22336_s3 + $0x3e0] sm:$0xf0] }
 0x120   :  { %v16270_v46 = vpop.f32.mrf.mxu2  ;;  %v10368_v5 = vor.u32 %v13839_v7, %v10365_v14  ;;  %v13835_v7 = vld [vmem:[%s22336_s3 + $0x39c] sm:$0xf0]  ;;  %v13831_v14 = vld [vmem:[%s22336_s3 + $0x384] sm:$0xf] }
 0x121   :  { %22370 = vst [vmem:[#allocation29_spill] sm:$0xff] %v16270_v46  ;;  %v16275_v20 = vpop.f32.mrf.mxu3  ;;  %v16277_v18 = vpop.f32.mrf.mxu0  ;;  %2555 = vmatpush.bf16.msra.mxu0 %v10076_v33  ;;  %v10364_v46 = vor.u32 %v13843_v45, %v10363_v53  ;;  %2581 = vmatpush.bf16.msra.mxu2 %v10080_v32  ;;  %v10045_v53 = vld [vmem:[%s22336_s3 + $0x160] sm:$0xf0]  ;;  %v10331_v32 = vld [vmem:[%s22336_s3 + $0x380] sm:$0xf] }
 0x122   :  { %22371 = vst [vmem:[#allocation30_spill] sm:$0xff] %v16275_v20  ;;  %v16288_v34 = vpop.f32.mrf.mxu1  ;;  %v10043_v20 = vld [vmem:[%s22336_s3 + $0x140] sm:$0xf]  ;;  %2593 = vmatpush.bf16.msra.mxu3 %v10368_v5  ;;  %v10048_v33 = vor.u32 %v13759_v38, %v10045_v53 }
 0x123   :  { %2567 = vmatpush.bf16.msra.mxu1 %v10364_v46  ;;  %v10044_v45 = vor.u32 %v13763_v22, %v10043_v20  ;;  %v10332_v22 = vor.u32 %v13835_v7, %v10331_v32  ;;  %v10333_v46 = vld [vmem:[%s22336_s3 + $0x3a0] sm:$0xf0]  ;;  %v10011_v20 = vld [vmem:[%s22336_s3 + $0x100] sm:$0xf] }
 0x124   :  { %v10336_v38 = vor.u32 %v13831_v14, %v10333_v46  ;;  %v13755_v5 = vld [vmem:[%s22336_s3 + $0x11c] sm:$0xf0] }
 0x125   :  { %2556 = vmatpush.bf16.msra.mxu0 %v10044_v45  ;;  %2582 = vmatpush.bf16.msra.mxu2 %v10048_v33  ;;  %v10012_v11 = vor.u32 %v13755_v5, %v10011_v20  ;;  %v13751_v45 = vld [vmem:[%s22336_s3 + $0x104] sm:$0xf]  ;;  %v10299_v46 = vld [vmem:[%s22336_s3 + $0x340] sm:$0xf] }
 0x126   :  { %v10013_v33 = vld [vmem:[%s22336_s3 + $0x120] sm:$0xf0]  ;;  %2594 = vmatpush.bf16.msra.mxu3 %v10336_v38 }
 0x127   :  { %2568 = vmatpush.bf16.msra.mxu1 %v10332_v22  ;;  %v10016_v14 = vor.u32 %v13751_v45, %v10013_v33  ;;  %v13827_v22 = vld [vmem:[%s22336_s3 + $0x35c] sm:$0xf0]  ;;  %v13823_v20 = vld [vmem:[%s22336_s3 + $0x344] sm:$0xf] }
 0x128   :  { %v16323_v53 = vpop.f32.mrf.mxu2  ;;  %v10300_v8 = vor.u32 %v13827_v22, %v10299_v46  ;;  %v10301_v38 = vld [vmem:[%s22336_s3 + $0x360] sm:$0xf0]  ;;  %v9979_v33 = vld [vmem:[%s22336_s3 + $0xc0] sm:$0xf] }
 0x129   :  { %v16331_v32 = vpop.f32.mrf.mxu3  ;;  %v1522_v7 = vpop.f32.mrf.mxu0  ;;  %2557 = vmatpush.bf16.msra.mxu0 %v10012_v11  ;;  %2583 = vmatpush.bf16.msra.mxu2 %v10016_v14  ;;  %v10304_v45 = vor.u32 %v13823_v20, %v10301_v38  ;;  %v9981_v46 = vld [vmem:[%s22336_s3 + $0xe0] sm:$0xf0]  ;;  %v10267_v22 = vld [vmem:[%s22336_s3 + $0x300] sm:$0xf] }
 0x12a   :  { %v1535_v5 = vpop.f32.mrf.mxu1  ;;  %v13747_v7 = vld [vmem:[%s22336_s3 + $0xdc] sm:$0xf0]  ;;  %v13815_v38 = vld [vmem:[%s22336_s3 + $0x304] sm:$0xf] }
 0x12b   :  { %v13743_v5 = vld [vmem:[%s22336_s3 + $0xc4] sm:$0xf]  ;;  %2569 = vmatpush.bf16.msra.mxu1 %v10300_v8  ;;  %v9980_v11 = vor.u32 %v13747_v7, %v9979_v33  ;;  %2595 = vmatpush.bf16.msra.mxu3 %v10304_v45  ;;  %v13819_v20 = vld [vmem:[%s22336_s3 + $0x31c] sm:$0xf0] }
 0x12c   :  { %v9984_v14 = vor.u32 %v13743_v5, %v9981_v46  ;;  %v10268_v8 = vor.u32 %v13819_v20, %v10267_v22  ;;  %v10269_v33 = vld [vmem:[%s22336_s3 + $0x320] sm:$0xf0]  ;;  %v9947_v7 = vld [vmem:[%s22336_s3 + $0x80] sm:$0xf]  ;;  %v1534_v20 = vadd.f32 %v16288_v34, %v16277_v18  ;;  %v448_v34 = vadd.f32 %v15677_v27, %v15777_v9 }
 0x12d   :  { %2558 = vmatpush.bf16.msra.mxu0 %v9980_v11  ;;  %v10272_v45 = vor.u32 %v13815_v38, %v10269_v33  ;;  %v13739_v5 = vld [vmem:[%s22336_s3 + $0x9c] sm:$0xf0]  ;;  %v13735_v46 = vld [vmem:[%s22336_s3 + $0x84] sm:$0xf] }
 0x12e   :  { %2584 = vmatpush.bf16.msra.mxu2 %v9984_v14  ;;  %v9948_v22 = vor.u32 %v13739_v5, %v9947_v7  ;;  %v9949_v14 = vld [vmem:[%s22336_s3 + $0xa0] sm:$0xf0] }
 0x12f   :  { %2570 = vmatpush.bf16.msra.mxu1 %v10268_v8  ;;  %2596 = vmatpush.bf16.msra.mxu3 %v10272_v45  ;;  %v9952_v50 = vor.u32 %v13735_v46, %v9949_v14  ;;  %v13811_v8 = vld [vmem:[%s22336_s3 + $0x2dc] sm:$0xf0]  ;;  %v13807_v7 = vld [vmem:[%s22336_s3 + $0x2c4] sm:$0xf]  ;;  %v506_v45 = vadd.f32 %v15724_v48, %v15844_v43 }
 0x130   :  { %v1548_v11 = vpop.f32.mrf.mxu2  ;;  %v10237_v18 = vld [vmem:[%s22336_s3 + $0x2e0] sm:$0xf0] }
 0x131   :  { %v1561_v38 = vpop.f32.mrf.mxu3  ;;  %v1572_v33 = vpop.f32.mrf.mxu0  ;;  %2559 = vmatpush.bf16.msra.mxu0 %v9948_v22  ;;  %v10236_v11 = vor.u32 %v13811_v8, %v10235_v19  ;;  %v10240_v14 = vor.u32 %v13807_v7, %v10237_v18  ;;  %v13731_v19 = vld [vmem:[%s22336_s3 + $0x5c] sm:$0xf0]  ;;  %v13727_v22 = vld [vmem:[%s22336_s3 + $0x44] sm:$0xf] }
 0x132   :  { %v1585_v5 = vpop.f32.mrf.mxu1  ;;  %2585 = vmatpush.bf16.msra.mxu2 %v9952_v50  ;;  %v9915_v38 = vld [vmem:[%s22336_s3 + $0x40] sm:$0xf]  ;;  %v9917_v48 = vld [vmem:[%s22336_s3 + $0x60] sm:$0xf0]  ;;  %v1719_v50 = vadd.f32 %v1534_v20, %v448_v34 }
 0x133   :  { %v1586_v46 = vadd.f32 %v1585_v5, %v1572_v33  ;;  %2571 = vmatpush.bf16.msra.mxu1 %v10236_v11  ;;  %v9916_v27 = vor.u32 %v13731_v19, %v9915_v38  ;;  %2597 = vmatpush.bf16.msra.mxu3 %v10240_v14  ;;  %v9920_v8 = vor.u32 %v13727_v22, %v9917_v48  ;;  %v10203_v7 = vld [vmem:[%s22336_s3 + $0x280] sm:$0xf]  ;;  %v13799_v11 = vld [vmem:[%s22336_s3 + $0x284] sm:$0xf] }
 0x134   :  { %v13803_v5 = vld [vmem:[%s22336_s3 + $0x29c] sm:$0xf0]  ;;  %v10205_v20 = vld [vmem:[%s22336_s3 + $0x2a0] sm:$0xf0]  ;;  %v1727_v48 = vmul.f32 0.5, %v1719_v50 }
 0x135   :  { %v1721_v33 = vadd.f32 %v1586_v46, %v506_v45  ;;  %2560 = vmatpush.bf16.msra.mxu0 %v9916_v27  ;;  %v10204_v18 = vor.u32 %v13803_v5, %v10203_v7  ;;  %v10208_v34 = vor.u32 %v13799_v11, %v10205_v20  ;;  %v9883_v45 = vld [vmem:[%s22336_s3] sm:$0xf]  ;;  %v13719_v19 = vld [vmem:[%s22336_s3 + $0x4] sm:$0xf]  ;;  %v10115_v27 = vld [vmem:[%s22336_s3 + $0x1c8] sm:$0xf] }
 0x136   :  { %2586 = vmatpush.bf16.msra.mxu2 %v9920_v8  ;;  %v13723_v46 = vld [vmem:[%s22336_s3 + $0x1c] sm:$0xf0]  ;;  %v9885_v22 = vld [vmem:[%s22336_s3 + $0x20] sm:$0xf0]  ;;  %v13776_v20 = vld [vmem:[%s22336_s3 + $0x1cc] sm:$0xf] }
 0x137   :  { %2572 = vmatpush.bf16.msra.mxu1 %v10204_v18  ;;  %v9884_v38 = vor.u32 %v13723_v46, %v9883_v45  ;;  %v1735_v8 = vmul.f32 0.5, %v1721_v33  ;;  %2598 = vmatpush.bf16.msra.mxu3 %v10208_v34  ;;  %v9888_v11 = vor.u32 %v13719_v19, %v9885_v22  ;;  %v13780_v18 = vld [vmem:[%s22336_s3 + $0x1e4] sm:$0xf0]  ;;  %v535_v45 = vadd.f32 %v15735_v54, %v15847_v44  ;;  %v10117_v33 = vld [vmem:[%s22336_s3 + $0x1e8] sm:$0xf0] }
 0x138   :  { %v1598_v14 = vpop.f32.mrf.mxu2  ;;  %v10116_v50 = vor.u32 %v13780_v18, %v10115_v27  ;;  %v10171_v34 = vld [vmem:[%s22336_s3 + $0x240] sm:$0xf]  ;;  %v10120_v22 = vor.u32 %v13776_v20, %v10117_v33  ;;  %v13791_v54 = vld [vmem:[%s22336_s3 + $0x244] sm:$0xf]  ;;  %v13768_v18 = vld [vmem:[%s22336_s3 + $0x18c] sm:$0xf] }
 0x139   :  { %v1611_v7 = vpop.f32.mrf.mxu3  ;;  %v1574_v5 = vpop.f32.mrf.mxu0  ;;  %2561 = vmatpush.bf16.msra.mxu0 %v9884_v38  ;;  %v13795_v19 = vld [vmem:[%s22336_s3 + $0x25c] sm:$0xf0]  ;;  %v1560_v38 = vadd.f32 %v16331_v32, %v16323_v53  ;;  %v10085_v20 = vld [vmem:[%s22336_s3 + $0x1a8] sm:$0xf0]  ;;  %14619 = vtanh.f32 %v1735_v8 }
 0x13a   :  { %v1612_v46 = vadd.f32 %v1611_v7, %v1598_v14  ;;  %v1587_v28 = vpop.f32.mrf.mxu1  ;;  %2587 = vmatpush.bf16.msra.mxu2 %v9888_v11  ;;  %v10172_v5 = vor.u32 %v13795_v19, %v10171_v34  ;;  %v10083_v14 = vld [vmem:[%s22336_s3 + $0x188] sm:$0xf]  ;;  %v10088_v34 = vor.u32 %v13768_v18, %v10085_v20  ;;  %v10139_v53 = vld [vmem:[%s22336_s3 + $0x200] sm:$0xf]  ;;  %v10141_v19 = vld [vmem:[%s22336_s3 + $0x220] sm:$0xf0]  ;;  %14621 = vtanh.f32 %v1727_v48 }
 0x13b   :  { %v10173_v28 = vld [vmem:[%s22336_s3 + $0x260] sm:$0xf0]  ;;  %v13772_v11 = vld [vmem:[%s22336_s3 + $0x1a4] sm:$0xf0]  ;;  %v13787_v32 = vld [vmem:[%s22336_s3 + $0x21c] sm:$0xf0] }
 0x13c   :  { %v1722_v27 = vadd.f32 %v1612_v46, %v535_v45  ;;  %v10176_v7 = vor.u32 %v13791_v54, %v10173_v28  ;;  %2573 = vmatpush.bf16.msra.mxu1 %v10172_v5  ;;  %v10084_v33 = vor.u32 %v13772_v11, %v10083_v14  ;;  %v477_v45 = vadd.f32 %v15685_v30, %v15800_v4  ;;  %v10371_v5 = vld [vmem:[%s22336_s3 + $0x3c8] sm:$0xf]  ;;  %v13840_v8 = vld [vmem:[%s22336_s3 + $0x3cc] sm:$0xf] }
 0x13d   :  { %2606 = vmatpush.bf16.msrb.mxu0 %v10116_v50  ;;  %v10140_v46 = vor.u32 %v13787_v32, %v10139_v53  ;;  %v13783_v50 = vld [vmem:[%s22336_s3 + $0x204] sm:$0xf]  ;;  %v13844_v30 = vld [vmem:[%s22336_s3 + $0x3e4] sm:$0xf0]  ;;  %v10373_v11 = vld [vmem:[%s22336_s3 + $0x3e8] sm:$0xf0] }
 0x13e   :  { %2632 = vmatpush.bf16.msrb.mxu2 %v10120_v22  ;;  %2599 = vmatpush.bf16.msra.mxu3 %v10176_v7  ;;  %v10144_v22 = vor.u32 %v13783_v50, %v10141_v19  ;;  %v1720_v54 = vadd.f32 %v1560_v38, %v477_v45  ;;  %v1736_v28 = vmul.f32 0.5, %v1722_v27  ;;  %v10372_v7 = vor.u32 %v13844_v30, %v10371_v5  ;;  %v10051_v18 = vld [vmem:[%s22336_s3 + $0x148] sm:$0xf]  ;;  %v13760_v38 = vld [vmem:[%s22336_s3 + $0x14c] sm:$0xf] }
 0x13f   :  { %v10376_v53 = vor.u32 %v13840_v8, %v10373_v11  ;;  %v13764_v48 = vld [vmem:[%s22336_s3 + $0x164] sm:$0xf0]  ;;  %v10053_v27 = vld [vmem:[%s22336_s3 + $0x168] sm:$0xf0]  ;;  %v14620_v5 = vpop.eup %14619 }
 0x140   :  { %v1600_v14 = vpop.f32.mrf.mxu2  ;;  %2574 = vmatpush.bf16.msra.mxu1 %v10140_v46  ;;  %v10056_v32 = vor.u32 %v13760_v38, %v10053_v27  ;;  %v13836_v45 = vld [vmem:[%s22336_s3 + $0x3a4] sm:$0xf0]  ;;  %v13832_v19 = vld [vmem:[%s22336_s3 + $0x38c] sm:$0xf]  ;;  %v1728_v30 = vmul.f32 0.5, %v1720_v54  ;;  %14623 = vtanh.f32 %v1736_v28 }
 0x141   :  { %2607 = vmatpush.bf16.msrb.mxu0 %v10084_v33  ;;  %v1613_v20 = vpop.f32.mrf.mxu3  ;;  %v10052_v33 = vor.u32 %v13764_v48, %v10051_v18  ;;  %v1624_v46 = vpop.f32.mrf.mxu0  ;;  %v13756_v11 = vld [vmem:[%s22336_s3 + $0x124] sm:$0xf0]  ;;  %v564_v18 = vadd.f32 %v16159_v51, %v16178_v1  ;;  %v13752_v54 = vld [vmem:[%s22336_s3 + $0x10c] sm:$0xf] }
 0x142   :  { %2633 = vmatpush.bf16.msrb.mxu2 %v10088_v34  ;;  %2600 = vmatpush.bf16.msra.mxu3 %v10144_v22  ;;  %v10339_v34 = vld [vmem:[%s22336_s3 + $0x388] sm:$0xf]  ;;  %v10341_v22 = vld [vmem:[%s22336_s3 + $0x3a8] sm:$0xf0]  ;;  %v1637_v8 = vpop.f32.mrf.mxu1  ;;  %v14622_v48 = vpop.eup %14621  ;;  %14625 = vtanh.f32 %v1728_v30 }
 0x143   :  { %v10340_v50 = vor.u32 %v13836_v45, %v10339_v34  ;;  %v10344_v14 = vor.u32 %v13832_v19, %v10341_v22  ;;  %v1638_v20 = vadd.f32 %v1637_v8, %v1624_v46  ;;  %v10021_v28 = vld [vmem:[%s22336_s3 + $0x128] sm:$0xf0]  ;;  %v10307_v27 = vld [vmem:[%s22336_s3 + $0x348] sm:$0xf]  ;;  %v1731_v8 = vmul.f32 0.5, %v14622_v48 }
 0x144   :  { %2619 = vmatpush.bf16.msrb.mxu1 %v10372_v7  ;;  %v10019_v7 = vld [vmem:[%s22336_s3 + $0x108] sm:$0xf]  ;;  %v10024_v38 = vor.u32 %v13752_v54, %v10021_v28  ;;  %v10309_v46 = vld [vmem:[%s22336_s3 + $0x368] sm:$0xf0] }
 0x145   :  { %2608 = vmatpush.bf16.msrb.mxu0 %v10052_v33  ;;  %v13828_v51 = vld [vmem:[%s22336_s3 + $0x364] sm:$0xf0]  ;;  %v13824_v33 = vld [vmem:[%s22336_s3 + $0x34c] sm:$0xf]  ;;  %v1723_v34 = vadd.f32 %v1638_v20, %v564_v18 }
 0x146   :  { %2645 = vmatpush.bf16.msrb.mxu3 %v10376_v53  ;;  %2634 = vmatpush.bf16.msrb.mxu2 %v10056_v32  ;;  %v10020_v53 = vor.u32 %v13756_v11, %v10019_v7  ;;  %v1739_v32 = vmul.f32 0.5, %v14620_v5  ;;  %v10308_v45 = vor.u32 %v13828_v51, %v10307_v27  ;;  %v9987_v19 = vld [vmem:[%s22336_s3 + $0xc8] sm:$0xf]  ;;  %v13744_v5 = vld [vmem:[%s22336_s3 + $0xcc] sm:$0xf]  ;;  %v14624_v7 = vpop.eup %14623 }
 0x147   :  { %v13748_v22 = vld [vmem:[%s22336_s3 + $0xe4] sm:$0xf0]  ;;  %14627 = vtanh.f32 %v1723_v34  ;;  %v9989_v30 = vld [vmem:[%s22336_s3 + $0xe8] sm:$0xf0] }
 0x148   :  { %2620 = vmatpush.bf16.msrb.mxu1 %v10340_v50  ;;  %v10312_v50 = vor.u32 %v13824_v33, %v10309_v46  ;;  %v9992_v18 = vor.u32 %v13744_v5, %v9989_v30  ;;  %v10275_v20 = vld [vmem:[%s22336_s3 + $0x308] sm:$0xf]  ;;  %v13816_v54 = vld [vmem:[%s22336_s3 + $0x30c] sm:$0xf]  ;;  %v1741_v28 = vadd.f32 0.5, %v1739_v32  ;;  %v593_v33 = vadd.f32 %v16161_v52, %v16183_v6  ;;  %v14626_v30 = vpop.eup %14625 }
 0x149   :  { %2609 = vmatpush.bf16.msrb.mxu0 %v10020_v53  ;;  %v1650_v11 = vpop.f32.mrf.mxu2  ;;  %v13820_v53 = vld [vmem:[%s22336_s3 + $0x324] sm:$0xf0]  ;;  %v10277_v51 = vld [vmem:[%s22336_s3 + $0x328] sm:$0xf0]  ;;  %v1740_v5 = vmul.f32 0.5, %v14624_v7 }
 0x14a   :  { %2646 = vmatpush.bf16.msrb.mxu3 %v10344_v14  ;;  %2635 = vmatpush.bf16.msrb.mxu2 %v10024_v38  ;;  %v9988_v14 = vor.u32 %v13748_v22, %v9987_v19  ;;  %v1626_v38 = vpop.f32.mrf.mxu0  ;;  %v10276_v27 = vor.u32 %v13820_v53, %v10275_v20  ;;  %v10280_v46 = vor.u32 %v13816_v54, %v10277_v51  ;;  %v9955_v19 = vld [vmem:[%s22336_s3 + $0x88] sm:$0xf]  ;;  %v1733_v22 = vadd.f32 0.5, %v1731_v8  ;;  %v16589_v20 = vpop.permute.xlu0 %1766  ;;  %v13808_v7 = vld [vmem:[%s22336_s3 + $0x2cc] sm:$0xf] }
 0x14b   :  { %v1663_v48 = vpop.f32.mrf.mxu3  ;;  %v13740_v32 = vld [vmem:[%s22336_s3 + $0xa4] sm:$0xf0]  ;;  %vm1768_vm3 = vcmp.eq.s32.totalorder %v16589_v20, 1  ;;  %v13753_v20 = vld [vmem:[%s22336_s3 + $0x114] sm:$0xf] }
 0x14c   :  { %2621 = vmatpush.bf16.msrb.mxu1 %v10308_v45  ;;  %v1664_v34 = vadd.f32 %v1663_v48, %v1650_v11  ;;  %v1639_v45 = vpop.f32.mrf.mxu1  ;;  %v9956_v52 = vor.u32 %v13740_v32, %v9955_v19  ;;  %v10243_v54 = vld [vmem:[%s22336_s3 + $0x2c8] sm:$0xf]  ;;  %v1753_v48 = vmul.f32 0.0, %v1741_v28  ;;  %v13728_v28 = vld [vmem:[%s22336_s3 + $0x4c] sm:$0xf]  ;;  %v1742_v19 = vadd.f32 0.5, %v1740_v5  ;;  %vm16691_vm4 = vmpackc.low %vm1768_vm3, %vm1768_vm3 }
 0x14d   :  { %2610 = vmatpush.bf16.msrb.mxu0 %v9988_v14  ;;  %v9957_v14 = vld [vmem:[%s22336_s3 + $0xa8] sm:$0xf0]  ;;  %v13812_v8 = vld [vmem:[%s22336_s3 + $0x2e4] sm:$0xf0] }
 0x14e   :  { %2647 = vmatpush.bf16.msrb.mxu3 %v10312_v50  ;;  %v13736_v50 = vld [vmem:[%s22336_s3 + $0x8c] sm:$0xf]  ;;  %2636 = vmatpush.bf16.msrb.mxu2 %v9992_v18  ;;  %v1724_v11 = vadd.f32 %v1664_v34, %v593_v33  ;;  %v14628_v18 = vpop.eup %14627  ;;  %v10244_v38 = vor.u32 %v13812_v8, %v10243_v54  ;;  %v9923_v34 = vld [vmem:[%s22336_s3 + $0x48] sm:$0xf] }
 0x14f   :  { %v9960_v53 = vor.u32 %v13736_v50, %v9957_v14  ;;  %v1755_v51 = vmul.f32 %v14628_v18, %v1733_v22  ;;  %v13732_v45 = vld [vmem:[%s22336_s3 + $0x64] sm:$0xf0]  ;;  %v9925_v50 = vld [vmem:[%s22336_s3 + $0x68] sm:$0xf0] }
 0x150   :  { %2622 = vmatpush.bf16.msrb.mxu1 %v10276_v27  ;;  %v10245_v27 = vld [vmem:[%s22336_s3 + $0x2e8] sm:$0xf0]  ;;  %14629 = vtanh.f32 %v1724_v11  ;;  %v9924_v32 = vor.u32 %v13732_v45, %v9923_v34  ;;  %v9928_v14 = vor.u32 %v13728_v28, %v9925_v50  ;;  %v10211_v11 = vld [vmem:[%s22336_s3 + $0x288] sm:$0xf]  ;;  %v1754_v28 = vmul.f32 0.0, %v1742_v19 }
 0x151   :  { %2611 = vmatpush.bf16.msrb.mxu0 %v9956_v52  ;;  %v10248_v33 = vor.u32 %v13808_v7, %v10245_v27  ;;  %v1757_v22 = vadd.f32 %v1755_v51, %v1753_v48  ;;  %v1652_v52 = vpop.f32.mrf.mxu2  ;;  %v13804_v5 = vld [vmem:[%s22336_s3 + $0x2a4] sm:$0xf0]  ;;  %v10213_v8 = vld [vmem:[%s22336_s3 + $0x2a8] sm:$0xf0] }
 0x152   :  { %2648 = vmatpush.bf16.msrb.mxu3 %v10280_v46  ;;  %v1732_v46 = vmul.f32 0.5, %v14626_v30  ;;  %2637 = vmatpush.bf16.msrb.mxu2 %v9960_v53  ;;  %v13800_v30 = vld [vmem:[%s22336_s3 + $0x28c] sm:$0xf]  ;;  %v10212_v54 = vor.u32 %v13804_v5, %v10211_v11  ;;  %v9891_v48 = vld [vmem:[%s22336_s3 + $0x8] sm:$0xf] }
 0x153   :  { %v1665_v53 = vpop.f32.mrf.mxu3  ;;  %v16630_v7 = vsel %vm1768_vm3, %v1757_v22, 0.0  ;;  %v10216_v18 = vor.u32 %v13800_v30, %v10213_v8  ;;  %v9893_v34 = vld [vmem:[%s22336_s3 + $0x28] sm:$0xf0]  ;;  %v13796_v52 = vld [vmem:[%s22336_s3 + $0x264] sm:$0xf0] }
 0x154   :  { %2623 = vmatpush.bf16.msrb.mxu1 %v10244_v38  ;;  %v13724_v38 = vld [vmem:[%s22336_s3 + $0x24] sm:$0xf0]  ;;  %v1734_v27 = vadd.f32 0.5, %v1732_v46  ;;  %v10181_v19 = vld [vmem:[%s22336_s3 + $0x268] sm:$0xf0] }
 0x155   :  { %2612 = vmatpush.bf16.msrb.mxu0 %v9924_v32  ;;  %v9892_v51 = vor.u32 %v13724_v38, %v9891_v48  ;;  %v10179_v46 = vld [vmem:[%s22336_s3 + $0x248] sm:$0xf]  ;;  %v13784_v48 = vld [vmem:[%s22336_s3 + $0x20c] sm:$0xf] }
 0x156   :  { %2649 = vmatpush.bf16.msrb.mxu3 %v10248_v33  ;;  %2638 = vmatpush.bf16.msrb.mxu2 %v9928_v14  ;;  %v13720_v33 = vld [vmem:[%s22336_s3 + $0xc] sm:$0xf]  ;;  %v14630_v45 = vpop.eup %14629  ;;  %v10180_v11 = vor.u32 %v13796_v52, %v10179_v46  ;;  %v10147_v53 = vld [vmem:[%s22336_s3 + $0x208] sm:$0xf] }
 0x157   :  { %v9896_v32 = vor.u32 %v13720_v33, %v9893_v34  ;;  %v1756_v50 = vmul.f32 %v14630_v45, %v1734_v27  ;;  %v13792_v14 = vld [vmem:[%s22336_s3 + $0x24c] sm:$0xf]  ;;  %v622_v34 = vadd.f32 %v16169_v56, %v16194_v21 }
 0x158   :  { %2624 = vmatpush.bf16.msrb.mxu1 %v10212_v54  ;;  %v10184_v30 = vor.u32 %v13792_v14, %v10181_v19  ;;  %v13788_v54 = vld [vmem:[%s22336_s3 + $0x224] sm:$0xf0]  ;;  %v10149_v38 = vld [vmem:[%s22336_s3 + $0x228] sm:$0xf0]  ;;  %v651_v14 = vadd.f32 %v16171_v57, %v16197_v25  ;;  %v13777_v57 = vld [vmem:[%s22336_s3 + $0x1d4] sm:$0xf] }
 0x159   :  { %2613 = vmatpush.bf16.msrb.mxu0 %v9892_v51  ;;  %v1758_v5 = vadd.f32 %v1756_v50, %v1754_v28  ;;  %v10152_v27 = vor.u32 %v13784_v48, %v10149_v38  ;;  %v10123_v38 = vld [vmem:[%s22336_s3 + $0x1d0] sm:$0xf] }
 0x15a   :  { %2650 = vmatpush.bf16.msrb.mxu3 %v10216_v18  ;;  %2639 = vmatpush.bf16.msrb.mxu2 %v9896_v32  ;;  %v10148_v18 = vor.u32 %v13788_v54, %v10147_v53 }
 0x15b   :  { %v16664_v8 = vsel %vm1768_vm3, %v1758_v5, 0.0 }
 0x15c   :  { %2625 = vmatpush.bf16.msrb.mxu1 %v10180_v11 }
 0x15e   :  { %2651 = vmatpush.bf16.msrb.mxu3 %v10184_v30 }
 0x160   :  { %2626 = vmatpush.bf16.msrb.mxu1 %v10148_v18 }
 0x161   :  { %v1676_v51 = vpop.f32.mrf.mxu0 }
 0x162   :  { %2652 = vmatpush.bf16.msrb.mxu3 %v10152_v27  ;;  %v1689_v33 = vpop.f32.mrf.mxu1  ;;  %v13781_v27 = vld [vmem:[%s22336_s3 + $0x1ec] sm:$0xf0] }
 0x163   :  { %v1690_v45 = vadd.f32 %v1689_v33, %v1676_v51 }
 0x165   :  { %v1725_v28 = vadd.f32 %v1690_v45, %v622_v34 }
 0x167   :  { %v1745_v32 = vmul.f32 0.5, %v1725_v28  ;;  %v10124_v28 = vor.u32 %v13781_v27, %v10123_v38  ;;  %v10381_v27 = vld [vmem:[%s22336_s3 + $0x3f0] sm:$0xf0] }
 0x169   :  { %v1702_v50 = vpop.f32.mrf.mxu2  ;;  %14631 = vtanh.f32 %v1745_v32  ;;  %v1715_v46 = vpop.f32.mrf.mxu3 }
 0x16a   :  { %v1678_v52 = vpop.f32.mrf.mxu0  ;;  %v1716_v11 = vadd.f32 %v1715_v46, %v1702_v50  ;;  %v1691_v19 = vpop.f32.mrf.mxu1  ;;  %14633 = vtanh.f32 %v1757_v22  ;;  %v10125_v22 = vld [vmem:[%s22336_s3 + $0x1f0] sm:$0xf0]  ;;  %v10091_v50 = vld [vmem:[%s22336_s3 + $0x190] sm:$0xf] }
 0x16b   :  { %v10128_v32 = vor.u32 %v13777_v57, %v10125_v22  ;;  %v13773_v46 = vld [vmem:[%s22336_s3 + $0x1ac] sm:$0xf0]  ;;  %v10093_v19 = vld [vmem:[%s22336_s3 + $0x1b0] sm:$0xf0] }
 0x16c   :  { %v1726_v30 = vadd.f32 %v1716_v11, %v651_v14  ;;  %v13769_v11 = vld [vmem:[%s22336_s3 + $0x194] sm:$0xf]  ;;  %v13765_v22 = vld [vmem:[%s22336_s3 + $0x16c] sm:$0xf0] }
 0x16d   :  { %v10096_v38 = vor.u32 %v13769_v11, %v10093_v19  ;;  %v10349_v11 = vld [vmem:[%s22336_s3 + $0x3b0] sm:$0xf0] }
 0x16e   :  { %v1746_v53 = vmul.f32 0.5, %v1726_v30 }
 0x16f   :  { %v14632_v54 = vpop.eup %14631 }
 0x170   :  { %v1749_v18 = vmul.f32 0.5, %v14632_v54  ;;  %14635 = vtanh.f32 %v1746_v53  ;;  %v14634_v33 = vpop.eup %14633  ;;  %v10379_v53 = vld [vmem:[%s22336_s3 + $0x3d0] sm:$0xf] }
 0x171   :  { %v1704_v48 = vpop.f32.mrf.mxu2  ;;  %v1717_v56 = vpop.f32.mrf.mxu3  ;;  %14637 = vtanh.f32 %v1758_v5  ;;  %v13845_v54 = vld [vmem:[%s22336_s3 + $0x3ec] sm:$0xf0] }
 0x172   :  { %v1751_v51 = vadd.f32 0.5, %v1749_v18  ;;  %v13841_v18 = vld [vmem:[%s22336_s3 + $0x3d4] sm:$0xf]  ;;  %v10092_v56 = vor.u32 %v13773_v46, %v10091_v50  ;;  %v10380_v50 = vor.u32 %v13845_v54, %v10379_v53 }
 0x173   :  { %v10384_v46 = vor.u32 %v13841_v18, %v10381_v27  ;;  %v10027_v18 = vld [vmem:[%s22336_s3 + $0x110] sm:$0xf] }
 0x174   :  { %v1761_v34 = vmul.f32 %v14634_v33, %v1751_v51  ;;  %v10059_v51 = vld [vmem:[%s22336_s3 + $0x150] sm:$0xf]  ;;  %v13761_v33 = vld [vmem:[%s22336_s3 + $0x154] sm:$0xf] }
 0x175   :  { %v10060_v53 = vor.u32 %v13765_v22, %v10059_v51  ;;  %v10315_v51 = vld [vmem:[%s22336_s3 + $0x350] sm:$0xf] }
 0x176   :  { %v14636_v52 = vpop.eup %14635  ;;  %v1769_v5 = vsel %vm1768_vm3, %v1761_v34, 0.0  ;;  %v16703_v14 = vpack.c.bf16 %v1761_v34, %v1761_v34  ;;  %v10061_v34 = vld [vmem:[%s22336_s3 + $0x170] sm:$0xf0] }
 0x177   :  { %1771 = vst [vmem:[%s22339_s5] sm:$0xff] %v1769_v5  ;;  %v1750_v30 = vmul.f32 0.5, %v14636_v52  ;;  %v14638_v57 = vpop.eup %14637  ;;  %v13837_v52 = vld [vmem:[%s22336_s3 + $0x3ac] sm:$0xf0]  ;;  %v13833_v5 = vld [vmem:[%s22336_s3 + $0x394] sm:$0xf]  ;;  %v10064_v54 = vor.u32 %v13761_v33, %v10061_v34 }
 0x178   :  { %10395 = vmatmul.msk.bf16.vlgmr.msra.gmra.mxu0 %vm16691_vm4, %v16703_v14  ;;  %10401 = vmatmul.msk.bf16.vlgmr.msra.gmra.mxu2 %vm16691_vm4, %v16703_v14  ;;  %v10352_v27 = vor.u32 %v13833_v5, %v10349_v11  ;;  %v13829_v33 = vld [vmem:[%s22336_s3 + $0x36c] sm:$0xf0]  ;;  %v13825_v34 = vld [vmem:[%s22336_s3 + $0x354] sm:$0xf] }
 0x179   :  { %v1752_v48 = vadd.f32 0.5, %v1750_v30  ;;  %2658 = vmatpush.bf16.msra.mxu0 %v10124_v28  ;;  %2684 = vmatpush.bf16.msra.mxu2 %v10128_v32  ;;  %v10347_v32 = vld [vmem:[%s22336_s3 + $0x390] sm:$0xf]  ;;  %v10316_v5 = vor.u32 %v13829_v33, %v10315_v51  ;;  %v9965_v51 = vld [vmem:[%s22336_s3 + $0xb0] sm:$0xf0] }
 0x17a   :  { %v10251_v33 = vld [vmem:[%s22336_s3 + $0x2d0] sm:$0xf] }
 0x17b   :  { %v1762_v28 = vmul.f32 %v14638_v57, %v1752_v48  ;;  %v13757_v48 = vld [vmem:[%s22336_s3 + $0x12c] sm:$0xf0] }
 0x17c   :  { %v10028_v57 = vor.u32 %v13757_v48, %v10027_v18  ;;  %v10285_v18 = vld [vmem:[%s22336_s3 + $0x330] sm:$0xf0] }
 0x17d   :  { %v1770_v19 = vsel %vm1768_vm3, %v1762_v28, 0.0  ;;  %v16758_v30 = vpack.c.bf16 %v1762_v28, %v1762_v28  ;;  %2659 = vmatpush.bf16.msra.mxu0 %v10092_v56  ;;  %2685 = vmatpush.bf16.msra.mxu2 %v10096_v38  ;;  %v10029_v56 = vld [vmem:[%s22336_s3 + $0x130] sm:$0xf0]  ;;  %v10348_v38 = vor.u32 %v13837_v52, %v10347_v32  ;;  %v9995_v32 = vld [vmem:[%s22336_s3 + $0xd0] sm:$0xf] }
 0x17e   :  { %1772 = vst [vmem:[%s22339_s5 + $0x8] sm:$0xff] %v1770_v19  ;;  %v10032_v22 = vor.u32 %v13753_v20, %v10029_v56  ;;  %v10317_v28 = vld [vmem:[%s22336_s3 + $0x370] sm:$0xf0]  ;;  %v10283_v19 = vld [vmem:[%s22336_s3 + $0x310] sm:$0xf] }
 0x17f   :  { %10398 = vmatmul.msk.bf16.vlgmr.msra.gmra.mxu1 %vm16691_vm4, %v16758_v30  ;;  %10404 = vmatmul.msk.bf16.vlgmr.msra.gmra.mxu3 %vm16691_vm4, %v16758_v30  ;;  %v9997_v52 = vld [vmem:[%s22336_s3 + $0xf0] sm:$0xf0]  ;;  %v10320_v11 = vor.u32 %v13825_v34, %v10317_v28  ;;  %v9963_v56 = vld [vmem:[%s22336_s3 + $0x90] sm:$0xf] }
 0x180   :  { %2671 = vmatpush.bf16.msra.mxu1 %v10380_v50  ;;  %2697 = vmatpush.bf16.msra.mxu3 %v10384_v46  ;;  %v13749_v50 = vld [vmem:[%s22336_s3 + $0xec] sm:$0xf0]  ;;  %v13745_v46 = vld [vmem:[%s22336_s3 + $0xd4] sm:$0xf] }
 0x181   :  { %2660 = vmatpush.bf16.msra.mxu0 %v10060_v53  ;;  %2686 = vmatpush.bf16.msra.mxu2 %v10064_v54  ;;  %v13821_v53 = vld [vmem:[%s22336_s3 + $0x32c] sm:$0xf0]  ;;  %v13817_v54 = vld [vmem:[%s22336_s3 + $0x314] sm:$0xf]  ;;  %v9996_v48 = vor.u32 %v13749_v50, %v9995_v32  ;;  %v10000_v20 = vor.u32 %v13745_v46, %v9997_v52 }
 0x182   :  { %v13813_v34 = vld [vmem:[%s22336_s3 + $0x2ec] sm:$0xf0]  ;;  %v13809_v28 = vld [vmem:[%s22336_s3 + $0x2d4] sm:$0xf] }
 0x183   :  { %v10253_v32 = vld [vmem:[%s22336_s3 + $0x2f0] sm:$0xf0]  ;;  %v9931_v52 = vld [vmem:[%s22336_s3 + $0x50] sm:$0xf] }
 0x184   :  { %2672 = vmatpush.bf16.msra.mxu1 %v10348_v38  ;;  %2698 = vmatpush.bf16.msra.mxu3 %v10352_v27  ;;  %v13741_v38 = vld [vmem:[%s22336_s3 + $0xac] sm:$0xf0]  ;;  %v13737_v27 = vld [vmem:[%s22336_s3 + $0x94] sm:$0xf] }
 0x185   :  { %2661 = vmatpush.bf16.msra.mxu0 %v10028_v57  ;;  %2687 = vmatpush.bf16.msra.mxu2 %v10032_v22  ;;  %v10284_v57 = vor.u32 %v13821_v53, %v10283_v19  ;;  %v10288_v22 = vor.u32 %v13817_v54, %v10285_v18  ;;  %v9964_v50 = vor.u32 %v13741_v38, %v9963_v56  ;;  %v9933_v19 = vld [vmem:[%s22336_s3 + $0x70] sm:$0xf0]  ;;  %v10219_v18 = vld [vmem:[%s22336_s3 + $0x290] sm:$0xf] }
 0x186   :  { %v9968_v46 = vor.u32 %v13737_v27, %v9965_v51  ;;  %v10252_v53 = vor.u32 %v13813_v34, %v10251_v33  ;;  %v10256_v54 = vor.u32 %v13809_v28, %v10253_v32  ;;  %v10221_v56 = vld [vmem:[%s22336_s3 + $0x2b0] sm:$0xf0]  ;;  %v9899_v51 = vld [vmem:[%s22336_s3 + $0x10] sm:$0xf]  ;;  %v10131_v34 = vld [vmem:[%s22336_s3 + $0x1d8] sm:$0xf] }
 0x187   :  { %v9901_v33 = vld [vmem:[%s22336_s3 + $0x30] sm:$0xf0]  ;;  %v13782_v28 = vld [vmem:[%s22336_s3 + $0x1f4] sm:$0xf0] }
 0x188   :  { %2673 = vmatpush.bf16.msra.mxu1 %v10316_v5  ;;  %2699 = vmatpush.bf16.msra.mxu3 %v10320_v11  ;;  %v13733_v5 = vld [vmem:[%s22336_s3 + $0x6c] sm:$0xf0]  ;;  %v13729_v11 = vld [vmem:[%s22336_s3 + $0x54] sm:$0xf] }
 0x189   :  { %10407 = vmatmul.msk.bf16.vlgmr.msrb.gmra.mxu0 %vm16691_vm4, %v16703_v14  ;;  %10413 = vmatmul.msk.bf16.vlgmr.msrb.gmra.mxu2 %vm16691_vm4, %v16703_v14  ;;  %v9932_v38 = vor.u32 %v13733_v5, %v9931_v52  ;;  %v9936_v27 = vor.u32 %v13729_v11, %v9933_v19  ;;  %v10133_v52 = vld [vmem:[%s22336_s3 + $0x1f8] sm:$0xf0]  ;;  %v10187_v5 = vld [vmem:[%s22336_s3 + $0x250] sm:$0xf]  ;;  %v13793_v19 = vld [vmem:[%s22336_s3 + $0x254] sm:$0xf] }
 0x18a   :  { %2662 = vmatpush.bf16.msra.mxu0 %v9996_v48  ;;  %2688 = vmatpush.bf16.msra.mxu2 %v10000_v20  ;;  %v13805_v48 = vld [vmem:[%s22336_s3 + $0x2ac] sm:$0xf0]  ;;  %v13801_v20 = vld [vmem:[%s22336_s3 + $0x294] sm:$0xf] }
 0x18b   :  { %v10220_v32 = vor.u32 %v13805_v48, %v10219_v18  ;;  %v13797_v11 = vld [vmem:[%s22336_s3 + $0x26c] sm:$0xf0]  ;;  %v10132_v48 = vor.u32 %v13782_v28, %v10131_v34  ;;  %v10157_v34 = vld [vmem:[%s22336_s3 + $0x230] sm:$0xf0]  ;;  %v10387_v28 = vld [vmem:[%s22336_s3 + $0x3d8] sm:$0xf] }
 0x18c   :  { %2674 = vmatpush.bf16.msra.mxu1 %v10284_v57  ;;  %2700 = vmatpush.bf16.msra.mxu3 %v10288_v22  ;;  %v13725_v57 = vld [vmem:[%s22336_s3 + $0x2c] sm:$0xf0]  ;;  %v13721_v22 = vld [vmem:[%s22336_s3 + $0x14] sm:$0xf] }
 0x18d   :  { %v9904_v18 = vor.u32 %v13721_v22, %v9901_v33  ;;  %v13789_v22 = vld [vmem:[%s22336_s3 + $0x22c] sm:$0xf0]  ;;  %v13785_v33 = vld [vmem:[%s22336_s3 + $0x214] sm:$0xf] }
 0x18e   :  { %2663 = vmatpush.bf16.msra.mxu0 %v9964_v50  ;;  %2689 = vmatpush.bf16.msra.mxu2 %v9968_v46  ;;  %v10224_v50 = vor.u32 %v13801_v20, %v10221_v56  ;;  %v13778_v46 = vld [vmem:[%s22336_s3 + $0x1dc] sm:$0xf]  ;;  %v10099_v56 = vld [vmem:[%s22336_s3 + $0x198] sm:$0xf] }
 0x18f   :  { %10410 = vmatmul.msk.bf16.vlgmr.msrb.gmra.mxu1 %vm16691_vm4, %v16758_v30  ;;  %10416 = vmatmul.msk.bf16.vlgmr.msrb.gmra.mxu3 %vm16691_vm4, %v16758_v30  ;;  %v10136_v20 = vor.u32 %v13778_v46, %v10133_v52  ;;  %v10389_v46 = vld [vmem:[%s22336_s3 + $0x3f8] sm:$0xf0]  ;;  %v10100_v52 = vor.u32 %v13774_v12, %v10099_v56  ;;  %v13838_v56 = vld [vmem:[%s22336_s3 + $0x3b4] sm:$0xf0] }
 0x190   :  { %2675 = vmatpush.bf16.msra.mxu1 %v10252_v53  ;;  %2701 = vmatpush.bf16.msra.mxu3 %v10256_v54  ;;  %v10189_v53 = vld [vmem:[%s22336_s3 + $0x270] sm:$0xf0]  ;;  %v9900_v54 = vor.u32 %v13725_v57, %v9899_v51  ;;  %v10101_v51 = vld [vmem:[%s22336_s3 + $0x1b8] sm:$0xf0]  ;;  %v10155_v57 = vld [vmem:[%s22336_s3 + $0x210] sm:$0xf] }
 0x192   :  { %2664 = vmatpush.bf16.msra.mxu0 %v9932_v38  ;;  %2690 = vmatpush.bf16.msra.mxu2 %v9936_v27  ;;  %v10188_v38 = vor.u32 %v13797_v11, %v10187_v5  ;;  %v10192_v27 = vor.u32 %v13793_v19, %v10189_v53  ;;  %v10104_v5 = vor.u32 %v13770_v58, %v10101_v51  ;;  %v10067_v11 = vld [vmem:[%s22336_s3 + $0x158] sm:$0xf]  ;;  %v10069_v58 = vld [vmem:[%s22336_s3 + $0x178] sm:$0xf0] }
 0x193   :  { %v10156_v19 = vor.u32 %v13789_v22, %v10155_v57  ;;  %v10160_v53 = vor.u32 %v13785_v33, %v10157_v34  ;;  %v10035_v22 = vld [vmem:[%s22336_s3 + $0x118] sm:$0xf]  ;;  %v13754_v34 = vld [vmem:[%s22336_s3 + $0x11c] sm:$0xf] }
 0x194   :  { %2676 = vmatpush.bf16.msra.mxu1 %v10220_v32  ;;  %2702 = vmatpush.bf16.msra.mxu3 %v10224_v50  ;;  %v13846_v32 = vld [vmem:[%s22336_s3 + $0x3f4] sm:$0xf0]  ;;  %v13842_v50 = vld [vmem:[%s22336_s3 + $0x3dc] sm:$0xf] }
 0x195   :  { %v10388_v12 = vor.u32 %v13846_v32, %v10387_v28  ;;  %v13758_v33 = vld [vmem:[%s22336_s3 + $0x134] sm:$0xf0]  ;;  %v10037_v28 = vld [vmem:[%s22336_s3 + $0x138] sm:$0xf0] }
 0x196   :  { %2665 = vmatpush.bf16.msra.mxu0 %v9900_v54  ;;  %2691 = vmatpush.bf16.msra.mxu2 %v9904_v18  ;;  %v13766_v54 = vld [vmem:[%s22336_s3 + $0x174] sm:$0xf0]  ;;  %v13762_v18 = vld [vmem:[%s22336_s3 + $0x15c] sm:$0xf] }
 0x197   :  { %v10068_v51 = vor.u32 %v13766_v54, %v10067_v11  ;;  %v10072_v57 = vor.u32 %v13762_v18, %v10069_v58  ;;  %v10325_v11 = vld [vmem:[%s22336_s3 + $0x378] sm:$0xf0]  ;;  %v10003_v54 = vld [vmem:[%s22336_s3 + $0xd8] sm:$0xf] }
 0x198   :  { %2677 = vmatpush.bf16.msra.mxu1 %v10188_v38  ;;  %2703 = vmatpush.bf16.msra.mxu3 %v10192_v27  ;;  %v13834_v38 = vld [vmem:[%s22336_s3 + $0x39c] sm:$0xf]  ;;  %v13750_v18 = vld [vmem:[%s22336_s3 + $0xf4] sm:$0xf0] }
 0x199   :  { %10419 = vmatmul.msk.bf16.vlgmr.msra.gmra.mxu0 %vm16691_vm4, %v16703_v14  ;;  %10425 = vmatmul.msk.bf16.vlgmr.msra.gmra.mxu2 %vm16691_vm4, %v16703_v14  ;;  %v10357_v27 = vld [vmem:[%s22336_s3 + $0x3b8] sm:$0xf0] }
 0x19a   :  { %2710 = vmatpush.bf16.msrb.mxu0 %v10132_v48  ;;  %2736 = vmatpush.bf16.msrb.mxu2 %v10136_v20  ;;  %v10392_v48 = vor.u32 %v13842_v50, %v10389_v46  ;;  %v10355_v20 = vld [vmem:[%s22336_s3 + $0x398] sm:$0xf]  ;;  %v10360_v50 = vor.u32 %v13834_v38, %v10357_v27  ;;  %v13746_v58 = vld [vmem:[%s22336_s3 + $0xdc] sm:$0xf] }
 0x19b   :  { %v10356_v32 = vor.u32 %v13838_v56, %v10355_v20  ;;  %v10323_v46 = vld [vmem:[%s22336_s3 + $0x358] sm:$0xf]  ;;  %v13818_v27 = vld [vmem:[%s22336_s3 + $0x31c] sm:$0xf] }
 0x19c   :  { %2678 = vmatpush.bf16.msra.mxu1 %v10156_v19  ;;  %2704 = vmatpush.bf16.msra.mxu3 %v10160_v53  ;;  %v10036_v19 = vor.u32 %v13758_v33, %v10035_v22  ;;  %v10040_v53 = vor.u32 %v13754_v34, %v10037_v28  ;;  %v10291_v56 = vld [vmem:[%s22336_s3 + $0x318] sm:$0xf]  ;;  %v13738_v28 = vld [vmem:[%s22336_s3 + $0x9c] sm:$0xf] }
 0x19d   :  { %v13822_v38 = vld [vmem:[%s22336_s3 + $0x334] sm:$0xf0] }
 0x19e   :  { %2711 = vmatpush.bf16.msrb.mxu0 %v10100_v52  ;;  %2737 = vmatpush.bf16.msrb.mxu2 %v10104_v5  ;;  %v13830_v52 = vld [vmem:[%s22336_s3 + $0x374] sm:$0xf0]  ;;  %v13826_v5 = vld [vmem:[%s22336_s3 + $0x35c] sm:$0xf] }
 0x19f   :  { %10422 = vmatmul.msk.bf16.vlgmr.msra.gmra.mxu1 %vm16691_vm4, %v16758_v30  ;;  %10428 = vmatmul.msk.bf16.vlgmr.msra.gmra.mxu3 %vm16691_vm4, %v16758_v30  ;;  %v10328_v20 = vor.u32 %v13826_v5, %v10325_v11  ;;  %v9971_v33 = vld [vmem:[%s22336_s3 + $0x98] sm:$0xf]  ;;  %v13810_v11 = vld [vmem:[%s22336_s3 + $0x2dc] sm:$0xf] }
 0x1a0   :  { %2723 = vmatpush.bf16.msrb.mxu1 %v10388_v12  ;;  %2749 = vmatpush.bf16.msrb.mxu3 %v10392_v48  ;;  %v10005_v12 = vld [vmem:[%s22336_s3 + $0xf8] sm:$0xf0]  ;;  %v10324_v48 = vor.u32 %v13830_v52, %v10323_v46  ;;  %v13742_v34 = vld [vmem:[%s22336_s3 + $0xb4] sm:$0xf0] }
 0x1a1   :  { %v10008_v22 = vor.u32 %v13746_v58, %v10005_v12  ;;  %v10259_v52 = vld [vmem:[%s22336_s3 + $0x2d8] sm:$0xf]  ;;  %v13730_v12 = vld [vmem:[%s22336_s3 + $0x5c] sm:$0xf] }
 0x1a2   :  { %2712 = vmatpush.bf16.msrb.mxu0 %v10068_v51  ;;  %2738 = vmatpush.bf16.msrb.mxu2 %v10072_v57  ;;  %v10293_v51 = vld [vmem:[%s22336_s3 + $0x338] sm:$0xf0]  ;;  %v10004_v57 = vor.u32 %v13750_v18, %v10003_v54  ;;  %v13814_v5 = vld [vmem:[%s22336_s3 + $0x2f4] sm:$0xf0] }
 0x1a3   :  { %v10296_v46 = vor.u32 %v13818_v27, %v10293_v51  ;;  %v9939_v18 = vld [vmem:[%s22336_s3 + $0x58] sm:$0xf]  ;;  %v13802_v51 = vld [vmem:[%s22336_s3 + $0x29c] sm:$0xf] }
 0x1a4   :  { %2724 = vmatpush.bf16.msrb.mxu1 %v10356_v32  ;;  %2750 = vmatpush.bf16.msrb.mxu3 %v10360_v50  ;;  %v9973_v32 = vld [vmem:[%s22336_s3 + $0xb8] sm:$0xf0]  ;;  %v10292_v50 = vor.u32 %v13822_v38, %v10291_v56  ;;  %v13734_v58 = vld [vmem:[%s22336_s3 + $0x74] sm:$0xf0] }
 0x1a5   :  { %v9976_v54 = vor.u32 %v13738_v28, %v9973_v32  ;;  %v10227_v38 = vld [vmem:[%s22336_s3 + $0x298] sm:$0xf]  ;;  %v13722_v32 = vld [vmem:[%s22336_s3 + $0x1c] sm:$0xf] }
 0x1a6   :  { %2713 = vmatpush.bf16.msrb.mxu0 %v10036_v19  ;;  %2739 = vmatpush.bf16.msrb.mxu2 %v10040_v53  ;;  %v10261_v19 = vld [vmem:[%s22336_s3 + $0x2f8] sm:$0xf0]  ;;  %v9972_v53 = vor.u32 %v13742_v34, %v9971_v33  ;;  %v13806_v27 = vld [vmem:[%s22336_s3 + $0x2b4] sm:$0xf0] }
 0x1a7   :  { %v10264_v56 = vor.u32 %v13810_v11, %v10261_v19  ;;  %v9907_v34 = vld [vmem:[%s22336_s3 + $0x18] sm:$0xf]  ;;  %v13794_v19 = vld [vmem:[%s22336_s3 + $0x25c] sm:$0xf] }
 0x1a8   :  { %2725 = vmatpush.bf16.msrb.mxu1 %v10324_v48  ;;  %2751 = vmatpush.bf16.msrb.mxu3 %v10328_v20  ;;  %v9941_v48 = vld [vmem:[%s22336_s3 + $0x78] sm:$0xf0]  ;;  %v10260_v20 = vor.u32 %v13814_v5, %v10259_v52  ;;  %v13726_v28 = vld [vmem:[%s22336_s3 + $0x34] sm:$0xf0] }
 0x1a9   :  { %v9944_v33 = vor.u32 %v13730_v12, %v9941_v48  ;;  %v10195_v5 = vld [vmem:[%s22336_s3 + $0x258] sm:$0xf] }
 0x1aa   :  { %2714 = vmatpush.bf16.msrb.mxu0 %v10004_v57  ;;  %2740 = vmatpush.bf16.msrb.mxu2 %v10008_v22  ;;  %v10229_v57 = vld [vmem:[%s22336_s3 + $0x2b8] sm:$0xf0]  ;;  %v9940_v22 = vor.u32 %v13734_v58, %v9939_v18  ;;  %v13798_v11 = vld [vmem:[%s22336_s3 + $0x274] sm:$0xf0] }
 0x1ab   :  { %v10232_v52 = vor.u32 %v13802_v51, %v10229_v57  ;;  %v10196_v58 = vor.u32 %v13798_v11, %v10195_v5  ;;  %v10163_v48 = vld [vmem:[%s22336_s3 + $0x218] sm:$0xf]  ;;  %v10669_v57 = vld [vmem:[%s22336_s3 + $0x1c0] sm:$0xf] }
 0x1ac   :  { %2726 = vmatpush.bf16.msrb.mxu1 %v10292_v50  ;;  %2752 = vmatpush.bf16.msrb.mxu3 %v10296_v46  ;;  %v9909_v50 = vld [vmem:[%s22336_s3 + $0x38] sm:$0xf0]  ;;  %v10228_v46 = vor.u32 %v13806_v27, %v10227_v38  ;;  %v10925_v11 = vld [vmem:[%s22336_s3 + $0x3c0] sm:$0xf] }
 0x1ad   :  { %v9912_v18 = vor.u32 %v13722_v32, %v9909_v50  ;;  %v10165_v38 = vld [vmem:[%s22336_s3 + $0x238] sm:$0xf0]  ;;  %v13899_v32 = vld [vmem:[%s22336_s3 + $0x19c] sm:$0xf0]  ;;  %v13895_v50 = vld [vmem:[%s22336_s3 + $0x184] sm:$0xf] }
 0x1ae   :  { %2715 = vmatpush.bf16.msrb.mxu0 %v9972_v53  ;;  %2741 = vmatpush.bf16.msrb.mxu2 %v9976_v54  ;;  %v10197_v53 = vld [vmem:[%s22336_s3 + $0x278] sm:$0xf0]  ;;  %v9908_v54 = vor.u32 %v13726_v28, %v9907_v34  ;;  %v10671_v34 = vld [vmem:[%s22336_s3 + $0x1e0] sm:$0xf0] }
 0x1af   :  { %v10200_v12 = vor.u32 %v13794_v19, %v10197_v53  ;;  %v13971_v19 = vld [vmem:[%s22336_s3 + $0x3dc] sm:$0xf0]  ;;  %v13967_v53 = vld [vmem:[%s22336_s3 + $0x3c4] sm:$0xf] }
 0x1b0   :  { %2727 = vmatpush.bf16.msrb.mxu1 %v10260_v20  ;;  %2753 = vmatpush.bf16.msrb.mxu3 %v10264_v56  ;;  %v13790_v20 = vld [vmem:[%s22336_s3 + $0x234] sm:$0xf0]  ;;  %v13786_v56 = vld [vmem:[%s22336_s3 + $0x21c] sm:$0xf] }
 0x1b1   :  { %v10164_v27 = vor.u32 %v13790_v20, %v10163_v48  ;;  %v10168_v51 = vor.u32 %v13786_v56, %v10165_v38  ;;  %v10605_v48 = vld [vmem:[%s22336_s3 + $0x140] sm:$0xf]  ;;  %v13887_v56 = vld [vmem:[%s22336_s3 + $0x144] sm:$0xf] }
 0x1b2   :  { %2716 = vmatpush.bf16.msrb.mxu0 %v9940_v22  ;;  %2742 = vmatpush.bf16.msrb.mxu2 %v9944_v33  ;;  %v13907_v22 = vld [vmem:[%s22336_s3 + $0x1dc] sm:$0xf0] }
 0x1b3   :  { %v10670_v33 = vor.u32 %v13907_v22, %v10669_v57  ;;  %v13891_v20 = vld [vmem:[%s22336_s3 + $0x15c] sm:$0xf0] }
 0x1b4   :  { %2728 = vmatpush.bf16.msrb.mxu1 %v10228_v46  ;;  %2754 = vmatpush.bf16.msrb.mxu3 %v10232_v52  ;;  %v10639_v52 = vld [vmem:[%s22336_s3 + $0x1a0] sm:$0xf0] }
 0x1b5   :  { %v10642_v5 = vor.u32 %v13895_v50, %v10639_v52  ;;  %v10573_v50 = vld [vmem:[%s22336_s3 + $0x100] sm:$0xf]  ;;  %v13879_v52 = vld [vmem:[%s22336_s3 + $0x104] sm:$0xf] }
 0x1b6   :  { %2717 = vmatpush.bf16.msrb.mxu0 %v9908_v54  ;;  %2743 = vmatpush.bf16.msrb.mxu2 %v9912_v18  ;;  %v10926_v54 = vor.u32 %v13971_v19, %v10925_v11  ;;  %v10927_v18 = vld [vmem:[%s22336_s3 + $0x3e0] sm:$0xf0] }
 0x1b7   :  { %v10575_v11 = vld [vmem:[%s22336_s3 + $0x120] sm:$0xf0] }
 0x1b8   :  { %2729 = vmatpush.bf16.msrb.mxu1 %v10196_v58  ;;  %2755 = vmatpush.bf16.msrb.mxu3 %v10200_v12  ;;  %v10930_v12 = vor.u32 %v13967_v53, %v10927_v18  ;;  %v10578_v19 = vor.u32 %v13879_v52, %v10575_v11  ;;  %v10861_v53 = vld [vmem:[%s22336_s3 + $0x340] sm:$0xf] }
 0x1b9   :  { %10431 = vmatmul.msk.bf16.vlgmr.msrb.gmra.mxu0 %vm16691_vm4, %v16703_v14  ;;  %10437 = vmatmul.msk.bf16.vlgmr.msrb.gmra.mxu2 %vm16691_vm4, %v16703_v14  ;;  %v13903_v14 = vld [vmem:[%s22336_s3 + $0x1c4] sm:$0xf] }
 0x1ba   :  { %v10674_v45 = vor.u32 %v13903_v14, %v10671_v34  ;;  %3600 = vmatpush.bf16.msra.mxu0 %v10670_v33  ;;  %v10893_v14 = vld [vmem:[%s22336_s3 + $0x380] sm:$0xf]  ;;  %v13959_v34 = vld [vmem:[%s22336_s3 + $0x384] sm:$0xf] }
 0x1bb   :  { %v13963_v33 = vld [vmem:[%s22336_s3 + $0x39c] sm:$0xf0] }
 0x1bc   :  { %2730 = vmatpush.bf16.msrb.mxu1 %v10164_v27  ;;  %2756 = vmatpush.bf16.msrb.mxu3 %v10168_v51  ;;  %v10606_v27 = vor.u32 %v13891_v20, %v10605_v48  ;;  %v10607_v51 = vld [vmem:[%s22336_s3 + $0x160] sm:$0xf0] }
 0x1bd   :  { %3626 = vmatpush.bf16.msra.mxu2 %v10674_v45  ;;  %v10610_v22 = vor.u32 %v13887_v56, %v10607_v51  ;;  %v10894_v45 = vor.u32 %v13963_v33, %v10893_v14  ;;  %v13951_v48 = vld [vmem:[%s22336_s3 + $0x344] sm:$0xf]  ;;  %v10541_v51 = vld [vmem:[%s22336_s3 + $0xc0] sm:$0xf] }
 0x1be   :  { %v10863_v20 = vld [vmem:[%s22336_s3 + $0x360] sm:$0xf0] }
 0x1bf   :  { %10434 = vmatmul.msk.bf16.vlgmr.msrb.gmra.mxu1 %vm16691_vm4, %v16758_v30  ;;  %10440 = vmatmul.msk.bf16.vlgmr.msrb.gmra.mxu3 %vm16691_vm4, %v16758_v30  ;;  %v10637_v30 = vld [vmem:[%s22336_s3 + $0x180] sm:$0xf] }
 0x1c0   :  { %v10638_v46 = vor.u32 %v13899_v32, %v10637_v30  ;;  %3613 = vmatpush.bf16.msra.mxu1 %v10926_v54  ;;  %3639 = vmatpush.bf16.msra.mxu3 %v10930_v12  ;;  %v10895_v30 = vld [vmem:[%s22336_s3 + $0x3a0] sm:$0xf0]  ;;  %v13955_v54 = vld [vmem:[%s22336_s3 + $0x35c] sm:$0xf0] }
 0x1c1   :  { %3627 = vmatpush.bf16.msra.mxu2 %v10642_v5  ;;  %v10898_v32 = vor.u32 %v13959_v34, %v10895_v30  ;;  %v10862_v12 = vor.u32 %v13955_v54, %v10861_v53  ;;  %v10543_v34 = vld [vmem:[%s22336_s3 + $0xe0] sm:$0xf0]  ;;  %v10829_v30 = vld [vmem:[%s22336_s3 + $0x300] sm:$0xf] }
 0x1c2   :  { %3601 = vmatpush.bf16.msra.mxu0 %v10638_v46  ;;  %v13883_v46 = vld [vmem:[%s22336_s3 + $0x11c] sm:$0xf0] }
 0x1c3   :  { %v10574_v5 = vor.u32 %v13883_v46, %v10573_v50  ;;  %v13943_v50 = vld [vmem:[%s22336_s3 + $0x304] sm:$0xf]  ;;  %v13867_v53 = vld [vmem:[%s22336_s3 + $0x9c] sm:$0xf0] }
 0x1c4   :  { %3614 = vmatpush.bf16.msra.mxu1 %v10894_v45  ;;  %3640 = vmatpush.bf16.msra.mxu3 %v10898_v32  ;;  %v13947_v32 = vld [vmem:[%s22336_s3 + $0x31c] sm:$0xf0] }
 0x1c5   :  { %3628 = vmatpush.bf16.msra.mxu2 %v10610_v22  ;;  %v13871_v22 = vld [vmem:[%s22336_s3 + $0xc4] sm:$0xf]  ;;  %v10830_v52 = vor.u32 %v13947_v32, %v10829_v30  ;;  %v13859_v30 = vld [vmem:[%s22336_s3 + $0x5c] sm:$0xf0] }
 0x1c6   :  { %3602 = vmatpush.bf16.msra.mxu0 %v10606_v27  ;;  %v10866_v27 = vor.u32 %v13951_v48, %v10863_v20  ;;  %v10546_v45 = vor.u32 %v13871_v22, %v10543_v34  ;;  %v10511_v48 = vld [vmem:[%s22336_s3 + $0xa0] sm:$0xf0] }
 0x1c8   :  { %3615 = vmatpush.bf16.msra.mxu1 %v10862_v12  ;;  %3641 = vmatpush.bf16.msra.mxu3 %v10866_v27  ;;  %v13863_v12 = vld [vmem:[%s22336_s3 + $0x84] sm:$0xf]  ;;  %v13939_v27 = vld [vmem:[%s22336_s3 + $0x2dc] sm:$0xf0] }
 0x1c9   :  { %3629 = vmatpush.bf16.msra.mxu2 %v10578_v19  ;;  %v10509_v19 = vld [vmem:[%s22336_s3 + $0x80] sm:$0xf]  ;;  %v10514_v20 = vor.u32 %v13863_v12, %v10511_v48  ;;  %v13927_v12 = vld [vmem:[%s22336_s3 + $0x284] sm:$0xf] }
 0x1ca   :  { %3603 = vmatpush.bf16.msra.mxu0 %v10574_v5  ;;  %v10831_v5 = vld [vmem:[%s22336_s3 + $0x320] sm:$0xf0]  ;;  %v10510_v54 = vor.u32 %v13867_v53, %v10509_v19 }
 0x1cb   :  { %v10834_v11 = vor.u32 %v13943_v50, %v10831_v5  ;;  %v10479_v5 = vld [vmem:[%s22336_s3 + $0x60] sm:$0xf0] }
 0x1cc   :  { %3616 = vmatpush.bf16.msra.mxu1 %v10830_v52 }
 0x1cd   :  { %3630 = vmatpush.bf16.msra.mxu2 %v10546_v45  ;;  %3642 = vmatpush.bf16.msra.mxu3 %v10834_v11  ;;  %v10477_v45 = vld [vmem:[%s22336_s3 + $0x40] sm:$0xf]  ;;  %v508_v11 = vadd.f32 %v15788_v17, %v15844_v43  ;;  %v10767_v17 = vld [vmem:[%s22336_s3 + $0x2a0] sm:$0xf0] }
 0x1ce   :  { %v10478_v52 = vor.u32 %v13859_v30, %v10477_v45 }
 0x1d1   :  { %3631 = vmatpush.bf16.msra.mxu2 %v10514_v20 }
 0x1f5   :  { %v17141_v28 = vpop.f32.mrf.mxu0 }
 0x1fb   :  { %v17167_v58 = vpop.f32.mrf.mxu2 }
 0x1fc   :  { %v2576_v38 = vpop.f32.mrf.mxu1 }
 0x1fd   :  { %v2565_v57 = vpop.f32.mrf.mxu0 }
 0x1fe   :  { %v13875_v57 = vld [vmem:[%s22336_s3 + $0xdc] sm:$0xf0] }
 0x1ff   :  { %v10542_v33 = vor.u32 %v13875_v57, %v10541_v51  ;;  %v13935_v51 = vld [vmem:[%s22336_s3 + $0x2c4] sm:$0xf]  ;;  %v2577_v57 = vadd.f32 %v2576_v38, %v17141_v28  ;;  %v450_v38 = vadd.f32 %v15737_v55, %v15777_v9  ;;  %v13931_v55 = vld [vmem:[%s22336_s3 + $0x29c] sm:$0xf0] }
 0x200   :  { %v13855_v28 = vld [vmem:[%s22336_s3 + $0x44] sm:$0xf] }
 0x201   :  { %3604 = vmatpush.bf16.msra.mxu0 %v10542_v33  ;;  %v10799_v33 = vld [vmem:[%s22336_s3 + $0x2e0] sm:$0xf0]  ;;  %v10482_v53 = vor.u32 %v13855_v28, %v10479_v5  ;;  %v2762_v48 = vadd.f32 %v2577_v57, %v450_v38  ;;  %v13908_v28 = vld [vmem:[%s22336_s3 + $0x1e4] sm:$0xf0]  ;;  %v13904_v38 = vld [vmem:[%s22336_s3 + $0x1cc] sm:$0xf] }
 0x202   :  { %v17211_v18 = vpop.f32.mrf.mxu3  ;;  %v10802_v34 = vor.u32 %v13935_v51, %v10799_v33  ;;  %v10445_v51 = vld [vmem:[%s22336_s3] sm:$0xf]  ;;  %v13847_v57 = vld [vmem:[%s22336_s3 + $0x4] sm:$0xf] }
 0x203   :  { %v2591_v56 = vpop.f32.mrf.mxu2  ;;  %3632 = vmatpush.bf16.msra.mxu2 %v10482_v53  ;;  %v10447_v33 = vld [vmem:[%s22336_s3 + $0x20] sm:$0xf0]  ;;  %v537_v53 = vadd.f32 %v15802_v23, %v15847_v44 }
 0x204   :  { %v2578_v14 = vpop.f32.mrf.mxu1  ;;  %v10797_v56 = vld [vmem:[%s22336_s3 + $0x2c0] sm:$0xf]  ;;  %3643 = vmatpush.bf16.msra.mxu3 %v10802_v34  ;;  %v10677_v34 = vld [vmem:[%s22336_s3 + $0x1c8] sm:$0xf]  ;;  %v10450_v30 = vor.u32 %v13847_v57, %v10447_v33 }
 0x205   :  { %3605 = vmatpush.bf16.msra.mxu0 %v10510_v54  ;;  %v10798_v14 = vor.u32 %v13939_v27, %v10797_v56  ;;  %v10765_v54 = vld [vmem:[%s22336_s3 + $0x280] sm:$0xf]  ;;  %v10770_v27 = vor.u32 %v13927_v12, %v10767_v17  ;;  %v10678_v5 = vor.u32 %v13908_v28, %v10677_v34  ;;  %v479_v34 = vadd.f32 %v15750_v59, %v15800_v4  ;;  %v13972_v59 = vld [vmem:[%s22336_s3 + $0x3e4] sm:$0xf0] }
 0x206   :  { %v2615_v46 = vpop.f32.mrf.mxu0  ;;  %v10766_v56 = vor.u32 %v13931_v55, %v10765_v54  ;;  %v13923_v12 = vld [vmem:[%s22336_s3 + $0x25c] sm:$0xf0] }
 0x207   :  { %3617 = vmatpush.bf16.msra.mxu1 %v10798_v14  ;;  %3633 = vmatpush.bf16.msra.mxu2 %v10450_v30  ;;  %v13915_v33 = vld [vmem:[%s22336_s3 + $0x21c] sm:$0xf0] }
 0x208   :  { %3644 = vmatpush.bf16.msra.mxu3 %v10770_v27  ;;  %v10645_v27 = vld [vmem:[%s22336_s3 + $0x188] sm:$0xf] }
 0x209   :  { %3606 = vmatpush.bf16.msra.mxu0 %v10478_v52 }
 0x20a   :  { %v2604_v22 = vpop.f32.mrf.mxu3 }
 0x20b   :  { %v13851_v22 = vld [vmem:[%s22336_s3 + $0x1c] sm:$0xf0]  ;;  %3618 = vmatpush.bf16.msra.mxu1 %v10766_v56  ;;  %v2603_v56 = vadd.f32 %v17211_v18, %v17167_v58  ;;  %v10647_v18 = vld [vmem:[%s22336_s3 + $0x1a8] sm:$0xf0] }
 0x20c   :  { %v2628_v32 = vpop.f32.mrf.mxu1  ;;  %v2641_v50 = vpop.f32.mrf.mxu2  ;;  %v10446_v14 = vor.u32 %v13851_v22, %v10445_v51  ;;  %v13900_v51 = vld [vmem:[%s22336_s3 + $0x1a4] sm:$0xf0]  ;;  %v13896_v22 = vld [vmem:[%s22336_s3 + $0x18c] sm:$0xf] }
 0x20d   :  { %v2629_v19 = vadd.f32 %v2628_v32, %v2615_v46  ;;  %v2770_v32 = vmul.f32 0.5, %v2762_v48  ;;  %v13919_v48 = vld [vmem:[%s22336_s3 + $0x244] sm:$0xf]  ;;  %v10646_v58 = vor.u32 %v13900_v51, %v10645_v27  ;;  %v10650_v30 = vor.u32 %v13896_v22, %v10647_v18 }
 0x20e   :  { %v2617_v20 = vpop.f32.mrf.mxu0  ;;  %3607 = vmatpush.bf16.msra.mxu0 %v10446_v14  ;;  %v10701_v14 = vld [vmem:[%s22336_s3 + $0x200] sm:$0xf] }
 0x20f   :  { %v2764_v46 = vadd.f32 %v2629_v19, %v508_v11  ;;  %v10679_v11 = vld [vmem:[%s22336_s3 + $0x1e8] sm:$0xf0]  ;;  %v10733_v19 = vld [vmem:[%s22336_s3 + $0x240] sm:$0xf]  ;;  %v10735_v20 = vld [vmem:[%s22336_s3 + $0x260] sm:$0xf0]  ;;  %v10702_v28 = vor.u32 %v13915_v33, %v10701_v14 }
 0x210   :  { %v10682_v55 = vor.u32 %v13904_v38, %v10679_v11  ;;  %v13911_v38 = vld [vmem:[%s22336_s3 + $0x204] sm:$0xf]  ;;  %v10903_v14 = vld [vmem:[%s22336_s3 + $0x3a8] sm:$0xf0] }
 0x211   :  { %v2778_v45 = vmul.f32 0.5, %v2764_v46  ;;  %v10738_v46 = vor.u32 %v13919_v48, %v10735_v20  ;;  %v10613_v48 = vld [vmem:[%s22336_s3 + $0x148] sm:$0xf] }
 0x212   :  { %v2654_v52 = vpop.f32.mrf.mxu3  ;;  %3652 = vmatpush.bf16.msrb.mxu0 %v10678_v5  ;;  %3678 = vmatpush.bf16.msrb.mxu2 %v10682_v55  ;;  %v10933_v5 = vld [vmem:[%s22336_s3 + $0x3c8] sm:$0xf] }
 0x213   :  { %14639 = vtanh.f32 %v2778_v45  ;;  %v2655_v54 = vadd.f32 %v2654_v52, %v2641_v50  ;;  %v10734_v50 = vor.u32 %v13923_v12, %v10733_v19  ;;  %3645 = vmatpush.bf16.msra.mxu3 %v10738_v46  ;;  %v10703_v52 = vld [vmem:[%s22336_s3 + $0x220] sm:$0xf0]  ;;  %v10934_v55 = vor.u32 %v13972_v59, %v10933_v5  ;;  %v10935_v12 = vld [vmem:[%s22336_s3 + $0x3e8] sm:$0xf0]  ;;  %v13892_v20 = vld [vmem:[%s22336_s3 + $0x164] sm:$0xf0] }
 0x214   :  { %v2630_v23 = vpop.f32.mrf.mxu1  ;;  %v2643_v17 = vpop.f32.mrf.mxu2  ;;  %v10706_v19 = vor.u32 %v13911_v38, %v10703_v52  ;;  %v10615_v46 = vld [vmem:[%s22336_s3 + $0x168] sm:$0xf0]  ;;  %v10581_v38 = vld [vmem:[%s22336_s3 + $0x108] sm:$0xf] }
 0x215   :  { %v2765_v57 = vadd.f32 %v2655_v54, %v537_v53  ;;  %3619 = vmatpush.bf16.msra.mxu1 %v10734_v50  ;;  %v13968_v53 = vld [vmem:[%s22336_s3 + $0x3cc] sm:$0xf]  ;;  %v2763_v54 = vadd.f32 %v2603_v56, %v479_v34  ;;  %v10614_v50 = vor.u32 %v13892_v20, %v10613_v48  ;;  %v13884_v52 = vld [vmem:[%s22336_s3 + $0x124] sm:$0xf0] }
 0x216   :  { %v2667_v45 = vpop.f32.mrf.mxu0  ;;  %3653 = vmatpush.bf16.msrb.mxu0 %v10646_v58  ;;  %3679 = vmatpush.bf16.msrb.mxu2 %v10650_v30  ;;  %v10938_v17 = vor.u32 %v13968_v53, %v10935_v12  ;;  %v13888_v56 = vld [vmem:[%s22336_s3 + $0x14c] sm:$0xf]  ;;  %v13964_v58 = vld [vmem:[%s22336_s3 + $0x3a4] sm:$0xf0]  ;;  %v566_v53 = vadd.f32 %v16173_v62, %v16178_v1 }
 0x217   :  { %v2779_v11 = vmul.f32 0.5, %v2765_v57  ;;  %3646 = vmatpush.bf16.msra.mxu3 %v10706_v19  ;;  %v10618_v22 = vor.u32 %v13888_v56, %v10615_v46  ;;  %v10901_v57 = vld [vmem:[%s22336_s3 + $0x388] sm:$0xf]  ;;  %v2771_v33 = vmul.f32 0.5, %v2763_v54  ;;  %v13880_v19 = vld [vmem:[%s22336_s3 + $0x10c] sm:$0xf] }
 0x218   :  { %v10902_v18 = vor.u32 %v13964_v58, %v10901_v57  ;;  %v10583_v59 = vld [vmem:[%s22336_s3 + $0x128] sm:$0xf0]  ;;  %v10869_v20 = vld [vmem:[%s22336_s3 + $0x348] sm:$0xf] }
 0x219   :  { %v14640_v23 = vpop.eup %14639  ;;  %14641 = vtanh.f32 %v2779_v11  ;;  %3620 = vmatpush.bf16.msra.mxu1 %v10702_v28  ;;  %v10582_v11 = vor.u32 %v13884_v52, %v10581_v38  ;;  %v10586_v48 = vor.u32 %v13880_v19, %v10583_v59  ;;  %v13876_v57 = vld [vmem:[%s22336_s3 + $0xe4] sm:$0xf0]  ;;  %v10839_v19 = vld [vmem:[%s22336_s3 + $0x328] sm:$0xf0]  ;;  %v595_v59 = vadd.f32 %v16175_v0, %v16183_v6 }
 0x21a   :  { %14643 = vtanh.f32 %v2770_v32  ;;  %v2782_v27 = vmul.f32 0.5, %v14640_v23  ;;  %v2656_v51 = vpop.f32.mrf.mxu3  ;;  %v13960_v32 = vld [vmem:[%s22336_s3 + $0x38c] sm:$0xf]  ;;  %3654 = vmatpush.bf16.msrb.mxu0 %v10614_v50  ;;  %3680 = vmatpush.bf16.msrb.mxu2 %v10618_v22  ;;  %v13956_v23 = vld [vmem:[%s22336_s3 + $0x364] sm:$0xf0] }
 0x21b   :  { %3691 = vmatpush.bf16.msrb.mxu3 %v10938_v17  ;;  %v10906_v28 = vor.u32 %v13960_v32, %v10903_v14  ;;  %v13952_v17 = vld [vmem:[%s22336_s3 + $0x34c] sm:$0xf]  ;;  %v10870_v62 = vor.u32 %v13956_v23, %v10869_v20  ;;  %14645 = vtanh.f32 %v2771_v33  ;;  %v10549_v22 = vld [vmem:[%s22336_s3 + $0xc8] sm:$0xf] }
 0x21c   :  { %v2784_v34 = vadd.f32 0.5, %v2782_v27  ;;  %v2693_v30 = vpop.f32.mrf.mxu2  ;;  %v2680_v5 = vpop.f32.mrf.mxu1  ;;  %v10550_v58 = vor.u32 %v13876_v57, %v10549_v22  ;;  %v10551_v32 = vld [vmem:[%s22336_s3 + $0xe8] sm:$0xf0]  ;;  %v10517_v20 = vld [vmem:[%s22336_s3 + $0x88] sm:$0xf] }
 0x21d   :  { %3665 = vmatpush.bf16.msrb.mxu1 %v10934_v55  ;;  %v2681_v55 = vadd.f32 %v2680_v5, %v2667_v45  ;;  %v10871_v45 = vld [vmem:[%s22336_s3 + $0x368] sm:$0xf0]  ;;  %v13868_v23 = vld [vmem:[%s22336_s3 + $0xa4] sm:$0xf0] }
 0x21e   :  { %v17413_v54 = vmul.f32 %v2784_v34, %v16630_v7  ;;  %v2669_v12 = vpop.f32.mrf.mxu0  ;;  %3655 = vmatpush.bf16.msrb.mxu0 %v10582_v11  ;;  %v10874_v51 = vor.u32 %v13952_v17, %v10871_v45  ;;  %3681 = vmatpush.bf16.msrb.mxu2 %v10586_v48  ;;  %v10837_v34 = vld [vmem:[%s22336_s3 + $0x308] sm:$0xf]  ;;  %v13944_v11 = vld [vmem:[%s22336_s3 + $0x30c] sm:$0xf] }
 0x21f   :  { %v14642_v50 = vpop.eup %14641  ;;  %3692 = vmatpush.bf16.msrb.mxu3 %v10906_v28  ;;  %v2766_v27 = vadd.f32 %v2681_v55, %v566_v53  ;;  %v13948_v28 = vld [vmem:[%s22336_s3 + $0x324] sm:$0xf0]  ;;  %v10842_v48 = vor.u32 %v13944_v11, %v10839_v19  ;;  %v13864_v17 = vld [vmem:[%s22336_s3 + $0x8c] sm:$0xf]  ;;  %v17492_v11 = vpop.permute.xlu0 %2809 }
 0x220   :  { %v14644_v56 = vpop.eup %14643  ;;  %v2783_v46 = vmul.f32 0.5, %v14642_v50  ;;  %v10838_v5 = vor.u32 %v13948_v28, %v10837_v34  ;;  %v10518_v50 = vor.u32 %v13868_v23, %v10517_v20  ;;  %v13856_v34 = vld [vmem:[%s22336_s3 + $0x4c] sm:$0xf]  ;;  %vm2811_vm5 = vcmp.eq.s32.totalorder %v17492_v11, 1  ;;  %v13961_v11 = vld [vmem:[%s22336_s3 + $0x394] sm:$0xf] }
 0x221   :  { %3666 = vmatpush.bf16.msrb.mxu1 %v10902_v18  ;;  %v13872_v18 = vld [vmem:[%s22336_s3 + $0xcc] sm:$0xf]  ;;  %14647 = vtanh.f32 %v2766_v27  ;;  %v2774_v38 = vmul.f32 0.5, %v14644_v56  ;;  %v13940_v27 = vld [vmem:[%s22336_s3 + $0x2e4] sm:$0xf0] }
 0x222   :  { %v2785_v14 = vadd.f32 0.5, %v2783_v46  ;;  %v10554_v33 = vor.u32 %v13872_v18, %v10551_v32  ;;  %v2706_v52 = vpop.f32.mrf.mxu3  ;;  %3656 = vmatpush.bf16.msrb.mxu0 %v10550_v58  ;;  %v10805_v46 = vld [vmem:[%s22336_s3 + $0x2c8] sm:$0xf]  ;;  %v10807_v58 = vld [vmem:[%s22336_s3 + $0x2e8] sm:$0xf0] }
 0x223   :  { %3693 = vmatpush.bf16.msrb.mxu3 %v10874_v51  ;;  %v2707_v55 = vadd.f32 %v2706_v52, %v2693_v30  ;;  %v10519_v30 = vld [vmem:[%s22336_s3 + $0xa8] sm:$0xf0]  ;;  %v2776_v22 = vadd.f32 0.5, %v2774_v38  ;;  %v10806_v57 = vor.u32 %v13940_v27, %v10805_v46 }
 0x224   :  { %v17454_v53 = vmul.f32 %v2785_v14, %v16664_v8  ;;  %v2695_v12 = vpop.f32.mrf.mxu2  ;;  %v2682_v0 = vpop.f32.mrf.mxu1  ;;  %3682 = vmatpush.bf16.msrb.mxu2 %v10554_v33  ;;  %v10522_v56 = vor.u32 %v13864_v17, %v10519_v30  ;;  %v13936_v51 = vld [vmem:[%s22336_s3 + $0x2cc] sm:$0xf]  ;;  %v10485_v14 = vld [vmem:[%s22336_s3 + $0x48] sm:$0xf] }
 0x225   :  { %3667 = vmatpush.bf16.msrb.mxu1 %v10870_v62  ;;  %v14646_v62 = vpop.eup %14645  ;;  %v2767_v45 = vadd.f32 %v2707_v55, %v595_v59  ;;  %v10810_v32 = vor.u32 %v13936_v51, %v10807_v58  ;;  %v13860_v33 = vld [vmem:[%s22336_s3 + $0x64] sm:$0xf0]  ;;  %v13928_v12 = vld [vmem:[%s22336_s3 + $0x28c] sm:$0xf] }
 0x226   :  { %3657 = vmatpush.bf16.msrb.mxu0 %v10518_v50  ;;  %v2775_v28 = vmul.f32 0.5, %v14646_v62  ;;  %v10486_v52 = vor.u32 %v13860_v33, %v10485_v14  ;;  %v10773_v59 = vld [vmem:[%s22336_s3 + $0x288] sm:$0xf]  ;;  %v10775_v17 = vld [vmem:[%s22336_s3 + $0x2a8] sm:$0xf0] }
 0x227   :  { %3694 = vmatpush.bf16.msrb.mxu3 %v10842_v48  ;;  %v14648_v18 = vpop.eup %14647  ;;  %14649 = vtanh.f32 %v2767_v45  ;;  %v13932_v55 = vld [vmem:[%s22336_s3 + $0x2a4] sm:$0xf0]  ;;  %v10778_v0 = vor.u32 %v13928_v12, %v10775_v17 }
 0x228   :  { %v2798_v38 = vmul.f32 %v14648_v18, %v2776_v22  ;;  %3683 = vmatpush.bf16.msrb.mxu2 %v10522_v56  ;;  %v10774_v23 = vor.u32 %v13932_v55, %v10773_v59  ;;  %v10453_v50 = vld [vmem:[%s22336_s3 + $0x8] sm:$0xf]  ;;  %v2777_v62 = vadd.f32 0.5, %v2775_v28  ;;  %v10455_v56 = vld [vmem:[%s22336_s3 + $0x28] sm:$0xf0] }
 0x229   :  { %3668 = vmatpush.bf16.msrb.mxu1 %v10838_v5  ;;  %v10487_v5 = vld [vmem:[%s22336_s3 + $0x68] sm:$0xf0]  ;;  %v13852_v30 = vld [vmem:[%s22336_s3 + $0x24] sm:$0xf0] }
 0x22a   :  { %v10490_v19 = vor.u32 %v13856_v34, %v10487_v5  ;;  %v2800_v48 = vadd.f32 %v2798_v38, %v17413_v54  ;;  %v2708_v20 = vpop.f32.mrf.mxu3  ;;  %3658 = vmatpush.bf16.msrb.mxu0 %v10486_v52  ;;  %v13848_v54 = vld [vmem:[%s22336_s3 + $0xc] sm:$0xf]  ;;  %v10454_v45 = vor.u32 %v13852_v30, %v10453_v50  ;;  %v13924_v58 = vld [vmem:[%s22336_s3 + $0x264] sm:$0xf0]  ;;  %v653_v30 = vadd.f32 %v16185_v10, %v16197_v25  ;;  %v13909_v10 = vld [vmem:[%s22336_s3 + $0x1ec] sm:$0xf0] }
 0x22b   :  { %3695 = vmatpush.bf16.msrb.mxu3 %v10810_v32  ;;  %v10458_v51 = vor.u32 %v13848_v54, %v10455_v56  ;;  %v13920_v18 = vld [vmem:[%s22336_s3 + $0x24c] sm:$0xf]  ;;  %v10709_v28 = vld [vmem:[%s22336_s3 + $0x208] sm:$0xf]  ;;  %v624_v20 = vadd.f32 %v16180_v47, %v16194_v21 }
 0x22c   :  { %3684 = vmatpush.bf16.msrb.mxu2 %v10490_v19  ;;  %v17523_v46 = vsel %vm2811_vm5, %v2800_v48, %v16630_v7  ;;  %v10743_v32 = vld [vmem:[%s22336_s3 + $0x268] sm:$0xf0]  ;;  %v13916_v38 = vld [vmem:[%s22336_s3 + $0x224] sm:$0xf0] }
 0x22d   :  { %3669 = vmatpush.bf16.msrb.mxu1 %v10806_v57  ;;  %v14650_v27 = vpop.eup %14649  ;;  %v10741_v57 = vld [vmem:[%s22336_s3 + $0x248] sm:$0xf]  ;;  %v10746_v33 = vor.u32 %v13920_v18, %v10743_v32  ;;  %v10710_v5 = vor.u32 %v13916_v38, %v10709_v28  ;;  %v10711_v19 = vld [vmem:[%s22336_s3 + $0x228] sm:$0xf0]  ;;  %v14779_v38 = vld [vmem:[%s22339_s5] sm:$0xff] }
 0x22e   :  { %v2799_v22 = vmul.f32 %v14650_v27, %v2777_v62  ;;  %3659 = vmatpush.bf16.msrb.mxu0 %v10454_v45  ;;  %v10742_v7 = vor.u32 %v13924_v58, %v10741_v57  ;;  %v10685_v58 = vld [vmem:[%s22336_s3 + $0x1d0] sm:$0xf] }
 0x22f   :  { %3696 = vmatpush.bf16.msrb.mxu3 %v10778_v0 }
 0x230   :  { %v2801_v14 = vadd.f32 %v2799_v22, %v17454_v53  ;;  %3685 = vmatpush.bf16.msrb.mxu2 %v10458_v51  ;;  %v13912_v53 = vld [vmem:[%s22336_s3 + $0x20c] sm:$0xf] }
 0x231   :  { %3670 = vmatpush.bf16.msrb.mxu1 %v10774_v23  ;;  %v10714_v59 = vor.u32 %v13912_v53, %v10711_v19  ;;  %v10653_v19 = vld [vmem:[%s22336_s3 + $0x190] sm:$0xf] }
 0x232   :  { %v17547_v52 = vsel %vm2811_vm5, %v2801_v14, %v16664_v8 }
 0x233   :  { %3697 = vmatpush.bf16.msrb.mxu3 %v10746_v33 }
 0x235   :  { %3671 = vmatpush.bf16.msrb.mxu1 %v10742_v7  ;;  %v10687_v7 = vld [vmem:[%s22336_s3 + $0x1f0] sm:$0xf0] }
 0x236   :  { %v2719_v34 = vpop.f32.mrf.mxu0 }
 0x237   :  { %3698 = vmatpush.bf16.msrb.mxu3 %v10714_v59  ;;  %v13901_v59 = vld [vmem:[%s22336_s3 + $0x1ac] sm:$0xf0] }
 0x239   :  { %3672 = vmatpush.bf16.msrb.mxu1 %v10710_v5 }
 0x23c   :  { %v2732_v55 = vpop.f32.mrf.mxu1  ;;  %v2745_v12 = vpop.f32.mrf.mxu2 }
 0x23d   :  { %v2733_v23 = vadd.f32 %v2732_v55, %v2719_v34  ;;  %v10686_v34 = vor.u32 %v13909_v10, %v10685_v58 }
 0x23e   :  { %v2721_v8 = vpop.f32.mrf.mxu0 }
 0x23f   :  { %v2768_v17 = vadd.f32 %v2733_v23, %v624_v20  ;;  %v10655_v20 = vld [vmem:[%s22336_s3 + $0x1b0] sm:$0xf0]  ;;  %v10941_v8 = vld [vmem:[%s22336_s3 + $0x3d0] sm:$0xf] }
 0x241   :  { %v2788_v0 = vmul.f32 0.5, %v2768_v17 }
 0x242   :  { %v2758_v50 = vpop.f32.mrf.mxu3 }
 0x243   :  { %14651 = vtanh.f32 %v2788_v0  ;;  %v2759_v54 = vadd.f32 %v2758_v50, %v2745_v12  ;;  %v13897_v12 = vld [vmem:[%s22336_s3 + $0x194] sm:$0xf]  ;;  %v13973_v0 = vld [vmem:[%s22336_s3 + $0x3ec] sm:$0xf0] }
 0x244   :  { %v2734_v62 = vpop.f32.mrf.mxu1  ;;  %v2747_v45 = vpop.f32.mrf.mxu2  ;;  %14653 = vtanh.f32 %v2800_v48  ;;  %v13905_v48 = vld [vmem:[%s22336_s3 + $0x1d4] sm:$0xf]  ;;  %v10942_v10 = vor.u32 %v13973_v0, %v10941_v8 }
 0x245   :  { %v2769_v56 = vadd.f32 %v2759_v54, %v653_v30  ;;  %v10690_v53 = vor.u32 %v13905_v48, %v10687_v7  ;;  %v13969_v50 = vld [vmem:[%s22336_s3 + $0x3d4] sm:$0xf]  ;;  %v10654_v62 = vor.u32 %v13901_v59, %v10653_v19  ;;  %v10658_v45 = vor.u32 %v13897_v12, %v10655_v20  ;;  %v10909_v48 = vld [vmem:[%s22336_s3 + $0x390] sm:$0xf] }
 0x246   :  { %v10943_v30 = vld [vmem:[%s22336_s3 + $0x3f0] sm:$0xf0]  ;;  %v13965_v7 = vld [vmem:[%s22336_s3 + $0x3ac] sm:$0xf0] }
 0x247   :  { %v2789_v27 = vmul.f32 0.5, %v2769_v56  ;;  %v10621_v56 = vld [vmem:[%s22336_s3 + $0x150] sm:$0xf]  ;;  %v10591_v19 = vld [vmem:[%s22336_s3 + $0x130] sm:$0xf0]  ;;  %v10910_v59 = vor.u32 %v13965_v7, %v10909_v48 }
 0x248   :  { %v10877_v20 = vld [vmem:[%s22336_s3 + $0x350] sm:$0xf]  ;;  %v13953_v8 = vld [vmem:[%s22336_s3 + $0x354] sm:$0xf] }
 0x249   :  { %v14652_v51 = vpop.eup %14651  ;;  %14655 = vtanh.f32 %v2789_v27  ;;  %v13893_v27 = vld [vmem:[%s22336_s3 + $0x16c] sm:$0xf0] }
 0x24a   :  { %v2792_v22 = vmul.f32 0.5, %v14652_v51  ;;  %v2760_v57 = vpop.f32.mrf.mxu3  ;;  %v14654_v18 = vpop.eup %14653  ;;  %14657 = vtanh.f32 %v2801_v14  ;;  %v13889_v51 = vld [vmem:[%s22336_s3 + $0x154] sm:$0xf]  ;;  %v10525_v48 = vld [vmem:[%s22336_s3 + $0x90] sm:$0xf] }
 0x24b   :  { %v13869_v7 = vld [vmem:[%s22336_s3 + $0xac] sm:$0xf0] }
 0x24c   :  { %v2794_v47 = vadd.f32 0.5, %v2792_v22  ;;  %v10623_v22 = vld [vmem:[%s22336_s3 + $0x170] sm:$0xf0] }
 0x24e   :  { %v2804_v32 = vmul.f32 %v14654_v18, %v2794_v47  ;;  %v14780_v47 = vld [vmem:[%s22339_s5 + $0x8] sm:$0xff]  ;;  %v10946_v18 = vor.u32 %v13969_v50, %v10943_v30  ;;  %v10557_v30 = vld [vmem:[%s22336_s3 + $0xd0] sm:$0xf] }
 0x24f   :  { %v14656_v33 = vpop.eup %14655 }
 0x250   :  { %v2812_v28 = vsel %vm2811_vm5, %v2804_v32, 0.0  ;;  %v17578_v14 = vsel %vm2811_vm5, %v2804_v32, %v14779_v38  ;;  %v2793_v5 = vmul.f32 0.5, %v14656_v33  ;;  %v14658_v17 = vpop.eup %14657  ;;  %v10911_v33 = vld [vmem:[%s22336_s3 + $0x3b0] sm:$0xf0]  ;;  %v10589_v38 = vld [vmem:[%s22336_s3 + $0x110] sm:$0xf] }
 0x251   :  { %10441 = vst [vmem:[%s22339_s5 + $0x10] sm:$0xff] %v2812_v28  ;;  %v17591_v55 = vpack.c.bf16 %v17578_v14, %v17578_v14  ;;  %v10626_v28 = vor.u32 %v13889_v51, %v10623_v22  ;;  %v10914_v12 = vor.u32 %v13961_v11, %v10911_v33  ;;  %v10845_v51 = vld [vmem:[%s22336_s3 + $0x310] sm:$0xf]  ;;  %v13865_v11 = vld [vmem:[%s22336_s3 + $0x94] sm:$0xf] }
 0x252   :  { %v2795_v23 = vadd.f32 0.5, %v2793_v5  ;;  %v13885_v5 = vld [vmem:[%s22336_s3 + $0x12c] sm:$0xf0]  ;;  %v10527_v33 = vld [vmem:[%s22336_s3 + $0xb0] sm:$0xf0] }
 0x253   :  { %3608 = vmatmul.bf16.vlgmr.msra.gmra.mxu0 %v17591_v55  ;;  %3634 = vmatmul.bf16.vlgmr.msra.gmra.mxu2 %v17591_v55  ;;  %v10590_v0 = vor.u32 %v13885_v5, %v10589_v38  ;;  %v13949_v22 = vld [vmem:[%s22336_s3 + $0x32c] sm:$0xf0] }
 0x254   :  { %v2805_v54 = vmul.f32 %v14658_v17, %v2795_v23  ;;  %3704 = vmatpush.bf16.msra.mxu0 %v10686_v34  ;;  %3730 = vmatpush.bf16.msra.mxu2 %v10690_v53  ;;  %v10622_v34 = vor.u32 %v13893_v27, %v10621_v56  ;;  %v13881_v53 = vld [vmem:[%s22336_s3 + $0x114] sm:$0xf]  ;;  %v13957_v23 = vld [vmem:[%s22336_s3 + $0x36c] sm:$0xf0] }
 0x255   :  { %v10879_v17 = vld [vmem:[%s22336_s3 + $0x370] sm:$0xf0]  ;;  %v10594_v50 = vor.u32 %v13881_v53, %v10591_v19  ;;  %v10878_v56 = vor.u32 %v13957_v23, %v10877_v20  ;;  %v10813_v38 = vld [vmem:[%s22336_s3 + $0x2d0] sm:$0xf] }
 0x256   :  { %v2813_v57 = vsel %vm2811_vm5, %v2805_v54, 0.0  ;;  %v17632_v58 = vsel %vm2811_vm5, %v2805_v54, %v14780_v47  ;;  %v13877_v54 = vld [vmem:[%s22336_s3 + $0xec] sm:$0xf0]  ;;  %v10882_v27 = vor.u32 %v13953_v8, %v10879_v17  ;;  %v10847_v47 = vld [vmem:[%s22336_s3 + $0x330] sm:$0xf0] }
 0x257   :  { %10442 = vst [vmem:[%s22339_s5 + $0x18] sm:$0xff] %v2813_v57  ;;  %v17645_v32 = vpack.c.bf16 %v17632_v58, %v17632_v58  ;;  %v13945_v57 = vld [vmem:[%s22336_s3 + $0x314] sm:$0xf]  ;;  %v13941_v5 = vld [vmem:[%s22336_s3 + $0x2ec] sm:$0xf0] }
 0x258   :  { %3705 = vmatpush.bf16.msra.mxu0 %v10654_v62  ;;  %3731 = vmatpush.bf16.msra.mxu2 %v10658_v45  ;;  %v13873_v62 = vld [vmem:[%s22336_s3 + $0xd4] sm:$0xf]  ;;  %v10493_v20 = vld [vmem:[%s22336_s3 + $0x50] sm:$0xf] }
 0x259   :  { %3621 = vmatmul.bf16.vlgmr.msra.gmra.mxu1 %v17645_v32  ;;  %3647 = vmatmul.bf16.vlgmr.msra.gmra.mxu3 %v17645_v32  ;;  %v10559_v45 = vld [vmem:[%s22336_s3 + $0xf0] sm:$0xf0]  ;;  %v13861_v23 = vld [vmem:[%s22336_s3 + $0x6c] sm:$0xf0] }
 0x25a   :  { %3717 = vmatpush.bf16.msra.mxu1 %v10942_v10  ;;  %3743 = vmatpush.bf16.msra.mxu3 %v10946_v18  ;;  %v10558_v10 = vor.u32 %v13877_v54, %v10557_v30  ;;  %v10562_v18 = vor.u32 %v13873_v62, %v10559_v45  ;;  %v13937_v53 = vld [vmem:[%s22336_s3 + $0x2d4] sm:$0xf]  ;;  %v10781_v30 = vld [vmem:[%s22336_s3 + $0x290] sm:$0xf] }
 0x25b   :  { %v10815_v19 = vld [vmem:[%s22336_s3 + $0x2f0] sm:$0xf0]  ;;  %v13933_v54 = vld [vmem:[%s22336_s3 + $0x2ac] sm:$0xf0] }
 0x25c   :  { %3706 = vmatpush.bf16.msra.mxu0 %v10622_v34  ;;  %3732 = vmatpush.bf16.msra.mxu2 %v10626_v28  ;;  %v10846_v34 = vor.u32 %v13949_v22, %v10845_v51  ;;  %v10850_v28 = vor.u32 %v13945_v57, %v10847_v47  ;;  %v13857_v8 = vld [vmem:[%s22336_s3 + $0x54] sm:$0xf]  ;;  %v10461_v51 = vld [vmem:[%s22336_s3 + $0x10] sm:$0xf] }
 0x25d   :  { %v10495_v17 = vld [vmem:[%s22336_s3 + $0x70] sm:$0xf0]  ;;  %v13853_v22 = vld [vmem:[%s22336_s3 + $0x2c] sm:$0xf0] }
 0x25e   :  { %3718 = vmatpush.bf16.msra.mxu1 %v10910_v59  ;;  %3744 = vmatpush.bf16.msra.mxu3 %v10914_v12  ;;  %v10526_v59 = vor.u32 %v13869_v7, %v10525_v48  ;;  %v10530_v12 = vor.u32 %v13865_v11, %v10527_v33  ;;  %v13929_v62 = vld [vmem:[%s22336_s3 + $0x294] sm:$0xf]  ;;  %v10782_v48 = vor.u32 %v13933_v54, %v10781_v30  ;;  %v13906_v11 = vld [vmem:[%s22336_s3 + $0x1dc] sm:$0xf]  ;;  %v10717_v30 = vld [vmem:[%s22336_s3 + $0x210] sm:$0xf] }
 0x25f   :  { %v10783_v45 = vld [vmem:[%s22336_s3 + $0x2b0] sm:$0xf0]  ;;  %v10695_v33 = vld [vmem:[%s22336_s3 + $0x1f8] sm:$0xf0]  ;;  %v13917_v54 = vld [vmem:[%s22336_s3 + $0x22c] sm:$0xf0] }
 0x260   :  { %3707 = vmatpush.bf16.msra.mxu0 %v10590_v0  ;;  %3733 = vmatpush.bf16.msra.mxu2 %v10594_v50  ;;  %v10814_v0 = vor.u32 %v13941_v5, %v10813_v38  ;;  %v10818_v50 = vor.u32 %v13937_v53, %v10815_v19  ;;  %v13849_v57 = vld [vmem:[%s22336_s3 + $0x14] sm:$0xf]  ;;  %v10786_v7 = vor.u32 %v13929_v62, %v10783_v45 }
 0x261   :  { %v10463_v47 = vld [vmem:[%s22336_s3 + $0x30] sm:$0xf0]  ;;  %v10462_v53 = vor.u32 %v13853_v22, %v10461_v51  ;;  %v13970_v51 = vld [vmem:[%s22336_s3 + $0x3dc] sm:$0xf] }
 0x262   :  { %3719 = vmatpush.bf16.msra.mxu1 %v10878_v56  ;;  %3745 = vmatpush.bf16.msra.mxu3 %v10882_v27  ;;  %v10494_v56 = vor.u32 %v13861_v23, %v10493_v20  ;;  %v10498_v27 = vor.u32 %v13857_v8, %v10495_v17  ;;  %v13921_v38 = vld [vmem:[%s22336_s3 + $0x254] sm:$0xf]  ;;  %v10466_v19 = vor.u32 %v13849_v57, %v10463_v47  ;;  %v13902_v23 = vld [vmem:[%s22336_s3 + $0x1b4] sm:$0xf0]  ;;  %v13898_v8 = vld [vmem:[%s22336_s3 + $0x19c] sm:$0xf] }
 0x263   :  { %3660 = vmatmul.bf16.vlgmr.msrb.gmra.mxu0 %v17591_v55  ;;  %3686 = vmatmul.bf16.vlgmr.msrb.gmra.mxu2 %v17591_v55  ;;  %v10751_v5 = vld [vmem:[%s22336_s3 + $0x270] sm:$0xf0]  ;;  %v10698_v20 = vor.u32 %v13906_v11, %v10695_v33  ;;  %v10663_v17 = vld [vmem:[%s22336_s3 + $0x1b8] sm:$0xf0]  ;;  %v17830_v57 = vld [vmem:[%s22338_s0] sm:$0xff]  ;;  %v10718_v11 = vor.u32 %v13917_v54, %v10717_v30 }
 0x264   :  { %3708 = vmatpush.bf16.msra.mxu0 %v10558_v10  ;;  %3734 = vmatpush.bf16.msra.mxu2 %v10562_v18  ;;  %v10693_v10 = vld [vmem:[%s22336_s3 + $0x1d8] sm:$0xf]  ;;  %v13913_v62 = vld [vmem:[%s22336_s3 + $0x214] sm:$0xf]  ;;  %v10951_v22 = vld [vmem:[%s22336_s3 + $0x3f8] sm:$0xf0] }
 0x265   :  { %v13910_v18 = vld [vmem:[%s22336_s3 + $0x1f4] sm:$0xf0]  ;;  %v10719_v45 = vld [vmem:[%s22336_s3 + $0x230] sm:$0xf0]  ;;  %vm3852_vm6 = vcmp.gt.s32.totalorder %v17830_v57, 2  ;;  %vm4898_vm7 = vcmp.gt.s32.totalorder %v17830_v57, 3 }
 0x266   :  { %3720 = vmatpush.bf16.msra.mxu1 %v10846_v34  ;;  %3746 = vmatpush.bf16.msra.mxu3 %v10850_v28  ;;  %v10749_v34 = vld [vmem:[%s22336_s3 + $0x250] sm:$0xf]  ;;  %v10722_v33 = vor.u32 %v13913_v62, %v10719_v45  ;;  %v10599_v30 = vld [vmem:[%s22336_s3 + $0x138] sm:$0xf0]  ;;  %v10885_v45 = vld [vmem:[%s22336_s3 + $0x358] sm:$0xf] }
 0x267   :  { %v13925_v28 = vld [vmem:[%s22336_s3 + $0x26c] sm:$0xf0]  ;;  %vm9082_vm8 = vcmp.gt.s32.totalorder %v17830_v57, 7  ;;  %v10823_v57 = vld [vmem:[%s22336_s3 + $0x2f8] sm:$0xf0] }
 0x268   :  { %3709 = vmatpush.bf16.msra.mxu0 %v10526_v59  ;;  %3735 = vmatpush.bf16.msra.mxu2 %v10530_v12  ;;  %v10661_v59 = vld [vmem:[%s22336_s3 + $0x198] sm:$0xf]  ;;  %v10694_v12 = vor.u32 %v13910_v18, %v10693_v10  ;;  %v10666_v10 = vor.u32 %v13898_v8, %v10663_v17 }
 0x269   :  { %3673 = vmatmul.bf16.vlgmr.msrb.gmra.mxu1 %v17645_v32  ;;  %3699 = vmatmul.bf16.vlgmr.msrb.gmra.mxu3 %v17645_v32  ;;  %v10662_v47 = vor.u32 %v13902_v23, %v10661_v59  ;;  %v10629_v18 = vld [vmem:[%s22336_s3 + $0x158] sm:$0xf] }
 0x26a   :  { %3721 = vmatpush.bf16.msra.mxu1 %v10814_v0  ;;  %3747 = vmatpush.bf16.msra.mxu3 %v10818_v50  ;;  %v10750_v0 = vor.u32 %v13925_v28, %v10749_v34  ;;  %v10754_v50 = vor.u32 %v13921_v38, %v10751_v5  ;;  %v13894_v34 = vld [vmem:[%s22336_s3 + $0x174] sm:$0xf0]  ;;  %v13890_v28 = vld [vmem:[%s22336_s3 + $0x15c] sm:$0xf] }
 0x26b   :  { %v10631_v38 = vld [vmem:[%s22336_s3 + $0x178] sm:$0xf0]  ;;  %v13966_v59 = vld [vmem:[%s22336_s3 + $0x3b4] sm:$0xf0]  ;;  %v10630_v23 = vor.u32 %v13894_v34, %v10629_v18 }
 0x26c   :  { %3710 = vmatpush.bf16.msra.mxu0 %v10494_v56  ;;  %3736 = vmatpush.bf16.msra.mxu2 %v10498_v27  ;;  %v10949_v56 = vld [vmem:[%s22336_s3 + $0x3d8] sm:$0xf]  ;;  %v10634_v8 = vor.u32 %v13890_v28, %v10631_v38 }
 0x26d   :  { %v13974_v27 = vld [vmem:[%s22336_s3 + $0x3f4] sm:$0xf0] }
 0x26e   :  { %3722 = vmatpush.bf16.msra.mxu1 %v10782_v48  ;;  %3748 = vmatpush.bf16.msra.mxu3 %v10786_v7  ;;  %v22374_v48 = vmov 0   ;;  %v10950_v5 = vor.u32 %v13974_v27, %v10949_v56  ;;  %v10597_v17 = vld [vmem:[%s22336_s3 + $0x118] sm:$0xf]  ;;  %v13954_v27 = vld [vmem:[%s22336_s3 + $0x35c] sm:$0xf] }
 0x26f   :  { %v3853_v7 = vsel %vm3852_vm6, 1, %v22374_v48  ;;  %v13958_v56 = vld [vmem:[%s22336_s3 + $0x374] sm:$0xf0]  ;;  %v4899_v18 = vsel %vm4898_vm7, 1, %v22374_v48 }
 0x270   :  { %3711 = vmatpush.bf16.msra.mxu0 %v10462_v53  ;;  %3737 = vmatpush.bf16.msra.mxu2 %v10466_v19  ;;  %v10954_v53 = vor.u32 %v13970_v51, %v10951_v22  ;;  %v10917_v19 = vld [vmem:[%s22336_s3 + $0x398] sm:$0xf]  ;;  %v10887_v51 = vld [vmem:[%s22336_s3 + $0x378] sm:$0xf0]  ;;  %v10886_v34 = vor.u32 %v13958_v56, %v10885_v45 }
 0x271   :  { %3855 = vperm.xlu1 %14617, %v3853_v7   ;;  %v10918_v54 = vor.u32 %v13966_v59, %v10917_v19  ;;  %v13878_v7 = vld [vmem:[%s22336_s3 + $0xf4] sm:$0xf0]  ;;  %v10890_v28 = vor.u32 %v13954_v27, %v10887_v51  ;;  %v10855_v19 = vld [vmem:[%s22336_s3 + $0x338] sm:$0xf0]  ;;  %v9083_v51 = vsel %vm9082_vm8, 1, %v22374_v48 }
 0x272   :  { %3723 = vmatpush.bf16.msra.mxu1 %v10750_v0  ;;  %3749 = vmatpush.bf16.msra.mxu3 %v10754_v50  ;;  %v13886_v0 = vld [vmem:[%s22336_s3 + $0x134] sm:$0xf0]  ;;  %v13882_v50 = vld [vmem:[%s22336_s3 + $0x11c] sm:$0xf] }
 0x273   :  { %3712 = vmatmul.bf16.vlgmr.msra.gmra.mxu0 %v17591_v55  ;;  %3738 = vmatmul.bf16.vlgmr.msra.gmra.mxu2 %v17591_v55  ;;  %v10598_v22 = vor.u32 %v13886_v0, %v10597_v17  ;;  %v10853_v38 = vld [vmem:[%s22336_s3 + $0x318] sm:$0xf]  ;;  %v10535_v17 = vld [vmem:[%s22336_s3 + $0xb8] sm:$0xf0] }
 0x274   :  { %3756 = vmatpush.bf16.msrb.mxu0 %v10694_v12  ;;  %3782 = vmatpush.bf16.msrb.mxu2 %v10698_v20  ;;  %v13962_v12 = vld [vmem:[%s22336_s3 + $0x39c] sm:$0xf]  ;;  %v10501_v27 = vld [vmem:[%s22336_s3 + $0x58] sm:$0xf] }
 0x275   :  { %v10919_v20 = vld [vmem:[%s22336_s3 + $0x3b8] sm:$0xf0] }
 0x276   :  { %3724 = vmatpush.bf16.msra.mxu1 %v10718_v11  ;;  %3750 = vmatpush.bf16.msra.mxu3 %v10722_v33  ;;  %v10922_v62 = vor.u32 %v13962_v12, %v10919_v20  ;;  %v13874_v11 = vld [vmem:[%s22336_s3 + $0xdc] sm:$0xf]  ;;  %v10533_v20 = vld [vmem:[%s22336_s3 + $0x98] sm:$0xf] }
 0x277   :  { %v10567_v33 = vld [vmem:[%s22336_s3 + $0xf8] sm:$0xf0] }
 0x278   :  { %3757 = vmatpush.bf16.msrb.mxu0 %v10662_v47  ;;  %3783 = vmatpush.bf16.msrb.mxu2 %v10666_v10  ;;  %v10602_v47 = vor.u32 %v13882_v50, %v10599_v30  ;;  %v10565_v10 = vld [vmem:[%s22336_s3 + $0xd8] sm:$0xf]  ;;  %v10570_v12 = vor.u32 %v13874_v11, %v10567_v33 }
 0x279   :  { %3725 = vmatmul.bf16.vlgmr.msra.gmra.mxu1 %v17645_v32  ;;  %3751 = vmatmul.bf16.vlgmr.msra.gmra.mxu3 %v17645_v32  ;;  %v10566_v59 = vor.u32 %v13878_v7, %v10565_v10  ;;  %v10821_v30 = vld [vmem:[%s22336_s3 + $0x2d8] sm:$0xf]  ;;  %v10503_v10 = vld [vmem:[%s22336_s3 + $0x78] sm:$0xf0] }
 0x27a   :  { %3769 = vmatpush.bf16.msrb.mxu1 %v10950_v5  ;;  %3795 = vmatpush.bf16.msrb.mxu3 %v10954_v53  ;;  %v13950_v5 = vld [vmem:[%s22336_s3 + $0x334] sm:$0xf0]  ;;  %v13946_v53 = vld [vmem:[%s22336_s3 + $0x31c] sm:$0xf] }
 0x27b   :  { %4901 = vperm.xlu1 %14617, %v4899_v18   ;;  %v10854_v0 = vor.u32 %v13950_v5, %v10853_v38  ;;  %v10858_v50 = vor.u32 %v13946_v53, %v10855_v19  ;;  %v10789_v11 = vld [vmem:[%s22336_s3 + $0x298] sm:$0xf] }
 0x27c   :  { %3758 = vmatpush.bf16.msrb.mxu0 %v10630_v23  ;;  %3784 = vmatpush.bf16.msrb.mxu2 %v10634_v8  ;;  %v13870_v23 = vld [vmem:[%s22336_s3 + $0xb4] sm:$0xf0]  ;;  %v13866_v8 = vld [vmem:[%s22336_s3 + $0x9c] sm:$0xf] }
 0x27d   :  { %v10534_v45 = vor.u32 %v13870_v23, %v10533_v20  ;;  %v10538_v56 = vor.u32 %v13866_v8, %v10535_v17  ;;  %v13934_v33 = vld [vmem:[%s22336_s3 + $0x2b4] sm:$0xf0] }
 0x27e   :  { %3770 = vmatpush.bf16.msrb.mxu1 %v10918_v54  ;;  %3796 = vmatpush.bf16.msrb.mxu3 %v10922_v62  ;;  %v13942_v54 = vld [vmem:[%s22336_s3 + $0x2f4] sm:$0xf0]  ;;  %v13938_v62 = vld [vmem:[%s22336_s3 + $0x2dc] sm:$0xf]  ;;  %v10790_v20 = vor.u32 %v13934_v33, %v10789_v11 }
 0x27f   :  { %v10822_v18 = vor.u32 %v13942_v54, %v10821_v30  ;;  %v10826_v7 = vor.u32 %v13938_v62, %v10823_v57  ;;  %v10469_v53 = vld [vmem:[%s22336_s3 + $0x18] sm:$0xf] }
 0x280   :  { %3759 = vmatpush.bf16.msrb.mxu0 %v10598_v22  ;;  %3785 = vmatpush.bf16.msrb.mxu2 %v10602_v47  ;;  %v13862_v22 = vld [vmem:[%s22336_s3 + $0x74] sm:$0xf0]  ;;  %v13858_v47 = vld [vmem:[%s22336_s3 + $0x5c] sm:$0xf] }
 0x281   :  { %v10502_v38 = vor.u32 %v13862_v22, %v10501_v27  ;;  %v10506_v5 = vor.u32 %v13858_v47, %v10503_v10  ;;  %v13854_v19 = vld [vmem:[%s22336_s3 + $0x34] sm:$0xf0]  ;;  %v13914_v27 = vld [vmem:[%s22336_s3 + $0x21c] sm:$0xf]  ;;  %v11183_v10 = vld [vmem:[%s22336_s3 + $0x1c0] sm:$0xf] }
 0x282   :  { %3771 = vmatpush.bf16.msrb.mxu1 %v10886_v34  ;;  %3797 = vmatpush.bf16.msrb.mxu3 %v10890_v28  ;;  %v13930_v34 = vld [vmem:[%s22336_s3 + $0x29c] sm:$0xf]  ;;  %v10757_v8 = vld [vmem:[%s22336_s3 + $0x258] sm:$0xf]  ;;  %v10470_v30 = vor.u32 %v13854_v19, %v10469_v53  ;;  %v11153_v53 = vld [vmem:[%s22336_s3 + $0x1a0] sm:$0xf0] }
 0x283   :  { %v10791_v28 = vld [vmem:[%s22336_s3 + $0x2b8] sm:$0xf0]  ;;  %9085 = vperm.xlu1 %14617, %v9083_v51   ;;  %v13926_v17 = vld [vmem:[%s22336_s3 + $0x274] sm:$0xf0] }
 0x284   :  { %3760 = vmatpush.bf16.msrb.mxu0 %v10566_v59  ;;  %3786 = vmatpush.bf16.msrb.mxu2 %v10570_v12  ;;  %v13850_v59 = vld [vmem:[%s22336_s3 + $0x1c] sm:$0xf]  ;;  %v10794_v23 = vor.u32 %v13930_v34, %v10791_v28  ;;  %v10758_v62 = vor.u32 %v13926_v17, %v10757_v8  ;;  %v14027_v28 = vld [vmem:[%s22336_s3 + $0x19c] sm:$0xf0]  ;;  %v11441_v8 = vld [vmem:[%s22336_s3 + $0x3e0] sm:$0xf0] }
 0x285   :  { %v10471_v12 = vld [vmem:[%s22336_s3 + $0x38] sm:$0xf0] }
 0x286   :  { %3772 = vmatpush.bf16.msrb.mxu1 %v10854_v0  ;;  %3798 = vmatpush.bf16.msrb.mxu3 %v10858_v50  ;;  %v13922_v0 = vld [vmem:[%s22336_s3 + $0x25c] sm:$0xf]  ;;  %v10474_v54 = vor.u32 %v13850_v59, %v10471_v12  ;;  %v11439_v59 = vld [vmem:[%s22336_s3 + $0x3c0] sm:$0xf] }
 0x287   :  { %v10759_v50 = vld [vmem:[%s22336_s3 + $0x278] sm:$0xf0]  ;;  %v14099_v12 = vld [vmem:[%s22336_s3 + $0x3dc] sm:$0xf0] }
 0x288   :  { %3761 = vmatpush.bf16.msrb.mxu0 %v10534_v45  ;;  %3787 = vmatpush.bf16.msrb.mxu2 %v10538_v56  ;;  %v10762_v57 = vor.u32 %v13922_v0, %v10759_v50  ;;  %v10725_v45 = vld [vmem:[%s22336_s3 + $0x218] sm:$0xf]  ;;  %v10727_v51 = vld [vmem:[%s22336_s3 + $0x238] sm:$0xf0]  ;;  %v11119_v0 = vld [vmem:[%s22336_s3 + $0x140] sm:$0xf] }
 0x289   :  { %v13918_v56 = vld [vmem:[%s22336_s3 + $0x234] sm:$0xf0]  ;;  %v10730_v47 = vor.u32 %v13914_v27, %v10727_v51  ;;  %v14019_v50 = vld [vmem:[%s22336_s3 + $0x15c] sm:$0xf0] }
 0x28a   :  { %3773 = vmatpush.bf16.msrb.mxu1 %v10822_v18  ;;  %3799 = vmatpush.bf16.msrb.mxu3 %v10826_v7  ;;  %v10726_v22 = vor.u32 %v13918_v56, %v10725_v45  ;;  %v14035_v18 = vld [vmem:[%s22336_s3 + $0x1dc] sm:$0xf0]  ;;  %v14031_v7 = vld [vmem:[%s22336_s3 + $0x1c4] sm:$0xf] }
 0x28b   :  { %v11184_v11 = vor.u32 %v14035_v18, %v11183_v10  ;;  %v11121_v45 = vld [vmem:[%s22336_s3 + $0x160] sm:$0xf0]  ;;  %v11407_v27 = vld [vmem:[%s22336_s3 + $0x380] sm:$0xf] }
 0x28c   :  { %3762 = vmatpush.bf16.msrb.mxu0 %v10502_v38  ;;  %3788 = vmatpush.bf16.msrb.mxu2 %v10506_v5  ;;  %v14023_v38 = vld [vmem:[%s22336_s3 + $0x184] sm:$0xf]  ;;  %v14091_v51 = vld [vmem:[%s22336_s3 + $0x39c] sm:$0xf0] }
 0x28d   :  { %v11156_v19 = vor.u32 %v14023_v38, %v11153_v53  ;;  %v11408_v10 = vor.u32 %v14091_v51, %v11407_v27  ;;  %v11409_v18 = vld [vmem:[%s22336_s3 + $0x3a0] sm:$0xf0]  ;;  %v14083_v53 = vld [vmem:[%s22336_s3 + $0x35c] sm:$0xf0] }
 0x28e   :  { %3774 = vmatpush.bf16.msrb.mxu1 %v10790_v20  ;;  %3800 = vmatpush.bf16.msrb.mxu3 %v10794_v23  ;;  %v14095_v20 = vld [vmem:[%s22336_s3 + $0x3c4] sm:$0xf]  ;;  %v11440_v23 = vor.u32 %v14099_v12, %v11439_v59  ;;  %v11343_v27 = vld [vmem:[%s22336_s3 + $0x300] sm:$0xf] }
 0x28f   :  { %v11444_v17 = vor.u32 %v14095_v20, %v11441_v8  ;;  %v14079_v12 = vld [vmem:[%s22336_s3 + $0x344] sm:$0xf]  ;;  %v11055_v8 = vld [vmem:[%s22336_s3 + $0xc0] sm:$0xf] }
 0x290   :  { %3763 = vmatpush.bf16.msrb.mxu0 %v10470_v30  ;;  %3789 = vmatpush.bf16.msrb.mxu2 %v10474_v54  ;;  %v14015_v30 = vld [vmem:[%s22336_s3 + $0x144] sm:$0xf]  ;;  %v14075_v51 = vld [vmem:[%s22336_s3 + $0x31c] sm:$0xf0] }
 0x291   :  { %v11124_v56 = vor.u32 %v14015_v30, %v11121_v45  ;;  %v11377_v20 = vld [vmem:[%s22336_s3 + $0x360] sm:$0xf0] }
 0x292   :  { %3775 = vmatpush.bf16.msrb.mxu1 %v10758_v62  ;;  %3801 = vmatpush.bf16.msrb.mxu3 %v10762_v57  ;;  %v11120_v57 = vor.u32 %v14019_v50, %v11119_v0  ;;  %v13999_v0 = vld [vmem:[%s22336_s3 + $0xc4] sm:$0xf] }
 0x293   :  { %3764 = vmatmul.bf16.vlgmr.msrb.gmra.mxu0 %v17591_v55  ;;  %3790 = vmatmul.bf16.vlgmr.msrb.gmra.mxu2 %v17591_v55  ;;  %v11185_v55 = vld [vmem:[%s22336_s3 + $0x1e0] sm:$0xf0] }
 0x294   :  { %v11188_v33 = vor.u32 %v14031_v7, %v11185_v55  ;;  %4646 = vmatpush.bf16.msra.mxu0 %v11184_v11  ;;  %v11087_v11 = vld [vmem:[%s22336_s3 + $0x100] sm:$0xf]  ;;  %v11057_v45 = vld [vmem:[%s22336_s3 + $0xe0] sm:$0xf0] }
 0x295   :  { %v14011_v55 = vld [vmem:[%s22336_s3 + $0x11c] sm:$0xf0] }
 0x296   :  { %3776 = vmatpush.bf16.msrb.mxu1 %v10726_v22  ;;  %3802 = vmatpush.bf16.msrb.mxu3 %v10730_v47  ;;  %v14087_v22 = vld [vmem:[%s22336_s3 + $0x384] sm:$0xf] }
 0x297   :  { %4672 = vmatpush.bf16.msra.mxu2 %v11188_v33  ;;  %v11412_v7 = vor.u32 %v14087_v22, %v11409_v18  ;;  %v14007_v33 = vld [vmem:[%s22336_s3 + $0x104] sm:$0xf] }
 0x298   :  { %v14071_v22 = vld [vmem:[%s22336_s3 + $0x304] sm:$0xf] }
 0x299   :  { %3777 = vmatmul.bf16.vlgmr.msrb.gmra.mxu1 %v17645_v32  ;;  %3803 = vmatmul.bf16.vlgmr.msrb.gmra.mxu3 %v17645_v32  ;;  %v11151_v32 = vld [vmem:[%s22336_s3 + $0x180] sm:$0xf]  ;;  %v11345_v18 = vld [vmem:[%s22336_s3 + $0x320] sm:$0xf0] }
 0x29a   :  { %v11152_v5 = vor.u32 %v14027_v28, %v11151_v32  ;;  %4659 = vmatpush.bf16.msra.mxu1 %v11440_v23  ;;  %4685 = vmatpush.bf16.msra.mxu3 %v11444_v17  ;;  %v11088_v32 = vor.u32 %v14011_v55, %v11087_v11  ;;  %v11089_v28 = vld [vmem:[%s22336_s3 + $0x120] sm:$0xf0]  ;;  %v11380_v23 = vor.u32 %v14079_v12, %v11377_v20  ;;  %v14003_v17 = vld [vmem:[%s22336_s3 + $0xdc] sm:$0xf0] }
 0x29b   :  { %4673 = vmatpush.bf16.msra.mxu2 %v11156_v19  ;;  %v11092_v38 = vor.u32 %v14007_v33, %v11089_v28  ;;  %v11023_v11 = vld [vmem:[%s22336_s3 + $0x80] sm:$0xf]  ;;  %v11025_v28 = vld [vmem:[%s22336_s3 + $0xa0] sm:$0xf0] }
 0x29c   :  { %4647 = vmatpush.bf16.msra.mxu0 %v11152_v5  ;;  %v11375_v5 = vld [vmem:[%s22336_s3 + $0x340] sm:$0xf] }
 0x29d   :  { %v11376_v59 = vor.u32 %v14083_v53, %v11375_v5  ;;  %v13995_v55 = vld [vmem:[%s22336_s3 + $0x9c] sm:$0xf0] }
 0x29e   :  { %4660 = vmatpush.bf16.msra.mxu1 %v11408_v10  ;;  %4686 = vmatpush.bf16.msra.mxu3 %v11412_v7  ;;  %v11344_v10 = vor.u32 %v14075_v51, %v11343_v27  ;;  %v11348_v7 = vor.u32 %v14071_v22, %v11345_v18  ;;  %v11024_v33 = vor.u32 %v13995_v55, %v11023_v11  ;;  %v11311_v5 = vld [vmem:[%s22336_s3 + $0x2c0] sm:$0xf] }
 0x29f   :  { %4674 = vmatpush.bf16.msra.mxu2 %v11124_v56  ;;  %v11060_v56 = vor.u32 %v13999_v0, %v11057_v45  ;;  %v14067_v53 = vld [vmem:[%s22336_s3 + $0x2dc] sm:$0xf0]  ;;  %v10993_v45 = vld [vmem:[%s22336_s3 + $0x60] sm:$0xf0] }
 0x2a0   :  { %4648 = vmatpush.bf16.msra.mxu0 %v11120_v57  ;;  %v11056_v57 = vor.u32 %v14003_v17, %v11055_v8  ;;  %v11313_v8 = vld [vmem:[%s22336_s3 + $0x2e0] sm:$0xf0]  ;;  %v10991_v0 = vld [vmem:[%s22336_s3 + $0x40] sm:$0xf] }
 0x2a1   :  { %v11279_v51 = vld [vmem:[%s22336_s3 + $0x280] sm:$0xf] }
 0x2a2   :  { %4661 = vmatpush.bf16.msra.mxu1 %v11376_v59  ;;  %4687 = vmatpush.bf16.msra.mxu3 %v11380_v23  ;;  %v14063_v59 = vld [vmem:[%s22336_s3 + $0x2c4] sm:$0xf]  ;;  %v11312_v23 = vor.u32 %v14067_v53, %v11311_v5  ;;  %v14059_v22 = vld [vmem:[%s22336_s3 + $0x29c] sm:$0xf0]  ;;  %v11191_v5 = vld [vmem:[%s22336_s3 + $0x1c8] sm:$0xf] }
 0x2a3   :  { %4675 = vmatpush.bf16.msra.mxu2 %v11092_v38  ;;  %v11316_v17 = vor.u32 %v14063_v59, %v11313_v8  ;;  %v11280_v11 = vor.u32 %v14059_v22, %v11279_v51 }
 0x2a4   :  { %4649 = vmatpush.bf16.msra.mxu0 %v11088_v32  ;;  %v13991_v32 = vld [vmem:[%s22336_s3 + $0x84] sm:$0xf] }
 0x2a5   :  { %v11028_v38 = vor.u32 %v13991_v32, %v11025_v28  ;;  %v10959_v32 = vld [vmem:[%s22336_s3] sm:$0xf] }
 0x2a6   :  { %4662 = vmatpush.bf16.msra.mxu1 %v11344_v10  ;;  %4688 = vmatpush.bf16.msra.mxu3 %v11348_v7  ;;  %v14055_v10 = vld [vmem:[%s22336_s3 + $0x284] sm:$0xf]  ;;  %v13979_v28 = vld [vmem:[%s22336_s3 + $0x1c] sm:$0xf0] }
 0x2a7   :  { %4676 = vmatpush.bf16.msra.mxu2 %v11060_v56 }
 0x2a8   :  { %4650 = vmatpush.bf16.msra.mxu0 %v11056_v57 }
 0x2aa   :  { %4663 = vmatpush.bf16.msra.mxu1 %v11312_v23  ;;  %4689 = vmatpush.bf16.msra.mxu3 %v11316_v17 }
 0x2ab   :  { %4677 = vmatpush.bf16.msra.mxu2 %v11028_v38  ;;  %v10960_v38 = vor.u32 %v13979_v28, %v10959_v32 }
 0x2ac   :  { %4651 = vmatpush.bf16.msra.mxu0 %v11024_v33 }
 0x2ae   :  { %4664 = vmatpush.bf16.msra.mxu1 %v11280_v11  ;;  %v14024_v11 = vld [vmem:[%s22336_s3 + $0x18c] sm:$0xf] }
 0x2d0   :  { %v18014_v34 = vpop.f32.mrf.mxu0 }
 0x2d6   :  { %v18049_v54 = vpop.f32.mrf.mxu1  ;;  %v18051_v62 = vpop.f32.mrf.mxu2 }
 0x2d7   :  { %v3623_v12 = vadd.f32 %v18049_v54, %v18014_v34  ;;  %v13983_v34 = vld [vmem:[%s22336_s3 + $0x44] sm:$0xf] }
 0x2d8   :  { %v3611_v47 = vpop.f32.mrf.mxu0  ;;  %v10996_v27 = vor.u32 %v13983_v34, %v10993_v45  ;;  %v14047_v45 = vld [vmem:[%s22336_s3 + $0x244] sm:$0xf] }
 0x2d9   :  { %v3808_v18 = vadd.f32 %v3623_v12, %v15811_v26  ;;  %v13975_v26 = vld [vmem:[%s22336_s3 + $0x4] sm:$0xf]  ;;  %v14036_v12 = vld [vmem:[%s22336_s3 + $0x1e4] sm:$0xf0] }
 0x2da   :  { %4678 = vmatpush.bf16.msra.mxu2 %v10996_v27  ;;  %v11192_v17 = vor.u32 %v14036_v12, %v11191_v5  ;;  %v14096_v12 = vld [vmem:[%s22336_s3 + $0x3cc] sm:$0xf] }
 0x2db   :  { %v3816_v23 = vmul.f32 0.5, %v3808_v18  ;;  %v11159_v18 = vld [vmem:[%s22336_s3 + $0x188] sm:$0xf] }
 0x2dc   :  { %v18086_v19 = vpop.f32.mrf.mxu3 }
 0x2dd   :  { %v3649_v27 = vadd.f32 %v18086_v19, %v18051_v62  ;;  %v11161_v19 = vld [vmem:[%s22336_s3 + $0x1a8] sm:$0xf0] }
 0x2de   :  { %v3624_v50 = vpop.f32.mrf.mxu1  ;;  %v3637_v30 = vpop.f32.mrf.mxu2  ;;  %v11164_v28 = vor.u32 %v14024_v11, %v11161_v19  ;;  %v11095_v19 = vld [vmem:[%s22336_s3 + $0x108] sm:$0xf] }
 0x2df   :  { %v13987_v50 = vld [vmem:[%s22336_s3 + $0x5c] sm:$0xf0] }
 0x2e0   :  { %v3661_v47 = vpop.f32.mrf.mxu0  ;;  %v10992_v57 = vor.u32 %v13987_v50, %v10991_v0  ;;  %v11193_v0 = vld [vmem:[%s22336_s3 + $0x1e8] sm:$0xf0]  ;;  %v11247_v50 = vld [vmem:[%s22336_s3 + $0x240] sm:$0xf] }
 0x2e2   :  { %4652 = vmatpush.bf16.msra.mxu0 %v10992_v57  ;;  %v14051_v57 = vld [vmem:[%s22336_s3 + $0x25c] sm:$0xf0] }
 0x2e4   :  { %v3650_v20 = vpop.f32.mrf.mxu3 }
 0x2e5   :  { %v14032_v20 = vld [vmem:[%s22336_s3 + $0x1cc] sm:$0xf] }
 0x2e6   :  { %v3674_v54 = vpop.f32.mrf.mxu1  ;;  %v3687_v30 = vpop.f32.mrf.mxu2  ;;  %4653 = vmatpush.bf16.msra.mxu0 %v10960_v38  ;;  %v11217_v38 = vld [vmem:[%s22336_s3 + $0x220] sm:$0xf0] }
 0x2e7   :  { %v3675_v56 = vadd.f32 %v3674_v54, %v3661_v47  ;;  %v11281_v47 = vld [vmem:[%s22336_s3 + $0x2a0] sm:$0xf0]  ;;  %v11196_v54 = vor.u32 %v14032_v20, %v11193_v0  ;;  %v3809_v20 = vadd.f32 %v3649_v27, %v15814_v31  ;;  %v11127_v0 = vld [vmem:[%s22336_s3 + $0x148] sm:$0xf]  ;;  %v14016_v31 = vld [vmem:[%s22336_s3 + $0x14c] sm:$0xf] }
 0x2e8   :  { %v3663_v7 = vpop.f32.mrf.mxu0  ;;  %v11284_v33 = vor.u32 %v14055_v10, %v11281_v47 }
 0x2e9   :  { %v3810_v55 = vadd.f32 %v3675_v56, %v15869_v61  ;;  %v10961_v61 = vld [vmem:[%s22336_s3 + $0x20] sm:$0xf0]  ;;  %v14028_v7 = vld [vmem:[%s22336_s3 + $0x1a4] sm:$0xf0] }
 0x2ea   :  { %4690 = vmatpush.bf16.msra.mxu3 %v11284_v33  ;;  %v10964_v59 = vor.u32 %v13975_v26, %v10961_v61  ;;  %v11249_v56 = vld [vmem:[%s22336_s3 + $0x260] sm:$0xf0]  ;;  %4698 = vmatpush.bf16.msrb.mxu0 %v11192_v17  ;;  %v11160_v62 = vor.u32 %v14028_v7, %v11159_v18  ;;  %v14043_v33 = vld [vmem:[%s22336_s3 + $0x21c] sm:$0xf0]  ;;  %v11447_v61 = vld [vmem:[%s22336_s3 + $0x3c8] sm:$0xf] }
 0x2eb   :  { %v3824_v53 = vmul.f32 0.5, %v3810_v55  ;;  %v11252_v10 = vor.u32 %v14047_v45, %v11249_v56  ;;  %v11215_v55 = vld [vmem:[%s22336_s3 + $0x200] sm:$0xf]  ;;  %v11449_v17 = vld [vmem:[%s22336_s3 + $0x3e8] sm:$0xf0]  ;;  %v3817_v7 = vmul.f32 0.5, %v3809_v20 }
 0x2ec   :  { %v3700_v8 = vpop.f32.mrf.mxu3  ;;  %4679 = vmatpush.bf16.msra.mxu2 %v10964_v59  ;;  %v11216_v26 = vor.u32 %v14043_v33, %v11215_v55  ;;  %v14100_v59 = vld [vmem:[%s22336_s3 + $0x3e4] sm:$0xf0]  ;;  %v11129_v45 = vld [vmem:[%s22336_s3 + $0x168] sm:$0xf0] }
 0x2ed   :  { %14659 = vtanh.f32 %v3824_v53  ;;  %v3701_v34 = vadd.f32 %v3700_v8, %v3687_v30  ;;  %v11248_v30 = vor.u32 %v14051_v57, %v11247_v50  ;;  %v11448_v8 = vor.u32 %v14100_v59, %v11447_v61  ;;  %v14020_v50 = vld [vmem:[%s22336_s3 + $0x164] sm:$0xf0]  ;;  %v11417_v18 = vld [vmem:[%s22336_s3 + $0x3a8] sm:$0xf0] }
 0x2ee   :  { %v3676_v51 = vpop.f32.mrf.mxu1  ;;  %v3689_v22 = vpop.f32.mrf.mxu2  ;;  %4691 = vmatpush.bf16.msra.mxu3 %v11252_v10  ;;  %4699 = vmatpush.bf16.msrb.mxu0 %v11160_v62  ;;  %v11128_v57 = vor.u32 %v14020_v50, %v11127_v0  ;;  %v14012_v55 = vld [vmem:[%s22336_s3 + $0x124] sm:$0xf0]  ;;  %v14080_v20 = vld [vmem:[%s22336_s3 + $0x34c] sm:$0xf] }
 0x2ef   :  { %v3811_v47 = vadd.f32 %v3701_v34, %v15880_v2  ;;  %4665 = vmatpush.bf16.msra.mxu1 %v11248_v30  ;;  %v14039_v2 = vld [vmem:[%s22336_s3 + $0x204] sm:$0xf]  ;;  %v11132_v51 = vor.u32 %v14016_v31, %v11129_v45  ;;  %v11415_v22 = vld [vmem:[%s22336_s3 + $0x388] sm:$0xf] }
 0x2f0   :  { %4724 = vmatpush.bf16.msrb.mxu2 %v11196_v54  ;;  %v3713_v32 = vpop.f32.mrf.mxu0  ;;  %v11220_v53 = vor.u32 %v14039_v2, %v11217_v38  ;;  %v11452_v54 = vor.u32 %v14096_v12, %v11449_v17  ;;  %v14092_v30 = vld [vmem:[%s22336_s3 + $0x3a4] sm:$0xf0]  ;;  %v11097_v2 = vld [vmem:[%s22336_s3 + $0x128] sm:$0xf0] }
 0x2f1   :  { %v3825_v5 = vmul.f32 0.5, %v3811_v47  ;;  %v11416_v10 = vor.u32 %v14092_v30, %v11415_v22  ;;  %v11383_v59 = vld [vmem:[%s22336_s3 + $0x348] sm:$0xf] }
 0x2f2   :  { %4692 = vmatpush.bf16.msra.mxu3 %v11220_v53  ;;  %4700 = vmatpush.bf16.msrb.mxu0 %v11128_v57  ;;  %v14084_v12 = vld [vmem:[%s22336_s3 + $0x364] sm:$0xf0] }
 0x2f3   :  { %v14660_v34 = vpop.eup %14659  ;;  %14661 = vtanh.f32 %v3825_v5  ;;  %4666 = vmatpush.bf16.msra.mxu1 %v11216_v26  ;;  %v14008_v26 = vld [vmem:[%s22336_s3 + $0x10c] sm:$0xf]  ;;  %v11384_v17 = vor.u32 %v14084_v12, %v11383_v59  ;;  %v11063_v57 = vld [vmem:[%s22336_s3 + $0xc8] sm:$0xf]  ;;  %v18338_v12 = vpop.permute.xlu1 %3855 }
 0x2f4   :  { %4725 = vmatpush.bf16.msrb.mxu2 %v11164_v28  ;;  %14663 = vtanh.f32 %v3816_v23  ;;  %v3828_v56 = vmul.f32 0.5, %v14660_v34  ;;  %v3702_v27 = vpop.f32.mrf.mxu3  ;;  %v14088_v23 = vld [vmem:[%s22336_s3 + $0x38c] sm:$0xf]  ;;  %v11096_v28 = vor.u32 %v14012_v55, %v11095_v19  ;;  %v11100_v53 = vor.u32 %v14008_v26, %v11097_v2  ;;  %v14004_v31 = vld [vmem:[%s22336_s3 + $0xe4] sm:$0xf0] }
 0x2f5   :  { %v11420_v62 = vor.u32 %v14088_v23, %v11417_v18  ;;  %14665 = vtanh.f32 %v3817_v7  ;;  %v11064_v45 = vor.u32 %v14004_v31, %v11063_v57  ;;  %v11351_v22 = vld [vmem:[%s22336_s3 + $0x308] sm:$0xf]  ;;  %v14072_v7 = vld [vmem:[%s22336_s3 + $0x30c] sm:$0xf]  ;;  %vm3857_vm9 = vcmp.eq.s32.totalorder %v18338_v12, 1 }
 0x2f6   :  { %4737 = vmatpush.bf16.msrb.mxu3 %v11452_v54  ;;  %v3830_v11 = vadd.f32 0.5, %v3828_v56  ;;  %v3739_v47 = vpop.f32.mrf.mxu2  ;;  %v3726_v33 = vpop.f32.mrf.mxu1  ;;  %4701 = vmatpush.bf16.msrb.mxu0 %v11096_v28  ;;  %v14000_v56 = vld [vmem:[%s22336_s3 + $0xcc] sm:$0xf]  ;;  %v14076_v30 = vld [vmem:[%s22336_s3 + $0x324] sm:$0xf0] }
 0x2f7   :  { %4711 = vmatpush.bf16.msrb.mxu1 %v11448_v8  ;;  %v3727_v61 = vadd.f32 %v3726_v33, %v3713_v32  ;;  %v11385_v32 = vld [vmem:[%s22336_s3 + $0x368] sm:$0xf0]  ;;  %v11352_v18 = vor.u32 %v14076_v30, %v11351_v22  ;;  %v11031_v28 = vld [vmem:[%s22336_s3 + $0x88] sm:$0xf]  ;;  %v11425_v12 = vld [vmem:[%s22336_s3 + $0x3b0] sm:$0xf0] }
 0x2f8   :  { %4726 = vmatpush.bf16.msrb.mxu2 %v11132_v51  ;;  %v18283_v38 = vmul.f32 %v3830_v11, %v17523_v46  ;;  %v3715_v5 = vpop.f32.mrf.mxu0  ;;  %v11388_v54 = vor.u32 %v14080_v20, %v11385_v32  ;;  %v11353_v11 = vld [vmem:[%s22336_s3 + $0x328] sm:$0xf0]  ;;  %v13996_v26 = vld [vmem:[%s22336_s3 + $0xa4] sm:$0xf0] }
 0x2f9   :  { %v14662_v8 = vpop.eup %14661  ;;  %v3812_v34 = vadd.f32 %v3727_v61, %v16188_v13  ;;  %v11065_v13 = vld [vmem:[%s22336_s3 + $0xe8] sm:$0xf0]  ;;  %v11356_v33 = vor.u32 %v14072_v7, %v11353_v11  ;;  %v11032_v5 = vor.u32 %v13996_v26, %v11031_v28  ;;  %v10999_v57 = vld [vmem:[%s22336_s3 + $0x48] sm:$0xf] }
 0x2fa   :  { %4738 = vmatpush.bf16.msrb.mxu3 %v11420_v62  ;;  %v14664_v0 = vpop.eup %14663  ;;  %v3829_v50 = vmul.f32 0.5, %v14662_v8  ;;  %v11068_v51 = vor.u32 %v14000_v56, %v11065_v13  ;;  %4702 = vmatpush.bf16.msrb.mxu0 %v11064_v45  ;;  %v13992_v2 = vld [vmem:[%s22336_s3 + $0x8c] sm:$0xf]  ;;  %v11319_v8 = vld [vmem:[%s22336_s3 + $0x2c8] sm:$0xf] }
 0x2fb   :  { %4712 = vmatpush.bf16.msrb.mxu1 %v11416_v10  ;;  %14667 = vtanh.f32 %v3812_v34  ;;  %v3820_v10 = vmul.f32 0.5, %v14664_v0  ;;  %v14064_v32 = vld [vmem:[%s22336_s3 + $0x2cc] sm:$0xf]  ;;  %v13988_v31 = vld [vmem:[%s22336_s3 + $0x64] sm:$0xf0] }
 0x2fc   :  { %4727 = vmatpush.bf16.msrb.mxu2 %v11100_v53  ;;  %v3831_v27 = vadd.f32 0.5, %v3829_v50  ;;  %v3752_v23 = vpop.f32.mrf.mxu3  ;;  %v14666_v53 = vpop.eup %14665  ;;  %v13984_v45 = vld [vmem:[%s22336_s3 + $0x4c] sm:$0xf]  ;;  %v11287_v30 = vld [vmem:[%s22336_s3 + $0x288] sm:$0xf] }
 0x2fd   :  { %v3753_v19 = vadd.f32 %v3752_v23, %v3739_v47  ;;  %v11033_v47 = vld [vmem:[%s22336_s3 + $0xa8] sm:$0xf0]  ;;  %v3822_v0 = vadd.f32 0.5, %v3820_v10  ;;  %v3821_v56 = vmul.f32 0.5, %v14666_v53  ;;  %v14060_v10 = vld [vmem:[%s22336_s3 + $0x2a4] sm:$0xf0] }
 0x2fe   :  { %4739 = vmatpush.bf16.msrb.mxu3 %v11388_v54  ;;  %v18323_v62 = vmul.f32 %v3831_v27, %v17547_v52  ;;  %v3741_v55 = vpop.f32.mrf.mxu2  ;;  %v3728_v61 = vpop.f32.mrf.mxu1  ;;  %v11036_v20 = vor.u32 %v13992_v2, %v11033_v47  ;;  %4703 = vmatpush.bf16.msrb.mxu0 %v11032_v5  ;;  %v11000_v27 = vor.u32 %v13988_v31, %v10999_v57  ;;  %v14056_v23 = vld [vmem:[%s22336_s3 + $0x28c] sm:$0xf]  ;;  %v13980_v28 = vld [vmem:[%s22336_s3 + $0x24] sm:$0xf0] }
 0x2ff   :  { %4713 = vmatpush.bf16.msrb.mxu1 %v11384_v17  ;;  %v3813_v59 = vadd.f32 %v3753_v19, %v16191_v15  ;;  %v14068_v17 = vld [vmem:[%s22336_s3 + $0x2e4] sm:$0xf0]  ;;  %v11321_v15 = vld [vmem:[%s22336_s3 + $0x2e8] sm:$0xf0]  ;;  %v11288_v11 = vor.u32 %v14060_v10, %v11287_v30  ;;  %v3823_v26 = vadd.f32 0.5, %v3821_v56 }
 0x300   :  { %4728 = vmatpush.bf16.msrb.mxu2 %v11068_v51  ;;  %v11320_v50 = vor.u32 %v14068_v17, %v11319_v8  ;;  %v11324_v54 = vor.u32 %v14064_v32, %v11321_v15  ;;  %v11001_v51 = vld [vmem:[%s22336_s3 + $0x68] sm:$0xf0]  ;;  %v14052_v8 = vld [vmem:[%s22336_s3 + $0x264] sm:$0xf0] }
 0x301   :  { %v14668_v34 = vpop.eup %14667  ;;  %14669 = vtanh.f32 %v3813_v59  ;;  %v11004_v22 = vor.u32 %v13984_v45, %v11001_v51  ;;  %v11289_v19 = vld [vmem:[%s22336_s3 + $0x2a8] sm:$0xf0]  ;;  %v14044_v57 = vld [vmem:[%s22336_s3 + $0x224] sm:$0xf0] }
 0x302   :  { %4740 = vmatpush.bf16.msrb.mxu3 %v11356_v33  ;;  %v3844_v13 = vmul.f32 %v14668_v34, %v3822_v0  ;;  %4704 = vmatpush.bf16.msrb.mxu0 %v11000_v27  ;;  %v11292_v55 = vor.u32 %v14056_v23, %v11289_v19  ;;  %v10967_v33 = vld [vmem:[%s22336_s3 + $0x8] sm:$0xf]  ;;  %v10969_v61 = vld [vmem:[%s22336_s3 + $0x28] sm:$0xf0] }
 0x303   :  { %4714 = vmatpush.bf16.msrb.mxu1 %v11352_v18  ;;  %v10968_v2 = vor.u32 %v13980_v28, %v10967_v33  ;;  %v14048_v17 = vld [vmem:[%s22336_s3 + $0x24c] sm:$0xf] }
 0x304   :  { %4729 = vmatpush.bf16.msrb.mxu2 %v11036_v20  ;;  %v3846_v18 = vadd.f32 %v3844_v13, %v18283_v38  ;;  %v3754_v7 = vpop.f32.mrf.mxu3  ;;  %v13976_v38 = vld [vmem:[%s22336_s3 + $0xc] sm:$0xf]  ;;  %v11255_v20 = vld [vmem:[%s22336_s3 + $0x248] sm:$0xf] }
 0x305   :  { %v10972_v53 = vor.u32 %v13976_v38, %v10969_v61  ;;  %v11257_v32 = vld [vmem:[%s22336_s3 + $0x268] sm:$0xf0] }
 0x306   :  { %4741 = vmatpush.bf16.msrb.mxu3 %v11324_v54  ;;  %v18393_v5 = vsel %vm3857_vm9, %v3846_v18, %v17523_v46  ;;  %4705 = vmatpush.bf16.msrb.mxu0 %v10968_v2  ;;  %v11256_v46 = vor.u32 %v14052_v8, %v11255_v20  ;;  %v11223_v54 = vld [vmem:[%s22336_s3 + $0x208] sm:$0xf]  ;;  %v11225_v45 = vld [vmem:[%s22336_s3 + $0x228] sm:$0xf0]  ;;  %v11199_v2 = vld [vmem:[%s22336_s3 + $0x1d0] sm:$0xf] }
 0x307   :  { %4715 = vmatpush.bf16.msrb.mxu1 %v11320_v50  ;;  %v14670_v47 = vpop.eup %14669  ;;  %v11260_v50 = vor.u32 %v14048_v17, %v11257_v32  ;;  %v11224_v31 = vor.u32 %v14044_v57, %v11223_v54  ;;  %v11167_v32 = vld [vmem:[%s22336_s3 + $0x190] sm:$0xf] }
 0x308   :  { %4730 = vmatpush.bf16.msrb.mxu2 %v11004_v22  ;;  %v3845_v59 = vmul.f32 %v14670_v47, %v3823_v26  ;;  %v11455_v57 = vld [vmem:[%s22336_s3 + $0x3d0] sm:$0xf] }
 0x30a   :  { %4742 = vmatpush.bf16.msrb.mxu3 %v11292_v55  ;;  %v3847_v0 = vadd.f32 %v3845_v59, %v18323_v62  ;;  %v14040_v62 = vld [vmem:[%s22336_s3 + $0x20c] sm:$0xf] }
 0x30b   :  { %4716 = vmatpush.bf16.msrb.mxu1 %v11288_v11  ;;  %v11228_v56 = vor.u32 %v14040_v62, %v11225_v45  ;;  %v14097_v45 = vld [vmem:[%s22336_s3 + $0x3d4] sm:$0xf] }
 0x30c   :  { %4731 = vmatpush.bf16.msrb.mxu2 %v10972_v53  ;;  %v18411_v34 = vsel %vm3857_vm9, %v3847_v0, %v17547_v52 }
 0x30e   :  { %4743 = vmatpush.bf16.msrb.mxu3 %v11260_v50 }
 0x30f   :  { %4717 = vmatpush.bf16.msrb.mxu1 %v11256_v46 }
 0x310   :  { %v3765_v15 = vpop.f32.mrf.mxu0 }
 0x312   :  { %4744 = vmatpush.bf16.msrb.mxu3 %v11228_v56  ;;  %v11457_v56 = vld [vmem:[%s22336_s3 + $0x3f0] sm:$0xf0] }
 0x313   :  { %4718 = vmatpush.bf16.msrb.mxu1 %v11224_v31  ;;  %v14101_v31 = vld [vmem:[%s22336_s3 + $0x3ec] sm:$0xf0] }
 0x316   :  { %v3778_v52 = vpop.f32.mrf.mxu1  ;;  %v3791_v13 = vpop.f32.mrf.mxu2 }
 0x317   :  { %v3779_v27 = vadd.f32 %v3778_v52, %v3765_v15  ;;  %v11169_v15 = vld [vmem:[%s22336_s3 + $0x1b0] sm:$0xf0] }
 0x318   :  { %v3767_v51 = vpop.f32.mrf.mxu0 }
 0x319   :  { %v3814_v22 = vadd.f32 %v3779_v27, %v16200_v29  ;;  %v14037_v29 = vld [vmem:[%s22336_s3 + $0x1ec] sm:$0xf0] }
 0x31a   :  { %v11200_v59 = vor.u32 %v14037_v29, %v11199_v2  ;;  %v11135_v51 = vld [vmem:[%s22336_s3 + $0x150] sm:$0xf] }
 0x31b   :  { %v3834_v30 = vmul.f32 0.5, %v3814_v22  ;;  %v14021_v22 = vld [vmem:[%s22336_s3 + $0x16c] sm:$0xf0] }
 0x31c   :  { %v3804_v10 = vpop.f32.mrf.mxu3  ;;  %v11103_v2 = vld [vmem:[%s22336_s3 + $0x110] sm:$0xf] }
 0x31d   :  { %14671 = vtanh.f32 %v3834_v30  ;;  %v3805_v23 = vadd.f32 %v3804_v10, %v3791_v13  ;;  %v14017_v30 = vld [vmem:[%s22336_s3 + $0x154] sm:$0xf]  ;;  %v14013_v29 = vld [vmem:[%s22336_s3 + $0x12c] sm:$0xf0] }
 0x31e   :  { %v3780_v7 = vpop.f32.mrf.mxu1  ;;  %v3793_v11 = vpop.f32.mrf.mxu2  ;;  %14673 = vtanh.f32 %v3846_v18  ;;  %v11201_v18 = vld [vmem:[%s22336_s3 + $0x1f0] sm:$0xf0] }
 0x31f   :  { %v3815_v19 = vadd.f32 %v3805_v23, %v16205_v16  ;;  %v14033_v16 = vld [vmem:[%s22336_s3 + $0x1d4] sm:$0xf]  ;;  %v11456_v11 = vor.u32 %v14101_v31, %v11455_v57  ;;  %v11359_v31 = vld [vmem:[%s22336_s3 + $0x310] sm:$0xf] }
 0x320   :  { %v11204_v46 = vor.u32 %v14033_v16, %v11201_v18  ;;  %v11137_v10 = vld [vmem:[%s22336_s3 + $0x170] sm:$0xf0] }
 0x321   :  { %v3835_v55 = vmul.f32 0.5, %v3815_v19  ;;  %v11460_v19 = vor.u32 %v14097_v45, %v11457_v56  ;;  %v11105_v16 = vld [vmem:[%s22336_s3 + $0x130] sm:$0xf0]  ;;  %v14077_v45 = vld [vmem:[%s22336_s3 + $0x32c] sm:$0xf0] }
 0x322   :  { %v14073_v56 = vld [vmem:[%s22336_s3 + $0x314] sm:$0xf] }
 0x323   :  { %v14672_v33 = vpop.eup %14671  ;;  %14675 = vtanh.f32 %v3835_v55  ;;  %v11423_v55 = vld [vmem:[%s22336_s3 + $0x390] sm:$0xf] }
 0x324   :  { %v3838_v28 = vmul.f32 0.5, %v14672_v33  ;;  %v3806_v38 = vpop.f32.mrf.mxu3  ;;  %v14674_v61 = vpop.eup %14673  ;;  %14677 = vtanh.f32 %v3847_v0  ;;  %v14029_v0 = vld [vmem:[%s22336_s3 + $0x1ac] sm:$0xf0] }
 0x325   :  { %v11168_v13 = vor.u32 %v14029_v0, %v11167_v32  ;;  %v14093_v33 = vld [vmem:[%s22336_s3 + $0x3ac] sm:$0xf0]  ;;  %v11136_v38 = vor.u32 %v14021_v22, %v11135_v51 }
 0x326   :  { %v3840_v26 = vadd.f32 0.5, %v3838_v28  ;;  %v11424_v18 = vor.u32 %v14093_v33, %v11423_v55  ;;  %v11071_v0 = vld [vmem:[%s22336_s3 + $0xd0] sm:$0xf]  ;;  %v14065_v33 = vld [vmem:[%s22336_s3 + $0x2d4] sm:$0xf] }
 0x327   :  { %v11039_v51 = vld [vmem:[%s22336_s3 + $0x90] sm:$0xf] }
 0x328   :  { %v3850_v47 = vmul.f32 %v14674_v61, %v3840_v26  ;;  %v11140_v26 = vor.u32 %v14017_v30, %v11137_v10  ;;  %v14009_v61 = vld [vmem:[%s22336_s3 + $0x114] sm:$0xf]  ;;  %v13997_v22 = vld [vmem:[%s22336_s3 + $0xac] sm:$0xf0] }
 0x329   :  { %v14676_v53 = vpop.eup %14675  ;;  %v11108_v32 = vor.u32 %v14009_v61, %v11105_v16  ;;  %v13993_v30 = vld [vmem:[%s22336_s3 + $0x94] sm:$0xf]  ;;  %v14069_v55 = vld [vmem:[%s22336_s3 + $0x2ec] sm:$0xf0] }
 0x32a   :  { %v3858_v20 = vsel %vm3857_vm9, %v3850_v47, 0.0  ;;  %v18444_v8 = vsel %vm3857_vm9, %v3850_v47, %v17578_v14  ;;  %v3839_v17 = vmul.f32 0.5, %v14676_v53  ;;  %v14025_v14 = vld [vmem:[%s22336_s3 + $0x194] sm:$0xf]  ;;  %v14678_v62 = vpop.eup %14677  ;;  %v11391_v53 = vld [vmem:[%s22336_s3 + $0x350] sm:$0xf] }
 0x32b   :  { %10955 = vst [vmem:[%s22339_s5 + $0x20] sm:$0xff] %v3858_v20  ;;  %v18457_v50 = vpack.c.bf16 %v18444_v8, %v18444_v8  ;;  %v11172_v27 = vor.u32 %v14025_v14, %v11169_v15  ;;  %v14081_v20 = vld [vmem:[%s22336_s3 + $0x354] sm:$0xf]  ;;  %v14005_v14 = vld [vmem:[%s22336_s3 + $0xec] sm:$0xf0] }
 0x32c   :  { %v3841_v54 = vadd.f32 0.5, %v3839_v17  ;;  %v11393_v17 = vld [vmem:[%s22336_s3 + $0x370] sm:$0xf0] }
 0x32d   :  { %4654 = vmatmul.bf16.vlgmr.msra.gmra.mxu0 %v18457_v50  ;;  %4680 = vmatmul.bf16.vlgmr.msra.gmra.mxu2 %v18457_v50  ;;  %v14001_v15 = vld [vmem:[%s22336_s3 + $0xd4] sm:$0xf] }
 0x32e   :  { %v3851_v52 = vmul.f32 %v14678_v62, %v3841_v54  ;;  %4750 = vmatpush.bf16.msra.mxu0 %v11200_v59  ;;  %4776 = vmatpush.bf16.msra.mxu2 %v11204_v46  ;;  %v14085_v59 = vld [vmem:[%s22336_s3 + $0x36c] sm:$0xf0]  ;;  %v11104_v46 = vor.u32 %v14013_v29, %v11103_v2  ;;  %v11073_v54 = vld [vmem:[%s22336_s3 + $0xf0] sm:$0xf0]  ;;  %v11396_v62 = vor.u32 %v14081_v20, %v11393_v17 }
 0x32f   :  { %v11392_v57 = vor.u32 %v14085_v59, %v11391_v53  ;;  %v11041_v10 = vld [vmem:[%s22336_s3 + $0xb0] sm:$0xf0]  ;;  %v13989_v2 = vld [vmem:[%s22336_s3 + $0x6c] sm:$0xf0] }
 0x330   :  { %v3859_v23 = vsel %vm3857_vm9, %v3851_v52, 0.0  ;;  %v18496_v7 = vsel %vm3857_vm9, %v3851_v52, %v17632_v58  ;;  %v14089_v58 = vld [vmem:[%s22336_s3 + $0x394] sm:$0xf]  ;;  %v14061_v53 = vld [vmem:[%s22336_s3 + $0x2ac] sm:$0xf0] }
 0x331   :  { %10956 = vst [vmem:[%s22339_s5 + $0x28] sm:$0xff] %v3859_v23  ;;  %v18509_v28 = vpack.c.bf16 %v18496_v7, %v18496_v7  ;;  %v11428_v47 = vor.u32 %v14089_v58, %v11425_v12  ;;  %v11361_v52 = vld [vmem:[%s22336_s3 + $0x330] sm:$0xf0]  ;;  %v11360_v23 = vor.u32 %v14077_v45, %v11359_v31  ;;  %v11040_v12 = vor.u32 %v13997_v22, %v11039_v51  ;;  %v14034_v45 = vld [vmem:[%s22336_s3 + $0x1dc] sm:$0xf] }
 0x332   :  { %4751 = vmatpush.bf16.msra.mxu0 %v11168_v13  ;;  %4777 = vmatpush.bf16.msra.mxu2 %v11172_v27  ;;  %v11072_v13 = vor.u32 %v14005_v14, %v11071_v0  ;;  %v11076_v27 = vor.u32 %v14001_v15, %v11073_v54  ;;  %v11329_v58 = vld [vmem:[%s22336_s3 + $0x2f0] sm:$0xf0]  ;;  %v13981_v0 = vld [vmem:[%s22336_s3 + $0x2c] sm:$0xf0]  ;;  %v11207_v54 = vld [vmem:[%s22336_s3 + $0x1d8] sm:$0xf] }
 0x333   :  { %4667 = vmatmul.bf16.vlgmr.msra.gmra.mxu1 %v18509_v28  ;;  %4693 = vmatmul.bf16.vlgmr.msra.gmra.mxu3 %v18509_v28  ;;  %v13985_v29 = vld [vmem:[%s22336_s3 + $0x54] sm:$0xf] }
 0x334   :  { %4763 = vmatpush.bf16.msra.mxu1 %v11456_v11  ;;  %4789 = vmatpush.bf16.msra.mxu3 %v11460_v19  ;;  %v11364_v11 = vor.u32 %v14073_v56, %v11361_v52  ;;  %v11327_v19 = vld [vmem:[%s22336_s3 + $0x2d0] sm:$0xf]  ;;  %v11009_v61 = vld [vmem:[%s22336_s3 + $0x70] sm:$0xf0]  ;;  %v11209_v56 = vld [vmem:[%s22336_s3 + $0x1f8] sm:$0xf0] }
 0x335   :  { %v11328_v16 = vor.u32 %v14069_v55, %v11327_v19  ;;  %v14057_v59 = vld [vmem:[%s22336_s3 + $0x294] sm:$0xf]  ;;  %v11263_v52 = vld [vmem:[%s22336_s3 + $0x250] sm:$0xf]  ;;  %v14030_v19 = vld [vmem:[%s22336_s3 + $0x1b4] sm:$0xf0] }
 0x336   :  { %4752 = vmatpush.bf16.msra.mxu0 %v11136_v38  ;;  %4778 = vmatpush.bf16.msra.mxu2 %v11140_v26  ;;  %v11044_v38 = vor.u32 %v13993_v30, %v11041_v10  ;;  %v11007_v26 = vld [vmem:[%s22336_s3 + $0x50] sm:$0xf]  ;;  %v11297_v20 = vld [vmem:[%s22336_s3 + $0x2b0] sm:$0xf0]  ;;  %v14026_v55 = vld [vmem:[%s22336_s3 + $0x19c] sm:$0xf] }
 0x337   :  { %v11008_v17 = vor.u32 %v13989_v2, %v11007_v26  ;;  %v13977_v14 = vld [vmem:[%s22336_s3 + $0x14] sm:$0xf]  ;;  %v11300_v31 = vor.u32 %v14057_v59, %v11297_v20  ;;  %v14045_v26 = vld [vmem:[%s22336_s3 + $0x22c] sm:$0xf0]  ;;  %v11143_v20 = vld [vmem:[%s22336_s3 + $0x158] sm:$0xf] }
 0x338   :  { %4764 = vmatpush.bf16.msra.mxu1 %v11424_v18  ;;  %4790 = vmatpush.bf16.msra.mxu3 %v11428_v47  ;;  %v11332_v18 = vor.u32 %v14065_v33, %v11329_v58  ;;  %v11295_v47 = vld [vmem:[%s22336_s3 + $0x290] sm:$0xf]  ;;  %v10977_v15 = vld [vmem:[%s22336_s3 + $0x30] sm:$0xf0] }
 0x339   :  { %v11265_v51 = vld [vmem:[%s22336_s3 + $0x270] sm:$0xf0]  ;;  %v10980_v30 = vor.u32 %v13977_v14, %v10977_v15  ;;  %v11145_v14 = vld [vmem:[%s22336_s3 + $0x178] sm:$0xf0] }
 0x33a   :  { %4753 = vmatpush.bf16.msra.mxu0 %v11104_v46  ;;  %4779 = vmatpush.bf16.msra.mxu2 %v11108_v32  ;;  %v11012_v46 = vor.u32 %v13985_v29, %v11009_v61  ;;  %v10975_v32 = vld [vmem:[%s22336_s3 + $0x10] sm:$0xf]  ;;  %v14041_v2 = vld [vmem:[%s22336_s3 + $0x214] sm:$0xf]  ;;  %v11463_v61 = vld [vmem:[%s22336_s3 + $0x3d8] sm:$0xf] }
 0x33b   :  { %v10976_v22 = vor.u32 %v13981_v0, %v10975_v32  ;;  %v11233_v29 = vld [vmem:[%s22336_s3 + $0x230] sm:$0xf0]  ;;  %v14022_v32 = vld [vmem:[%s22336_s3 + $0x174] sm:$0xf0]  ;;  %v14018_v0 = vld [vmem:[%s22336_s3 + $0x15c] sm:$0xf] }
 0x33c   :  { %4765 = vmatpush.bf16.msra.mxu1 %v11392_v57  ;;  %4791 = vmatpush.bf16.msra.mxu3 %v11396_v62  ;;  %v14038_v57 = vld [vmem:[%s22336_s3 + $0x1f4] sm:$0xf0]  ;;  %v11296_v62 = vor.u32 %v14061_v53, %v11295_v47  ;;  %v11465_v47 = vld [vmem:[%s22336_s3 + $0x3f8] sm:$0xf0] }
 0x33d   :  { %4706 = vmatmul.bf16.vlgmr.msrb.gmra.mxu0 %v18457_v50  ;;  %4732 = vmatmul.bf16.vlgmr.msrb.gmra.mxu2 %v18457_v50  ;;  %v11208_v10 = vor.u32 %v14038_v57, %v11207_v54  ;;  %v11431_v57 = vld [vmem:[%s22336_s3 + $0x398] sm:$0xf] }
 0x33e   :  { %4754 = vmatpush.bf16.msra.mxu0 %v11072_v13  ;;  %4780 = vmatpush.bf16.msra.mxu2 %v11076_v27  ;;  %v14053_v13 = vld [vmem:[%s22336_s3 + $0x26c] sm:$0xf0]  ;;  %v14049_v27 = vld [vmem:[%s22336_s3 + $0x254] sm:$0xf] }
 0x33f   :  { %v11264_v33 = vor.u32 %v14053_v13, %v11263_v52  ;;  %v11268_v58 = vor.u32 %v14049_v27, %v11265_v51  ;;  %v11148_v52 = vor.u32 %v14018_v0, %v11145_v14  ;;  %v11111_v13 = vld [vmem:[%s22336_s3 + $0x118] sm:$0xf]  ;;  %v14010_v51 = vld [vmem:[%s22336_s3 + $0x11c] sm:$0xf] }
 0x340   :  { %4766 = vmatpush.bf16.msra.mxu1 %v11360_v23  ;;  %4792 = vmatpush.bf16.msra.mxu3 %v11364_v11  ;;  %v11212_v23 = vor.u32 %v14034_v45, %v11209_v56  ;;  %v11175_v11 = vld [vmem:[%s22336_s3 + $0x198] sm:$0xf]  ;;  %v11433_v45 = vld [vmem:[%s22336_s3 + $0x3b8] sm:$0xf0]  ;;  %v11144_v56 = vor.u32 %v14022_v32, %v11143_v20 }
 0x341   :  { %v11176_v53 = vor.u32 %v14030_v19, %v11175_v11  ;;  %v14014_v27 = vld [vmem:[%s22336_s3 + $0x134] sm:$0xf0]  ;;  %v14082_v19 = vld [vmem:[%s22336_s3 + $0x35c] sm:$0xf] }
 0x342   :  { %4755 = vmatpush.bf16.msra.mxu0 %v11040_v12  ;;  %4781 = vmatpush.bf16.msra.mxu2 %v11044_v38  ;;  %v11177_v12 = vld [vmem:[%s22336_s3 + $0x1b8] sm:$0xf0]  ;;  %v11231_v38 = vld [vmem:[%s22336_s3 + $0x210] sm:$0xf]  ;;  %v14086_v11 = vld [vmem:[%s22336_s3 + $0x374] sm:$0xf0] }
 0x343   :  { %4719 = vmatmul.bf16.vlgmr.msrb.gmra.mxu1 %v18509_v28  ;;  %4745 = vmatmul.bf16.vlgmr.msrb.gmra.mxu3 %v18509_v28  ;;  %v11180_v59 = vor.u32 %v14026_v55, %v11177_v12  ;;  %v11401_v55 = vld [vmem:[%s22336_s3 + $0x378] sm:$0xf0]  ;;  %v11079_v12 = vld [vmem:[%s22336_s3 + $0xd8] sm:$0xf] }
 0x344   :  { %4767 = vmatpush.bf16.msra.mxu1 %v11328_v16  ;;  %4793 = vmatpush.bf16.msra.mxu3 %v11332_v18  ;;  %v14102_v16 = vld [vmem:[%s22336_s3 + $0x3f4] sm:$0xf0]  ;;  %v14098_v18 = vld [vmem:[%s22336_s3 + $0x3dc] sm:$0xf] }
 0x345   :  { %v11464_v15 = vor.u32 %v14102_v16, %v11463_v61  ;;  %v11468_v54 = vor.u32 %v14098_v18, %v11465_v47  ;;  %v11404_v61 = vor.u32 %v14082_v19, %v11401_v55  ;;  %v11367_v16 = vld [vmem:[%s22336_s3 + $0x318] sm:$0xf]  ;;  %v14074_v47 = vld [vmem:[%s22336_s3 + $0x31c] sm:$0xf] }
 0x346   :  { %4756 = vmatpush.bf16.msra.mxu0 %v11008_v17  ;;  %4782 = vmatpush.bf16.msra.mxu2 %v11012_v46  ;;  %v11232_v17 = vor.u32 %v14045_v26, %v11231_v38  ;;  %v11236_v46 = vor.u32 %v14041_v2, %v11233_v29  ;;  %v14006_v38 = vld [vmem:[%s22336_s3 + $0xf4] sm:$0xf0]  ;;  %v14002_v26 = vld [vmem:[%s22336_s3 + $0xdc] sm:$0xf] }
 0x347   :  { %v11081_v2 = vld [vmem:[%s22336_s3 + $0xf8] sm:$0xf0]  ;;  %v14078_v18 = vld [vmem:[%s22336_s3 + $0x334] sm:$0xf0] }
 0x348   :  { %4768 = vmatpush.bf16.msra.mxu1 %v11296_v62  ;;  %4794 = vmatpush.bf16.msra.mxu3 %v11300_v31  ;;  %v14094_v62 = vld [vmem:[%s22336_s3 + $0x3b4] sm:$0xf0]  ;;  %v14090_v31 = vld [vmem:[%s22336_s3 + $0x39c] sm:$0xf]  ;;  %v11084_v20 = vor.u32 %v14002_v26, %v11081_v2  ;;  %v11368_v14 = vor.u32 %v14078_v18, %v11367_v16 }
 0x349   :  { %v13994_v32 = vld [vmem:[%s22336_s3 + $0x9c] sm:$0xf]  ;;  %v14054_v16 = vld [vmem:[%s22336_s3 + $0x274] sm:$0xf0] }
 0x34a   :  { %4757 = vmatpush.bf16.msra.mxu0 %v10976_v22  ;;  %4783 = vmatpush.bf16.msra.mxu2 %v10980_v30  ;;  %v11113_v22 = vld [vmem:[%s22336_s3 + $0x138] sm:$0xf0]  ;;  %v11432_v30 = vor.u32 %v14094_v62, %v11431_v57  ;;  %v14070_v57 = vld [vmem:[%s22336_s3 + $0x2f4] sm:$0xf0] }
 0x34b   :  { %v11049_v0 = vld [vmem:[%s22336_s3 + $0xb8] sm:$0xf0] }
 0x34c   :  { %4769 = vmatpush.bf16.msra.mxu1 %v11264_v33  ;;  %4795 = vmatpush.bf16.msra.mxu3 %v11268_v58  ;;  %v11112_v33 = vor.u32 %v14014_v27, %v11111_v13  ;;  %v11116_v58 = vor.u32 %v14010_v51, %v11113_v22  ;;  %v14066_v62 = vld [vmem:[%s22336_s3 + $0x2dc] sm:$0xf]  ;;  %v13990_v13 = vld [vmem:[%s22336_s3 + $0x74] sm:$0xf0] }
 0x34d   :  { %4758 = vmatmul.bf16.vlgmr.msra.gmra.mxu0 %v18457_v50  ;;  %4784 = vmatmul.bf16.vlgmr.msra.gmra.mxu2 %v18457_v50  ;;  %v13986_v27 = vld [vmem:[%s22336_s3 + $0x5c] sm:$0xf] }
 0x34e   :  { %4802 = vmatpush.bf16.msrb.mxu0 %v11208_v10  ;;  %4828 = vmatpush.bf16.msrb.mxu2 %v11212_v23  ;;  %v11436_v10 = vor.u32 %v14090_v31, %v11433_v45  ;;  %v11399_v23 = vld [vmem:[%s22336_s3 + $0x358] sm:$0xf]  ;;  %v11337_v31 = vld [vmem:[%s22336_s3 + $0x2f8] sm:$0xf0] }
 0x34f   :  { %v11400_v29 = vor.u32 %v14086_v11, %v11399_v23  ;;  %v11017_v51 = vld [vmem:[%s22336_s3 + $0x78] sm:$0xf0]  ;;  %v14062_v23 = vld [vmem:[%s22336_s3 + $0x2b4] sm:$0xf0] }
 0x350   :  { %4770 = vmatpush.bf16.msra.mxu1 %v11232_v17  ;;  %4796 = vmatpush.bf16.msra.mxu3 %v11236_v46  ;;  %v11047_v17 = vld [vmem:[%s22336_s3 + $0x98] sm:$0xf]  ;;  %v14058_v11 = vld [vmem:[%s22336_s3 + $0x29c] sm:$0xf] }
 0x351   :  { %v13998_v46 = vld [vmem:[%s22336_s3 + $0xb4] sm:$0xf0]  ;;  %v11305_v19 = vld [vmem:[%s22336_s3 + $0x2b8] sm:$0xf0] }
 0x352   :  { %4803 = vmatpush.bf16.msrb.mxu0 %v11176_v53  ;;  %4829 = vmatpush.bf16.msrb.mxu2 %v11180_v59  ;;  %v11369_v53 = vld [vmem:[%s22336_s3 + $0x338] sm:$0xf0]  ;;  %v11080_v59 = vor.u32 %v14006_v38, %v11079_v12  ;;  %v11048_v45 = vor.u32 %v13998_v46, %v11047_v17  ;;  %v13982_v12 = vld [vmem:[%s22336_s3 + $0x34] sm:$0xf0] }
 0x353   :  { %4771 = vmatmul.bf16.vlgmr.msra.gmra.mxu1 %v18509_v28  ;;  %4797 = vmatmul.bf16.vlgmr.msra.gmra.mxu3 %v18509_v28  ;;  %v13978_v38 = vld [vmem:[%s22336_s3 + $0x1c] sm:$0xf]  ;;  %v11239_v46 = vld [vmem:[%s22336_s3 + $0x218] sm:$0xf] }
 0x354   :  { %4815 = vmatpush.bf16.msrb.mxu1 %v11464_v15  ;;  %4841 = vmatpush.bf16.msrb.mxu3 %v11468_v54  ;;  %v11372_v15 = vor.u32 %v14074_v47, %v11369_v53  ;;  %v11335_v54 = vld [vmem:[%s22336_s3 + $0x2d8] sm:$0xf]  ;;  %v10985_v26 = vld [vmem:[%s22336_s3 + $0x38] sm:$0xf0] }
 0x355   :  { %v11336_v22 = vor.u32 %v14070_v57, %v11335_v54  ;;  %v14050_v18 = vld [vmem:[%s22336_s3 + $0x25c] sm:$0xf]  ;;  %v11697_v57 = vld [vmem:[%s22336_s3 + $0x1c0] sm:$0xf] }
 0x356   :  { %4804 = vmatpush.bf16.msrb.mxu0 %v11144_v56  ;;  %4830 = vmatpush.bf16.msrb.mxu2 %v11148_v52  ;;  %v11052_v56 = vor.u32 %v13994_v32, %v11049_v0  ;;  %v11015_v52 = vld [vmem:[%s22336_s3 + $0x58] sm:$0xf]  ;;  %v11273_v47 = vld [vmem:[%s22336_s3 + $0x278] sm:$0xf0] }
 0x357   :  { %v11016_v55 = vor.u32 %v13990_v13, %v11015_v52  ;;  %v11276_v17 = vor.u32 %v14050_v18, %v11273_v47  ;;  %v14046_v32 = vld [vmem:[%s22336_s3 + $0x234] sm:$0xf0]  ;;  %v14042_v0 = vld [vmem:[%s22336_s3 + $0x21c] sm:$0xf]  ;;  %v14155_v13 = vld [vmem:[%s22336_s3 + $0x19c] sm:$0xf0] }
 0x358   :  { %4816 = vmatpush.bf16.msrb.mxu1 %v11432_v30  ;;  %4842 = vmatpush.bf16.msrb.mxu3 %v11436_v10  ;;  %v11340_v30 = vor.u32 %v14066_v62, %v11337_v31  ;;  %v11303_v10 = vld [vmem:[%s22336_s3 + $0x298] sm:$0xf]  ;;  %v14163_v62 = vld [vmem:[%s22336_s3 + $0x1dc] sm:$0xf0]  ;;  %v14159_v31 = vld [vmem:[%s22336_s3 + $0x1c4] sm:$0xf] }
 0x359   :  { %v11304_v2 = vor.u32 %v14062_v23, %v11303_v10  ;;  %v11953_v10 = vld [vmem:[%s22336_s3 + $0x3c0] sm:$0xf] }
 0x35a   :  { %4805 = vmatpush.bf16.msrb.mxu0 %v11112_v33  ;;  %4831 = vmatpush.bf16.msrb.mxu2 %v11116_v58  ;;  %v11020_v33 = vor.u32 %v13986_v27, %v11017_v51  ;;  %v10983_v58 = vld [vmem:[%s22336_s3 + $0x18] sm:$0xf]  ;;  %v14151_v27 = vld [vmem:[%s22336_s3 + $0x184] sm:$0xf]  ;;  %v14227_v23 = vld [vmem:[%s22336_s3 + $0x3dc] sm:$0xf0] }
 0x35b   :  { %v10984_v53 = vor.u32 %v13982_v12, %v10983_v58  ;;  %v11633_v58 = vld [vmem:[%s22336_s3 + $0x140] sm:$0xf] }
 0x35c   :  { %4817 = vmatpush.bf16.msrb.mxu1 %v11400_v29  ;;  %4843 = vmatpush.bf16.msrb.mxu3 %v11404_v61  ;;  %v11308_v29 = vor.u32 %v14058_v11, %v11305_v19  ;;  %v11271_v61 = vld [vmem:[%s22336_s3 + $0x258] sm:$0xf]  ;;  %v14223_v11 = vld [vmem:[%s22336_s3 + $0x3c4] sm:$0xf]  ;;  %v11954_v19 = vor.u32 %v14227_v23, %v11953_v10  ;;  %v14147_v12 = vld [vmem:[%s22336_s3 + $0x15c] sm:$0xf0] }
 0x35d   :  { %v11921_v18 = vld [vmem:[%s22336_s3 + $0x380] sm:$0xf] }
 0x35e   :  { %4806 = vmatpush.bf16.msrb.mxu0 %v11080_v59  ;;  %4832 = vmatpush.bf16.msrb.mxu2 %v11084_v20  ;;  %v10988_v59 = vor.u32 %v13978_v38, %v10985_v26  ;;  %v11272_v20 = vor.u32 %v14054_v16, %v11271_v61  ;;  %v14143_v38 = vld [vmem:[%s22336_s3 + $0x144] sm:$0xf]  ;;  %v14219_v47 = vld [vmem:[%s22336_s3 + $0x39c] sm:$0xf0] }
 0x35f   :  { %v11635_v61 = vld [vmem:[%s22336_s3 + $0x160] sm:$0xf0] }
 0x360   :  { %4818 = vmatpush.bf16.msrb.mxu1 %v11368_v14  ;;  %4844 = vmatpush.bf16.msrb.mxu3 %v11372_v15  ;;  %v11241_v14 = vld [vmem:[%s22336_s3 + $0x238] sm:$0xf0]  ;;  %v11240_v15 = vor.u32 %v14046_v32, %v11239_v46  ;;  %v11638_v16 = vor.u32 %v14143_v38, %v11635_v61  ;;  %v11601_v32 = vld [vmem:[%s22336_s3 + $0x100] sm:$0xf] }
 0x361   :  { %v11244_v54 = vor.u32 %v14042_v0, %v11241_v14  ;;  %v14139_v0 = vld [vmem:[%s22336_s3 + $0x11c] sm:$0xf0]  ;;  %v14135_v14 = vld [vmem:[%s22336_s3 + $0x104] sm:$0xf] }
 0x362   :  { %4807 = vmatpush.bf16.msrb.mxu0 %v11048_v45  ;;  %4833 = vmatpush.bf16.msrb.mxu2 %v11052_v56  ;;  %v11698_v45 = vor.u32 %v14163_v62, %v11697_v57  ;;  %v11889_v62 = vld [vmem:[%s22336_s3 + $0x340] sm:$0xf] }
 0x364   :  { %4819 = vmatpush.bf16.msrb.mxu1 %v11336_v22  ;;  %4845 = vmatpush.bf16.msrb.mxu3 %v11340_v30  ;;  %v11667_v22 = vld [vmem:[%s22336_s3 + $0x1a0] sm:$0xf0] }
 0x365   :  { %v11670_v30 = vor.u32 %v14151_v27, %v11667_v22  ;;  %v11569_v27 = vld [vmem:[%s22336_s3 + $0xc0] sm:$0xf]  ;;  %v14127_v22 = vld [vmem:[%s22336_s3 + $0xc4] sm:$0xf] }
 0x366   :  { %4808 = vmatpush.bf16.msrb.mxu0 %v11016_v55  ;;  %4834 = vmatpush.bf16.msrb.mxu2 %v11020_v33  ;;  %v11955_v55 = vld [vmem:[%s22336_s3 + $0x3e0] sm:$0xf0] }
 0x367   :  { %v11958_v33 = vor.u32 %v14223_v11, %v11955_v55  ;;  %v11571_v11 = vld [vmem:[%s22336_s3 + $0xe0] sm:$0xf0]  ;;  %v11857_v55 = vld [vmem:[%s22336_s3 + $0x300] sm:$0xf] }
 0x368   :  { %4820 = vmatpush.bf16.msrb.mxu1 %v11304_v2  ;;  %4846 = vmatpush.bf16.msrb.mxu3 %v11308_v29  ;;  %v11634_v29 = vor.u32 %v14147_v12, %v11633_v58  ;;  %v14199_v58 = vld [vmem:[%s22336_s3 + $0x304] sm:$0xf] }
 0x36a   :  { %4809 = vmatpush.bf16.msrb.mxu0 %v10984_v53  ;;  %4835 = vmatpush.bf16.msrb.mxu2 %v10988_v59  ;;  %v14215_v53 = vld [vmem:[%s22336_s3 + $0x384] sm:$0xf] }
 0x36c   :  { %4821 = vmatpush.bf16.msrb.mxu1 %v11272_v20  ;;  %4847 = vmatpush.bf16.msrb.mxu3 %v11276_v17  ;;  %v11922_v20 = vor.u32 %v14219_v47, %v11921_v18  ;;  %v11923_v17 = vld [vmem:[%s22336_s3 + $0x3a0] sm:$0xf0]  ;;  %v14123_v18 = vld [vmem:[%s22336_s3 + $0x9c] sm:$0xf0] }
 0x36d   :  { %4810 = vmatmul.bf16.vlgmr.msrb.gmra.mxu0 %v18457_v50  ;;  %4836 = vmatmul.bf16.vlgmr.msrb.gmra.mxu2 %v18457_v50  ;;  %v11699_v50 = vld [vmem:[%s22336_s3 + $0x1e0] sm:$0xf0]  ;;  %v11926_v46 = vor.u32 %v14215_v53, %v11923_v17  ;;  %v11825_v17 = vld [vmem:[%s22336_s3 + $0x2c0] sm:$0xf] }
 0x36e   :  { %v11702_v56 = vor.u32 %v14159_v31, %v11699_v50  ;;  %5692 = vmatpush.bf16.msra.mxu0 %v11698_v45  ;;  %v14211_v31 = vld [vmem:[%s22336_s3 + $0x35c] sm:$0xf0]  ;;  %v14119_v53 = vld [vmem:[%s22336_s3 + $0x84] sm:$0xf] }
 0x36f   :  { %v11890_v50 = vor.u32 %v14211_v31, %v11889_v62  ;;  %v11505_v62 = vld [vmem:[%s22336_s3 + $0x40] sm:$0xf] }
 0x370   :  { %4822 = vmatpush.bf16.msrb.mxu1 %v11240_v15  ;;  %4848 = vmatpush.bf16.msrb.mxu3 %v11244_v54  ;;  %v11602_v15 = vor.u32 %v14139_v0, %v11601_v32  ;;  %v11603_v54 = vld [vmem:[%s22336_s3 + $0x120] sm:$0xf0]  ;;  %v14115_v31 = vld [vmem:[%s22336_s3 + $0x5c] sm:$0xf0] }
 0x371   :  { %5718 = vmatpush.bf16.msra.mxu2 %v11702_v56  ;;  %v11606_v57 = vor.u32 %v14135_v14, %v11603_v54  ;;  %v14207_v56 = vld [vmem:[%s22336_s3 + $0x344] sm:$0xf] }
 0x372   :  { %v14191_v32 = vld [vmem:[%s22336_s3 + $0x2c4] sm:$0xf] }
 0x373   :  { %4823 = vmatmul.bf16.vlgmr.msrb.gmra.mxu1 %v18509_v28  ;;  %4849 = vmatmul.bf16.vlgmr.msrb.gmra.mxu3 %v18509_v28  ;;  %v11665_v28 = vld [vmem:[%s22336_s3 + $0x180] sm:$0xf]  ;;  %v11827_v54 = vld [vmem:[%s22336_s3 + $0x2e0] sm:$0xf0] }
 0x374   :  { %v11666_v51 = vor.u32 %v14155_v13, %v11665_v28  ;;  %5705 = vmatpush.bf16.msra.mxu1 %v11954_v19  ;;  %5731 = vmatpush.bf16.msra.mxu3 %v11958_v33  ;;  %v11891_v28 = vld [vmem:[%s22336_s3 + $0x360] sm:$0xf0]  ;;  %v11574_v19 = vor.u32 %v14127_v22, %v11571_v11  ;;  %v14203_v33 = vld [vmem:[%s22336_s3 + $0x31c] sm:$0xf0] }
 0x375   :  { %5719 = vmatpush.bf16.msra.mxu2 %v11670_v30  ;;  %v11894_v13 = vor.u32 %v14207_v56, %v11891_v28  ;;  %v11858_v38 = vor.u32 %v14203_v33, %v11857_v55  ;;  %v11506_v28 = vor.u32 %v14115_v31, %v11505_v62  ;;  %v14175_v62 = vld [vmem:[%s22336_s3 + $0x244] sm:$0xf] }
 0x376   :  { %5693 = vmatpush.bf16.msra.mxu0 %v11666_v51  ;;  %v14131_v51 = vld [vmem:[%s22336_s3 + $0xdc] sm:$0xf0]  ;;  %v11763_v31 = vld [vmem:[%s22336_s3 + $0x260] sm:$0xf0] }
 0x377   :  { %v11570_v23 = vor.u32 %v14131_v51, %v11569_v27  ;;  %v513_v27 = vadd.f32 %v15932_v37, %v15844_v43  ;;  %v11795_v37 = vld [vmem:[%s22336_s3 + $0x2a0] sm:$0xf0] }
 0x378   :  { %5706 = vmatpush.bf16.msra.mxu1 %v11922_v20  ;;  %5732 = vmatpush.bf16.msra.mxu3 %v11926_v46  ;;  %v14195_v46 = vld [vmem:[%s22336_s3 + $0x2dc] sm:$0xf0] }
 0x379   :  { %5720 = vmatpush.bf16.msra.mxu2 %v11638_v16  ;;  %v11537_v16 = vld [vmem:[%s22336_s3 + $0x80] sm:$0xf] }
 0x37a   :  { %5694 = vmatpush.bf16.msra.mxu0 %v11634_v29  ;;  %v11859_v29 = vld [vmem:[%s22336_s3 + $0x320] sm:$0xf0]  ;;  %v11538_v47 = vor.u32 %v14123_v18, %v11537_v16  ;;  %v11705_v16 = vld [vmem:[%s22336_s3 + $0x1c8] sm:$0xf] }
 0x37b   :  { %v11862_v61 = vor.u32 %v14199_v58, %v11859_v29  ;;  %v11473_v58 = vld [vmem:[%s22336_s3] sm:$0xf] }
 0x37c   :  { %5707 = vmatpush.bf16.msra.mxu1 %v11890_v50  ;;  %5733 = vmatpush.bf16.msra.mxu3 %v11894_v13  ;;  %v11507_v13 = vld [vmem:[%s22336_s3 + $0x60] sm:$0xf0] }
 0x37d   :  { %5721 = vmatpush.bf16.msra.mxu2 %v11606_v57  ;;  %v11830_v57 = vor.u32 %v14191_v32, %v11827_v54  ;;  %v11707_v32 = vld [vmem:[%s22336_s3 + $0x1e8] sm:$0xf0] }
 0x37e   :  { %5695 = vmatpush.bf16.msra.mxu0 %v11602_v15  ;;  %v11826_v15 = vor.u32 %v14195_v46, %v11825_v17 }
 0x380   :  { %5708 = vmatpush.bf16.msra.mxu1 %v11858_v38  ;;  %5734 = vmatpush.bf16.msra.mxu3 %v11862_v61  ;;  %v14103_v38 = vld [vmem:[%s22336_s3 + $0x4] sm:$0xf] }
 0x381   :  { %5722 = vmatpush.bf16.msra.mxu2 %v11574_v19  ;;  %v11475_v61 = vld [vmem:[%s22336_s3 + $0x20] sm:$0xf0] }
 0x382   :  { %5696 = vmatpush.bf16.msra.mxu0 %v11570_v23 }
 0x384   :  { %5709 = vmatpush.bf16.msra.mxu1 %v11826_v15  ;;  %5735 = vmatpush.bf16.msra.mxu3 %v11830_v57  ;;  %v14179_v57 = vld [vmem:[%s22336_s3 + $0x25c] sm:$0xf0] }
 0x386   :  { %5697 = vmatpush.bf16.msra.mxu0 %v11538_v47  ;;  %v11478_v47 = vor.u32 %v14103_v38, %v11475_v61  ;;  %v11963_v61 = vld [vmem:[%s22336_s3 + $0x3e8] sm:$0xf0] }
 0x38a   :  { %5698 = vmatpush.bf16.msra.mxu0 %v11506_v28  ;;  %v11673_v28 = vld [vmem:[%s22336_s3 + $0x188] sm:$0xf] }
 0x3aa   :  { %v18867_v52 = vpop.f32.mrf.mxu0 }
 0x3b0   :  { %v18902_v26 = vpop.f32.mrf.mxu1  ;;  %v18904_v2 = vpop.f32.mrf.mxu2 }
 0x3b1   :  { %v4669_v0 = vadd.f32 %v18902_v26, %v18867_v52  ;;  %v14111_v52 = vld [vmem:[%s22336_s3 + $0x44] sm:$0xf]  ;;  %v455_v26 = vadd.f32 %v15871_v63, %v15777_v9  ;;  %v14187_v63 = vld [vmem:[%s22336_s3 + $0x29c] sm:$0xf0] }
 0x3b2   :  { %v4657_v59 = vpop.f32.mrf.mxu0  ;;  %v11510_v22 = vor.u32 %v14111_v52, %v11507_v13  ;;  %v14156_v13 = vld [vmem:[%s22336_s3 + $0x1a4] sm:$0xf0] }
 0x3b3   :  { %v11539_v59 = vld [vmem:[%s22336_s3 + $0xa0] sm:$0xf0]  ;;  %v4854_v23 = vadd.f32 %v4669_v0, %v455_v26  ;;  %v11761_v0 = vld [vmem:[%s22336_s3 + $0x240] sm:$0xf] }
 0x3b4   :  { %v11542_v20 = vor.u32 %v14119_v53, %v11539_v59  ;;  %v14164_v53 = vld [vmem:[%s22336_s3 + $0x1e4] sm:$0xf0]  ;;  %v14160_v59 = vld [vmem:[%s22336_s3 + $0x1cc] sm:$0xf] }
 0x3b5   :  { %v11706_v46 = vor.u32 %v14164_v53, %v11705_v16  ;;  %v11710_v54 = vor.u32 %v14160_v59, %v11707_v32  ;;  %v11641_v16 = vld [vmem:[%s22336_s3 + $0x148] sm:$0xf] }
 0x3b6   :  { %v18939_v45 = vpop.f32.mrf.mxu3  ;;  %5723 = vmatpush.bf16.msra.mxu2 %v11542_v20  ;;  %v4862_v20 = vmul.f32 0.5, %v4854_v23 }
 0x3b7   :  { %v4695_v52 = vadd.f32 %v18939_v45, %v18904_v2  ;;  %v11674_v2 = vor.u32 %v14156_v13, %v11673_v28  ;;  %v11675_v45 = vld [vmem:[%s22336_s3 + $0x1a8] sm:$0xf0] }
 0x3b8   :  { %v4670_v30 = vpop.f32.mrf.mxu1  ;;  %v4683_v10 = vpop.f32.mrf.mxu2 }
 0x3b9   :  { %v11793_v30 = vld [vmem:[%s22336_s3 + $0x280] sm:$0xf]  ;;  %v14183_v10 = vld [vmem:[%s22336_s3 + $0x284] sm:$0xf] }
 0x3ba   :  { %v4707_v12 = vpop.f32.mrf.mxu0  ;;  %v11794_v19 = vor.u32 %v14187_v63, %v11793_v30  ;;  %5724 = vmatpush.bf16.msra.mxu2 %v11510_v22  ;;  %v11798_v33 = vor.u32 %v14183_v10, %v11795_v37  ;;  %v11729_v22 = vld [vmem:[%s22336_s3 + $0x200] sm:$0xf]  ;;  %v484_v63 = vadd.f32 %v15882_v3, %v15800_v4  ;;  %v11731_v37 = vld [vmem:[%s22336_s3 + $0x220] sm:$0xf0]  ;;  %v14228_v3 = vld [vmem:[%s22336_s3 + $0x3e4] sm:$0xf0] }
 0x3bb   :  { %v14171_v30 = vld [vmem:[%s22336_s3 + $0x21c] sm:$0xf0] }
 0x3bc   :  { %5710 = vmatpush.bf16.msra.mxu1 %v11794_v19  ;;  %5736 = vmatpush.bf16.msra.mxu3 %v11798_v33  ;;  %v14167_v19 = vld [vmem:[%s22336_s3 + $0x204] sm:$0xf]  ;;  %v4855_v38 = vadd.f32 %v4695_v52, %v484_v63 }
 0x3be   :  { %v4696_v14 = vpop.f32.mrf.mxu3  ;;  %5725 = vmatpush.bf16.msra.mxu2 %v11478_v47 }
 0x3bf   :  { %v542_v14 = vadd.f32 %v15937_v40, %v15847_v44 }
 0x3c0   :  { %v4720_v50 = vpop.f32.mrf.mxu1  ;;  %v4733_v56 = vpop.f32.mrf.mxu2 }
 0x3c1   :  { %v4721_v51 = vadd.f32 %v4720_v50, %v4707_v12  ;;  %v14107_v12 = vld [vmem:[%s22336_s3 + $0x1c] sm:$0xf0]  ;;  %v11762_v50 = vor.u32 %v14179_v57, %v11761_v0 }
 0x3c2   :  { %v4709_v11 = vpop.f32.mrf.mxu0  ;;  %v11474_v29 = vor.u32 %v14107_v12, %v11473_v58  ;;  %5770 = vmatpush.bf16.msrb.mxu2 %v11710_v54  ;;  %v11734_v58 = vor.u32 %v14167_v19, %v11731_v37  ;;  %v14224_v12 = vld [vmem:[%s22336_s3 + $0x3cc] sm:$0xf]  ;;  %v14220_v54 = vld [vmem:[%s22336_s3 + $0x3a4] sm:$0xf0] }
 0x3c3   :  { %v4856_v55 = vadd.f32 %v4721_v51, %v513_v27  ;;  %v14152_v27 = vld [vmem:[%s22336_s3 + $0x18c] sm:$0xf]  ;;  %5711 = vmatpush.bf16.msra.mxu1 %v11762_v50  ;;  %v11730_v11 = vor.u32 %v14171_v30, %v11729_v22  ;;  %v11966_v53 = vor.u32 %v14224_v12, %v11963_v61  ;;  %v11609_v50 = vld [vmem:[%s22336_s3 + $0x108] sm:$0xf] }
 0x3c4   :  { %5699 = vmatpush.bf16.msra.mxu0 %v11474_v29  ;;  %v11678_v23 = vor.u32 %v14152_v27, %v11675_v45  ;;  %v14136_v27 = vld [vmem:[%s22336_s3 + $0x10c] sm:$0xf]  ;;  %v11577_v12 = vld [vmem:[%s22336_s3 + $0xc8] sm:$0xf] }
 0x3c5   :  { %v4870_v18 = vmul.f32 0.5, %v4856_v55  ;;  %v11961_v55 = vld [vmem:[%s22336_s3 + $0x3c8] sm:$0xf]  ;;  %v14208_v19 = vld [vmem:[%s22336_s3 + $0x34c] sm:$0xf] }
 0x3c6   :  { %v4746_v17 = vpop.f32.mrf.mxu3  ;;  %v11962_v29 = vor.u32 %v14228_v3, %v11961_v55  ;;  %5771 = vmatpush.bf16.msrb.mxu2 %v11678_v23  ;;  %v11897_v23 = vld [vmem:[%s22336_s3 + $0x348] sm:$0xf]  ;;  %v14128_v61 = vld [vmem:[%s22336_s3 + $0xcc] sm:$0xf] }
 0x3c7   :  { %14679 = vtanh.f32 %v4870_v18  ;;  %v4747_v15 = vadd.f32 %v4746_v17, %v4733_v56  ;;  %v11766_v56 = vor.u32 %v14175_v62, %v11763_v31  ;;  %v14148_v18 = vld [vmem:[%s22336_s3 + $0x164] sm:$0xf0]  ;;  %v14144_v17 = vld [vmem:[%s22336_s3 + $0x14c] sm:$0xf]  ;;  %5712 = vmatpush.bf16.msra.mxu1 %v11730_v11  ;;  %v4863_v31 = vmul.f32 0.5, %v4855_v38 }
 0x3c8   :  { %v4722_v40 = vpop.f32.mrf.mxu1  ;;  %v4735_v26 = vpop.f32.mrf.mxu2  ;;  %5744 = vmatpush.bf16.msrb.mxu0 %v11706_v46  ;;  %v11642_v59 = vor.u32 %v14148_v18, %v11641_v16  ;;  %v11643_v46 = vld [vmem:[%s22336_s3 + $0x168] sm:$0xf0]  ;;  %v14212_v11 = vld [vmem:[%s22336_s3 + $0x364] sm:$0xf0] }
 0x3c9   :  { %v4857_v51 = vadd.f32 %v4747_v15, %v542_v14  ;;  %5737 = vmatpush.bf16.msra.mxu3 %v11766_v56  ;;  %v11646_v14 = vor.u32 %v14144_v17, %v11643_v46  ;;  %v11929_v15 = vld [vmem:[%s22336_s3 + $0x388] sm:$0xf]  ;;  %v11931_v62 = vld [vmem:[%s22336_s3 + $0x3a8] sm:$0xf0] }
 0x3ca   :  { %v4759_v10 = vpop.f32.mrf.mxu0  ;;  %v11930_v57 = vor.u32 %v14220_v54, %v11929_v15  ;;  %v14140_v56 = vld [vmem:[%s22336_s3 + $0x124] sm:$0xf0]  ;;  %v11579_v16 = vld [vmem:[%s22336_s3 + $0xe8] sm:$0xf0]  ;;  %v600_v15 = vadd.f32 %v16207_v39, %v16183_v6 }
 0x3cb   :  { %v4871_v33 = vmul.f32 0.5, %v4857_v51  ;;  %5757 = vmatpush.bf16.msrb.mxu1 %v11962_v29  ;;  %5772 = vmatpush.bf16.msrb.mxu2 %v11646_v14  ;;  %v11610_v13 = vor.u32 %v14140_v56, %v11609_v50  ;;  %v11611_v51 = vld [vmem:[%s22336_s3 + $0x128] sm:$0xf0]  ;;  %v14132_v38 = vld [vmem:[%s22336_s3 + $0xe4] sm:$0xf0] }
 0x3cc   :  { %5745 = vmatpush.bf16.msrb.mxu0 %v11674_v2  ;;  %v571_v2 = vadd.f32 %v16202_v35, %v16178_v1  ;;  %v11614_v63 = vor.u32 %v14136_v27, %v11611_v51  ;;  %v11898_v35 = vor.u32 %v14212_v11, %v11897_v23  ;;  %v11578_v29 = vor.u32 %v14132_v38, %v11577_v12  ;;  %v11867_v14 = vld [vmem:[%s22336_s3 + $0x328] sm:$0xf0]  ;;  %v11833_v27 = vld [vmem:[%s22336_s3 + $0x2c8] sm:$0xf] }
 0x3cd   :  { %v14680_v47 = vpop.eup %14679  ;;  %14681 = vtanh.f32 %v4871_v33  ;;  %5738 = vmatpush.bf16.msra.mxu3 %v11734_v58  ;;  %v14196_v51 = vld [vmem:[%s22336_s3 + $0x2e4] sm:$0xf0] }
 0x3ce   :  { %14683 = vtanh.f32 %v4862_v20  ;;  %v4874_v32 = vmul.f32 0.5, %v14680_v47  ;;  %v4748_v0 = vpop.f32.mrf.mxu3  ;;  %v14216_v20 = vld [vmem:[%s22336_s3 + $0x38c] sm:$0xf]  ;;  %v11582_v47 = vor.u32 %v14128_v61, %v11579_v16  ;;  %v11801_v38 = vld [vmem:[%s22336_s3 + $0x288] sm:$0xf] }
 0x3cf   :  { %v11934_v26 = vor.u32 %v14216_v20, %v11931_v62  ;;  %5758 = vmatpush.bf16.msrb.mxu1 %v11930_v57  ;;  %14685 = vtanh.f32 %v4863_v31  ;;  %5773 = vmatpush.bf16.msrb.mxu2 %v11614_v63  ;;  %v14200_v0 = vld [vmem:[%s22336_s3 + $0x30c] sm:$0xf]  ;;  %v11545_v31 = vld [vmem:[%s22336_s3 + $0x88] sm:$0xf] }
 0x3d0   :  { %v4876_v52 = vadd.f32 0.5, %v4874_v32  ;;  %v4785_v40 = vpop.f32.mrf.mxu2  ;;  %5746 = vmatpush.bf16.msrb.mxu0 %v11642_v59  ;;  %v4772_v28 = vpop.f32.mrf.mxu1  ;;  %v14204_v59 = vld [vmem:[%s22336_s3 + $0x324] sm:$0xf0]  ;;  %v11870_v62 = vor.u32 %v14200_v0, %v11867_v14  ;;  %v11835_v63 = vld [vmem:[%s22336_s3 + $0x2e8] sm:$0xf0] }
 0x3d1   :  { %5783 = vmatpush.bf16.msrb.mxu3 %v11966_v53  ;;  %v4773_v22 = vadd.f32 %v4772_v28, %v4759_v10  ;;  %v11899_v10 = vld [vmem:[%s22336_s3 + $0x368] sm:$0xf0]  ;;  %v11865_v53 = vld [vmem:[%s22336_s3 + $0x308] sm:$0xf] }
 0x3d2   :  { %v19142_v45 = vmul.f32 %v4876_v52, %v18393_v5  ;;  %v4761_v30 = vpop.f32.mrf.mxu0  ;;  %v11902_v3 = vor.u32 %v14208_v19, %v11899_v10  ;;  %v11866_v32 = vor.u32 %v14204_v59, %v11865_v53  ;;  %v14124_v52 = vld [vmem:[%s22336_s3 + $0xa4] sm:$0xf0]  ;;  %v14184_v61 = vld [vmem:[%s22336_s3 + $0x28c] sm:$0xf] }
 0x3d3   :  { %v14682_v37 = vpop.eup %14681  ;;  %v4858_v58 = vadd.f32 %v4773_v22, %v571_v2  ;;  %5759 = vmatpush.bf16.msrb.mxu1 %v11898_v35  ;;  %5774 = vmatpush.bf16.msrb.mxu2 %v11582_v47  ;;  %v11546_v50 = vor.u32 %v14124_v52, %v11545_v31  ;;  %v14192_v2 = vld [vmem:[%s22336_s3 + $0x2cc] sm:$0xf]  ;;  %v11834_v30 = vor.u32 %v14196_v51, %v11833_v27  ;;  %v11513_v19 = vld [vmem:[%s22336_s3 + $0x48] sm:$0xf] }
 0x3d4   :  { %v14684_v55 = vpop.eup %14683  ;;  %v4875_v33 = vmul.f32 0.5, %v14682_v37  ;;  %5747 = vmatpush.bf16.msrb.mxu0 %v11610_v13  ;;  %v11838_v11 = vor.u32 %v14192_v2, %v11835_v63  ;;  %v14116_v37 = vld [vmem:[%s22336_s3 + $0x64] sm:$0xf0]  ;;  %v14112_v35 = vld [vmem:[%s22336_s3 + $0x4c] sm:$0xf] }
 0x3d5   :  { %5784 = vmatpush.bf16.msrb.mxu3 %v11934_v26  ;;  %14687 = vtanh.f32 %v4858_v58  ;;  %v4866_v17 = vmul.f32 0.5, %v14684_v55  ;;  %v14120_v26 = vld [vmem:[%s22336_s3 + $0x8c] sm:$0xf]  ;;  %v14686_v56 = vpop.eup %14685  ;;  %v11769_v31 = vld [vmem:[%s22336_s3 + $0x248] sm:$0xf] }
 0x3d6   :  { %v4877_v18 = vadd.f32 0.5, %v4875_v33  ;;  %v4798_v46 = vpop.f32.mrf.mxu3  ;;  %v4867_v10 = vmul.f32 0.5, %v14686_v56  ;;  %v11514_v33 = vor.u32 %v14116_v37, %v11513_v19  ;;  %v11515_v58 = vld [vmem:[%s22336_s3 + $0x68] sm:$0xf0]  ;;  %v14180_v52 = vld [vmem:[%s22336_s3 + $0x264] sm:$0xf0] }
 0x3d7   :  { %v4799_v57 = vadd.f32 %v4798_v46, %v4785_v40  ;;  %v11547_v40 = vld [vmem:[%s22336_s3 + $0xa8] sm:$0xf0]  ;;  %v4868_v22 = vadd.f32 0.5, %v4866_v17  ;;  %5760 = vmatpush.bf16.msrb.mxu1 %v11866_v32  ;;  %v11518_v12 = vor.u32 %v14112_v35, %v11515_v58  ;;  %v11481_v17 = vld [vmem:[%s22336_s3 + $0x8] sm:$0xf] }
 0x3d8   :  { %v19183_v54 = vmul.f32 %v4877_v18, %v18411_v34  ;;  %v4787_v20 = vpop.f32.mrf.mxu2  ;;  %5748 = vmatpush.bf16.msrb.mxu0 %v11578_v29  ;;  %v4774_v39 = vpop.f32.mrf.mxu1  ;;  %v11550_v13 = vor.u32 %v14120_v26, %v11547_v40  ;;  %v14188_v29 = vld [vmem:[%s22336_s3 + $0x2a4] sm:$0xf0]  ;;  %v11803_v53 = vld [vmem:[%s22336_s3 + $0x2a8] sm:$0xf0]  ;;  %v4869_v32 = vadd.f32 0.5, %v4867_v10  ;;  %v658_v10 = vadd.f32 %v16211_v42, %v16197_v25 }
 0x3d9   :  { %5785 = vmatpush.bf16.msrb.mxu3 %v11902_v3  ;;  %v4859_v28 = vadd.f32 %v4799_v57, %v600_v15  ;;  %v19221_v3 = vpop.permute.xlu1 %4901  ;;  %v11802_v47 = vor.u32 %v14188_v29, %v11801_v38  ;;  %v11806_v59 = vor.u32 %v14184_v61, %v11803_v53  ;;  %v14108_v46 = vld [vmem:[%s22336_s3 + $0x24] sm:$0xf0]  ;;  %v11483_v14 = vld [vmem:[%s22336_s3 + $0x28] sm:$0xf0]  ;;  %v14165_v42 = vld [vmem:[%s22336_s3 + $0x1ec] sm:$0xf0] }
 0x3da   :  { %5775 = vmatpush.bf16.msrb.mxu2 %v11550_v13  ;;  %vm4903_vm10 = vcmp.eq.s32.totalorder %v19221_v3, 1  ;;  %v11482_v0 = vor.u32 %v14108_v46, %v11481_v17  ;;  %v14176_v26 = vld [vmem:[%s22336_s3 + $0x24c] sm:$0xf]  ;;  %v14172_v13 = vld [vmem:[%s22336_s3 + $0x224] sm:$0xf0] }
 0x3db   :  { %v14688_v23 = vpop.eup %14687  ;;  %14689 = vtanh.f32 %v4859_v28  ;;  %5761 = vmatpush.bf16.msrb.mxu1 %v11834_v30  ;;  %v11771_v39 = vld [vmem:[%s22336_s3 + $0x268] sm:$0xf0]  ;;  %v11737_v28 = vld [vmem:[%s22336_s3 + $0x208] sm:$0xf]  ;;  %v11939_v3 = vld [vmem:[%s22336_s3 + $0x3b0] sm:$0xf0] }
 0x3dc   :  { %5749 = vmatpush.bf16.msrb.mxu0 %v11546_v50  ;;  %v4890_v55 = vmul.f32 %v14688_v23, %v4868_v22  ;;  %v11774_v40 = vor.u32 %v14176_v26, %v11771_v39  ;;  %v11738_v51 = vor.u32 %v14172_v13, %v11737_v28  ;;  %v11739_v2 = vld [vmem:[%s22336_s3 + $0x228] sm:$0xf0]  ;;  %v629_v23 = vadd.f32 %v16209_v41, %v16194_v21 }
 0x3dd   :  { %5786 = vmatpush.bf16.msrb.mxu3 %v11870_v62 }
 0x3de   :  { %v4892_v16 = vadd.f32 %v4890_v55, %v19142_v45  ;;  %v4800_v18 = vpop.f32.mrf.mxu3  ;;  %v14104_v45 = vld [vmem:[%s22336_s3 + $0xc] sm:$0xf]  ;;  %5776 = vmatpush.bf16.msrb.mxu2 %v11518_v12 }
 0x3df   :  { %v11486_v20 = vor.u32 %v14104_v45, %v11483_v14  ;;  %5762 = vmatpush.bf16.msrb.mxu1 %v11802_v47  ;;  %v11713_v47 = vld [vmem:[%s22336_s3 + $0x1d0] sm:$0xf] }
 0x3e0   :  { %5750 = vmatpush.bf16.msrb.mxu0 %v11514_v33  ;;  %v19252_v15 = vsel %vm4903_vm10, %v4892_v16, %v18393_v5  ;;  %v11770_v5 = vor.u32 %v14180_v52, %v11769_v31  ;;  %v11714_v45 = vor.u32 %v14165_v42, %v11713_v47  ;;  %v11683_v52 = vld [vmem:[%s22336_s3 + $0x1b0] sm:$0xf0] }
 0x3e1   :  { %5787 = vmatpush.bf16.msrb.mxu3 %v11838_v11  ;;  %v14690_v57 = vpop.eup %14689  ;;  %v14209_v47 = vld [vmem:[%s22336_s3 + $0x354] sm:$0xf] }
 0x3e2   :  { %v4891_v62 = vmul.f32 %v14690_v57, %v4869_v32  ;;  %5777 = vmatpush.bf16.msrb.mxu2 %v11486_v20  ;;  %v11681_v20 = vld [vmem:[%s22336_s3 + $0x190] sm:$0xf]  ;;  %v11907_v42 = vld [vmem:[%s22336_s3 + $0x370] sm:$0xf0] }
 0x3e3   :  { %5763 = vmatpush.bf16.msrb.mxu1 %v11770_v5  ;;  %v11969_v5 = vld [vmem:[%s22336_s3 + $0x3d0] sm:$0xf] }
 0x3e4   :  { %5751 = vmatpush.bf16.msrb.mxu0 %v11482_v0  ;;  %v4893_v50 = vadd.f32 %v4891_v62, %v19183_v54  ;;  %v14168_v54 = vld [vmem:[%s22336_s3 + $0x20c] sm:$0xf]  ;;  %v14157_v62 = vld [vmem:[%s22336_s3 + $0x1ac] sm:$0xf0] }
 0x3e5   :  { %5788 = vmatpush.bf16.msrb.mxu3 %v11806_v59  ;;  %v11742_v22 = vor.u32 %v14168_v54, %v11739_v2  ;;  %v11715_v59 = vld [vmem:[%s22336_s3 + $0x1f0] sm:$0xf0]  ;;  %v11682_v13 = vor.u32 %v14157_v62, %v11681_v20  ;;  %v11649_v54 = vld [vmem:[%s22336_s3 + $0x150] sm:$0xf] }
 0x3e6   :  { %v19276_v27 = vsel %vm4903_vm10, %v4893_v50, %v18411_v34  ;;  %v14149_v2 = vld [vmem:[%s22336_s3 + $0x16c] sm:$0xf0]  ;;  %v14201_v62 = vld [vmem:[%s22336_s3 + $0x314] sm:$0xf] }
 0x3e7   :  { %5764 = vmatpush.bf16.msrb.mxu1 %v11738_v51  ;;  %v14205_v20 = vld [vmem:[%s22336_s3 + $0x32c] sm:$0xf0] }
 0x3e9   :  { %5789 = vmatpush.bf16.msrb.mxu3 %v11774_v40  ;;  %v14225_v40 = vld [vmem:[%s22336_s3 + $0x3d4] sm:$0xf] }
 0x3ea   :  { %v4811_v56 = vpop.f32.mrf.mxu0 }
 0x3ed   :  { %5790 = vmatpush.bf16.msrb.mxu3 %v11742_v22  ;;  %v14145_v22 = vld [vmem:[%s22336_s3 + $0x154] sm:$0xf] }
 0x3f0   :  { %v4824_v30 = vpop.f32.mrf.mxu1  ;;  %v4837_v63 = vpop.f32.mrf.mxu2 }
 0x3f1   :  { %v4825_v11 = vadd.f32 %v4824_v30, %v4811_v56  ;;  %v11971_v56 = vld [vmem:[%s22336_s3 + $0x3f0] sm:$0xf0] }
 0x3f2   :  { %v4813_v34 = vpop.f32.mrf.mxu0  ;;  %v11651_v30 = vld [vmem:[%s22336_s3 + $0x170] sm:$0xf0] }
 0x3f3   :  { %v4860_v19 = vadd.f32 %v4825_v11, %v629_v23  ;;  %v11974_v34 = vor.u32 %v14225_v40, %v11971_v56  ;;  %v11555_v40 = vld [vmem:[%s22336_s3 + $0xb0] sm:$0xf0] }
 0x3f5   :  { %v4880_v37 = vmul.f32 0.5, %v4860_v19  ;;  %v11937_v19 = vld [vmem:[%s22336_s3 + $0x390] sm:$0xf] }
 0x3f6   :  { %v4850_v35 = vpop.f32.mrf.mxu3 }
 0x3f7   :  { %14691 = vtanh.f32 %v4880_v37  ;;  %v4851_v55 = vadd.f32 %v4850_v35, %v4837_v63  ;;  %v14221_v37 = vld [vmem:[%s22336_s3 + $0x3ac] sm:$0xf0] }
 0x3f8   :  { %v4826_v33 = vpop.f32.mrf.mxu1  ;;  %v4839_v58 = vpop.f32.mrf.mxu2  ;;  %14693 = vtanh.f32 %v4892_v16  ;;  %v14161_v16 = vld [vmem:[%s22336_s3 + $0x1d4] sm:$0xf] }
 0x3f9   :  { %v4861_v12 = vadd.f32 %v4851_v55, %v658_v10  ;;  %v11718_v57 = vor.u32 %v14161_v16, %v11715_v59  ;;  %v11650_v10 = vor.u32 %v14149_v2, %v11649_v54  ;;  %v11654_v55 = vor.u32 %v14145_v22, %v11651_v30  ;;  %v11617_v33 = vld [vmem:[%s22336_s3 + $0x110] sm:$0xf]  ;;  %v14193_v54 = vld [vmem:[%s22336_s3 + $0x2d4] sm:$0xf] }
 0x3fa   :  { %v14141_v58 = vld [vmem:[%s22336_s3 + $0x12c] sm:$0xf0]  ;;  %v11843_v2 = vld [vmem:[%s22336_s3 + $0x2f0] sm:$0xf0] }
 0x3fb   :  { %v4881_v38 = vmul.f32 0.5, %v4861_v12  ;;  %v14137_v12 = vld [vmem:[%s22336_s3 + $0x114] sm:$0xf]  ;;  %v11585_v59 = vld [vmem:[%s22336_s3 + $0xd0] sm:$0xf] }
 0x3fd   :  { %v14692_v29 = vpop.eup %14691  ;;  %14695 = vtanh.f32 %v4881_v38  ;;  %v11619_v38 = vld [vmem:[%s22336_s3 + $0x130] sm:$0xf0] }
 0x3fe   :  { %v4884_v61 = vmul.f32 0.5, %v14692_v29  ;;  %v4852_v18 = vpop.f32.mrf.mxu3  ;;  %v14694_v53 = vpop.eup %14693  ;;  %14697 = vtanh.f32 %v4893_v50  ;;  %v14229_v50 = vld [vmem:[%s22336_s3 + $0x3ec] sm:$0xf0]  ;;  %v11938_v29 = vor.u32 %v14221_v37, %v11937_v19  ;;  %v11622_v16 = vor.u32 %v14137_v12, %v11619_v38  ;;  %v11523_v19 = vld [vmem:[%s22336_s3 + $0x70] sm:$0xf0] }
 0x3ff   :  { %v11970_v11 = vor.u32 %v14229_v50, %v11969_v5  ;;  %v11905_v18 = vld [vmem:[%s22336_s3 + $0x350] sm:$0xf]  ;;  %v14121_v50 = vld [vmem:[%s22336_s3 + $0x94] sm:$0xf] }
 0x400   :  { %v4886_v41 = vadd.f32 0.5, %v4884_v61  ;;  %v11553_v5 = vld [vmem:[%s22336_s3 + $0x90] sm:$0xf]  ;;  %v11558_v30 = vor.u32 %v14121_v50, %v11555_v40  ;;  %v11691_v50 = vld [vmem:[%s22336_s3 + $0x1b8] sm:$0xf0] }
 0x401   :  { %v11489_v38 = vld [vmem:[%s22336_s3 + $0x10] sm:$0xf] }
 0x402   :  { %v4896_v17 = vmul.f32 %v14694_v53, %v4886_v41  ;;  %v14213_v41 = vld [vmem:[%s22336_s3 + $0x36c] sm:$0xf0]  ;;  %v11618_v53 = vor.u32 %v14141_v58, %v11617_v33  ;;  %v11811_v33 = vld [vmem:[%s22336_s3 + $0x2b0] sm:$0xf0] }
 0x403   :  { %v14696_v46 = vpop.eup %14695  ;;  %v11745_v40 = vld [vmem:[%s22336_s3 + $0x210] sm:$0xf] }
 0x404   :  { %v4904_v32 = vsel %vm4903_vm10, %v4896_v17, 0.0  ;;  %v19305_v0 = vsel %vm4903_vm10, %v4896_v17, %v18444_v8  ;;  %v4885_v14 = vmul.f32 0.5, %v14696_v46  ;;  %v14153_v8 = vld [vmem:[%s22336_s3 + $0x194] sm:$0xf]  ;;  %v14698_v39 = vpop.eup %14697  ;;  %v14133_v17 = vld [vmem:[%s22336_s3 + $0xec] sm:$0xf0] }
 0x405   :  { %11469 = vst [vmem:[%s22339_s5 + $0x30] sm:$0xff] %v4904_v32  ;;  %v19318_v31 = vpack.c.bf16 %v19305_v0, %v19305_v0  ;;  %v11686_v51 = vor.u32 %v14153_v8, %v11683_v52  ;;  %v14129_v46 = vld [vmem:[%s22336_s3 + $0xd4] sm:$0xf]  ;;  %v11906_v32 = vor.u32 %v14213_v41, %v11905_v18  ;;  %v11586_v52 = vor.u32 %v14133_v17, %v11585_v59  ;;  %v11721_v41 = vld [vmem:[%s22336_s3 + $0x1d8] sm:$0xf] }
 0x406   :  { %v4887_v26 = vadd.f32 0.5, %v4885_v14  ;;  %v11910_v14 = vor.u32 %v14209_v47, %v11907_v42  ;;  %v11875_v8 = vld [vmem:[%s22336_s3 + $0x330] sm:$0xf0]  ;;  %v14166_v47 = vld [vmem:[%s22336_s3 + $0x1f4] sm:$0xf0] }
 0x407   :  { %5700 = vmatmul.bf16.vlgmr.msra.gmra.mxu0 %v19318_v31  ;;  %5726 = vmatmul.bf16.vlgmr.msra.gmra.mxu2 %v19318_v31  ;;  %v11491_v18 = vld [vmem:[%s22336_s3 + $0x30] sm:$0xf0]  ;;  %v11723_v59 = vld [vmem:[%s22336_s3 + $0x1f8] sm:$0xf0]  ;;  %v11777_v17 = vld [vmem:[%s22336_s3 + $0x250] sm:$0xf] }
 0x408   :  { %v4897_v28 = vmul.f32 %v14698_v39, %v4887_v26  ;;  %5796 = vmatpush.bf16.msra.mxu0 %v11714_v45  ;;  %5822 = vmatpush.bf16.msra.mxu2 %v11718_v57  ;;  %v11587_v45 = vld [vmem:[%s22336_s3 + $0xf0] sm:$0xf0]  ;;  %v11873_v57 = vld [vmem:[%s22336_s3 + $0x310] sm:$0xf] }
 0x409   :  { %v11590_v26 = vor.u32 %v14129_v46, %v11587_v45  ;;  %v14125_v39 = vld [vmem:[%s22336_s3 + $0xac] sm:$0xf0]  ;;  %v11874_v56 = vor.u32 %v14205_v20, %v11873_v57  ;;  %v14177_v45 = vld [vmem:[%s22336_s3 + $0x254] sm:$0xf]  ;;  %v11722_v20 = vor.u32 %v14166_v47, %v11721_v41  ;;  %v14142_v41 = vld [vmem:[%s22336_s3 + $0x134] sm:$0xf0] }
 0x40a   :  { %v4905_v63 = vsel %vm4903_vm10, %v4897_v28, 0.0  ;;  %v19357_v23 = vsel %vm4903_vm10, %v4897_v28, %v18496_v7  ;;  %v14217_v7 = vld [vmem:[%s22336_s3 + $0x394] sm:$0xf]  ;;  %v11878_v28 = vor.u32 %v14201_v62, %v11875_v8  ;;  %v11554_v22 = vor.u32 %v14125_v39, %v11553_v5  ;;  %v14181_v46 = vld [vmem:[%s22336_s3 + $0x26c] sm:$0xf0] }
 0x40b   :  { %11470 = vst [vmem:[%s22339_s5 + $0x38] sm:$0xff] %v4905_v63  ;;  %v19370_v35 = vpack.c.bf16 %v19357_v23, %v19357_v23  ;;  %v11942_v61 = vor.u32 %v14217_v7, %v11939_v3  ;;  %v11521_v63 = vld [vmem:[%s22336_s3 + $0x50] sm:$0xf]  ;;  %v11846_v7 = vor.u32 %v14193_v54, %v11843_v2  ;;  %v11689_v8 = vld [vmem:[%s22336_s3 + $0x198] sm:$0xf]  ;;  %v11778_v5 = vor.u32 %v14181_v46, %v11777_v17 }
 0x40c   :  { %5797 = vmatpush.bf16.msra.mxu0 %v11682_v13  ;;  %5823 = vmatpush.bf16.msra.mxu2 %v11686_v51  ;;  %v11841_v13 = vld [vmem:[%s22336_s3 + $0x2d0] sm:$0xf]  ;;  %v14230_v54 = vld [vmem:[%s22336_s3 + $0x3f4] sm:$0xf0]  ;;  %v14226_v2 = vld [vmem:[%s22336_s3 + $0x3dc] sm:$0xf] }
 0x40d   :  { %5713 = vmatmul.bf16.vlgmr.msra.gmra.mxu1 %v19370_v35  ;;  %5739 = vmatmul.bf16.vlgmr.msra.gmra.mxu3 %v19370_v35  ;;  %v14197_v51 = vld [vmem:[%s22336_s3 + $0x2ec] sm:$0xf0]  ;;  %v14138_v47 = vld [vmem:[%s22336_s3 + $0x11c] sm:$0xf]  ;;  %v11913_v17 = vld [vmem:[%s22336_s3 + $0x358] sm:$0xf] }
 0x40e   :  { %5809 = vmatpush.bf16.msra.mxu1 %v11970_v11  ;;  %5835 = vmatpush.bf16.msra.mxu3 %v11974_v34  ;;  %v14117_v11 = vld [vmem:[%s22336_s3 + $0x6c] sm:$0xf0]  ;;  %v14113_v34 = vld [vmem:[%s22336_s3 + $0x54] sm:$0xf]  ;;  %v11842_v37 = vor.u32 %v14197_v51, %v11841_v13  ;;  %v11977_v51 = vld [vmem:[%s22336_s3 + $0x3d8] sm:$0xf] }
 0x40f   :  { %v11809_v3 = vld [vmem:[%s22336_s3 + $0x290] sm:$0xf]  ;;  %v11522_v58 = vor.u32 %v14117_v11, %v11521_v63  ;;  %v11526_v12 = vor.u32 %v14113_v34, %v11523_v19  ;;  %v11747_v13 = vld [vmem:[%s22336_s3 + $0x230] sm:$0xf0]  ;;  %v11657_v11 = vld [vmem:[%s22336_s3 + $0x158] sm:$0xf] }
 0x410   :  { %5798 = vmatpush.bf16.msra.mxu0 %v11650_v10  ;;  %5824 = vmatpush.bf16.msra.mxu2 %v11654_v55  ;;  %v14189_v10 = vld [vmem:[%s22336_s3 + $0x2ac] sm:$0xf0]  ;;  %v14185_v55 = vld [vmem:[%s22336_s3 + $0x294] sm:$0xf] }
 0x411   :  { %v11810_v42 = vor.u32 %v14189_v10, %v11809_v3  ;;  %v11659_v3 = vld [vmem:[%s22336_s3 + $0x178] sm:$0xf0]  ;;  %v11978_v10 = vor.u32 %v14230_v54, %v11977_v51  ;;  %v11561_v54 = vld [vmem:[%s22336_s3 + $0x98] sm:$0xf] }
 0x412   :  { %5810 = vmatpush.bf16.msra.mxu1 %v11938_v29  ;;  %5836 = vmatpush.bf16.msra.mxu3 %v11942_v61  ;;  %v14109_v29 = vld [vmem:[%s22336_s3 + $0x2c] sm:$0xf0]  ;;  %v14105_v61 = vld [vmem:[%s22336_s3 + $0x14] sm:$0xf] }
 0x413   :  { %v11494_v57 = vor.u32 %v14105_v61, %v11491_v18  ;;  %v11625_v18 = vld [vmem:[%s22336_s3 + $0x118] sm:$0xf] }
 0x414   :  { %5799 = vmatpush.bf16.msra.mxu0 %v11618_v53  ;;  %5825 = vmatpush.bf16.msra.mxu2 %v11622_v16  ;;  %v11814_v53 = vor.u32 %v14185_v55, %v11811_v33  ;;  %v14162_v16 = vld [vmem:[%s22336_s3 + $0x1dc] sm:$0xf]  ;;  %v11945_v33 = vld [vmem:[%s22336_s3 + $0x398] sm:$0xf] }
 0x415   :  { %v11726_v62 = vor.u32 %v14162_v16, %v11723_v59 }
 0x416   :  { %5811 = vmatpush.bf16.msra.mxu1 %v11906_v32  ;;  %5837 = vmatpush.bf16.msra.mxu3 %v11910_v14  ;;  %v11779_v32 = vld [vmem:[%s22336_s3 + $0x270] sm:$0xf0]  ;;  %v11490_v14 = vor.u32 %v14109_v29, %v11489_v38  ;;  %v11947_v38 = vld [vmem:[%s22336_s3 + $0x3b8] sm:$0xf0] }
 0x417   :  { %5752 = vmatmul.bf16.vlgmr.msrb.gmra.mxu0 %v19318_v31  ;;  %5778 = vmatmul.bf16.vlgmr.msrb.gmra.mxu2 %v19318_v31  ;;  %v11782_v39 = vor.u32 %v14177_v45, %v11779_v32  ;;  %v14214_v45 = vld [vmem:[%s22336_s3 + $0x374] sm:$0xf0]  ;;  %v14210_v32 = vld [vmem:[%s22336_s3 + $0x35c] sm:$0xf] }
 0x418   :  { %5800 = vmatpush.bf16.msra.mxu0 %v11586_v52  ;;  %5826 = vmatpush.bf16.msra.mxu2 %v11590_v26  ;;  %v14158_v52 = vld [vmem:[%s22336_s3 + $0x1b4] sm:$0xf0]  ;;  %v14154_v26 = vld [vmem:[%s22336_s3 + $0x19c] sm:$0xf] }
 0x419   :  { %v11694_v63 = vor.u32 %v14154_v26, %v11691_v50  ;;  %v11595_v26 = vld [vmem:[%s22336_s3 + $0xf8] sm:$0xf0]  ;;  %v11881_v50 = vld [vmem:[%s22336_s3 + $0x318] sm:$0xf] }
 0x41a   :  { %5812 = vmatpush.bf16.msra.mxu1 %v11874_v56  ;;  %5838 = vmatpush.bf16.msra.mxu3 %v11878_v28  ;;  %v14173_v56 = vld [vmem:[%s22336_s3 + $0x22c] sm:$0xf0]  ;;  %v14169_v28 = vld [vmem:[%s22336_s3 + $0x214] sm:$0xf] }
 0x41b   :  { %v11746_v34 = vor.u32 %v14173_v56, %v11745_v40  ;;  %v11750_v19 = vor.u32 %v14169_v28, %v11747_v13  ;;  %v14206_v40 = vld [vmem:[%s22336_s3 + $0x334] sm:$0xf0]  ;;  %v14202_v56 = vld [vmem:[%s22336_s3 + $0x31c] sm:$0xf] }
 0x41c   :  { %5801 = vmatpush.bf16.msra.mxu0 %v11554_v22  ;;  %5827 = vmatpush.bf16.msra.mxu2 %v11558_v30  ;;  %v11979_v22 = vld [vmem:[%s22336_s3 + $0x3f8] sm:$0xf0]  ;;  %v11690_v30 = vor.u32 %v14158_v52, %v11689_v8  ;;  %v14134_v8 = vld [vmem:[%s22336_s3 + $0xf4] sm:$0xf0] }
 0x41d   :  { %5765 = vmatmul.bf16.vlgmr.msrb.gmra.mxu1 %v19370_v35  ;;  %5791 = vmatmul.bf16.vlgmr.msrb.gmra.mxu3 %v19370_v35  ;;  %v11982_v55 = vor.u32 %v14226_v2, %v11979_v22  ;;  %v14130_v52 = vld [vmem:[%s22336_s3 + $0xdc] sm:$0xf]  ;;  %v14126_v22 = vld [vmem:[%s22336_s3 + $0xb4] sm:$0xf0] }
 0x41e   :  { %5813 = vmatpush.bf16.msra.mxu1 %v11842_v37  ;;  %5839 = vmatpush.bf16.msra.mxu3 %v11846_v7  ;;  %v14150_v37 = vld [vmem:[%s22336_s3 + $0x174] sm:$0xf0]  ;;  %v14146_v7 = vld [vmem:[%s22336_s3 + $0x15c] sm:$0xf]  ;;  %v11598_v51 = vor.u32 %v14130_v52, %v11595_v26 }
 0x41f   :  { %v11658_v29 = vor.u32 %v14150_v37, %v11657_v11  ;;  %v11662_v61 = vor.u32 %v14146_v7, %v11659_v3  ;;  %v11883_v28 = vld [vmem:[%s22336_s3 + $0x338] sm:$0xf0]  ;;  %v11882_v11 = vor.u32 %v14206_v40, %v11881_v50  ;;  %v11562_v3 = vor.u32 %v14126_v22, %v11561_v54  ;;  %v14174_v50 = vld [vmem:[%s22336_s3 + $0x234] sm:$0xf0]  ;;  %v14291_v54 = vld [vmem:[%s22336_s3 + $0x1dc] sm:$0xf0] }
 0x420   :  { %5802 = vmatpush.bf16.msra.mxu0 %v11522_v58  ;;  %5828 = vmatpush.bf16.msra.mxu2 %v11526_v12  ;;  %v14222_v58 = vld [vmem:[%s22336_s3 + $0x3b4] sm:$0xf0]  ;;  %v14218_v12 = vld [vmem:[%s22336_s3 + $0x39c] sm:$0xf] }
 0x421   :  { %v11946_v16 = vor.u32 %v14222_v58, %v11945_v33  ;;  %v11950_v59 = vor.u32 %v14218_v12, %v11947_v38  ;;  %v14194_v37 = vld [vmem:[%s22336_s3 + $0x2dc] sm:$0xf]  ;;  %v14118_v33 = vld [vmem:[%s22336_s3 + $0x74] sm:$0xf0] }
 0x422   :  { %5814 = vmatpush.bf16.msra.mxu1 %v11810_v42  ;;  %5840 = vmatpush.bf16.msra.mxu3 %v11814_v53  ;;  %v11627_v42 = vld [vmem:[%s22336_s3 + $0x138] sm:$0xf0]  ;;  %v14782_v53 = vld [vmem:[%s22338_s0] sm:$0xff] }
 0x423   :  { %vm5944_vm11 = vcmp.gt.s32.totalorder %v14782_v53, 4  ;;  %vm6990_vm12 = vcmp.gt.s32.totalorder %v14782_v53, 5  ;;  %v11851_v7 = vld [vmem:[%s22336_s3 + $0x2f8] sm:$0xf0] }
 0x424   :  { %5803 = vmatpush.bf16.msra.mxu0 %v11490_v14  ;;  %5829 = vmatpush.bf16.msra.mxu2 %v11494_v57  ;;  %v5945_v46 = vsel %vm5944_vm11, 1, %v22374_v48  ;;  %v11915_v14 = vld [vmem:[%s22336_s3 + $0x378] sm:$0xf0]  ;;  %v11626_v57 = vor.u32 %v14142_v41, %v11625_v18  ;;  %v6991_v2 = vsel %vm6990_vm12, 1, %v22374_v48  ;;  %v11849_v48 = vld [vmem:[%s22336_s3 + $0x2d8] sm:$0xf] }
 0x425   :  { %5947 = vperm.xlu2 %14618, %v5945_v46   ;;  %v14114_v58 = vld [vmem:[%s22336_s3 + $0x5c] sm:$0xf]  ;;  %v14190_v18 = vld [vmem:[%s22336_s3 + $0x2b4] sm:$0xf0] }
 0x426   :  { %5815 = vmatpush.bf16.msra.mxu1 %v11778_v5  ;;  %5841 = vmatpush.bf16.msra.mxu3 %v11782_v39  ;;  %v11914_v5 = vor.u32 %v14214_v45, %v11913_v17  ;;  %v11918_v39 = vor.u32 %v14210_v32, %v11915_v14  ;;  %v11531_v12 = vld [vmem:[%s22336_s3 + $0x78] sm:$0xf0]  ;;  %v11785_v14 = vld [vmem:[%s22336_s3 + $0x258] sm:$0xf] }
 0x427   :  { %5804 = vmatmul.bf16.vlgmr.msra.gmra.mxu0 %v19318_v31  ;;  %5830 = vmatmul.bf16.vlgmr.msra.gmra.mxu2 %v19318_v31  ;;  %v14186_v41 = vld [vmem:[%s22336_s3 + $0x29c] sm:$0xf]  ;;  %v11534_v53 = vor.u32 %v14114_v58, %v11531_v12  ;;  %v12147_v12 = vld [vmem:[%s22336_s3 + $0x140] sm:$0xf] }
 0x428   :  { %5848 = vmatpush.bf16.msrb.mxu0 %v11722_v20  ;;  %5874 = vmatpush.bf16.msrb.mxu2 %v11726_v62  ;;  %v11630_v20 = vor.u32 %v14138_v47, %v11627_v42  ;;  %v11593_v62 = vld [vmem:[%s22336_s3 + $0xd8] sm:$0xf]  ;;  %v11819_v47 = vld [vmem:[%s22336_s3 + $0x2b8] sm:$0xf0] }
 0x429   :  { %v11594_v13 = vor.u32 %v14134_v8, %v11593_v62  ;;  %v14106_v17 = vld [vmem:[%s22336_s3 + $0x1c] sm:$0xf]  ;;  %v11822_v32 = vor.u32 %v14186_v41, %v11819_v47  ;;  %v12149_v47 = vld [vmem:[%s22336_s3 + $0x160] sm:$0xf0] }
 0x42a   :  { %5816 = vmatpush.bf16.msra.mxu1 %v11746_v34  ;;  %5842 = vmatpush.bf16.msra.mxu3 %v11750_v19  ;;  %v11886_v34 = vor.u32 %v14202_v56, %v11883_v28  ;;  %v14198_v19 = vld [vmem:[%s22336_s3 + $0x2f4] sm:$0xf0]  ;;  %v11499_v46 = vld [vmem:[%s22336_s3 + $0x38] sm:$0xf0] }
 0x42b   :  { %v11850_v38 = vor.u32 %v14198_v19, %v11849_v48  ;;  %v11787_v62 = vld [vmem:[%s22336_s3 + $0x278] sm:$0xf0]  ;;  %v11502_v52 = vor.u32 %v14106_v17, %v11499_v46  ;;  %v12181_v19 = vld [vmem:[%s22336_s3 + $0x1a0] sm:$0xf0] }
 0x42c   :  { %5849 = vmatpush.bf16.msrb.mxu0 %v11690_v30  ;;  %5875 = vmatpush.bf16.msrb.mxu2 %v11694_v63  ;;  %v14122_v30 = vld [vmem:[%s22336_s3 + $0x9c] sm:$0xf] }
 0x42d   :  { %5817 = vmatmul.bf16.vlgmr.msra.gmra.mxu1 %v19370_v35  ;;  %5843 = vmatmul.bf16.vlgmr.msra.gmra.mxu3 %v19370_v35  ;;  %v11563_v63 = vld [vmem:[%s22336_s3 + $0xb8] sm:$0xf0] }
 0x42e   :  { %5861 = vmatpush.bf16.msrb.mxu1 %v11978_v10  ;;  %5887 = vmatpush.bf16.msrb.mxu3 %v11982_v55  ;;  %v11566_v10 = vor.u32 %v14122_v30, %v11563_v63  ;;  %v11529_v55 = vld [vmem:[%s22336_s3 + $0x58] sm:$0xf]  ;;  %v14170_v40 = vld [vmem:[%s22336_s3 + $0x21c] sm:$0xf] }
 0x42f   :  { %6993 = vperm.xlu2 %14618, %v6991_v2   ;;  %v11530_v42 = vor.u32 %v14118_v33, %v11529_v55  ;;  %v11755_v56 = vld [vmem:[%s22336_s3 + $0x238] sm:$0xf0]  ;;  %v14287_v2 = vld [vmem:[%s22336_s3 + $0x1c4] sm:$0xf] }
 0x430   :  { %5850 = vmatpush.bf16.msrb.mxu0 %v11658_v29  ;;  %5876 = vmatpush.bf16.msrb.mxu2 %v11662_v61  ;;  %v11854_v29 = vor.u32 %v14194_v37, %v11851_v7  ;;  %v11817_v61 = vld [vmem:[%s22336_s3 + $0x298] sm:$0xf]  ;;  %v12467_v7 = vld [vmem:[%s22336_s3 + $0x3c0] sm:$0xf]  ;;  %v12469_v33 = vld [vmem:[%s22336_s3 + $0x3e0] sm:$0xf0] }
 0x431   :  { %v11818_v45 = vor.u32 %v14190_v18, %v11817_v61 }
 0x432   :  { %5862 = vmatpush.bf16.msrb.mxu1 %v11946_v16  ;;  %5888 = vmatpush.bf16.msrb.mxu3 %v11950_v59  ;;  %v11497_v16 = vld [vmem:[%s22336_s3 + $0x18] sm:$0xf] }
 0x433   :  { %v14110_v59 = vld [vmem:[%s22336_s3 + $0x34] sm:$0xf0] }
 0x434   :  { %5851 = vmatpush.bf16.msrb.mxu0 %v11626_v57  ;;  %5877 = vmatpush.bf16.msrb.mxu2 %v11630_v20  ;;  %v14182_v57 = vld [vmem:[%s22336_s3 + $0x274] sm:$0xf0]  ;;  %v14178_v20 = vld [vmem:[%s22336_s3 + $0x25c] sm:$0xf]  ;;  %v11498_v8 = vor.u32 %v14110_v59, %v11497_v16  ;;  %v14347_v16 = vld [vmem:[%s22336_s3 + $0x39c] sm:$0xf0] }
 0x435   :  { %v11786_v26 = vor.u32 %v14182_v57, %v11785_v14  ;;  %v14343_v59 = vld [vmem:[%s22336_s3 + $0x384] sm:$0xf]  ;;  %v12115_v14 = vld [vmem:[%s22336_s3 + $0x100] sm:$0xf] }
 0x436   :  { %5863 = vmatpush.bf16.msrb.mxu1 %v11914_v5  ;;  %5889 = vmatpush.bf16.msrb.mxu3 %v11918_v39  ;;  %v11790_v5 = vor.u32 %v14178_v20, %v11787_v62  ;;  %v11753_v39 = vld [vmem:[%s22336_s3 + $0x218] sm:$0xf]  ;;  %v14267_v57 = vld [vmem:[%s22336_s3 + $0x11c] sm:$0xf0]  ;;  %v14263_v20 = vld [vmem:[%s22336_s3 + $0x104] sm:$0xf] }
 0x437   :  { %v11754_v28 = vor.u32 %v14174_v50, %v11753_v39  ;;  %v12116_v62 = vor.u32 %v14267_v57, %v12115_v14  ;;  %v12021_v57 = vld [vmem:[%s22336_s3 + $0x60] sm:$0xf0] }
 0x438   :  { %5852 = vmatpush.bf16.msrb.mxu0 %v11594_v13  ;;  %5878 = vmatpush.bf16.msrb.mxu2 %v11598_v51  ;;  %v11758_v13 = vor.u32 %v14170_v40, %v11755_v56  ;;  %v12211_v51 = vld [vmem:[%s22336_s3 + $0x1c0] sm:$0xf]  ;;  %v14335_v40 = vld [vmem:[%s22336_s3 + $0x344] sm:$0xf] }
 0x439   :  { %v12212_v22 = vor.u32 %v14291_v54, %v12211_v51  ;;  %v12405_v56 = vld [vmem:[%s22336_s3 + $0x360] sm:$0xf0]  ;;  %v14259_v51 = vld [vmem:[%s22336_s3 + $0xdc] sm:$0xf0] }
 0x43a   :  { %5864 = vmatpush.bf16.msrb.mxu1 %v11882_v11  ;;  %5890 = vmatpush.bf16.msrb.mxu3 %v11886_v34  ;;  %v14283_v11 = vld [vmem:[%s22336_s3 + $0x19c] sm:$0xf0]  ;;  %v14279_v34 = vld [vmem:[%s22336_s3 + $0x184] sm:$0xf] }
 0x43b   :  { %v12184_v37 = vor.u32 %v14279_v34, %v12181_v19  ;;  %v14255_v54 = vld [vmem:[%s22336_s3 + $0xc4] sm:$0xf]  ;;  %v14331_v34 = vld [vmem:[%s22336_s3 + $0x31c] sm:$0xf0] }
 0x43c   :  { %5853 = vmatpush.bf16.msrb.mxu0 %v11562_v3  ;;  %5879 = vmatpush.bf16.msrb.mxu2 %v11566_v10  ;;  %v14355_v3 = vld [vmem:[%s22336_s3 + $0x3dc] sm:$0xf0]  ;;  %v14351_v10 = vld [vmem:[%s22336_s3 + $0x3c4] sm:$0xf] }
 0x43d   :  { %v12468_v55 = vor.u32 %v14355_v3, %v12467_v7  ;;  %v12472_v58 = vor.u32 %v14351_v10, %v12469_v33  ;;  %v12373_v7 = vld [vmem:[%s22336_s3 + $0x320] sm:$0xf0]  ;;  %v12051_v10 = vld [vmem:[%s22336_s3 + $0x80] sm:$0xf] }
 0x43e   :  { %5865 = vmatpush.bf16.msrb.mxu1 %v11850_v38  ;;  %5891 = vmatpush.bf16.msrb.mxu3 %v11854_v29  ;;  %v14275_v38 = vld [vmem:[%s22336_s3 + $0x15c] sm:$0xf0]  ;;  %v14271_v29 = vld [vmem:[%s22336_s3 + $0x144] sm:$0xf] }
 0x43f   :  { %v12148_v41 = vor.u32 %v14275_v38, %v12147_v12  ;;  %v12053_v12 = vld [vmem:[%s22336_s3 + $0xa0] sm:$0xf0] }
 0x440   :  { %5854 = vmatpush.bf16.msrb.mxu0 %v11530_v42  ;;  %5880 = vmatpush.bf16.msrb.mxu2 %v11534_v53  ;;  %v12152_v42 = vor.u32 %v14271_v29, %v12149_v47  ;;  %v12435_v53 = vld [vmem:[%s22336_s3 + $0x380] sm:$0xf]  ;;  %v14319_v47 = vld [vmem:[%s22336_s3 + $0x2c4] sm:$0xf] }
 0x441   :  { %v12436_v46 = vor.u32 %v14347_v16, %v12435_v53  ;;  %v12339_v29 = vld [vmem:[%s22336_s3 + $0x2c0] sm:$0xf] }
 0x442   :  { %5866 = vmatpush.bf16.msrb.mxu1 %v11818_v45  ;;  %5892 = vmatpush.bf16.msrb.mxu3 %v11822_v32  ;;  %v12437_v45 = vld [vmem:[%s22336_s3 + $0x3a0] sm:$0xf0] }
 0x443   :  { %v12440_v32 = vor.u32 %v14343_v59, %v12437_v45  ;;  %v12341_v59 = vld [vmem:[%s22336_s3 + $0x2e0] sm:$0xf0]  ;;  %v14243_v45 = vld [vmem:[%s22336_s3 + $0x5c] sm:$0xf0] }
 0x444   :  { %5855 = vmatpush.bf16.msrb.mxu0 %v11498_v8  ;;  %5881 = vmatpush.bf16.msrb.mxu2 %v11502_v52  ;;  %v12117_v8 = vld [vmem:[%s22336_s3 + $0x120] sm:$0xf0] }
 0x445   :  { %v12120_v52 = vor.u32 %v14263_v20, %v12117_v8  ;;  %v12307_v8 = vld [vmem:[%s22336_s3 + $0x280] sm:$0xf] }
 0x446   :  { %5867 = vmatpush.bf16.msrb.mxu1 %v11786_v26  ;;  %5893 = vmatpush.bf16.msrb.mxu3 %v11790_v5  ;;  %v12403_v26 = vld [vmem:[%s22336_s3 + $0x340] sm:$0xf] }
 0x447   :  { %5856 = vmatmul.bf16.vlgmr.msrb.gmra.mxu0 %v19318_v31  ;;  %5882 = vmatmul.bf16.vlgmr.msrb.gmra.mxu2 %v19318_v31  ;;  %v12213_v31 = vld [vmem:[%s22336_s3 + $0x1e0] sm:$0xf0]  ;;  %v14339_v5 = vld [vmem:[%s22336_s3 + $0x35c] sm:$0xf0] }
 0x448   :  { %v12216_v30 = vor.u32 %v14287_v2, %v12213_v31  ;;  %6738 = vmatpush.bf16.msra.mxu0 %v12212_v22  ;;  %v12404_v50 = vor.u32 %v14339_v5, %v12403_v26  ;;  %v14311_v26 = vld [vmem:[%s22336_s3 + $0x284] sm:$0xf] }
 0x44a   :  { %5868 = vmatpush.bf16.msrb.mxu1 %v11754_v28  ;;  %5894 = vmatpush.bf16.msrb.mxu3 %v11758_v13  ;;  %v12408_v28 = vor.u32 %v14335_v40, %v12405_v56  ;;  %v12083_v13 = vld [vmem:[%s22336_s3 + $0xc0] sm:$0xf]  ;;  %v12309_v56 = vld [vmem:[%s22336_s3 + $0x2a0] sm:$0xf0] }
 0x44b   :  { %6764 = vmatpush.bf16.msra.mxu2 %v12216_v30  ;;  %v12084_v31 = vor.u32 %v14259_v51, %v12083_v13  ;;  %v12085_v30 = vld [vmem:[%s22336_s3 + $0xe0] sm:$0xf0]  ;;  %v12312_v13 = vor.u32 %v14311_v26, %v12309_v56  ;;  %v11987_v51 = vld [vmem:[%s22336_s3] sm:$0xf] }
 0x44d   :  { %5869 = vmatmul.bf16.vlgmr.msrb.gmra.mxu1 %v19370_v35  ;;  %5895 = vmatmul.bf16.vlgmr.msrb.gmra.mxu3 %v19370_v35  ;;  %v12179_v35 = vld [vmem:[%s22336_s3 + $0x180] sm:$0xf] }
 0x44e   :  { %v12180_v48 = vor.u32 %v14283_v11, %v12179_v35  ;;  %6751 = vmatpush.bf16.msra.mxu1 %v12468_v55  ;;  %6777 = vmatpush.bf16.msra.mxu3 %v12472_v58  ;;  %v12088_v35 = vor.u32 %v14255_v54, %v12085_v30  ;;  %v12371_v11 = vld [vmem:[%s22336_s3 + $0x300] sm:$0xf]  ;;  %v14247_v58 = vld [vmem:[%s22336_s3 + $0x84] sm:$0xf] }
 0x44f   :  { %6765 = vmatpush.bf16.msra.mxu2 %v12184_v37  ;;  %v12372_v37 = vor.u32 %v14331_v34, %v12371_v11  ;;  %v14251_v55 = vld [vmem:[%s22336_s3 + $0x9c] sm:$0xf0]  ;;  %v12056_v38 = vor.u32 %v14247_v58, %v12053_v12  ;;  %v14288_v11 = vld [vmem:[%s22336_s3 + $0x1cc] sm:$0xf]  ;;  %v12277_v58 = vld [vmem:[%s22336_s3 + $0x260] sm:$0xf0] }
 0x450   :  { %6739 = vmatpush.bf16.msra.mxu0 %v12180_v48  ;;  %v14327_v48 = vld [vmem:[%s22336_s3 + $0x304] sm:$0xf]  ;;  %v12052_v33 = vor.u32 %v14251_v55, %v12051_v10  ;;  %v14235_v54 = vld [vmem:[%s22336_s3 + $0x1c] sm:$0xf0] }
 0x451   :  { %v12376_v3 = vor.u32 %v14327_v48, %v12373_v7  ;;  %v12275_v7 = vld [vmem:[%s22336_s3 + $0x240] sm:$0xf] }
 0x452   :  { %6752 = vmatpush.bf16.msra.mxu1 %v12436_v46  ;;  %6778 = vmatpush.bf16.msra.mxu3 %v12440_v32  ;;  %v12019_v46 = vld [vmem:[%s22336_s3 + $0x40] sm:$0xf] }
 0x453   :  { %6766 = vmatpush.bf16.msra.mxu2 %v12152_v42  ;;  %v12020_v14 = vor.u32 %v14243_v45, %v12019_v46  ;;  %v14307_v55 = vld [vmem:[%s22336_s3 + $0x25c] sm:$0xf0] }
 0x454   :  { %6740 = vmatpush.bf16.msra.mxu0 %v12148_v41  ;;  %v14323_v41 = vld [vmem:[%s22336_s3 + $0x2dc] sm:$0xf0] }
 0x455   :  { %v12340_v16 = vor.u32 %v14323_v41, %v12339_v29  ;;  %v12276_v41 = vor.u32 %v14307_v55, %v12275_v7  ;;  %v14299_v46 = vld [vmem:[%s22336_s3 + $0x21c] sm:$0xf0]  ;;  %v14268_v7 = vld [vmem:[%s22336_s3 + $0x124] sm:$0xf0]  ;;  %v14264_v55 = vld [vmem:[%s22336_s3 + $0x10c] sm:$0xf] }
 0x456   :  { %6753 = vmatpush.bf16.msra.mxu1 %v12404_v50  ;;  %6779 = vmatpush.bf16.msra.mxu3 %v12408_v28 }
 0x457   :  { %6767 = vmatpush.bf16.msra.mxu2 %v12120_v52  ;;  %v14315_v52 = vld [vmem:[%s22336_s3 + $0x29c] sm:$0xf0] }
 0x458   :  { %6741 = vmatpush.bf16.msra.mxu0 %v12116_v62  ;;  %v12308_v40 = vor.u32 %v14315_v52, %v12307_v8  ;;  %v14352_v8 = vld [vmem:[%s22336_s3 + $0x3cc] sm:$0xf] }
 0x45a   :  { %6754 = vmatpush.bf16.msra.mxu1 %v12372_v37  ;;  %6780 = vmatpush.bf16.msra.mxu3 %v12376_v3  ;;  %v12221_v37 = vld [vmem:[%s22336_s3 + $0x1e8] sm:$0xf0] }
 0x45b   :  { %6768 = vmatpush.bf16.msra.mxu2 %v12088_v35  ;;  %v14292_v35 = vld [vmem:[%s22336_s3 + $0x1e4] sm:$0xf0]  ;;  %v12224_v10 = vor.u32 %v14288_v11, %v12221_v37 }
 0x45c   :  { %6742 = vmatpush.bf16.msra.mxu0 %v12084_v31  ;;  %v12123_v37 = vld [vmem:[%s22336_s3 + $0x108] sm:$0xf] }
 0x45e   :  { %6755 = vmatpush.bf16.msra.mxu1 %v12340_v16  ;;  %v14280_v16 = vld [vmem:[%s22336_s3 + $0x18c] sm:$0xf] }
 0x45f   :  { %6769 = vmatpush.bf16.msra.mxu2 %v12056_v38 }
 0x460   :  { %6743 = vmatpush.bf16.msra.mxu0 %v12052_v33  ;;  %v14303_v33 = vld [vmem:[%s22336_s3 + $0x244] sm:$0xf] }
 0x462   :  { %6756 = vmatpush.bf16.msra.mxu1 %v12308_v40  ;;  %v14276_v40 = vld [vmem:[%s22336_s3 + $0x164] sm:$0xf0] }
 0x464   :  { %6744 = vmatpush.bf16.msra.mxu0 %v12020_v14  ;;  %v12475_v14 = vld [vmem:[%s22336_s3 + $0x3c8] sm:$0xf] }
 0x466   :  { %6757 = vmatpush.bf16.msra.mxu1 %v12276_v41  ;;  %v12411_v41 = vld [vmem:[%s22336_s3 + $0x348] sm:$0xf] }
 0x484   :  { %v19733_v63 = vpop.f32.mrf.mxu0 }
 0x48a   :  { %v19768_v61 = vpop.f32.mrf.mxu1  ;;  %v19770_v18 = vpop.f32.mrf.mxu2 }
 0x48b   :  { %v5715_v42 = vadd.f32 %v19768_v61, %v19733_v63  ;;  %v14239_v63 = vld [vmem:[%s22336_s3 + $0x44] sm:$0xf] }
 0x48c   :  { %v5703_v17 = vpop.f32.mrf.mxu0  ;;  %v12024_v62 = vor.u32 %v14239_v63, %v12021_v57 }
 0x48d   :  { %v12344_v17 = vor.u32 %v14319_v47, %v12341_v59  ;;  %v5900_v5 = vadd.f32 %v5715_v42, %v15951_v49  ;;  %v14231_v49 = vld [vmem:[%s22336_s3 + $0x4] sm:$0xf]  ;;  %v12280_v47 = vor.u32 %v14303_v33, %v12277_v58  ;;  %v12187_v42 = vld [vmem:[%s22336_s3 + $0x188] sm:$0xf]  ;;  %v12125_v33 = vld [vmem:[%s22336_s3 + $0x128] sm:$0xf0] }
 0x48e   :  { %6770 = vmatpush.bf16.msra.mxu2 %v12024_v62  ;;  %v14356_v62 = vld [vmem:[%s22336_s3 + $0x3e4] sm:$0xf0] }
 0x48f   :  { %6781 = vmatpush.bf16.msra.mxu3 %v12344_v17  ;;  %v5908_v34 = vmul.f32 0.5, %v5900_v5  ;;  %v12243_v17 = vld [vmem:[%s22336_s3 + $0x200] sm:$0xf]  ;;  %v12476_v26 = vor.u32 %v14356_v62, %v12475_v14  ;;  %v12477_v5 = vld [vmem:[%s22336_s3 + $0x3e8] sm:$0xf0] }
 0x490   :  { %v19805_v39 = vpop.f32.mrf.mxu3  ;;  %v12093_v14 = vld [vmem:[%s22336_s3 + $0xe8] sm:$0xf0]  ;;  %v12379_v62 = vld [vmem:[%s22336_s3 + $0x308] sm:$0xf] }
 0x491   :  { %v5741_v12 = vadd.f32 %v19805_v39, %v19770_v18  ;;  %v12189_v39 = vld [vmem:[%s22336_s3 + $0x1a8] sm:$0xf0] }
 0x492   :  { %v5716_v2 = vpop.f32.mrf.mxu1  ;;  %v5729_v22 = vpop.f32.mrf.mxu2  ;;  %v12192_v63 = vor.u32 %v14280_v16, %v12189_v39 }
 0x493   :  { %v11988_v2 = vor.u32 %v14235_v54, %v11987_v51  ;;  %v12219_v22 = vld [vmem:[%s22336_s3 + $0x1c8] sm:$0xf]  ;;  %6782 = vmatpush.bf16.msra.mxu3 %v12312_v13  ;;  %v5901_v52 = vadd.f32 %v5741_v12, %v15963_v60  ;;  %v14272_v60 = vld [vmem:[%s22336_s3 + $0x14c] sm:$0xf] }
 0x494   :  { %v5753_v19 = vpop.f32.mrf.mxu0  ;;  %v12157_v51 = vld [vmem:[%s22336_s3 + $0x168] sm:$0xf0] }
 0x495   :  { %6745 = vmatpush.bf16.msra.mxu0 %v11988_v2  ;;  %v12160_v2 = vor.u32 %v14272_v60, %v12157_v51  ;;  %v5909_v11 = vmul.f32 0.5, %v5901_v52  ;;  %v12059_v51 = vld [vmem:[%s22336_s3 + $0x88] sm:$0xf] }
 0x497   :  { %6783 = vmatpush.bf16.msra.mxu3 %v12280_v47  ;;  %v14340_v47 = vld [vmem:[%s22336_s3 + $0x364] sm:$0xf0] }
 0x498   :  { %v5742_v53 = vpop.f32.mrf.mxu3  ;;  %v12412_v16 = vor.u32 %v14340_v47, %v12411_v41 }
 0x499   :  { %v14284_v53 = vld [vmem:[%s22336_s3 + $0x1a4] sm:$0xf0] }
 0x49a   :  { %v5766_v61 = vpop.f32.mrf.mxu1  ;;  %v5779_v32 = vpop.f32.mrf.mxu2  ;;  %v12188_v18 = vor.u32 %v14284_v53, %v12187_v42  ;;  %v14336_v42 = vld [vmem:[%s22336_s3 + $0x34c] sm:$0xf] }
 0x49b   :  { %v5767_v20 = vadd.f32 %v5766_v61, %v5753_v19  ;;  %v12220_v19 = vor.u32 %v14292_v35, %v12219_v22  ;;  %v12244_v61 = vor.u32 %v14299_v46, %v12243_v17  ;;  %v14348_v22 = vld [vmem:[%s22336_s3 + $0x3a4] sm:$0xf0]  ;;  %v12445_v35 = vld [vmem:[%s22336_s3 + $0x3a8] sm:$0xf0]  ;;  %v22375_v17 = vld [vmem:[#allocation15_spill] sm:$0xff] }
 0x49c   :  { %v5755_v50 = vpop.f32.mrf.mxu0 }
 0x49d   :  { %v5902_v28 = vadd.f32 %v5767_v20, %v16004_v24  ;;  %v11989_v24 = vld [vmem:[%s22336_s3 + $0x20] sm:$0xf0]  ;;  %6790 = vmatpush.bf16.msrb.mxu0 %v12220_v19  ;;  %v12155_v50 = vld [vmem:[%s22336_s3 + $0x148] sm:$0xf]  ;;  %6758 = vmatpush.bf16.msra.mxu1 %v12244_v61 }
 0x49e   :  { %v11992_v30 = vor.u32 %v14231_v49, %v11989_v24  ;;  %v12156_v13 = vor.u32 %v14276_v40, %v12155_v50  ;;  %v12443_v24 = vld [vmem:[%s22336_s3 + $0x388] sm:$0xf]  ;;  %v14328_v50 = vld [vmem:[%s22336_s3 + $0x30c] sm:$0xf] }
 0x49f   :  { %v5916_v31 = vmul.f32 0.5, %v5902_v28  ;;  %v12480_v28 = vor.u32 %v14352_v8, %v12477_v5  ;;  %v14260_v61 = vld [vmem:[%s22336_s3 + $0xe4] sm:$0xf0]  ;;  %v12381_v40 = vld [vmem:[%s22336_s3 + $0x328] sm:$0xf0] }
 0x4a0   :  { %v5792_v48 = vpop.f32.mrf.mxu3  ;;  %6771 = vmatpush.bf16.msra.mxu2 %v11992_v30  ;;  %v14344_v30 = vld [vmem:[%s22336_s3 + $0x38c] sm:$0xf]  ;;  %v14332_v8 = vld [vmem:[%s22336_s3 + $0x324] sm:$0xf0]  ;;  %v12384_v60 = vor.u32 %v14328_v50, %v12381_v40 }
 0x4a1   :  { %14699 = vtanh.f32 %v5916_v31  ;;  %v5793_v3 = vadd.f32 %v5792_v48, %v5779_v32  ;;  %v12245_v32 = vld [vmem:[%s22336_s3 + $0x220] sm:$0xf0]  ;;  %6791 = vmatpush.bf16.msrb.mxu0 %v12188_v18  ;;  %6803 = vmatpush.bf16.msrb.mxu1 %v12476_v26  ;;  %v12444_v31 = vor.u32 %v14348_v22, %v12443_v24  ;;  %v12448_v19 = vor.u32 %v14344_v30, %v12445_v35  ;;  %v12061_v22 = vld [vmem:[%s22336_s3 + $0xa8] sm:$0xf0]  ;;  %v14308_v50 = vld [vmem:[%s22336_s3 + $0x264] sm:$0xf0] }
 0x4a2   :  { %v5768_v38 = vpop.f32.mrf.mxu1  ;;  %v5781_v29 = vpop.f32.mrf.mxu2  ;;  %v12380_v5 = vor.u32 %v14332_v8, %v12379_v62  ;;  %v22376_v30 = vld [vmem:[#allocation16_spill] sm:$0xff] }
 0x4a3   :  { %v5903_v59 = vadd.f32 %v5793_v3, %v16018_v36  ;;  %v14295_v36 = vld [vmem:[%s22336_s3 + $0x204] sm:$0xf]  ;;  %v12128_v29 = vor.u32 %v14264_v55, %v12125_v33  ;;  %v14304_v40 = vld [vmem:[%s22336_s3 + $0x24c] sm:$0xf] }
 0x4a4   :  { %6816 = vmatpush.bf16.msrb.mxu2 %v12224_v10  ;;  %v5805_v45 = vpop.f32.mrf.mxu0  ;;  %v12248_v20 = vor.u32 %v14295_v36, %v12245_v32  ;;  %v12124_v10 = vor.u32 %v14268_v7, %v12123_v37  ;;  %v14256_v32 = vld [vmem:[%s22336_s3 + $0xcc] sm:$0xf] }
 0x4a5   :  { %v5917_v57 = vmul.f32 0.5, %v5903_v59  ;;  %6792 = vmatpush.bf16.msrb.mxu0 %v12156_v13  ;;  %6804 = vmatpush.bf16.msrb.mxu1 %v12444_v31  ;;  %v12413_v59 = vld [vmem:[%s22336_s3 + $0x368] sm:$0xf0] }
 0x4a6   :  { %6784 = vmatpush.bf16.msra.mxu3 %v12248_v20  ;;  %v12096_v20 = vor.u32 %v14256_v32, %v12093_v14  ;;  %v14320_v37 = vld [vmem:[%s22336_s3 + $0x2cc] sm:$0xf]  ;;  %v14236_v32 = vld [vmem:[%s22336_s3 + $0x24] sm:$0xf0] }
 0x4a7   :  { %v14700_v56 = vpop.eup %14699  ;;  %14701 = vtanh.f32 %v5917_v57 }
 0x4a8   :  { %6817 = vmatpush.bf16.msrb.mxu2 %v12192_v63  ;;  %14703 = vtanh.f32 %v5908_v34  ;;  %v5920_v54 = vmul.f32 0.5, %v14700_v56  ;;  %v5794_v49 = vpop.f32.mrf.mxu3  ;;  %v12091_v63 = vld [vmem:[%s22336_s3 + $0xc8] sm:$0xf] }
 0x4a9   :  { %14705 = vtanh.f32 %v5909_v11  ;;  %6793 = vmatpush.bf16.msrb.mxu0 %v12124_v10  ;;  %v12092_v36 = vor.u32 %v14260_v61, %v12091_v63  ;;  %6805 = vmatpush.bf16.msrb.mxu1 %v12412_v16  ;;  %v14248_v49 = vld [vmem:[%s22336_s3 + $0x8c] sm:$0xf]  ;;  %v20057_v11 = vpop.permute.xlu2 %5947 }
 0x4aa   :  { %6829 = vmatpush.bf16.msrb.mxu3 %v12480_v28  ;;  %v5922_v34 = vadd.f32 0.5, %v5920_v54  ;;  %v5831_v48 = vpop.f32.mrf.mxu2  ;;  %v5818_v3 = vpop.f32.mrf.mxu1  ;;  %v14252_v54 = vld [vmem:[%s22336_s3 + $0xa4] sm:$0xf0]  ;;  %v12349_v10 = vld [vmem:[%s22336_s3 + $0x2e8] sm:$0xf0]  ;;  %vm5949_vm13 = vcmp.eq.s32.totalorder %v20057_v11, 1 }
 0x4ab   :  { %v5819_v12 = vadd.f32 %v5818_v3, %v5805_v45  ;;  %v12416_v45 = vor.u32 %v14336_v42, %v12413_v59  ;;  %v12060_v24 = vor.u32 %v14252_v54, %v12059_v51  ;;  %v12352_v33 = vor.u32 %v14320_v37, %v12349_v10  ;;  %v12315_v59 = vld [vmem:[%s22336_s3 + $0x288] sm:$0xf]  ;;  %v12317_v63 = vld [vmem:[%s22336_s3 + $0x2a8] sm:$0xf0]  ;;  %v12453_v11 = vld [vmem:[%s22336_s3 + $0x3b0] sm:$0xf0] }
 0x4ac   :  { %6818 = vmatpush.bf16.msrb.mxu2 %v12160_v2  ;;  %v20002_v58 = vmul.f32 %v5922_v34, %v19252_v15  ;;  %v5807_v38 = vpop.f32.mrf.mxu0  ;;  %v12064_v34 = vor.u32 %v14248_v49, %v12061_v22  ;;  %v12251_v54 = vld [vmem:[%s22336_s3 + $0x208] sm:$0xf] }
 0x4ad   :  { %v14702_v53 = vpop.eup %14701  ;;  %v5904_v46 = vadd.f32 %v5819_v12, %v22375_v17  ;;  %6794 = vmatpush.bf16.msrb.mxu0 %v12092_v36  ;;  %6806 = vmatpush.bf16.msrb.mxu1 %v12380_v5  ;;  %v12027_v12 = vld [vmem:[%s22336_s3 + $0x48] sm:$0xf] }
 0x4ae   :  { %6830 = vmatpush.bf16.msrb.mxu3 %v12448_v19  ;;  %v14704_v18 = vpop.eup %14703  ;;  %v5921_v39 = vmul.f32 0.5, %v14702_v53  ;;  %v14324_v19 = vld [vmem:[%s22336_s3 + $0x2e4] sm:$0xf0]  ;;  %v12029_v53 = vld [vmem:[%s22336_s3 + $0x68] sm:$0xf0] }
 0x4af   :  { %14707 = vtanh.f32 %v5904_v46  ;;  %v5912_v52 = vmul.f32 0.5, %v14704_v18  ;;  %v14706_v31 = vpop.eup %14705  ;;  %v14244_v38 = vld [vmem:[%s22336_s3 + $0x64] sm:$0xf0] }
 0x4b0   :  { %6819 = vmatpush.bf16.msrb.mxu2 %v12128_v29  ;;  %v5923_v57 = vadd.f32 0.5, %v5921_v39  ;;  %v5844_v26 = vpop.f32.mrf.mxu3  ;;  %v14240_v29 = vld [vmem:[%s22336_s3 + $0x4c] sm:$0xf]  ;;  %v5913_v41 = vmul.f32 0.5, %v14706_v31  ;;  %v12028_v42 = vor.u32 %v14244_v38, %v12027_v12  ;;  %v14316_v18 = vld [vmem:[%s22336_s3 + $0x2a4] sm:$0xf0] }
 0x4b1   :  { %v5845_v28 = vadd.f32 %v5844_v26, %v5831_v48  ;;  %v12347_v48 = vld [vmem:[%s22336_s3 + $0x2c8] sm:$0xf]  ;;  %v5914_v7 = vadd.f32 0.5, %v5912_v52  ;;  %6795 = vmatpush.bf16.msrb.mxu0 %v12060_v24  ;;  %v12032_v16 = vor.u32 %v14240_v29, %v12029_v53  ;;  %v14312_v39 = vld [vmem:[%s22336_s3 + $0x28c] sm:$0xf] }
 0x4b2   :  { %6831 = vmatpush.bf16.msrb.mxu3 %v12416_v45  ;;  %v20042_v56 = vmul.f32 %v5923_v57, %v19276_v27  ;;  %v5833_v13 = vpop.f32.mrf.mxu2  ;;  %v5820_v2 = vpop.f32.mrf.mxu1  ;;  %v12348_v3 = vor.u32 %v14324_v19, %v12347_v48  ;;  %v12316_v45 = vor.u32 %v14316_v18, %v12315_v59  ;;  %v12320_v61 = vor.u32 %v14312_v39, %v12317_v63  ;;  %v11995_v36 = vld [vmem:[%s22336_s3 + $0x8] sm:$0xf]  ;;  %v12253_v24 = vld [vmem:[%s22336_s3 + $0x228] sm:$0xf0]  ;;  %v22377_v48 = vld [vmem:[#allocation17_spill] sm:$0xff] }
 0x4b3   :  { %v5905_v35 = vadd.f32 %v5845_v28, %v22376_v30  ;;  %v5915_v14 = vadd.f32 0.5, %v5913_v41  ;;  %v11996_v57 = vor.u32 %v14236_v32, %v11995_v36  ;;  %v12283_v5 = vld [vmem:[%s22336_s3 + $0x248] sm:$0xf]  ;;  %v12285_v28 = vld [vmem:[%s22336_s3 + $0x268] sm:$0xf0] }
 0x4b4   :  { %6820 = vmatpush.bf16.msrb.mxu2 %v12096_v20  ;;  %6807 = vmatpush.bf16.msrb.mxu1 %v12348_v3  ;;  %v11997_v20 = vld [vmem:[%s22336_s3 + $0x28] sm:$0xf0]  ;;  %v14300_v2 = vld [vmem:[%s22336_s3 + $0x224] sm:$0xf0]  ;;  %v12227_v53 = vld [vmem:[%s22336_s3 + $0x1d0] sm:$0xf] }
 0x4b5   :  { %v14708_v55 = vpop.eup %14707  ;;  %14709 = vtanh.f32 %v5905_v35  ;;  %6796 = vmatpush.bf16.msrb.mxu0 %v12028_v42  ;;  %v12252_v22 = vor.u32 %v14300_v2, %v12251_v54  ;;  %v14289_v18 = vld [vmem:[%s22336_s3 + $0x1d4] sm:$0xf] }
 0x4b6   :  { %6832 = vmatpush.bf16.msrb.mxu3 %v12384_v60  ;;  %v5936_v47 = vmul.f32 %v14708_v55, %v5914_v7  ;;  %v12288_v60 = vor.u32 %v14304_v40, %v12285_v28  ;;  %v12229_v39 = vld [vmem:[%s22336_s3 + $0x1f0] sm:$0xf0] }
 0x4b7   :  { %v12232_v32 = vor.u32 %v14289_v18, %v12229_v39  ;;  %v12485_v40 = vld [vmem:[%s22336_s3 + $0x3f0] sm:$0xf0] }
 0x4b8   :  { %6821 = vmatpush.bf16.msrb.mxu2 %v12064_v34  ;;  %v5938_v17 = vadd.f32 %v5936_v47, %v20002_v58  ;;  %v5846_v46 = vpop.f32.mrf.mxu3  ;;  %v14232_v58 = vld [vmem:[%s22336_s3 + $0xc] sm:$0xf]  ;;  %6808 = vmatpush.bf16.msrb.mxu1 %v12316_v45  ;;  %v14273_v54 = vld [vmem:[%s22336_s3 + $0x154] sm:$0xf] }
 0x4b9   :  { %v12000_v52 = vor.u32 %v14232_v58, %v11997_v20  ;;  %6797 = vmatpush.bf16.msrb.mxu0 %v11996_v57  ;;  %v12195_v58 = vld [vmem:[%s22336_s3 + $0x190] sm:$0xf]  ;;  %v12197_v20 = vld [vmem:[%s22336_s3 + $0x1b0] sm:$0xf0] }
 0x4ba   :  { %6833 = vmatpush.bf16.msrb.mxu3 %v12352_v33  ;;  %v20112_v62 = vsel %vm5949_vm13, %v5938_v17, %v19252_v15  ;;  %v12284_v15 = vor.u32 %v14308_v50, %v12283_v5  ;;  %v22378_v33 = vld [vmem:[#allocation19_spill] sm:$0xff]  ;;  %v14357_v5 = vld [vmem:[%s22336_s3 + $0x3ec] sm:$0xf0]  ;;  %v14353_v50 = vld [vmem:[%s22336_s3 + $0x3d4] sm:$0xf] }
 0x4bb   :  { %v14710_v8 = vpop.eup %14709  ;;  %v12165_v2 = vld [vmem:[%s22336_s3 + $0x170] sm:$0xf0] }
 0x4bc   :  { %6822 = vmatpush.bf16.msrb.mxu2 %v12032_v16  ;;  %v5937_v26 = vmul.f32 %v14710_v8, %v5915_v14  ;;  %6809 = vmatpush.bf16.msrb.mxu1 %v12284_v15  ;;  %v14293_v16 = vld [vmem:[%s22336_s3 + $0x1ec] sm:$0xf0] }
 0x4bd   :  { %v12228_v45 = vor.u32 %v14293_v16, %v12227_v53  ;;  %v14285_v14 = vld [vmem:[%s22336_s3 + $0x1ac] sm:$0xf0]  ;;  %v14257_v16 = vld [vmem:[%s22336_s3 + $0xd4] sm:$0xf] }
 0x4be   :  { %6834 = vmatpush.bf16.msrb.mxu3 %v12320_v61  ;;  %v5939_v13 = vadd.f32 %v5937_v26, %v20042_v56  ;;  %v14296_v56 = vld [vmem:[%s22336_s3 + $0x20c] sm:$0xf]  ;;  %v12196_v28 = vor.u32 %v14285_v14, %v12195_v58  ;;  %v14261_v53 = vld [vmem:[%s22336_s3 + $0xec] sm:$0xf0] }
 0x4bf   :  { %v12256_v31 = vor.u32 %v14296_v56, %v12253_v24  ;;  %v12067_v58 = vld [vmem:[%s22336_s3 + $0x90] sm:$0xf] }
 0x4c0   :  { %6823 = vmatpush.bf16.msrb.mxu2 %v12000_v52  ;;  %v20133_v49 = vsel %vm5949_vm13, %v5939_v13, %v19276_v27  ;;  %6810 = vmatpush.bf16.msrb.mxu1 %v12252_v22  ;;  %v12483_v52 = vld [vmem:[%s22336_s3 + $0x3d0] sm:$0xf] }
 0x4c1   :  { %v12484_v22 = vor.u32 %v14357_v5, %v12483_v52  ;;  %v14253_v14 = vld [vmem:[%s22336_s3 + $0xac] sm:$0xf0] }
 0x4c2   :  { %6835 = vmatpush.bf16.msrb.mxu3 %v12288_v60  ;;  %v12163_v60 = vld [vmem:[%s22336_s3 + $0x150] sm:$0xf] }
 0x4c3   :  { %v14325_v5 = vld [vmem:[%s22336_s3 + $0x2ec] sm:$0xf0] }
 0x4c4   :  { %v5857_v51 = vpop.f32.mrf.mxu0 }
 0x4c6   :  { %6836 = vmatpush.bf16.msrb.mxu3 %v12256_v31  ;;  %v12488_v31 = vor.u32 %v14353_v50, %v12485_v40  ;;  %v14321_v50 = vld [vmem:[%s22336_s3 + $0x2d4] sm:$0xf] }
 0x4c7   :  { %v12357_v40 = vld [vmem:[%s22336_s3 + $0x2f0] sm:$0xf0] }
 0x4ca   :  { %v5870_v30 = vpop.f32.mrf.mxu1  ;;  %v5883_v35 = vpop.f32.mrf.mxu2 }
 0x4cb   :  { %v5871_v27 = vadd.f32 %v5870_v30, %v5857_v51  ;;  %v14277_v51 = vld [vmem:[%s22336_s3 + $0x16c] sm:$0xf0] }
 0x4cc   :  { %v5859_v34 = vpop.f32.mrf.mxu0  ;;  %v12451_v30 = vld [vmem:[%s22336_s3 + $0x390] sm:$0xf] }
 0x4cd   :  { %v5906_v19 = vadd.f32 %v5871_v27, %v22377_v48  ;;  %v12164_v34 = vor.u32 %v14277_v51, %v12163_v60  ;;  %v12168_v48 = vor.u32 %v14273_v54, %v12165_v2  ;;  %v14245_v60 = vld [vmem:[%s22336_s3 + $0x6c] sm:$0xf0]  ;;  %v14241_v51 = vld [vmem:[%s22336_s3 + $0x54] sm:$0xf] }
 0x4ce   :  { %v12037_v54 = vld [vmem:[%s22336_s3 + $0x70] sm:$0xf0] }
 0x4cf   :  { %v5926_v37 = vmul.f32 0.5, %v5906_v19  ;;  %v12131_v19 = vld [vmem:[%s22336_s3 + $0x110] sm:$0xf] }
 0x4d0   :  { %v5896_v7 = vpop.f32.mrf.mxu3 }
 0x4d1   :  { %14711 = vtanh.f32 %v5926_v37  ;;  %v5897_v3 = vadd.f32 %v5896_v7, %v5883_v35  ;;  %v14349_v35 = vld [vmem:[%s22336_s3 + $0x3ac] sm:$0xf0]  ;;  %v14265_v7 = vld [vmem:[%s22336_s3 + $0x114] sm:$0xf] }
 0x4d2   :  { %v5872_v10 = vpop.f32.mrf.mxu1  ;;  %v5885_v55 = vpop.f32.mrf.mxu2  ;;  %14713 = vtanh.f32 %v5938_v17  ;;  %v14269_v37 = vld [vmem:[%s22336_s3 + $0x12c] sm:$0xf0] }
 0x4d3   :  { %v5907_v12 = vadd.f32 %v5897_v3, %v22378_v33  ;;  %v12133_v3 = vld [vmem:[%s22336_s3 + $0x130] sm:$0xf0]  ;;  %v12452_v10 = vor.u32 %v14349_v35, %v12451_v30  ;;  %v12419_v33 = vld [vmem:[%s22336_s3 + $0x350] sm:$0xf] }
 0x4d4   :  { %v14313_v30 = vld [vmem:[%s22336_s3 + $0x294] sm:$0xf] }
 0x4d5   :  { %v5927_v38 = vmul.f32 0.5, %v5907_v12  ;;  %v14341_v12 = vld [vmem:[%s22336_s3 + $0x36c] sm:$0xf0]  ;;  %v12325_v35 = vld [vmem:[%s22336_s3 + $0x2b0] sm:$0xf0] }
 0x4d6   :  { %v12420_v18 = vor.u32 %v14341_v12, %v12419_v33  ;;  %v14290_v33 = vld [vmem:[%s22336_s3 + $0x1dc] sm:$0xf] }
 0x4d7   :  { %v14712_v29 = vpop.eup %14711  ;;  %14715 = vtanh.f32 %v5927_v38  ;;  %v14337_v38 = vld [vmem:[%s22336_s3 + $0x354] sm:$0xf]  ;;  %v12237_v12 = vld [vmem:[%s22336_s3 + $0x1f8] sm:$0xf0] }
 0x4d8   :  { %v5930_v41 = vmul.f32 0.5, %v14712_v29  ;;  %v5898_v47 = vpop.f32.mrf.mxu3  ;;  %v14714_v59 = vpop.eup %14713  ;;  %14717 = vtanh.f32 %v5939_v13  ;;  %v12421_v29 = vld [vmem:[%s22336_s3 + $0x370] sm:$0xf0] }
 0x4d9   :  { %v12136_v47 = vor.u32 %v14265_v7, %v12133_v3  ;;  %v12424_v39 = vor.u32 %v14337_v38, %v12421_v29  ;;  %v12235_v7 = vld [vmem:[%s22336_s3 + $0x1d8] sm:$0xf]  ;;  %v12291_v38 = vld [vmem:[%s22336_s3 + $0x250] sm:$0xf] }
 0x4da   :  { %v5932_v42 = vadd.f32 0.5, %v5930_v41  ;;  %v12132_v41 = vor.u32 %v14269_v37, %v12131_v19  ;;  %v14233_v19 = vld [vmem:[%s22336_s3 + $0x14] sm:$0xf]  ;;  %v14294_v3 = vld [vmem:[%s22336_s3 + $0x1f4] sm:$0xf0] }
 0x4db   :  { %v12005_v37 = vld [vmem:[%s22336_s3 + $0x30] sm:$0xf0]  ;;  %v14309_v29 = vld [vmem:[%s22336_s3 + $0x26c] sm:$0xf0] }
 0x4dc   :  { %v5942_v17 = vmul.f32 %v14714_v59, %v5932_v42  ;;  %v12099_v42 = vld [vmem:[%s22336_s3 + $0xd0] sm:$0xf]  ;;  %v12101_v59 = vld [vmem:[%s22336_s3 + $0xf0] sm:$0xf0] }
 0x4dd   :  { %v14716_v46 = vpop.eup %14715 }
 0x4de   :  { %v5950_v63 = vsel %vm5949_vm13, %v5942_v17, 0.0  ;;  %v20163_v61 = vsel %vm5949_vm13, %v5942_v17, %v19305_v0  ;;  %v5931_v36 = vmul.f32 0.5, %v14716_v46  ;;  %v14281_v0 = vld [vmem:[%s22336_s3 + $0x194] sm:$0xf]  ;;  %v14718_v26 = vpop.eup %14717  ;;  %v12387_v17 = vld [vmem:[%s22336_s3 + $0x310] sm:$0xf] }
 0x4df   :  { %11983 = vst [vmem:[%s22339_s5 + $0x40] sm:$0xff] %v5950_v63  ;;  %v20176_v57 = vpack.c.bf16 %v20163_v61, %v20163_v61  ;;  %v12200_v13 = vor.u32 %v14281_v0, %v12197_v20  ;;  %v14333_v46 = vld [vmem:[%s22336_s3 + $0x32c] sm:$0xf0]  ;;  %v12389_v63 = vld [vmem:[%s22336_s3 + $0x330] sm:$0xf0] }
 0x4e0   :  { %v5933_v8 = vadd.f32 0.5, %v5931_v36  ;;  %v12100_v36 = vor.u32 %v14261_v53, %v12099_v42  ;;  %v14249_v0 = vld [vmem:[%s22336_s3 + $0x94] sm:$0xf]  ;;  %v12008_v53 = vor.u32 %v14233_v19, %v12005_v37 }
 0x4e1   :  { %6746 = vmatmul.bf16.vlgmr.msra.gmra.mxu0 %v20176_v57  ;;  %6772 = vmatmul.bf16.vlgmr.msra.gmra.mxu2 %v20176_v57  ;;  %v12069_v20 = vld [vmem:[%s22336_s3 + $0xb0] sm:$0xf0] }
 0x4e2   :  { %v5943_v15 = vmul.f32 %v14718_v26, %v5933_v8  ;;  %6842 = vmatpush.bf16.msra.mxu0 %v12228_v45  ;;  %6868 = vmatpush.bf16.msra.mxu2 %v12232_v32  ;;  %v14329_v45 = vld [vmem:[%s22336_s3 + $0x314] sm:$0xf]  ;;  %v12104_v32 = vor.u32 %v14257_v16, %v12101_v59  ;;  %v12388_v8 = vor.u32 %v14333_v46, %v12387_v17  ;;  %v12355_v26 = vld [vmem:[%s22336_s3 + $0x2d0] sm:$0xf]  ;;  %v14282_v17 = vld [vmem:[%s22336_s3 + $0x19c] sm:$0xf] }
 0x4e3   :  { %v12392_v52 = vor.u32 %v14329_v45, %v12389_v63  ;;  %v12356_v2 = vor.u32 %v14325_v5, %v12355_v26  ;;  %v12236_v16 = vor.u32 %v14294_v3, %v12235_v7  ;;  %v12240_v59 = vor.u32 %v14290_v33, %v12237_v12  ;;  %v12205_v63 = vld [vmem:[%s22336_s3 + $0x1b8] sm:$0xf0]  ;;  %v12427_v7 = vld [vmem:[%s22336_s3 + $0x358] sm:$0xf] }
 0x4e4   :  { %v5951_v56 = vsel %vm5949_vm13, %v5943_v15, 0.0  ;;  %v20215_v24 = vsel %vm5949_vm13, %v5943_v15, %v19357_v23  ;;  %v14345_v23 = vld [vmem:[%s22336_s3 + $0x394] sm:$0xf]  ;;  %v12068_v15 = vor.u32 %v14253_v14, %v12067_v58  ;;  %v12292_v46 = vor.u32 %v14309_v29, %v12291_v38  ;;  %v14342_v3 = vld [vmem:[%s22336_s3 + $0x374] sm:$0xf0] }
 0x4e5   :  { %11984 = vst [vmem:[%s22339_s5 + $0x48] sm:$0xff] %v5951_v56  ;;  %v20228_v27 = vpack.c.bf16 %v20215_v24, %v20215_v24  ;;  %v12456_v55 = vor.u32 %v14345_v23, %v12453_v11  ;;  %v12360_v56 = vor.u32 %v14321_v50, %v12357_v40  ;;  %v12040_v11 = vor.u32 %v14241_v51, %v12037_v54  ;;  %v14297_v58 = vld [vmem:[%s22336_s3 + $0x214] sm:$0xf]  ;;  %v12171_v50 = vld [vmem:[%s22336_s3 + $0x158] sm:$0xf] }
 0x4e6   :  { %6843 = vmatpush.bf16.msra.mxu0 %v12196_v28  ;;  %6869 = vmatpush.bf16.msra.mxu2 %v12200_v13  ;;  %v12072_v28 = vor.u32 %v14249_v0, %v12069_v20  ;;  %v12035_v13 = vld [vmem:[%s22336_s3 + $0x50] sm:$0xf]  ;;  %v12261_v14 = vld [vmem:[%s22336_s3 + $0x230] sm:$0xf0]  ;;  %v12491_v0 = vld [vmem:[%s22336_s3 + $0x3d8] sm:$0xf]  ;;  %v12208_v5 = vor.u32 %v14282_v17, %v12205_v63 }
 0x4e7   :  { %6759 = vmatmul.bf16.vlgmr.msra.gmra.mxu1 %v20228_v27  ;;  %6785 = vmatmul.bf16.vlgmr.msra.gmra.mxu3 %v20228_v27  ;;  %v12036_v23 = vor.u32 %v14245_v60, %v12035_v13  ;;  %v14358_v20 = vld [vmem:[%s22336_s3 + $0x3f4] sm:$0xf0]  ;;  %v14274_v13 = vld [vmem:[%s22336_s3 + $0x15c] sm:$0xf] }
 0x4e8   :  { %6855 = vmatpush.bf16.msra.mxu1 %v12484_v22  ;;  %6881 = vmatpush.bf16.msra.mxu3 %v12488_v31  ;;  %v12323_v22 = vld [vmem:[%s22336_s3 + $0x290] sm:$0xf]  ;;  %v12173_v60 = vld [vmem:[%s22336_s3 + $0x178] sm:$0xf0]  ;;  %v12492_v51 = vor.u32 %v14358_v20, %v12491_v0  ;;  %v12107_v38 = vld [vmem:[%s22336_s3 + $0xd8] sm:$0xf] }
 0x4e9   :  { %v14317_v31 = vld [vmem:[%s22336_s3 + $0x2ac] sm:$0xf0]  ;;  %v14262_v29 = vld [vmem:[%s22336_s3 + $0xf4] sm:$0xf0] }
 0x4ea   :  { %6844 = vmatpush.bf16.msra.mxu0 %v12164_v34  ;;  %6870 = vmatpush.bf16.msra.mxu2 %v12168_v48  ;;  %v12003_v34 = vld [vmem:[%s22336_s3 + $0x10] sm:$0xf]  ;;  %v12108_v17 = vor.u32 %v14262_v29, %v12107_v38  ;;  %v14254_v63 = vld [vmem:[%s22336_s3 + $0xb4] sm:$0xf0] }
 0x4eb   :  { %v14237_v48 = vld [vmem:[%s22336_s3 + $0x2c] sm:$0xf0]  ;;  %v12363_v0 = vld [vmem:[%s22336_s3 + $0x2d8] sm:$0xf] }
 0x4ec   :  { %6856 = vmatpush.bf16.msra.mxu1 %v12452_v10  ;;  %6882 = vmatpush.bf16.msra.mxu3 %v12456_v55  ;;  %v12324_v10 = vor.u32 %v14317_v31, %v12323_v22  ;;  %v12328_v55 = vor.u32 %v14313_v30, %v12325_v35  ;;  %v12004_v42 = vor.u32 %v14237_v48, %v12003_v34  ;;  %v14346_v22 = vld [vmem:[%s22336_s3 + $0x39c] sm:$0xf]  ;;  %v14326_v20 = vld [vmem:[%s22336_s3 + $0x2f4] sm:$0xf0] }
 0x4ed   :  { %v12461_v31 = vld [vmem:[%s22336_s3 + $0x3b8] sm:$0xf0]  ;;  %v12176_v35 = vor.u32 %v14274_v13, %v12173_v60  ;;  %v12364_v13 = vor.u32 %v14326_v20, %v12363_v0  ;;  %v12267_v38 = vld [vmem:[%s22336_s3 + $0x218] sm:$0xf]  ;;  %v14483_v0 = vld [vmem:[%s22336_s3 + $0x3dc] sm:$0xf0] }
 0x4ee   :  { %6845 = vmatpush.bf16.msra.mxu0 %v12132_v41  ;;  %6871 = vmatpush.bf16.msra.mxu2 %v12136_v47  ;;  %v14305_v41 = vld [vmem:[%s22336_s3 + $0x254] sm:$0xf]  ;;  %v14266_v34 = vld [vmem:[%s22336_s3 + $0x11c] sm:$0xf]  ;;  %v12464_v37 = vor.u32 %v14346_v22, %v12461_v31  ;;  %v14302_v29 = vld [vmem:[%s22336_s3 + $0x234] sm:$0xf0] }
 0x4ef   :  { %v12293_v47 = vld [vmem:[%s22336_s3 + $0x270] sm:$0xf0]  ;;  %v12141_v48 = vld [vmem:[%s22336_s3 + $0x138] sm:$0xf0]  ;;  %v14479_v20 = vld [vmem:[%s22336_s3 + $0x3c4] sm:$0xf] }
 0x4f0   :  { %6857 = vmatpush.bf16.msra.mxu1 %v12420_v18  ;;  %6883 = vmatpush.bf16.msra.mxu3 %v12424_v39  ;;  %v12203_v18 = vld [vmem:[%s22336_s3 + $0x198] sm:$0xf]  ;;  %v12296_v45 = vor.u32 %v14305_v41, %v12293_v47  ;;  %v12144_v12 = vor.u32 %v14266_v34, %v12141_v48  ;;  %v14258_v41 = vld [vmem:[%s22336_s3 + $0xdc] sm:$0xf] }
 0x4f1   :  { %6798 = vmatmul.bf16.vlgmr.msrb.gmra.mxu0 %v20176_v57  ;;  %6824 = vmatmul.bf16.vlgmr.msrb.gmra.mxu2 %v20176_v57  ;;  %v14286_v39 = vld [vmem:[%s22336_s3 + $0x1b4] sm:$0xf0]  ;;  %v12109_v47 = vld [vmem:[%s22336_s3 + $0xf8] sm:$0xf0] }
 0x4f2   :  { %6846 = vmatpush.bf16.msra.mxu0 %v12100_v36  ;;  %6872 = vmatpush.bf16.msra.mxu2 %v12104_v32  ;;  %v12259_v36 = vld [vmem:[%s22336_s3 + $0x210] sm:$0xf]  ;;  %v12204_v26 = vor.u32 %v14286_v39, %v12203_v18  ;;  %v14330_v18 = vld [vmem:[%s22336_s3 + $0x31c] sm:$0xf] }
 0x4f3   :  { %v14301_v32 = vld [vmem:[%s22336_s3 + $0x22c] sm:$0xf0]  ;;  %v12397_v39 = vld [vmem:[%s22336_s3 + $0x338] sm:$0xf0] }
 0x4f4   :  { %6858 = vmatpush.bf16.msra.mxu1 %v12388_v8  ;;  %6884 = vmatpush.bf16.msra.mxu3 %v12392_v52  ;;  %v14354_v8 = vld [vmem:[%s22336_s3 + $0x3dc] sm:$0xf]  ;;  %v12260_v40 = vor.u32 %v14301_v32, %v12259_v36 }
 0x4f5   :  { %v12493_v52 = vld [vmem:[%s22336_s3 + $0x3f8] sm:$0xf0] }
 0x4f6   :  { %6847 = vmatpush.bf16.msra.mxu0 %v12068_v15  ;;  %6873 = vmatpush.bf16.msra.mxu2 %v12072_v28  ;;  %v12264_v15 = vor.u32 %v14297_v58, %v12261_v14  ;;  %v14278_v28 = vld [vmem:[%s22336_s3 + $0x174] sm:$0xf0]  ;;  %v12496_v54 = vor.u32 %v14354_v8, %v12493_v52  ;;  %v14250_v36 = vld [vmem:[%s22336_s3 + $0x9c] sm:$0xf]  ;;  %v12400_v14 = vor.u32 %v14330_v18, %v12397_v39  ;;  %v14415_v18 = vld [vmem:[%s22336_s3 + $0x1c4] sm:$0xf] }
 0x4f7   :  { %6811 = vmatmul.bf16.vlgmr.msrb.gmra.mxu1 %v20228_v27  ;;  %6837 = vmatmul.bf16.vlgmr.msrb.gmra.mxu3 %v20228_v27  ;;  %v12172_v30 = vor.u32 %v14278_v28, %v12171_v50  ;;  %v12077_v32 = vld [vmem:[%s22336_s3 + $0xb8] sm:$0xf0]  ;;  %v12043_v50 = vld [vmem:[%s22336_s3 + $0x58] sm:$0xf] }
 0x4f8   :  { %6859 = vmatpush.bf16.msra.mxu1 %v12356_v2  ;;  %6885 = vmatpush.bf16.msra.mxu3 %v12360_v56  ;;  %v12459_v2 = vld [vmem:[%s22336_s3 + $0x398] sm:$0xf]  ;;  %v14322_v8 = vld [vmem:[%s22336_s3 + $0x2dc] sm:$0xf] }
 0x4f9   :  { %v14350_v56 = vld [vmem:[%s22336_s3 + $0x3b4] sm:$0xf0]  ;;  %v12365_v52 = vld [vmem:[%s22336_s3 + $0x2f8] sm:$0xf0] }
 0x4fa   :  { %6848 = vmatpush.bf16.msra.mxu0 %v12036_v23  ;;  %6874 = vmatpush.bf16.msra.mxu2 %v12040_v11  ;;  %v12139_v23 = vld [vmem:[%s22336_s3 + $0x118] sm:$0xf]  ;;  %v12460_v19 = vor.u32 %v14350_v56, %v12459_v2  ;;  %v12045_v28 = vld [vmem:[%s22336_s3 + $0x78] sm:$0xf0]  ;;  %v12368_v60 = vor.u32 %v14322_v8, %v12365_v52  ;;  %v12983_v52 = vld [vmem:[%s22336_s3 + $0x3e0] sm:$0xf0] }
 0x4fb   :  { %v14270_v11 = vld [vmem:[%s22336_s3 + $0x134] sm:$0xf0]  ;;  %v14314_v2 = vld [vmem:[%s22336_s3 + $0x29c] sm:$0xf] }
 0x4fc   :  { %6860 = vmatpush.bf16.msra.mxu1 %v12324_v10  ;;  %6886 = vmatpush.bf16.msra.mxu3 %v12328_v55  ;;  %v14338_v10 = vld [vmem:[%s22336_s3 + $0x35c] sm:$0xf]  ;;  %v12140_v33 = vor.u32 %v14270_v11, %v12139_v23 }
 0x4fd   :  { %v12429_v55 = vld [vmem:[%s22336_s3 + $0x378] sm:$0xf0] }
 0x4fe   :  { %6849 = vmatpush.bf16.msra.mxu0 %v12004_v42  ;;  %6875 = vmatpush.bf16.msra.mxu2 %v12008_v53  ;;  %v12428_v42 = vor.u32 %v14342_v3, %v12427_v7  ;;  %v12432_v53 = vor.u32 %v14338_v10, %v12429_v55  ;;  %v12333_v56 = vld [vmem:[%s22336_s3 + $0x2b8] sm:$0xf0] }
 0x4ff   :  { %v14234_v23 = vld [vmem:[%s22336_s3 + $0x1c] sm:$0xf]  ;;  %v12336_v48 = vor.u32 %v14314_v2, %v12333_v56  ;;  %v14475_v2 = vld [vmem:[%s22336_s3 + $0x39c] sm:$0xf0]  ;;  %v14471_v56 = vld [vmem:[%s22336_s3 + $0x384] sm:$0xf] }
 0x500   :  { %6861 = vmatpush.bf16.msra.mxu1 %v12292_v46  ;;  %6887 = vmatpush.bf16.msra.mxu3 %v12296_v45  ;;  %v12112_v46 = vor.u32 %v14258_v41, %v12109_v47  ;;  %v12075_v45 = vld [vmem:[%s22336_s3 + $0x98] sm:$0xf]  ;;  %v12013_v11 = vld [vmem:[%s22336_s3 + $0x38] sm:$0xf0] }
 0x501   :  { %6850 = vmatmul.bf16.vlgmr.msra.gmra.mxu0 %v20176_v57  ;;  %6876 = vmatmul.bf16.vlgmr.msra.gmra.mxu2 %v20176_v57  ;;  %v14306_v7 = vld [vmem:[%s22336_s3 + $0x25c] sm:$0xf]  ;;  %v12016_v55 = vor.u32 %v14234_v23, %v12013_v11  ;;  %v12629_v23 = vld [vmem:[%s22336_s3 + $0x100] sm:$0xf] }
 0x502   :  { %6894 = vmatpush.bf16.msrb.mxu0 %v12236_v16  ;;  %6920 = vmatpush.bf16.msrb.mxu2 %v12240_v59  ;;  %v12395_v16 = vld [vmem:[%s22336_s3 + $0x318] sm:$0xf]  ;;  %v12301_v3 = vld [vmem:[%s22336_s3 + $0x278] sm:$0xf0]  ;;  %v14395_v11 = vld [vmem:[%s22336_s3 + $0x11c] sm:$0xf0] }
 0x503   :  { %v14334_v59 = vld [vmem:[%s22336_s3 + $0x334] sm:$0xf0]  ;;  %v14298_v41 = vld [vmem:[%s22336_s3 + $0x21c] sm:$0xf] }
 0x504   :  { %6862 = vmatpush.bf16.msra.mxu1 %v12260_v40  ;;  %6888 = vmatpush.bf16.msra.mxu3 %v12264_v15  ;;  %v12396_v58 = vor.u32 %v14334_v59, %v12395_v16  ;;  %v14246_v40 = vld [vmem:[%s22336_s3 + $0x74] sm:$0xf0]  ;;  %v14242_v15 = vld [vmem:[%s22336_s3 + $0x5c] sm:$0xf]  ;;  %v12725_v16 = vld [vmem:[%s22336_s3 + $0x1c0] sm:$0xf] }
 0x505   :  { %v12044_v22 = vor.u32 %v14246_v40, %v12043_v50  ;;  %v12048_v31 = vor.u32 %v14242_v15, %v12045_v28  ;;  %v12269_v47 = vld [vmem:[%s22336_s3 + $0x238] sm:$0xf0]  ;;  %v14419_v59 = vld [vmem:[%s22336_s3 + $0x1dc] sm:$0xf0]  ;;  %v14399_v40 = vld [vmem:[%s22336_s3 + $0x144] sm:$0xf] }
 0x506   :  { %6895 = vmatpush.bf16.msrb.mxu0 %v12204_v26  ;;  %6921 = vmatpush.bf16.msrb.mxu2 %v12208_v5  ;;  %v12076_v26 = vor.u32 %v14254_v63, %v12075_v45  ;;  %v12080_v5 = vor.u32 %v14250_v36, %v12077_v32  ;;  %v12726_v39 = vor.u32 %v14419_v59, %v12725_v16  ;;  %v14411_v45 = vld [vmem:[%s22336_s3 + $0x19c] sm:$0xf0]  ;;  %v14407_v63 = vld [vmem:[%s22336_s3 + $0x184] sm:$0xf] }
 0x507   :  { %6863 = vmatmul.bf16.vlgmr.msra.gmra.mxu1 %v20228_v27  ;;  %6889 = vmatmul.bf16.vlgmr.msra.gmra.mxu3 %v20228_v27  ;;  %v12695_v32 = vld [vmem:[%s22336_s3 + $0x1a0] sm:$0xf0]  ;;  %v14403_v50 = vld [vmem:[%s22336_s3 + $0x15c] sm:$0xf0] }
 0x508   :  { %6907 = vmatpush.bf16.msrb.mxu1 %v12492_v51  ;;  %6933 = vmatpush.bf16.msrb.mxu3 %v12496_v54  ;;  %v12331_v51 = vld [vmem:[%s22336_s3 + $0x298] sm:$0xf]  ;;  %v12599_v59 = vld [vmem:[%s22336_s3 + $0xe0] sm:$0xf0] }
 0x509   :  { %v14318_v54 = vld [vmem:[%s22336_s3 + $0x2b4] sm:$0xf0] }
 0x50a   :  { %6896 = vmatpush.bf16.msrb.mxu0 %v12172_v30  ;;  %6922 = vmatpush.bf16.msrb.mxu2 %v12176_v35  ;;  %v12011_v30 = vld [vmem:[%s22336_s3 + $0x18] sm:$0xf]  ;;  %v12332_v34 = vor.u32 %v14318_v54, %v12331_v51  ;;  %v12949_v54 = vld [vmem:[%s22336_s3 + $0x380] sm:$0xf] }
 0x50b   :  { %v14238_v35 = vld [vmem:[%s22336_s3 + $0x34] sm:$0xf0] }
 0x50c   :  { %6908 = vmatpush.bf16.msrb.mxu1 %v12460_v19  ;;  %6934 = vmatpush.bf16.msrb.mxu3 %v12464_v37  ;;  %v12299_v19 = vld [vmem:[%s22336_s3 + $0x258] sm:$0xf]  ;;  %v12012_v10 = vor.u32 %v14238_v35, %v12011_v30  ;;  %v12951_v30 = vld [vmem:[%s22336_s3 + $0x3a0] sm:$0xf0] }
 0x50d   :  { %v14310_v37 = vld [vmem:[%s22336_s3 + $0x274] sm:$0xf0]  ;;  %v12954_v35 = vor.u32 %v14471_v56, %v12951_v30 }
 0x50e   :  { %6897 = vmatpush.bf16.msrb.mxu0 %v12140_v33  ;;  %6923 = vmatpush.bf16.msrb.mxu2 %v12144_v12  ;;  %v12300_v33 = vor.u32 %v14310_v37, %v12299_v19  ;;  %v12304_v12 = vor.u32 %v14306_v7, %v12301_v3  ;;  %v12631_v19 = vld [vmem:[%s22336_s3 + $0x120] sm:$0xf0]  ;;  %v12917_v7 = vld [vmem:[%s22336_s3 + $0x340] sm:$0xf] }
 0x50f   :  { %v14467_v3 = vld [vmem:[%s22336_s3 + $0x35c] sm:$0xf0] }
 0x510   :  { %6909 = vmatpush.bf16.msrb.mxu1 %v12428_v42  ;;  %6935 = vmatpush.bf16.msrb.mxu3 %v12432_v53  ;;  %v12268_v42 = vor.u32 %v14302_v29, %v12267_v38  ;;  %v12272_v53 = vor.u32 %v14298_v41, %v12269_v47  ;;  %v12597_v29 = vld [vmem:[%s22336_s3 + $0xc0] sm:$0xf]  ;;  %v14383_v47 = vld [vmem:[%s22336_s3 + $0xc4] sm:$0xf] }
 0x511   :  { %v14387_v41 = vld [vmem:[%s22336_s3 + $0xdc] sm:$0xf0] }
 0x512   :  { %6898 = vmatpush.bf16.msrb.mxu0 %v12108_v17  ;;  %6924 = vmatpush.bf16.msrb.mxu2 %v12112_v46  ;;  %v12598_v16 = vor.u32 %v14387_v41, %v12597_v29  ;;  %v12501_v41 = vld [vmem:[%s22336_s3] sm:$0xf] }
 0x514   :  { %6910 = vmatpush.bf16.msrb.mxu1 %v12396_v58  ;;  %6936 = vmatpush.bf16.msrb.mxu3 %v12400_v14  ;;  %v12698_v58 = vor.u32 %v14407_v63, %v12695_v32  ;;  %v12981_v14 = vld [vmem:[%s22336_s3 + $0x3c0] sm:$0xf]  ;;  %v12887_v63 = vld [vmem:[%s22336_s3 + $0x320] sm:$0xf0] }
 0x515   :  { %v12982_v8 = vor.u32 %v14483_v0, %v12981_v14  ;;  %v12565_v32 = vld [vmem:[%s22336_s3 + $0x80] sm:$0xf]  ;;  %v14375_v0 = vld [vmem:[%s22336_s3 + $0x84] sm:$0xf] }
 0x516   :  { %6899 = vmatpush.bf16.msrb.mxu0 %v12076_v26  ;;  %6925 = vmatpush.bf16.msrb.mxu2 %v12080_v5  ;;  %v12986_v26 = vor.u32 %v14479_v20, %v12983_v52  ;;  %v12661_v5 = vld [vmem:[%s22336_s3 + $0x140] sm:$0xf]  ;;  %v12567_v20 = vld [vmem:[%s22336_s3 + $0xa0] sm:$0xf0] }
 0x517   :  { %v12853_v52 = vld [vmem:[%s22336_s3 + $0x2c0] sm:$0xf] }
 0x518   :  { %6911 = vmatpush.bf16.msrb.mxu1 %v12364_v13  ;;  %6937 = vmatpush.bf16.msrb.mxu3 %v12368_v60  ;;  %v12662_v13 = vor.u32 %v14403_v50, %v12661_v5  ;;  %v12663_v60 = vld [vmem:[%s22336_s3 + $0x160] sm:$0xf0] }
 0x519   :  { %v12666_v51 = vor.u32 %v14399_v40, %v12663_v60  ;;  %v14447_v5 = vld [vmem:[%s22336_s3 + $0x2c4] sm:$0xf] }
 0x51a   :  { %6900 = vmatpush.bf16.msrb.mxu0 %v12044_v22  ;;  %6926 = vmatpush.bf16.msrb.mxu2 %v12048_v31  ;;  %v12950_v31 = vor.u32 %v14475_v2, %v12949_v54  ;;  %v12855_v60 = vld [vmem:[%s22336_s3 + $0x2e0] sm:$0xf0]  ;;  %v12533_v54 = vld [vmem:[%s22336_s3 + $0x40] sm:$0xf] }
 0x51b   :  { %v14371_v2 = vld [vmem:[%s22336_s3 + $0x5c] sm:$0xf0] }
 0x51c   :  { %6912 = vmatpush.bf16.msrb.mxu1 %v12332_v34  ;;  %6938 = vmatpush.bf16.msrb.mxu3 %v12336_v48  ;;  %v14391_v34 = vld [vmem:[%s22336_s3 + $0x104] sm:$0xf]  ;;  %v12630_v48 = vor.u32 %v14395_v11, %v12629_v23  ;;  %v12534_v30 = vor.u32 %v14371_v2, %v12533_v54  ;;  %v22380_v23 = vld [vmem:[#allocation5_spill] sm:$0xff]  ;;  %v14412_v54 = vld [vmem:[%s22336_s3 + $0x1a4] sm:$0xf0] }
 0x51d   :  { %v12634_v37 = vor.u32 %v14391_v34, %v12631_v19  ;;  %v518_v11 = vadd.f32 %v22380_v23, %v15844_v43  ;;  %v12821_v19 = vld [vmem:[%s22336_s3 + $0x280] sm:$0xf]  ;;  %v14408_v2 = vld [vmem:[%s22336_s3 + $0x18c] sm:$0xf] }
 0x51e   :  { %6901 = vmatpush.bf16.msrb.mxu0 %v12012_v10  ;;  %6927 = vmatpush.bf16.msrb.mxu2 %v12016_v55  ;;  %v12918_v55 = vor.u32 %v14467_v3, %v12917_v7  ;;  %v14439_v7 = vld [vmem:[%s22336_s3 + $0x284] sm:$0xf] }
 0x520   :  { %6913 = vmatpush.bf16.msrb.mxu1 %v12300_v33  ;;  %6939 = vmatpush.bf16.msrb.mxu3 %v12304_v12  ;;  %v14463_v33 = vld [vmem:[%s22336_s3 + $0x344] sm:$0xf] }
 0x521   :  { %6902 = vmatmul.bf16.vlgmr.msrb.gmra.mxu0 %v20176_v57  ;;  %6928 = vmatmul.bf16.vlgmr.msrb.gmra.mxu2 %v20176_v57  ;;  %v12727_v57 = vld [vmem:[%s22336_s3 + $0x1e0] sm:$0xf0] }
 0x522   :  { %v12730_v17 = vor.u32 %v14415_v18, %v12727_v57  ;;  %7784 = vmatpush.bf16.msra.mxu0 %v12726_v39  ;;  %v12919_v12 = vld [vmem:[%s22336_s3 + $0x360] sm:$0xf0]  ;;  %v12602_v18 = vor.u32 %v14383_v47, %v12599_v59  ;;  %v12885_v39 = vld [vmem:[%s22336_s3 + $0x300] sm:$0xf]  ;;  %v12733_v59 = vld [vmem:[%s22336_s3 + $0x1c8] sm:$0xf] }
 0x523   :  { %v12922_v38 = vor.u32 %v14463_v33, %v12919_v12  ;;  %v14459_v57 = vld [vmem:[%s22336_s3 + $0x31c] sm:$0xf0]  ;;  %v12823_v12 = vld [vmem:[%s22336_s3 + $0x2a0] sm:$0xf0] }
 0x524   :  { %6914 = vmatpush.bf16.msrb.mxu1 %v12268_v42  ;;  %6940 = vmatpush.bf16.msrb.mxu3 %v12272_v53  ;;  %v12826_v29 = vor.u32 %v14439_v7, %v12823_v12  ;;  %v14363_v47 = vld [vmem:[%s22336_s3 + $0x1c] sm:$0xf0]  ;;  %v14484_v7 = vld [vmem:[%s22336_s3 + $0x3e4] sm:$0xf0]  ;;  %v12991_v12 = vld [vmem:[%s22336_s3 + $0x3e8] sm:$0xf0] }
 0x525   :  { %7810 = vmatpush.bf16.msra.mxu2 %v12730_v17  ;;  %v14455_v17 = vld [vmem:[%s22336_s3 + $0x304] sm:$0xf] }
 0x527   :  { %6915 = vmatmul.bf16.vlgmr.msrb.gmra.mxu1 %v20228_v27  ;;  %6941 = vmatmul.bf16.vlgmr.msrb.gmra.mxu3 %v20228_v27  ;;  %v12693_v27 = vld [vmem:[%s22336_s3 + $0x180] sm:$0xf] }
 0x528   :  { %v12694_v36 = vor.u32 %v14411_v45, %v12693_v27  ;;  %7797 = vmatpush.bf16.msra.mxu1 %v12982_v8  ;;  %7823 = vmatpush.bf16.msra.mxu3 %v12986_v26  ;;  %v12886_v45 = vor.u32 %v14459_v57, %v12885_v39  ;;  %v12570_v8 = vor.u32 %v14375_v0, %v12567_v20  ;;  %v14451_v26 = vld [vmem:[%s22336_s3 + $0x2dc] sm:$0xf0]  ;;  %v14420_v57 = vld [vmem:[%s22336_s3 + $0x1e4] sm:$0xf0] }
 0x529   :  { %7811 = vmatpush.bf16.msra.mxu2 %v12698_v58  ;;  %v14379_v58 = vld [vmem:[%s22336_s3 + $0x9c] sm:$0xf0] }
 0x52a   :  { %7785 = vmatpush.bf16.msra.mxu0 %v12694_v36  ;;  %v12890_v36 = vor.u32 %v14455_v17, %v12887_v63  ;;  %v12566_v14 = vor.u32 %v14379_v58, %v12565_v32  ;;  %v14416_v17 = vld [vmem:[%s22336_s3 + $0x1cc] sm:$0xf]  ;;  %v12734_v63 = vor.u32 %v14420_v57, %v12733_v59  ;;  %v12789_v32 = vld [vmem:[%s22336_s3 + $0x240] sm:$0xf]  ;;  %v22381_v58 = vld [vmem:[#allocation6_spill] sm:$0xff] }
 0x52b   :  { %v12957_v57 = vld [vmem:[%s22336_s3 + $0x388] sm:$0xf] }
 0x52c   :  { %7798 = vmatpush.bf16.msra.mxu1 %v12950_v31  ;;  %7824 = vmatpush.bf16.msra.mxu3 %v12954_v35  ;;  %v12535_v35 = vld [vmem:[%s22336_s3 + $0x60] sm:$0xf0] }
 0x52d   :  { %7812 = vmatpush.bf16.msra.mxu2 %v12666_v51  ;;  %v12858_v51 = vor.u32 %v14447_v5, %v12855_v60 }
 0x52e   :  { %7786 = vmatpush.bf16.msra.mxu0 %v12662_v13  ;;  %v12854_v13 = vor.u32 %v14451_v26, %v12853_v52  ;;  %v14431_v52 = vld [vmem:[%s22336_s3 + $0x244] sm:$0xf] }
 0x52f   :  { %v12791_v26 = vld [vmem:[%s22336_s3 + $0x260] sm:$0xf0] }
 0x530   :  { %7799 = vmatpush.bf16.msra.mxu1 %v12918_v55  ;;  %7825 = vmatpush.bf16.msra.mxu3 %v12922_v38  ;;  %v12794_v60 = vor.u32 %v14431_v52, %v12791_v26  ;;  %v14392_v26 = vld [vmem:[%s22336_s3 + $0x10c] sm:$0xf] }
 0x531   :  { %7813 = vmatpush.bf16.msra.mxu2 %v12634_v37  ;;  %v14443_v37 = vld [vmem:[%s22336_s3 + $0x29c] sm:$0xf0] }
 0x532   :  { %7787 = vmatpush.bf16.msra.mxu0 %v12630_v48  ;;  %v12822_v33 = vor.u32 %v14443_v37, %v12821_v19 }
 0x534   :  { %7800 = vmatpush.bf16.msra.mxu1 %v12886_v45  ;;  %7826 = vmatpush.bf16.msra.mxu3 %v12890_v36  ;;  %v12735_v36 = vld [vmem:[%s22336_s3 + $0x1e8] sm:$0xf0] }
 0x535   :  { %7814 = vmatpush.bf16.msra.mxu2 %v12602_v18  ;;  %v12738_v20 = vor.u32 %v14416_v17, %v12735_v36  ;;  %v14476_v17 = vld [vmem:[%s22336_s3 + $0x3a4] sm:$0xf0] }
 0x536   :  { %7788 = vmatpush.bf16.msra.mxu0 %v12598_v16  ;;  %v12503_v16 = vld [vmem:[%s22336_s3 + $0x20] sm:$0xf0] }
 0x538   :  { %7801 = vmatpush.bf16.msra.mxu1 %v12854_v13  ;;  %7827 = vmatpush.bf16.msra.mxu3 %v12858_v51  ;;  %v12701_v51 = vld [vmem:[%s22336_s3 + $0x188] sm:$0xf] }
 0x539   :  { %7815 = vmatpush.bf16.msra.mxu2 %v12570_v8  ;;  %v14435_v8 = vld [vmem:[%s22336_s3 + $0x25c] sm:$0xf0] }
 0x53a   :  { %7789 = vmatpush.bf16.msra.mxu0 %v12566_v14  ;;  %v547_v14 = vadd.f32 %v22381_v58, %v15847_v44  ;;  %v12790_v13 = vor.u32 %v14435_v8, %v12789_v32 }
 0x53c   :  { %7802 = vmatpush.bf16.msra.mxu1 %v12822_v33  ;;  %7828 = vmatpush.bf16.msra.mxu3 %v12826_v29  ;;  %v14404_v29 = vld [vmem:[%s22336_s3 + $0x164] sm:$0xf0] }
 0x53e   :  { %7790 = vmatpush.bf16.msra.mxu0 %v12534_v30 }
 0x540   :  { %7803 = vmatpush.bf16.msra.mxu1 %v12790_v13  ;;  %7829 = vmatpush.bf16.msra.mxu3 %v12794_v60 }
 0x55e   :  { %v20586_v46 = vpop.f32.mrf.mxu0 }
 0x564   :  { %v20621_v15 = vpop.f32.mrf.mxu1  ;;  %v20623_v28 = vpop.f32.mrf.mxu2 }
 0x565   :  { %v6761_v50 = vadd.f32 %v20621_v15, %v20586_v46  ;;  %v14367_v46 = vld [vmem:[%s22336_s3 + $0x44] sm:$0xf] }
 0x566   :  { %v6749_v22 = vpop.f32.mrf.mxu0  ;;  %v22379_v15 = vld [vmem:[#allocation3_spill] sm:$0xff]  ;;  %v12538_v48 = vor.u32 %v14367_v46, %v12535_v35 }
 0x567   :  { %v460_v56 = vadd.f32 %v22379_v15, %v15777_v9  ;;  %v12757_v15 = vld [vmem:[%s22336_s3 + $0x200] sm:$0xf] }
 0x568   :  { %7816 = vmatpush.bf16.msra.mxu2 %v12538_v48  ;;  %v12989_v48 = vld [vmem:[%s22336_s3 + $0x3c8] sm:$0xf] }
 0x569   :  { %v6946_v3 = vadd.f32 %v6761_v50, %v460_v56  ;;  %v14427_v56 = vld [vmem:[%s22336_s3 + $0x21c] sm:$0xf0]  ;;  %v12990_v33 = vor.u32 %v14484_v7, %v12989_v48  ;;  %v14384_v48 = vld [vmem:[%s22336_s3 + $0xcc] sm:$0xf] }
 0x56a   :  { %v20658_v10 = vpop.f32.mrf.mxu3  ;;  %v12758_v23 = vor.u32 %v14427_v56, %v12757_v15  ;;  %v12927_v56 = vld [vmem:[%s22336_s3 + $0x368] sm:$0xf0] }
 0x56b   :  { %v6787_v5 = vadd.f32 %v20658_v10, %v20623_v28  ;;  %v12702_v28 = vor.u32 %v14412_v54, %v12701_v51  ;;  %v12703_v10 = vld [vmem:[%s22336_s3 + $0x1a8] sm:$0xf0] }
 0x56c   :  { %v6762_v42 = vpop.f32.mrf.mxu1  ;;  %v6775_v53 = vpop.f32.mrf.mxu2  ;;  %v12706_v35 = vor.u32 %v14408_v2, %v12703_v10  ;;  %7804 = vmatpush.bf16.msra.mxu1 %v12758_v23  ;;  %v12925_v2 = vld [vmem:[%s22336_s3 + $0x348] sm:$0xf] }
 0x56d   :  { %v14359_v42 = vld [vmem:[%s22336_s3 + $0x4] sm:$0xf]  ;;  %v12502_v53 = vor.u32 %v14363_v47, %v12501_v41  ;;  %v12605_v23 = vld [vmem:[%s22336_s3 + $0xc8] sm:$0xf] }
 0x56e   :  { %v6799_v27 = vpop.f32.mrf.mxu0  ;;  %v12506_v39 = vor.u32 %v14359_v42, %v12503_v16  ;;  %v12671_v16 = vld [vmem:[%s22336_s3 + $0x168] sm:$0xf0] }
 0x56f   :  { %7791 = vmatpush.bf16.msra.mxu0 %v12502_v53  ;;  %v14400_v53 = vld [vmem:[%s22336_s3 + $0x14c] sm:$0xf] }
 0x570   :  { %7817 = vmatpush.bf16.msra.mxu2 %v12506_v39  ;;  %v12674_v39 = vor.u32 %v14400_v53, %v12671_v16  ;;  %7849 = vmatpush.bf16.msrb.mxu1 %v12990_v33 }
 0x572   :  { %v6788_v40 = vpop.f32.mrf.mxu3 }
 0x573   :  { %7836 = vmatpush.bf16.msrb.mxu0 %v12734_v63  ;;  %v12959_v63 = vld [vmem:[%s22336_s3 + $0x3a8] sm:$0xf0] }
 0x574   :  { %v6812_v22 = vpop.f32.mrf.mxu1  ;;  %v6825_v31 = vpop.f32.mrf.mxu2  ;;  %7862 = vmatpush.bf16.msrb.mxu2 %v12738_v20  ;;  %v14396_v20 = vld [vmem:[%s22336_s3 + $0x124] sm:$0xf0] }
 0x575   :  { %v6813_v34 = vadd.f32 %v6812_v22, %v6799_v27  ;;  %v6954_v27 = vmul.f32 0.5, %v6946_v3  ;;  %v22382_v22 = vld [vmem:[#allocation4_spill] sm:$0xff] }
 0x576   :  { %v6801_v55 = vpop.f32.mrf.mxu0  ;;  %v14480_v3 = vld [vmem:[%s22336_s3 + $0x3cc] sm:$0xf] }
 0x577   :  { %v6948_v38 = vadd.f32 %v6813_v34, %v518_v11  ;;  %v14423_v11 = vld [vmem:[%s22336_s3 + $0x204] sm:$0xf]  ;;  %7837 = vmatpush.bf16.msrb.mxu0 %v12702_v28  ;;  %v12994_v47 = vor.u32 %v14480_v3, %v12991_v12  ;;  %v14464_v28 = vld [vmem:[%s22336_s3 + $0x34c] sm:$0xf]  ;;  %v12893_v3 = vld [vmem:[%s22336_s3 + $0x308] sm:$0xf] }
 0x578   :  { %v12759_v34 = vld [vmem:[%s22336_s3 + $0x220] sm:$0xf0]  ;;  %7863 = vmatpush.bf16.msrb.mxu2 %v12706_v35  ;;  %v12930_v35 = vor.u32 %v14464_v28, %v12927_v56  ;;  %v12829_v56 = vld [vmem:[%s22336_s3 + $0x288] sm:$0xf] }
 0x579   :  { %v6962_v18 = vmul.f32 0.5, %v6948_v38  ;;  %v12762_v37 = vor.u32 %v14423_v11, %v12759_v34  ;;  %v12669_v38 = vld [vmem:[%s22336_s3 + $0x148] sm:$0xf] }
 0x57a   :  { %v6838_v45 = vpop.f32.mrf.mxu3  ;;  %v12670_v42 = vor.u32 %v14404_v29, %v12669_v38  ;;  %v14388_v11 = vld [vmem:[%s22336_s3 + $0xe4] sm:$0xf0]  ;;  %v14456_v29 = vld [vmem:[%s22336_s3 + $0x30c] sm:$0xf] }
 0x57b   :  { %14719 = vtanh.f32 %v6962_v18  ;;  %v6839_v0 = vadd.f32 %v6838_v45, %v6825_v31  ;;  %v489_v31 = vadd.f32 %v22382_v22, %v15800_v4  ;;  %7830 = vmatpush.bf16.msra.mxu3 %v12762_v37  ;;  %v12958_v45 = vor.u32 %v14476_v17, %v12957_v57  ;;  %v14380_v57 = vld [vmem:[%s22336_s3 + $0xa4] sm:$0xf0]  ;;  %v14376_v17 = vld [vmem:[%s22336_s3 + $0x8c] sm:$0xf] }
 0x57c   :  { %v6814_v50 = vpop.f32.mrf.mxu1  ;;  %v6827_v40 = vpop.f32.mrf.mxu2  ;;  %7838 = vmatpush.bf16.msrb.mxu0 %v12670_v42  ;;  %7864 = vmatpush.bf16.msrb.mxu2 %v12674_v39  ;;  %v12606_v34 = vor.u32 %v14388_v11, %v12605_v23  ;;  %v12573_v39 = vld [vmem:[%s22336_s3 + $0x88] sm:$0xf]  ;;  %v12831_v11 = vld [vmem:[%s22336_s3 + $0x2a8] sm:$0xf0] }
 0x57d   :  { %v6949_v46 = vadd.f32 %v6839_v0, %v547_v14  ;;  %v6947_v55 = vadd.f32 %v6787_v5, %v489_v31  ;;  %v12637_v0 = vld [vmem:[%s22336_s3 + $0x108] sm:$0xf]  ;;  %v12639_v5 = vld [vmem:[%s22336_s3 + $0x128] sm:$0xf0]  ;;  %v22383_v50 = vld [vmem:[#allocation18_spill] sm:$0xff]  ;;  %7850 = vmatpush.bf16.msrb.mxu1 %v12958_v45 }
 0x57e   :  { %v6851_v30 = vpop.f32.mrf.mxu0  ;;  %v12638_v52 = vor.u32 %v14396_v20, %v12637_v0  ;;  %v576_v40 = vadd.f32 %v22383_v50, %v16178_v1  ;;  %v12642_v54 = vor.u32 %v14392_v26, %v12639_v5  ;;  %v14452_v0 = vld [vmem:[%s22336_s3 + $0x2e4] sm:$0xf0]  ;;  %v14448_v20 = vld [vmem:[%s22336_s3 + $0x2cc] sm:$0xf]  ;;  %v20928_v50 = vpop.permute.xlu2 %6993 }
 0x57f   :  { %v6963_v19 = vmul.f32 0.5, %v6949_v46  ;;  %7875 = vmatpush.bf16.msrb.mxu3 %v12994_v47  ;;  %v6955_v36 = vmul.f32 0.5, %v6947_v55  ;;  %v14468_v46 = vld [vmem:[%s22336_s3 + $0x364] sm:$0xf0]  ;;  %v12863_v26 = vld [vmem:[%s22336_s3 + $0x2e8] sm:$0xf0] }
 0x580   :  { %v12926_v15 = vor.u32 %v14468_v46, %v12925_v2  ;;  %7839 = vmatpush.bf16.msrb.mxu0 %v12638_v52  ;;  %7865 = vmatpush.bf16.msrb.mxu2 %v12642_v54  ;;  %v14460_v55 = vld [vmem:[%s22336_s3 + $0x324] sm:$0xf0]  ;;  %v14368_v54 = vld [vmem:[%s22336_s3 + $0x4c] sm:$0xf]  ;;  %vm6995_vm14 = vcmp.eq.s32.totalorder %v20928_v50, 1 }
 0x581   :  { %v14720_v41 = vpop.eup %14719  ;;  %14721 = vtanh.f32 %v6963_v19  ;;  %v12607_v19 = vld [vmem:[%s22336_s3 + $0xe8] sm:$0xf0]  ;;  %v12894_v38 = vor.u32 %v14460_v55, %v12893_v3  ;;  %v12967_v50 = vld [vmem:[%s22336_s3 + $0x3b0] sm:$0xf0] }
 0x582   :  { %14723 = vtanh.f32 %v6954_v27  ;;  %v6966_v59 = vmul.f32 0.5, %v14720_v41  ;;  %v6840_v18 = vpop.f32.mrf.mxu3  ;;  %v14472_v27 = vld [vmem:[%s22336_s3 + $0x38c] sm:$0xf]  ;;  %v12610_v7 = vor.u32 %v14384_v48, %v12607_v19  ;;  %7851 = vmatpush.bf16.msrb.mxu1 %v12926_v15  ;;  %v12509_v48 = vld [vmem:[%s22336_s3 + $0x8] sm:$0xf] }
 0x583   :  { %v12962_v14 = vor.u32 %v14472_v27, %v12959_v63  ;;  %14725 = vtanh.f32 %v6955_v36  ;;  %v12895_v41 = vld [vmem:[%s22336_s3 + $0x328] sm:$0xf0]  ;;  %v12574_v27 = vor.u32 %v14380_v57, %v12573_v39  ;;  %v14364_v19 = vld [vmem:[%s22336_s3 + $0x24] sm:$0xf0] }
 0x584   :  { %v6968_v32 = vadd.f32 0.5, %v6966_v59  ;;  %v6877_v58 = vpop.f32.mrf.mxu2  ;;  %v6864_v8 = vpop.f32.mrf.mxu1  ;;  %v22384_v47 = vld [vmem:[#allocation20_spill] sm:$0xff]  ;;  %7840 = vmatpush.bf16.msrb.mxu0 %v12606_v34  ;;  %v12898_v18 = vor.u32 %v14456_v29, %v12895_v41  ;;  %7866 = vmatpush.bf16.msrb.mxu2 %v12610_v7  ;;  %v12510_v7 = vor.u32 %v14364_v19, %v12509_v48 }
 0x585   :  { %v6865_v60 = vadd.f32 %v6864_v8, %v6851_v30  ;;  %7876 = vmatpush.bf16.msrb.mxu3 %v12962_v14  ;;  %v605_v42 = vadd.f32 %v22384_v47, %v16183_v6  ;;  %v12575_v63 = vld [vmem:[%s22336_s3 + $0xa8] sm:$0xf0]  ;;  %v12861_v14 = vld [vmem:[%s22336_s3 + $0x2c8] sm:$0xf] }
 0x586   :  { %v20861_v13 = vmul.f32 %v6968_v32, %v20112_v62  ;;  %v6853_v51 = vpop.f32.mrf.mxu0  ;;  %7852 = vmatpush.bf16.msrb.mxu1 %v12894_v38  ;;  %v12862_v52 = vor.u32 %v14452_v0, %v12861_v14  ;;  %v12511_v3 = vld [vmem:[%s22336_s3 + $0x28] sm:$0xf0]  ;;  %v12797_v29 = vld [vmem:[%s22336_s3 + $0x248] sm:$0xf] }
 0x587   :  { %v14722_v10 = vpop.eup %14721  ;;  %v6950_v30 = vadd.f32 %v6865_v60, %v576_v40  ;;  %v12866_v40 = vor.u32 %v14448_v20, %v12863_v26  ;;  %v12541_v60 = vld [vmem:[%s22336_s3 + $0x48] sm:$0xf]  ;;  %v14432_v47 = vld [vmem:[%s22336_s3 + $0x24c] sm:$0xf]  ;;  %v22386_v26 = vld [vmem:[#allocation22_spill] sm:$0xff] }
 0x588   :  { %v14724_v22 = vpop.eup %14723  ;;  %v6967_v31 = vmul.f32 0.5, %v14722_v10  ;;  %7841 = vmatpush.bf16.msrb.mxu0 %v12574_v27  ;;  %v14372_v51 = vld [vmem:[%s22336_s3 + $0x64] sm:$0xf0]  ;;  %v12543_v10 = vld [vmem:[%s22336_s3 + $0x68] sm:$0xf0] }
 0x589   :  { %14727 = vtanh.f32 %v6950_v30  ;;  %v6958_v33 = vmul.f32 0.5, %v14724_v22  ;;  %7877 = vmatpush.bf16.msrb.mxu3 %v12930_v35  ;;  %v14726_v36 = vpop.eup %14725  ;;  %v12542_v28 = vor.u32 %v14372_v51, %v12541_v60  ;;  %v12546_v15 = vor.u32 %v14368_v54, %v12543_v10  ;;  %v14444_v22 = vld [vmem:[%s22336_s3 + $0x2a4] sm:$0xf0]  ;;  %v12767_v27 = vld [vmem:[%s22336_s3 + $0x228] sm:$0xf0] }
 0x58a   :  { %v6969_v37 = vadd.f32 0.5, %v6967_v31  ;;  %v6890_v12 = vpop.f32.mrf.mxu3  ;;  %v6959_v2 = vmul.f32 0.5, %v14726_v36  ;;  %v14440_v31 = vld [vmem:[%s22336_s3 + $0x28c] sm:$0xf]  ;;  %7853 = vmatpush.bf16.msrb.mxu1 %v12862_v52  ;;  %v12830_v23 = vor.u32 %v14444_v22, %v12829_v56  ;;  %v14436_v41 = vld [vmem:[%s22336_s3 + $0x264] sm:$0xf0] }
 0x58b   :  { %v6891_v16 = vadd.f32 %v6890_v12, %v6877_v58  ;;  %v12578_v58 = vor.u32 %v14376_v17, %v12575_v63  ;;  %v6960_v8 = vadd.f32 0.5, %v6958_v33  ;;  %v12834_v34 = vor.u32 %v14440_v31, %v12831_v11  ;;  %v12765_v39 = vld [vmem:[%s22336_s3 + $0x208] sm:$0xf]  ;;  %v12741_v56 = vld [vmem:[%s22336_s3 + $0x1d0] sm:$0xf] }
 0x58c   :  { %v20902_v53 = vmul.f32 %v6969_v37, %v20133_v49  ;;  %v6879_v59 = vpop.f32.mrf.mxu2  ;;  %v6866_v45 = vpop.f32.mrf.mxu1  ;;  %7842 = vmatpush.bf16.msrb.mxu0 %v12542_v28  ;;  %v6961_v37 = vadd.f32 0.5, %v6959_v2  ;;  %v14428_v57 = vld [vmem:[%s22336_s3 + $0x224] sm:$0xf0]  ;;  %v14421_v22 = vld [vmem:[%s22336_s3 + $0x1ec] sm:$0xf0] }
 0x58d   :  { %v6951_v32 = vadd.f32 %v6891_v16, %v605_v42  ;;  %7878 = vmatpush.bf16.msrb.mxu3 %v12898_v18  ;;  %7867 = vmatpush.bf16.msrb.mxu2 %v12578_v58  ;;  %v12799_v42 = vld [vmem:[%s22336_s3 + $0x268] sm:$0xf0]  ;;  %v12766_v45 = vor.u32 %v14428_v57, %v12765_v39  ;;  %v22385_v58 = vld [vmem:[#allocation21_spill] sm:$0xff] }
 0x58e   :  { %7854 = vmatpush.bf16.msrb.mxu1 %v12830_v23  ;;  %v12802_v59 = vor.u32 %v14432_v47, %v12799_v42  ;;  %v634_v14 = vadd.f32 %v22385_v58, %v16194_v21  ;;  %v14485_v47 = vld [vmem:[%s22336_s3 + $0x3ec] sm:$0xf0]  ;;  %v12999_v42 = vld [vmem:[%s22336_s3 + $0x3f0] sm:$0xf0] }
 0x58f   :  { %v14728_v5 = vpop.eup %14727  ;;  %14729 = vtanh.f32 %v6951_v32  ;;  %v12677_v39 = vld [vmem:[%s22336_s3 + $0x150] sm:$0xf] }
 0x590   :  { %v6982_v46 = vmul.f32 %v14728_v5, %v6960_v8  ;;  %7843 = vmatpush.bf16.msrb.mxu0 %v12510_v7  ;;  %v663_v5 = vadd.f32 %v22386_v26, %v16197_v25  ;;  %v12709_v7 = vld [vmem:[%s22336_s3 + $0x190] sm:$0xf]  ;;  %v14393_v26 = vld [vmem:[%s22336_s3 + $0x114] sm:$0xf] }
 0x591   :  { %7879 = vmatpush.bf16.msrb.mxu3 %v12866_v40  ;;  %7868 = vmatpush.bf16.msrb.mxu2 %v12546_v15  ;;  %v14405_v57 = vld [vmem:[%s22336_s3 + $0x16c] sm:$0xf0] }
 0x592   :  { %v6984_v30 = vadd.f32 %v6982_v46, %v20861_v13  ;;  %v6892_v35 = vpop.f32.mrf.mxu3  ;;  %v14360_v13 = vld [vmem:[%s22336_s3 + $0xc] sm:$0xf]  ;;  %v12965_v58 = vld [vmem:[%s22336_s3 + $0x390] sm:$0xf] }
 0x593   :  { %v12514_v12 = vor.u32 %v14360_v13, %v12511_v3  ;;  %v12743_v35 = vld [vmem:[%s22336_s3 + $0x1f0] sm:$0xf0]  ;;  %v14413_v3 = vld [vmem:[%s22336_s3 + $0x1ac] sm:$0xf0] }
 0x594   :  { %v20971_v55 = vsel %vm6995_vm14, %v6984_v30, %v20112_v62  ;;  %v12798_v62 = vor.u32 %v14436_v41, %v12797_v29  ;;  %v12997_v29 = vld [vmem:[%s22336_s3 + $0x3d0] sm:$0xf] }
 0x595   :  { %v14730_v33 = vpop.eup %14729  ;;  %7880 = vmatpush.bf16.msrb.mxu3 %v12834_v34  ;;  %7869 = vmatpush.bf16.msrb.mxu2 %v12514_v12  ;;  %v12742_v34 = vor.u32 %v14421_v22, %v12741_v56  ;;  %v12711_v12 = vld [vmem:[%s22336_s3 + $0x1b0] sm:$0xf0]  ;;  %v14389_v56 = vld [vmem:[%s22336_s3 + $0xec] sm:$0xf0] }
 0x596   :  { %v6983_v38 = vmul.f32 %v14730_v33, %v6961_v37  ;;  %7855 = vmatpush.bf16.msrb.mxu1 %v12798_v62  ;;  %v14481_v62 = vld [vmem:[%s22336_s3 + $0x3d4] sm:$0xf] }
 0x597   :  { %v14385_v22 = vld [vmem:[%s22336_s3 + $0xd4] sm:$0xf] }
 0x598   :  { %v6985_v16 = vadd.f32 %v6983_v38, %v20902_v53  ;;  %v14424_v53 = vld [vmem:[%s22336_s3 + $0x20c] sm:$0xf] }
 0x599   :  { %7881 = vmatpush.bf16.msrb.mxu3 %v12802_v59  ;;  %v12770_v63 = vor.u32 %v14424_v53, %v12767_v27  ;;  %v12710_v59 = vor.u32 %v14413_v3, %v12709_v7  ;;  %v12679_v53 = vld [vmem:[%s22336_s3 + $0x170] sm:$0xf0]  ;;  %v12581_v7 = vld [vmem:[%s22336_s3 + $0x90] sm:$0xf] }
 0x59a   :  { %v20995_v17 = vsel %vm6995_vm14, %v6985_v16, %v20133_v49  ;;  %7856 = vmatpush.bf16.msrb.mxu1 %v12766_v45  ;;  %v14401_v45 = vld [vmem:[%s22336_s3 + $0x154] sm:$0xf]  ;;  %v14381_v3 = vld [vmem:[%s22336_s3 + $0xac] sm:$0xf0] }
 0x59d   :  { %7882 = vmatpush.bf16.msrb.mxu3 %v12770_v63 }
 0x59e   :  { %v6903_v18 = vpop.f32.mrf.mxu0 }
 0x5a4   :  { %v6916_v36 = vpop.f32.mrf.mxu1  ;;  %v6929_v32 = vpop.f32.mrf.mxu2 }
 0x5a5   :  { %v6917_v0 = vadd.f32 %v6916_v36, %v6903_v18  ;;  %v12998_v36 = vor.u32 %v14485_v47, %v12997_v29  ;;  %v14453_v47 = vld [vmem:[%s22336_s3 + $0x2ec] sm:$0xf0] }
 0x5a6   :  { %v6905_v49 = vpop.f32.mrf.mxu0 }
 0x5a7   :  { %v6952_v20 = vadd.f32 %v6917_v0, %v634_v14  ;;  %v14477_v14 = vld [vmem:[%s22336_s3 + $0x3ac] sm:$0xf0]  ;;  %v12678_v49 = vor.u32 %v14405_v57, %v12677_v39  ;;  %v14369_v57 = vld [vmem:[%s22336_s3 + $0x54] sm:$0xf] }
 0x5a8   :  { %v14373_v39 = vld [vmem:[%s22336_s3 + $0x6c] sm:$0xf0] }
 0x5a9   :  { %v6972_v8 = vmul.f32 0.5, %v6952_v20  ;;  %v12682_v20 = vor.u32 %v14401_v45, %v12679_v53  ;;  %v12551_v45 = vld [vmem:[%s22336_s3 + $0x70] sm:$0xf0] }
 0x5aa   :  { %v6942_v52 = vpop.f32.mrf.mxu3 }
 0x5ab   :  { %14731 = vtanh.f32 %v6972_v8  ;;  %v6943_v40 = vadd.f32 %v6942_v52, %v6929_v32  ;;  %v13002_v32 = vor.u32 %v14481_v62, %v12999_v42  ;;  %v12645_v8 = vld [vmem:[%s22336_s3 + $0x110] sm:$0xf]  ;;  %v14449_v62 = vld [vmem:[%s22336_s3 + $0x2d4] sm:$0xf] }
 0x5ac   :  { %v6918_v60 = vpop.f32.mrf.mxu1  ;;  %v6931_v51 = vpop.f32.mrf.mxu2  ;;  %14733 = vtanh.f32 %v6984_v30  ;;  %v14417_v30 = vld [vmem:[%s22336_s3 + $0x1d4] sm:$0xf]  ;;  %v14397_v52 = vld [vmem:[%s22336_s3 + $0x12c] sm:$0xf0] }
 0x5ad   :  { %v6953_v54 = vadd.f32 %v6943_v40, %v663_v5  ;;  %v12746_v37 = vor.u32 %v14417_v30, %v12743_v35  ;;  %v12647_v5 = vld [vmem:[%s22336_s3 + $0x130] sm:$0xf0]  ;;  %v12966_v40 = vor.u32 %v14477_v14, %v12965_v58  ;;  %v12933_v51 = vld [vmem:[%s22336_s3 + $0x350] sm:$0xf] }
 0x5ae   :  { %v12871_v42 = vld [vmem:[%s22336_s3 + $0x2f0] sm:$0xf0] }
 0x5af   :  { %v6973_v2 = vmul.f32 0.5, %v6953_v54  ;;  %v14469_v54 = vld [vmem:[%s22336_s3 + $0x36c] sm:$0xf0]  ;;  %v14441_v58 = vld [vmem:[%s22336_s3 + $0x294] sm:$0xf] }
 0x5b0   :  { %v12934_v30 = vor.u32 %v14469_v54, %v12933_v51  ;;  %v12839_v14 = vld [vmem:[%s22336_s3 + $0x2b0] sm:$0xf0]  ;;  %v14418_v51 = vld [vmem:[%s22336_s3 + $0x1dc] sm:$0xf] }
 0x5b1   :  { %v14732_v46 = vpop.eup %14731  ;;  %14735 = vtanh.f32 %v6973_v2  ;;  %v14465_v2 = vld [vmem:[%s22336_s3 + $0x354] sm:$0xf]  ;;  %v12751_v54 = vld [vmem:[%s22336_s3 + $0x1f8] sm:$0xf0] }
 0x5b2   :  { %v6976_v28 = vmul.f32 0.5, %v14732_v46  ;;  %v6944_v10 = vpop.f32.mrf.mxu3  ;;  %v14734_v31 = vpop.eup %14733  ;;  %14737 = vtanh.f32 %v6985_v16  ;;  %v12935_v46 = vld [vmem:[%s22336_s3 + $0x370] sm:$0xf0] }
 0x5b3   :  { %v12650_v10 = vor.u32 %v14393_v26, %v12647_v5  ;;  %v12938_v35 = vor.u32 %v14465_v2, %v12935_v46  ;;  %v12749_v26 = vld [vmem:[%s22336_s3 + $0x1d8] sm:$0xf]  ;;  %v12805_v2 = vld [vmem:[%s22336_s3 + $0x250] sm:$0xf] }
 0x5b4   :  { %v6978_v15 = vadd.f32 0.5, %v6976_v28  ;;  %v12646_v28 = vor.u32 %v14397_v52, %v12645_v8  ;;  %v14361_v8 = vld [vmem:[%s22336_s3 + $0x14] sm:$0xf]  ;;  %v14422_v5 = vld [vmem:[%s22336_s3 + $0x1f4] sm:$0xf0] }
 0x5b5   :  { %v12519_v52 = vld [vmem:[%s22336_s3 + $0x30] sm:$0xf0]  ;;  %v14437_v46 = vld [vmem:[%s22336_s3 + $0x26c] sm:$0xf0] }
 0x5b6   :  { %v6988_v23 = vmul.f32 %v14734_v31, %v6978_v15  ;;  %v12613_v15 = vld [vmem:[%s22336_s3 + $0xd0] sm:$0xf]  ;;  %v12615_v31 = vld [vmem:[%s22336_s3 + $0xf0] sm:$0xf0] }
 0x5b7   :  { %v14736_v11 = vpop.eup %14735 }
 0x5b8   :  { %v6996_v48 = vsel %vm6995_vm14, %v6988_v23, 0.0  ;;  %v21024_v19 = vsel %vm6995_vm14, %v6988_v23, %v20163_v61  ;;  %v6977_v13 = vmul.f32 0.5, %v14736_v11  ;;  %v14409_v61 = vld [vmem:[%s22336_s3 + $0x194] sm:$0xf]  ;;  %v14738_v41 = vpop.eup %14737  ;;  %v12901_v23 = vld [vmem:[%s22336_s3 + $0x310] sm:$0xf] }
 0x5b9   :  { %12497 = vst [vmem:[%s22339_s5 + $0x50] sm:$0xff] %v6996_v48  ;;  %v21037_v33 = vpack.c.bf16 %v21024_v19, %v21024_v19  ;;  %v12714_v18 = vor.u32 %v14409_v61, %v12711_v12  ;;  %v14461_v11 = vld [vmem:[%s22336_s3 + $0x32c] sm:$0xf0]  ;;  %v12903_v48 = vld [vmem:[%s22336_s3 + $0x330] sm:$0xf0] }
 0x5ba   :  { %v6979_v38 = vadd.f32 0.5, %v6977_v13  ;;  %v12614_v13 = vor.u32 %v14389_v56, %v12613_v15  ;;  %v14377_v61 = vld [vmem:[%s22336_s3 + $0x94] sm:$0xf]  ;;  %v12522_v56 = vor.u32 %v14361_v8, %v12519_v52 }
 0x5bb   :  { %7792 = vmatmul.bf16.vlgmr.msra.gmra.mxu0 %v21037_v33  ;;  %7818 = vmatmul.bf16.vlgmr.msra.gmra.mxu2 %v21037_v33  ;;  %v12583_v12 = vld [vmem:[%s22336_s3 + $0xb0] sm:$0xf0] }
 0x5bc   :  { %v6989_v16 = vmul.f32 %v14738_v41, %v6979_v38  ;;  %7888 = vmatpush.bf16.msra.mxu0 %v12742_v34  ;;  %7914 = vmatpush.bf16.msra.mxu2 %v12746_v37  ;;  %v14457_v34 = vld [vmem:[%s22336_s3 + $0x314] sm:$0xf]  ;;  %v12618_v37 = vor.u32 %v14385_v22, %v12615_v31  ;;  %v12902_v38 = vor.u32 %v14461_v11, %v12901_v23  ;;  %v12869_v41 = vld [vmem:[%s22336_s3 + $0x2d0] sm:$0xf]  ;;  %v14410_v23 = vld [vmem:[%s22336_s3 + $0x19c] sm:$0xf] }
 0x5bd   :  { %v12906_v29 = vor.u32 %v14457_v34, %v12903_v48  ;;  %v12870_v53 = vor.u32 %v14453_v47, %v12869_v41  ;;  %v12750_v22 = vor.u32 %v14422_v5, %v12749_v26  ;;  %v12754_v31 = vor.u32 %v14418_v51, %v12751_v54  ;;  %v12719_v48 = vld [vmem:[%s22336_s3 + $0x1b8] sm:$0xf0]  ;;  %v12941_v26 = vld [vmem:[%s22336_s3 + $0x358] sm:$0xf] }
 0x5be   :  { %v6997_v27 = vsel %vm6995_vm14, %v6989_v16, 0.0  ;;  %v21076_v63 = vsel %vm6995_vm14, %v6989_v16, %v20215_v24  ;;  %v14473_v24 = vld [vmem:[%s22336_s3 + $0x394] sm:$0xf]  ;;  %v12582_v16 = vor.u32 %v14381_v3, %v12581_v7  ;;  %v12806_v11 = vor.u32 %v14437_v46, %v12805_v2  ;;  %v14470_v5 = vld [vmem:[%s22336_s3 + $0x374] sm:$0xf0] }
 0x5bf   :  { %12498 = vst [vmem:[%s22339_s5 + $0x58] sm:$0xff] %v6997_v27  ;;  %v21089_v0 = vpack.c.bf16 %v21076_v63, %v21076_v63  ;;  %v12970_v60 = vor.u32 %v14473_v24, %v12967_v50  ;;  %v12874_v27 = vor.u32 %v14449_v62, %v12871_v42  ;;  %v12554_v50 = vor.u32 %v14369_v57, %v12551_v45  ;;  %v14425_v7 = vld [vmem:[%s22336_s3 + $0x214] sm:$0xf]  ;;  %v12685_v62 = vld [vmem:[%s22336_s3 + $0x158] sm:$0xf] }
 0x5c0   :  { %7889 = vmatpush.bf16.msra.mxu0 %v12710_v59  ;;  %7915 = vmatpush.bf16.msra.mxu2 %v12714_v18  ;;  %v12586_v59 = vor.u32 %v14377_v61, %v12583_v12  ;;  %v12549_v18 = vld [vmem:[%s22336_s3 + $0x50] sm:$0xf]  ;;  %v12775_v3 = vld [vmem:[%s22336_s3 + $0x230] sm:$0xf0]  ;;  %v13005_v61 = vld [vmem:[%s22336_s3 + $0x3d8] sm:$0xf]  ;;  %v12722_v47 = vor.u32 %v14410_v23, %v12719_v48 }
 0x5c1   :  { %7805 = vmatmul.bf16.vlgmr.msra.gmra.mxu1 %v21089_v0  ;;  %7831 = vmatmul.bf16.vlgmr.msra.gmra.mxu3 %v21089_v0  ;;  %v12550_v24 = vor.u32 %v14373_v39, %v12549_v18  ;;  %v14486_v12 = vld [vmem:[%s22336_s3 + $0x3f4] sm:$0xf0]  ;;  %v14402_v18 = vld [vmem:[%s22336_s3 + $0x15c] sm:$0xf] }
 0x5c2   :  { %7901 = vmatpush.bf16.msra.mxu1 %v12998_v36  ;;  %7927 = vmatpush.bf16.msra.mxu3 %v13002_v32  ;;  %v12837_v36 = vld [vmem:[%s22336_s3 + $0x290] sm:$0xf]  ;;  %v12687_v39 = vld [vmem:[%s22336_s3 + $0x178] sm:$0xf0]  ;;  %v13006_v57 = vor.u32 %v14486_v12, %v13005_v61  ;;  %v12621_v2 = vld [vmem:[%s22336_s3 + $0xd8] sm:$0xf] }
 0x5c3   :  { %v14445_v32 = vld [vmem:[%s22336_s3 + $0x2ac] sm:$0xf0]  ;;  %v14390_v46 = vld [vmem:[%s22336_s3 + $0xf4] sm:$0xf0] }
 0x5c4   :  { %7890 = vmatpush.bf16.msra.mxu0 %v12678_v49  ;;  %7916 = vmatpush.bf16.msra.mxu2 %v12682_v20  ;;  %v12517_v49 = vld [vmem:[%s22336_s3 + $0x10] sm:$0xf]  ;;  %v12622_v23 = vor.u32 %v14390_v46, %v12621_v2  ;;  %v14382_v48 = vld [vmem:[%s22336_s3 + $0xb4] sm:$0xf0] }
 0x5c5   :  { %v14365_v20 = vld [vmem:[%s22336_s3 + $0x2c] sm:$0xf0]  ;;  %v12877_v61 = vld [vmem:[%s22336_s3 + $0x2d8] sm:$0xf] }
 0x5c6   :  { %7902 = vmatpush.bf16.msra.mxu1 %v12966_v40  ;;  %7928 = vmatpush.bf16.msra.mxu3 %v12970_v60  ;;  %v12838_v40 = vor.u32 %v14445_v32, %v12837_v36  ;;  %v12842_v60 = vor.u32 %v14441_v58, %v12839_v14  ;;  %v12518_v15 = vor.u32 %v14365_v20, %v12517_v49  ;;  %v14474_v36 = vld [vmem:[%s22336_s3 + $0x39c] sm:$0xf]  ;;  %v14454_v12 = vld [vmem:[%s22336_s3 + $0x2f4] sm:$0xf0] }
 0x5c7   :  { %v12975_v32 = vld [vmem:[%s22336_s3 + $0x3b8] sm:$0xf0]  ;;  %v12690_v14 = vor.u32 %v14402_v18, %v12687_v39  ;;  %v12878_v18 = vor.u32 %v14454_v12, %v12877_v61  ;;  %v12781_v2 = vld [vmem:[%s22336_s3 + $0x218] sm:$0xf]  ;;  %v14611_v61 = vld [vmem:[%s22336_s3 + $0x3dc] sm:$0xf0] }
 0x5c8   :  { %7891 = vmatpush.bf16.msra.mxu0 %v12646_v28  ;;  %7917 = vmatpush.bf16.msra.mxu2 %v12650_v10  ;;  %v14433_v28 = vld [vmem:[%s22336_s3 + $0x254] sm:$0xf]  ;;  %v14394_v49 = vld [vmem:[%s22336_s3 + $0x11c] sm:$0xf]  ;;  %v12978_v52 = vor.u32 %v14474_v36, %v12975_v32  ;;  %v14430_v46 = vld [vmem:[%s22336_s3 + $0x234] sm:$0xf0] }
 0x5c9   :  { %v12807_v10 = vld [vmem:[%s22336_s3 + $0x270] sm:$0xf0]  ;;  %v12655_v20 = vld [vmem:[%s22336_s3 + $0x138] sm:$0xf0]  ;;  %v14607_v12 = vld [vmem:[%s22336_s3 + $0x3c4] sm:$0xf] }
 0x5ca   :  { %7903 = vmatpush.bf16.msra.mxu1 %v12934_v30  ;;  %7929 = vmatpush.bf16.msra.mxu3 %v12938_v35  ;;  %v12717_v30 = vld [vmem:[%s22336_s3 + $0x198] sm:$0xf]  ;;  %v12810_v34 = vor.u32 %v14433_v28, %v12807_v10  ;;  %v12658_v54 = vor.u32 %v14394_v49, %v12655_v20  ;;  %v14386_v28 = vld [vmem:[%s22336_s3 + $0xdc] sm:$0xf] }
 0x5cb   :  { %7844 = vmatmul.bf16.vlgmr.msrb.gmra.mxu0 %v21037_v33  ;;  %7870 = vmatmul.bf16.vlgmr.msrb.gmra.mxu2 %v21037_v33  ;;  %v14414_v35 = vld [vmem:[%s22336_s3 + $0x1b4] sm:$0xf0]  ;;  %v12623_v10 = vld [vmem:[%s22336_s3 + $0xf8] sm:$0xf0] }
 0x5cc   :  { %7892 = vmatpush.bf16.msra.mxu0 %v12614_v13  ;;  %7918 = vmatpush.bf16.msra.mxu2 %v12618_v37  ;;  %v12773_v13 = vld [vmem:[%s22336_s3 + $0x210] sm:$0xf]  ;;  %v12718_v41 = vor.u32 %v14414_v35, %v12717_v30  ;;  %v14458_v30 = vld [vmem:[%s22336_s3 + $0x31c] sm:$0xf] }
 0x5cd   :  { %v14429_v37 = vld [vmem:[%s22336_s3 + $0x22c] sm:$0xf0]  ;;  %v12911_v35 = vld [vmem:[%s22336_s3 + $0x338] sm:$0xf0] }
 0x5ce   :  { %7904 = vmatpush.bf16.msra.mxu1 %v12902_v38  ;;  %7930 = vmatpush.bf16.msra.mxu3 %v12906_v29  ;;  %v14482_v38 = vld [vmem:[%s22336_s3 + $0x3dc] sm:$0xf]  ;;  %v12774_v42 = vor.u32 %v14429_v37, %v12773_v13 }
 0x5cf   :  { %v13007_v29 = vld [vmem:[%s22336_s3 + $0x3f8] sm:$0xf0] }
 0x5d0   :  { %7893 = vmatpush.bf16.msra.mxu0 %v12582_v16  ;;  %7919 = vmatpush.bf16.msra.mxu2 %v12586_v59  ;;  %v12778_v16 = vor.u32 %v14425_v7, %v12775_v3  ;;  %v14406_v59 = vld [vmem:[%s22336_s3 + $0x174] sm:$0xf0]  ;;  %v13010_v45 = vor.u32 %v14482_v38, %v13007_v29  ;;  %v14378_v13 = vld [vmem:[%s22336_s3 + $0x9c] sm:$0xf]  ;;  %v12914_v3 = vor.u32 %v14458_v30, %v12911_v35  ;;  %v14543_v30 = vld [vmem:[%s22336_s3 + $0x1c4] sm:$0xf] }
 0x5d1   :  { %7857 = vmatmul.bf16.vlgmr.msrb.gmra.mxu1 %v21089_v0  ;;  %7883 = vmatmul.bf16.vlgmr.msrb.gmra.mxu3 %v21089_v0  ;;  %v12686_v58 = vor.u32 %v14406_v59, %v12685_v62  ;;  %v12591_v37 = vld [vmem:[%s22336_s3 + $0xb8] sm:$0xf0]  ;;  %v12557_v62 = vld [vmem:[%s22336_s3 + $0x58] sm:$0xf] }
 0x5d2   :  { %7905 = vmatpush.bf16.msra.mxu1 %v12870_v53  ;;  %7931 = vmatpush.bf16.msra.mxu3 %v12874_v27  ;;  %v12973_v53 = vld [vmem:[%s22336_s3 + $0x398] sm:$0xf]  ;;  %v14450_v38 = vld [vmem:[%s22336_s3 + $0x2dc] sm:$0xf] }
 0x5d3   :  { %v14478_v27 = vld [vmem:[%s22336_s3 + $0x3b4] sm:$0xf0]  ;;  %v12879_v29 = vld [vmem:[%s22336_s3 + $0x2f8] sm:$0xf0] }
 0x5d4   :  { %7894 = vmatpush.bf16.msra.mxu0 %v12550_v24  ;;  %7920 = vmatpush.bf16.msra.mxu2 %v12554_v50  ;;  %v12653_v24 = vld [vmem:[%s22336_s3 + $0x118] sm:$0xf]  ;;  %v12974_v8 = vor.u32 %v14478_v27, %v12973_v53  ;;  %v12559_v59 = vld [vmem:[%s22336_s3 + $0x78] sm:$0xf0]  ;;  %v12882_v39 = vor.u32 %v14450_v38, %v12879_v29  ;;  %v13497_v29 = vld [vmem:[%s22336_s3 + $0x3e0] sm:$0xf0] }
 0x5d5   :  { %v14398_v50 = vld [vmem:[%s22336_s3 + $0x134] sm:$0xf0]  ;;  %v14442_v53 = vld [vmem:[%s22336_s3 + $0x29c] sm:$0xf] }
 0x5d6   :  { %7906 = vmatpush.bf16.msra.mxu1 %v12838_v40  ;;  %7932 = vmatpush.bf16.msra.mxu3 %v12842_v60  ;;  %v14466_v40 = vld [vmem:[%s22336_s3 + $0x35c] sm:$0xf]  ;;  %v12654_v51 = vor.u32 %v14398_v50, %v12653_v24 }
 0x5d7   :  { %v12943_v60 = vld [vmem:[%s22336_s3 + $0x378] sm:$0xf0] }
 0x5d8   :  { %7895 = vmatpush.bf16.msra.mxu0 %v12518_v15  ;;  %7921 = vmatpush.bf16.msra.mxu2 %v12522_v56  ;;  %v12942_v15 = vor.u32 %v14470_v5, %v12941_v26  ;;  %v12946_v56 = vor.u32 %v14466_v40, %v12943_v60  ;;  %v12847_v27 = vld [vmem:[%s22336_s3 + $0x2b8] sm:$0xf0] }
 0x5d9   :  { %v14362_v24 = vld [vmem:[%s22336_s3 + $0x1c] sm:$0xf]  ;;  %v12850_v20 = vor.u32 %v14442_v53, %v12847_v27  ;;  %v14603_v53 = vld [vmem:[%s22336_s3 + $0x39c] sm:$0xf0]  ;;  %v14599_v27 = vld [vmem:[%s22336_s3 + $0x384] sm:$0xf] }
 0x5da   :  { %7907 = vmatpush.bf16.msra.mxu1 %v12806_v11  ;;  %7933 = vmatpush.bf16.msra.mxu3 %v12810_v34  ;;  %v12626_v11 = vor.u32 %v14386_v28, %v12623_v10  ;;  %v12589_v34 = vld [vmem:[%s22336_s3 + $0x98] sm:$0xf]  ;;  %v12527_v50 = vld [vmem:[%s22336_s3 + $0x38] sm:$0xf0] }
 0x5db   :  { %7896 = vmatmul.bf16.vlgmr.msra.gmra.mxu0 %v21037_v33  ;;  %7922 = vmatmul.bf16.vlgmr.msra.gmra.mxu2 %v21037_v33  ;;  %v14434_v26 = vld [vmem:[%s22336_s3 + $0x25c] sm:$0xf]  ;;  %v12530_v60 = vor.u32 %v14362_v24, %v12527_v50  ;;  %v13143_v24 = vld [vmem:[%s22336_s3 + $0x100] sm:$0xf] }
 0x5dc   :  { %7940 = vmatpush.bf16.msrb.mxu0 %v12750_v22  ;;  %7966 = vmatpush.bf16.msrb.mxu2 %v12754_v31  ;;  %v12909_v22 = vld [vmem:[%s22336_s3 + $0x318] sm:$0xf]  ;;  %v12815_v5 = vld [vmem:[%s22336_s3 + $0x278] sm:$0xf0]  ;;  %v14523_v50 = vld [vmem:[%s22336_s3 + $0x11c] sm:$0xf0] }
 0x5dd   :  { %v14462_v31 = vld [vmem:[%s22336_s3 + $0x334] sm:$0xf0]  ;;  %v14426_v28 = vld [vmem:[%s22336_s3 + $0x21c] sm:$0xf] }
 0x5de   :  { %7908 = vmatpush.bf16.msra.mxu1 %v12774_v42  ;;  %7934 = vmatpush.bf16.msra.mxu3 %v12778_v16  ;;  %v12910_v7 = vor.u32 %v14462_v31, %v12909_v22  ;;  %v14374_v42 = vld [vmem:[%s22336_s3 + $0x74] sm:$0xf0]  ;;  %v14370_v16 = vld [vmem:[%s22336_s3 + $0x5c] sm:$0xf]  ;;  %v13239_v22 = vld [vmem:[%s22336_s3 + $0x1c0] sm:$0xf] }
 0x5df   :  { %v12558_v36 = vor.u32 %v14374_v42, %v12557_v62  ;;  %v12562_v32 = vor.u32 %v14370_v16, %v12559_v59  ;;  %v12783_v10 = vld [vmem:[%s22336_s3 + $0x238] sm:$0xf0]  ;;  %v14547_v31 = vld [vmem:[%s22336_s3 + $0x1dc] sm:$0xf0]  ;;  %v14527_v42 = vld [vmem:[%s22336_s3 + $0x144] sm:$0xf] }
 0x5e0   :  { %7941 = vmatpush.bf16.msrb.mxu0 %v12718_v41  ;;  %7967 = vmatpush.bf16.msrb.mxu2 %v12722_v47  ;;  %v12590_v41 = vor.u32 %v14382_v48, %v12589_v34  ;;  %v12594_v47 = vor.u32 %v14378_v13, %v12591_v37  ;;  %v13240_v35 = vor.u32 %v14547_v31, %v13239_v22  ;;  %v14539_v34 = vld [vmem:[%s22336_s3 + $0x19c] sm:$0xf0]  ;;  %v14535_v48 = vld [vmem:[%s22336_s3 + $0x184] sm:$0xf] }
 0x5e1   :  { %7909 = vmatmul.bf16.vlgmr.msra.gmra.mxu1 %v21089_v0  ;;  %7935 = vmatmul.bf16.vlgmr.msra.gmra.mxu3 %v21089_v0  ;;  %v13209_v37 = vld [vmem:[%s22336_s3 + $0x1a0] sm:$0xf0]  ;;  %v14531_v62 = vld [vmem:[%s22336_s3 + $0x15c] sm:$0xf0] }
 0x5e2   :  { %7953 = vmatpush.bf16.msrb.mxu1 %v13006_v57  ;;  %7979 = vmatpush.bf16.msrb.mxu3 %v13010_v45  ;;  %v12845_v57 = vld [vmem:[%s22336_s3 + $0x298] sm:$0xf]  ;;  %v13113_v31 = vld [vmem:[%s22336_s3 + $0xe0] sm:$0xf0] }
 0x5e3   :  { %v14446_v45 = vld [vmem:[%s22336_s3 + $0x2b4] sm:$0xf0] }
 0x5e4   :  { %7942 = vmatpush.bf16.msrb.mxu0 %v12686_v58  ;;  %7968 = vmatpush.bf16.msrb.mxu2 %v12690_v14  ;;  %v12525_v58 = vld [vmem:[%s22336_s3 + $0x18] sm:$0xf]  ;;  %v12846_v49 = vor.u32 %v14446_v45, %v12845_v57  ;;  %v13463_v45 = vld [vmem:[%s22336_s3 + $0x380] sm:$0xf] }
 0x5e5   :  { %v14366_v14 = vld [vmem:[%s22336_s3 + $0x34] sm:$0xf0] }
 0x5e6   :  { %7954 = vmatpush.bf16.msrb.mxu1 %v12974_v8  ;;  %7980 = vmatpush.bf16.msrb.mxu3 %v12978_v52  ;;  %v12813_v8 = vld [vmem:[%s22336_s3 + $0x258] sm:$0xf]  ;;  %v12526_v40 = vor.u32 %v14366_v14, %v12525_v58  ;;  %v13465_v58 = vld [vmem:[%s22336_s3 + $0x3a0] sm:$0xf0] }
 0x5e7   :  { %v14438_v52 = vld [vmem:[%s22336_s3 + $0x274] sm:$0xf0]  ;;  %v13468_v14 = vor.u32 %v14599_v27, %v13465_v58 }
 0x5e8   :  { %7943 = vmatpush.bf16.msrb.mxu0 %v12654_v51  ;;  %7969 = vmatpush.bf16.msrb.mxu2 %v12658_v54  ;;  %v12814_v51 = vor.u32 %v14438_v52, %v12813_v8  ;;  %v12818_v54 = vor.u32 %v14434_v26, %v12815_v5  ;;  %v13145_v8 = vld [vmem:[%s22336_s3 + $0x120] sm:$0xf0]  ;;  %v13431_v26 = vld [vmem:[%s22336_s3 + $0x340] sm:$0xf] }
 0x5e9   :  { %v14595_v5 = vld [vmem:[%s22336_s3 + $0x35c] sm:$0xf0] }
 0x5ea   :  { %7955 = vmatpush.bf16.msrb.mxu1 %v12942_v15  ;;  %7981 = vmatpush.bf16.msrb.mxu3 %v12946_v56  ;;  %v12782_v15 = vor.u32 %v14430_v46, %v12781_v2  ;;  %v12786_v56 = vor.u32 %v14426_v28, %v12783_v10  ;;  %v13111_v46 = vld [vmem:[%s22336_s3 + $0xc0] sm:$0xf]  ;;  %v14511_v10 = vld [vmem:[%s22336_s3 + $0xc4] sm:$0xf] }
 0x5eb   :  { %v14515_v28 = vld [vmem:[%s22336_s3 + $0xdc] sm:$0xf0] }
 0x5ec   :  { %7944 = vmatpush.bf16.msrb.mxu0 %v12622_v23  ;;  %7970 = vmatpush.bf16.msrb.mxu2 %v12626_v11  ;;  %v13112_v22 = vor.u32 %v14515_v28, %v13111_v46  ;;  %v14491_v46 = vld [vmem:[%s22336_s3 + $0x1c] sm:$0xf0]  ;;  %v14487_v28 = vld [vmem:[%s22336_s3 + $0x4] sm:$0xf] }
 0x5ee   :  { %7956 = vmatpush.bf16.msrb.mxu1 %v12910_v7  ;;  %7982 = vmatpush.bf16.msrb.mxu3 %v12914_v3  ;;  %v13212_v7 = vor.u32 %v14535_v48, %v13209_v37  ;;  %v13495_v3 = vld [vmem:[%s22336_s3 + $0x3c0] sm:$0xf]  ;;  %v13401_v48 = vld [vmem:[%s22336_s3 + $0x320] sm:$0xf0] }
 0x5ef   :  { %v13496_v38 = vor.u32 %v14611_v61, %v13495_v3  ;;  %v13079_v37 = vld [vmem:[%s22336_s3 + $0x80] sm:$0xf]  ;;  %v14503_v61 = vld [vmem:[%s22336_s3 + $0x84] sm:$0xf] }
 0x5f0   :  { %7945 = vmatpush.bf16.msrb.mxu0 %v12590_v41  ;;  %7971 = vmatpush.bf16.msrb.mxu2 %v12594_v47  ;;  %v13500_v41 = vor.u32 %v14607_v12, %v13497_v29  ;;  %v13175_v47 = vld [vmem:[%s22336_s3 + $0x140] sm:$0xf]  ;;  %v13081_v12 = vld [vmem:[%s22336_s3 + $0xa0] sm:$0xf0] }
 0x5f1   :  { %v13367_v29 = vld [vmem:[%s22336_s3 + $0x2c0] sm:$0xf] }
 0x5f2   :  { %7957 = vmatpush.bf16.msrb.mxu1 %v12878_v18  ;;  %7983 = vmatpush.bf16.msrb.mxu3 %v12882_v39  ;;  %v13176_v18 = vor.u32 %v14531_v62, %v13175_v47  ;;  %v13177_v39 = vld [vmem:[%s22336_s3 + $0x160] sm:$0xf0] }
 0x5f3   :  { %v13180_v57 = vor.u32 %v14527_v42, %v13177_v39  ;;  %v14575_v47 = vld [vmem:[%s22336_s3 + $0x2c4] sm:$0xf] }
 0x5f4   :  { %7946 = vmatpush.bf16.msrb.mxu0 %v12558_v36  ;;  %7972 = vmatpush.bf16.msrb.mxu2 %v12562_v32  ;;  %v13464_v32 = vor.u32 %v14603_v53, %v13463_v45  ;;  %v13369_v39 = vld [vmem:[%s22336_s3 + $0x2e0] sm:$0xf0]  ;;  %v13047_v45 = vld [vmem:[%s22336_s3 + $0x40] sm:$0xf] }
 0x5f5   :  { %v14499_v53 = vld [vmem:[%s22336_s3 + $0x5c] sm:$0xf0] }
 0x5f6   :  { %7958 = vmatpush.bf16.msrb.mxu1 %v12846_v49  ;;  %7984 = vmatpush.bf16.msrb.mxu3 %v12850_v20  ;;  %v14519_v49 = vld [vmem:[%s22336_s3 + $0x104] sm:$0xf]  ;;  %v13144_v20 = vor.u32 %v14523_v50, %v13143_v24  ;;  %v13335_v24 = vld [vmem:[%s22336_s3 + $0x280] sm:$0xf] }
 0x5f7   :  { %v13148_v52 = vor.u32 %v14519_v49, %v13145_v8  ;;  %v14571_v50 = vld [vmem:[%s22336_s3 + $0x29c] sm:$0xf0]  ;;  %v14567_v49 = vld [vmem:[%s22336_s3 + $0x284] sm:$0xf] }
 0x5f8   :  { %7947 = vmatpush.bf16.msrb.mxu0 %v12526_v40  ;;  %7973 = vmatpush.bf16.msrb.mxu2 %v12530_v60  ;;  %v13432_v60 = vor.u32 %v14595_v5, %v13431_v26  ;;  %v13336_v26 = vor.u32 %v14571_v50, %v13335_v24  ;;  %v13337_v5 = vld [vmem:[%s22336_s3 + $0x2a0] sm:$0xf0]  ;;  %v14612_v50 = vld [vmem:[%s22336_s3 + $0x3e4] sm:$0xf0] }
 0x5fa   :  { %7959 = vmatpush.bf16.msrb.mxu1 %v12814_v51  ;;  %7985 = vmatpush.bf16.msrb.mxu3 %v12818_v54  ;;  %v14591_v51 = vld [vmem:[%s22336_s3 + $0x344] sm:$0xf] }
 0x5fb   :  { %7948 = vmatmul.bf16.vlgmr.msrb.gmra.mxu0 %v21037_v33  ;;  %7974 = vmatmul.bf16.vlgmr.msrb.gmra.mxu2 %v21037_v33  ;;  %v13241_v33 = vld [vmem:[%s22336_s3 + $0x1e0] sm:$0xf0] }
 0x5fc   :  { %v13244_v23 = vor.u32 %v14543_v30, %v13241_v33  ;;  %8830 = vmatpush.bf16.msra.mxu0 %v13240_v35  ;;  %v13433_v54 = vld [vmem:[%s22336_s3 + $0x360] sm:$0xf0]  ;;  %v13116_v30 = vor.u32 %v14511_v10, %v13113_v31  ;;  %v13399_v35 = vld [vmem:[%s22336_s3 + $0x300] sm:$0xf] }
 0x5fd   :  { %v13436_v2 = vor.u32 %v14591_v51, %v13433_v54  ;;  %v14587_v33 = vld [vmem:[%s22336_s3 + $0x31c] sm:$0xf0]  ;;  %v13340_v54 = vor.u32 %v14567_v49, %v13337_v5  ;;  %v14608_v49 = vld [vmem:[%s22336_s3 + $0x3cc] sm:$0xf]  ;;  %v13183_v5 = vld [vmem:[%s22336_s3 + $0x148] sm:$0xf] }
 0x5fe   :  { %7960 = vmatpush.bf16.msrb.mxu1 %v12782_v15  ;;  %7986 = vmatpush.bf16.msrb.mxu3 %v12786_v56 }
 0x5ff   :  { %8856 = vmatpush.bf16.msra.mxu2 %v13244_v23  ;;  %v14583_v23 = vld [vmem:[%s22336_s3 + $0x304] sm:$0xf] }
 0x601   :  { %7961 = vmatmul.bf16.vlgmr.msrb.gmra.mxu1 %v21089_v0  ;;  %7987 = vmatmul.bf16.vlgmr.msrb.gmra.mxu3 %v21089_v0  ;;  %v13207_v0 = vld [vmem:[%s22336_s3 + $0x180] sm:$0xf] }
 0x602   :  { %v13208_v13 = vor.u32 %v14539_v34, %v13207_v0  ;;  %8843 = vmatpush.bf16.msra.mxu1 %v13496_v38  ;;  %8869 = vmatpush.bf16.msra.mxu3 %v13500_v41  ;;  %v13400_v34 = vor.u32 %v14587_v33, %v13399_v35  ;;  %v13084_v38 = vor.u32 %v14503_v61, %v13081_v12  ;;  %v14579_v41 = vld [vmem:[%s22336_s3 + $0x2dc] sm:$0xf0]  ;;  %v14544_v35 = vld [vmem:[%s22336_s3 + $0x1cc] sm:$0xf]  ;;  %v13305_v61 = vld [vmem:[%s22336_s3 + $0x260] sm:$0xf0] }
 0x603   :  { %8857 = vmatpush.bf16.msra.mxu2 %v13212_v7  ;;  %v14507_v7 = vld [vmem:[%s22336_s3 + $0x9c] sm:$0xf0] }
 0x604   :  { %8831 = vmatpush.bf16.msra.mxu0 %v13208_v13  ;;  %v13404_v13 = vor.u32 %v14583_v23, %v13401_v48  ;;  %v13080_v3 = vor.u32 %v14507_v7, %v13079_v37  ;;  %v13303_v48 = vld [vmem:[%s22336_s3 + $0x240] sm:$0xf] }
 0x605   :  { %v14563_v7 = vld [vmem:[%s22336_s3 + $0x25c] sm:$0xf0] }
 0x606   :  { %8844 = vmatpush.bf16.msra.mxu1 %v13464_v32  ;;  %8870 = vmatpush.bf16.msra.mxu3 %v13468_v14  ;;  %v13049_v32 = vld [vmem:[%s22336_s3 + $0x60] sm:$0xf0] }
 0x607   :  { %8858 = vmatpush.bf16.msra.mxu2 %v13180_v57  ;;  %v13372_v57 = vor.u32 %v14575_v47, %v13369_v39  ;;  %v22389_v39 = vld [vmem:[#allocation11_spill] sm:$0xff] }
 0x608   :  { %8832 = vmatpush.bf16.msra.mxu0 %v13176_v18  ;;  %v13368_v18 = vor.u32 %v14579_v41, %v13367_v29  ;;  %v13304_v41 = vor.u32 %v14563_v7, %v13303_v48 }
 0x60a   :  { %8845 = vmatpush.bf16.msra.mxu1 %v13432_v60  ;;  %8871 = vmatpush.bf16.msra.mxu3 %v13436_v2  ;;  %v22388_v60 = vld [vmem:[#allocation9_spill] sm:$0xff]  ;;  %v13015_v2 = vld [vmem:[%s22336_s3] sm:$0xf] }
 0x60b   :  { %8859 = vmatpush.bf16.msra.mxu2 %v13148_v52  ;;  %v13016_v10 = vor.u32 %v14491_v46, %v13015_v2  ;;  %v14528_v46 = vld [vmem:[%s22336_s3 + $0x14c] sm:$0xf] }
 0x60c   :  { %8833 = vmatpush.bf16.msra.mxu0 %v13144_v20  ;;  %v22387_v20 = vld [vmem:[#allocation7_spill] sm:$0xff] }
 0x60e   :  { %8846 = vmatpush.bf16.msra.mxu1 %v13400_v34  ;;  %8872 = vmatpush.bf16.msra.mxu3 %v13404_v13  ;;  %v13249_v34 = vld [vmem:[%s22336_s3 + $0x1e8] sm:$0xf0] }
 0x60f   :  { %8860 = vmatpush.bf16.msra.mxu2 %v13116_v30  ;;  %v14548_v30 = vld [vmem:[%s22336_s3 + $0x1e4] sm:$0xf0]  ;;  %v13252_v37 = vor.u32 %v14544_v35, %v13249_v34  ;;  %v14600_v35 = vld [vmem:[%s22336_s3 + $0x38c] sm:$0xf] }
 0x610   :  { %8834 = vmatpush.bf16.msra.mxu0 %v13112_v22 }
 0x612   :  { %8847 = vmatpush.bf16.msra.mxu1 %v13368_v18  ;;  %8873 = vmatpush.bf16.msra.mxu3 %v13372_v57  ;;  %v14536_v18 = vld [vmem:[%s22336_s3 + $0x18c] sm:$0xf] }
 0x613   :  { %8861 = vmatpush.bf16.msra.mxu2 %v13084_v38 }
 0x614   :  { %8835 = vmatpush.bf16.msra.mxu0 %v13080_v3  ;;  %v14559_v3 = vld [vmem:[%s22336_s3 + $0x244] sm:$0xf] }
 0x615   :  { %v13308_v47 = vor.u32 %v14559_v3, %v13305_v61  ;;  %v14520_v61 = vld [vmem:[%s22336_s3 + $0x10c] sm:$0xf] }
 0x616   :  { %8848 = vmatpush.bf16.msra.mxu1 %v13336_v26  ;;  %8874 = vmatpush.bf16.msra.mxu3 %v13340_v54  ;;  %v13505_v26 = vld [vmem:[%s22336_s3 + $0x3e8] sm:$0xf0] }
 0x617   :  { %v13508_v54 = vor.u32 %v14608_v49, %v13505_v26  ;;  %v13407_v49 = vld [vmem:[%s22336_s3 + $0x308] sm:$0xf] }
 0x61a   :  { %8849 = vmatpush.bf16.msra.mxu1 %v13304_v41  ;;  %8875 = vmatpush.bf16.msra.mxu3 %v13308_v47 }
 0x638   :  { %v21447_v11 = vpop.f32.mrf.mxu0 }
 0x63e   :  { %v21482_v16 = vpop.f32.mrf.mxu1  ;;  %v21484_v59 = vpop.f32.mrf.mxu2 }
 0x63f   :  { %v7807_v62 = vadd.f32 %v21482_v16, %v21447_v11  ;;  %v14495_v11 = vld [vmem:[%s22336_s3 + $0x44] sm:$0xf] }
 0x640   :  { %v7795_v36 = vpop.f32.mrf.mxu0  ;;  %v13052_v14 = vor.u32 %v14495_v11, %v13049_v32  ;;  %v13273_v32 = vld [vmem:[%s22336_s3 + $0x220] sm:$0xf0] }
 0x641   :  { %v13048_v36 = vor.u32 %v14499_v53, %v13047_v45  ;;  %v7992_v8 = vadd.f32 %v7807_v62, %v22387_v20  ;;  %v13215_v62 = vld [vmem:[%s22336_s3 + $0x188] sm:$0xf]  ;;  %v13271_v45 = vld [vmem:[%s22336_s3 + $0x200] sm:$0xf] }
 0x642   :  { %8862 = vmatpush.bf16.msra.mxu2 %v13052_v14  ;;  %v14555_v53 = vld [vmem:[%s22336_s3 + $0x21c] sm:$0xf0]  ;;  %v22390_v20 = vld [vmem:[#allocation8_spill] sm:$0xff] }
 0x643   :  { %8836 = vmatpush.bf16.msra.mxu0 %v13048_v36  ;;  %v8000_v33 = vmul.f32 0.5, %v7992_v8  ;;  %v14551_v36 = vld [vmem:[%s22336_s3 + $0x204] sm:$0xf] }
 0x644   :  { %v21519_v40 = vpop.f32.mrf.mxu3  ;;  %v13276_v24 = vor.u32 %v14551_v36, %v13273_v32  ;;  %v14516_v36 = vld [vmem:[%s22336_s3 + $0xe4] sm:$0xf0] }
 0x645   :  { %v7833_v12 = vadd.f32 %v21519_v40, %v21484_v59  ;;  %v13217_v40 = vld [vmem:[%s22336_s3 + $0x1a8] sm:$0xf0] }
 0x646   :  { %v7808_v15 = vpop.f32.mrf.mxu1  ;;  %v7821_v56 = vpop.f32.mrf.mxu2  ;;  %8876 = vmatpush.bf16.msra.mxu3 %v13276_v24 }
 0x647   :  { %v13017_v15 = vld [vmem:[%s22336_s3 + $0x20] sm:$0xf0]  ;;  %v13247_v56 = vld [vmem:[%s22336_s3 + $0x1c8] sm:$0xf]  ;;  %8837 = vmatpush.bf16.msra.mxu0 %v13016_v10  ;;  %v7993_v8 = vadd.f32 %v7833_v12, %v22390_v20  ;;  %v13153_v12 = vld [vmem:[%s22336_s3 + $0x128] sm:$0xf0] }
 0x648   :  { %v7845_v0 = vpop.f32.mrf.mxu0  ;;  %v13020_v31 = vor.u32 %v14487_v28, %v13017_v15  ;;  %v13185_v28 = vld [vmem:[%s22336_s3 + $0x168] sm:$0xf0]  ;;  %v13156_v47 = vor.u32 %v14520_v61, %v13153_v12  ;;  %v14588_v20 = vld [vmem:[%s22336_s3 + $0x324] sm:$0xf0]  ;;  %v21783_v61 = vpop.permute.xlu0 %8039 }
 0x649   :  { %v13408_v26 = vor.u32 %v14588_v20, %v13407_v49  ;;  %vm8041_vm15 = vcmp.eq.s32.totalorder %v21783_v61, 1  ;;  %v13481_v61 = vld [vmem:[%s22336_s3 + $0x3b0] sm:$0xf0] }
 0x64a   :  { %8863 = vmatpush.bf16.msra.mxu2 %v13020_v31  ;;  %v14604_v31 = vld [vmem:[%s22336_s3 + $0x3a4] sm:$0xf0]  ;;  %8921 = vmatpush.bf16.msrb.mxu3 %v13508_v54 }
 0x64c   :  { %v7834_v42 = vpop.f32.mrf.mxu3 }
 0x64d   :  { %v14540_v42 = vld [vmem:[%s22336_s3 + $0x1a4] sm:$0xf0] }
 0x64e   :  { %v7858_v16 = vpop.f32.mrf.mxu1  ;;  %v7871_v27 = vpop.f32.mrf.mxu2  ;;  %8908 = vmatpush.bf16.msrb.mxu2 %v13252_v37  ;;  %v13216_v59 = vor.u32 %v14540_v42, %v13215_v62  ;;  %v14524_v37 = vld [vmem:[%s22336_s3 + $0x124] sm:$0xf0] }
 0x64f   :  { %v7859_v58 = vadd.f32 %v7858_v16, %v7845_v0  ;;  %v13248_v0 = vor.u32 %v14548_v30, %v13247_v56  ;;  %v13220_v16 = vor.u32 %v14536_v18, %v13217_v40  ;;  %v13188_v56 = vor.u32 %v14528_v46, %v13185_v28  ;;  %v13439_v62 = vld [vmem:[%s22336_s3 + $0x348] sm:$0xf]  ;;  %v14592_v18 = vld [vmem:[%s22336_s3 + $0x34c] sm:$0xf] }
 0x650   :  { %v7847_v52 = vpop.f32.mrf.mxu0  ;;  %v14596_v42 = vld [vmem:[%s22336_s3 + $0x364] sm:$0xf0] }
 0x651   :  { %v7994_v51 = vadd.f32 %v7859_v58, %v22388_v60  ;;  %8882 = vmatpush.bf16.msrb.mxu0 %v13248_v0  ;;  %v13503_v58 = vld [vmem:[%s22336_s3 + $0x3c8] sm:$0xf] }
 0x652   :  { %v13504_v52 = vor.u32 %v14612_v50, %v13503_v58  ;;  %v14532_v60 = vld [vmem:[%s22336_s3 + $0x164] sm:$0xf0]  ;;  %8909 = vmatpush.bf16.msrb.mxu2 %v13220_v16  ;;  %v14512_v58 = vld [vmem:[%s22336_s3 + $0xcc] sm:$0xf] }
 0x653   :  { %v8008_v22 = vmul.f32 0.5, %v7994_v51  ;;  %v13184_v2 = vor.u32 %v14532_v60, %v13183_v5  ;;  %v14584_v5 = vld [vmem:[%s22336_s3 + $0x30c] sm:$0xf]  ;;  %v13087_v28 = vld [vmem:[%s22336_s3 + $0x88] sm:$0xf] }
 0x654   :  { %v7884_v23 = vpop.f32.mrf.mxu3  ;;  %v13409_v60 = vld [vmem:[%s22336_s3 + $0x328] sm:$0xf0] }
 0x655   :  { %14739 = vtanh.f32 %v8008_v22  ;;  %v7885_v13 = vadd.f32 %v7884_v23, %v7871_v27  ;;  %v13272_v27 = vor.u32 %v14555_v53, %v13271_v45  ;;  %8883 = vmatpush.bf16.msrb.mxu0 %v13216_v59  ;;  %v13471_v22 = vld [vmem:[%s22336_s3 + $0x388] sm:$0xf]  ;;  %v8001_v23 = vmul.f32 0.5, %v7993_v8  ;;  %v13441_v59 = vld [vmem:[%s22336_s3 + $0x368] sm:$0xf0]  ;;  %v22391_v53 = vld [vmem:[#allocation23_spill] sm:$0xff] }
 0x656   :  { %v7860_v38 = vpop.f32.mrf.mxu1  ;;  %v7873_v29 = vpop.f32.mrf.mxu2  ;;  %v13472_v30 = vor.u32 %v14604_v31, %v13471_v22  ;;  %8910 = vmatpush.bf16.msrb.mxu2 %v13188_v56  ;;  %v13444_v16 = vor.u32 %v14592_v18, %v13441_v59  ;;  %v13412_v46 = vor.u32 %v14584_v5, %v13409_v60  ;;  %v13089_v31 = vld [vmem:[%s22336_s3 + $0xa8] sm:$0xf0]  ;;  %v13343_v59 = vld [vmem:[%s22336_s3 + $0x288] sm:$0xf] }
 0x657   :  { %v7995_v57 = vadd.f32 %v7885_v13, %v22389_v39  ;;  %8850 = vmatpush.bf16.msra.mxu1 %v13272_v27  ;;  %v13151_v13 = vld [vmem:[%s22336_s3 + $0x108] sm:$0xf]  ;;  %v14560_v60 = vld [vmem:[%s22336_s3 + $0x24c] sm:$0xf] }
 0x658   :  { %v7897_v11 = vpop.f32.mrf.mxu0  ;;  %v13152_v3 = vor.u32 %v14524_v37, %v13151_v13  ;;  %v13119_v27 = vld [vmem:[%s22336_s3 + $0xc8] sm:$0xf] }
 0x659   :  { %v8009_v14 = vmul.f32 0.5, %v7995_v57  ;;  %8884 = vmatpush.bf16.msrb.mxu0 %v13184_v2  ;;  %v13440_v57 = vor.u32 %v14596_v42, %v13439_v62  ;;  %v13120_v32 = vor.u32 %v14516_v36, %v13119_v27  ;;  %v13345_v27 = vld [vmem:[%s22336_s3 + $0x2a8] sm:$0xf0]  ;;  %v14564_v5 = vld [vmem:[%s22336_s3 + $0x264] sm:$0xf0] }
 0x65a   :  { %8911 = vmatpush.bf16.msrb.mxu2 %v13156_v47  ;;  %v14496_v47 = vld [vmem:[%s22336_s3 + $0x4c] sm:$0xf] }
 0x65b   :  { %v14740_v51 = vpop.eup %14739  ;;  %14741 = vtanh.f32 %v8009_v14  ;;  %8895 = vmatpush.bf16.msrb.mxu1 %v13504_v52  ;;  %v13121_v14 = vld [vmem:[%s22336_s3 + $0xe8] sm:$0xf0] }
 0x65c   :  { %14743 = vtanh.f32 %v8000_v33  ;;  %v8012_v10 = vmul.f32 0.5, %v14740_v51  ;;  %v7886_v15 = vpop.f32.mrf.mxu3  ;;  %v13473_v33 = vld [vmem:[%s22336_s3 + $0x3a8] sm:$0xf0]  ;;  %v13124_v50 = vor.u32 %v14512_v58, %v13121_v14  ;;  %v14492_v58 = vld [vmem:[%s22336_s3 + $0x24] sm:$0xf0] }
 0x65d   :  { %v13476_v48 = vor.u32 %v14600_v35, %v13473_v33  ;;  %14745 = vtanh.f32 %v8001_v23  ;;  %8885 = vmatpush.bf16.msrb.mxu0 %v13152_v3  ;;  %v14504_v15 = vld [vmem:[%s22336_s3 + $0x8c] sm:$0xf] }
 0x65e   :  { %v8014_v0 = vadd.f32 0.5, %v8012_v10  ;;  %v7923_v34 = vpop.f32.mrf.mxu2  ;;  %v7910_v7 = vpop.f32.mrf.mxu1  ;;  %v14508_v10 = vld [vmem:[%s22336_s3 + $0xa4] sm:$0xf0]  ;;  %8912 = vmatpush.bf16.msrb.mxu2 %v13124_v50  ;;  %v13092_v23 = vor.u32 %v14504_v15, %v13089_v31  ;;  %v13025_v50 = vld [vmem:[%s22336_s3 + $0x28] sm:$0xf0] }
 0x65f   :  { %v7911_v29 = vadd.f32 %v7910_v7, %v7897_v11  ;;  %8896 = vmatpush.bf16.msrb.mxu1 %v13472_v30  ;;  %8922 = vmatpush.bf16.msrb.mxu3 %v13476_v48  ;;  %v13088_v22 = vor.u32 %v14508_v10, %v13087_v28  ;;  %v22392_v35 = vld [vmem:[#allocation24_spill] sm:$0xff] }
 0x660   :  { %v21716_v38 = vmul.f32 %v8014_v0, %v20971_v55  ;;  %v7899_v41 = vpop.f32.mrf.mxu0  ;;  %v13375_v0 = vld [vmem:[%s22336_s3 + $0x2c8] sm:$0xf]  ;;  %v14576_v48 = vld [vmem:[%s22336_s3 + $0x2cc] sm:$0xf] }
 0x661   :  { %v14742_v39 = vpop.eup %14741  ;;  %v7996_v11 = vadd.f32 %v7911_v29, %v22391_v53  ;;  %8886 = vmatpush.bf16.msrb.mxu0 %v13120_v32  ;;  %v13377_v7 = vld [vmem:[%s22336_s3 + $0x2e8] sm:$0xf0]  ;;  %v13055_v29 = vld [vmem:[%s22336_s3 + $0x48] sm:$0xf] }
 0x662   :  { %v14744_v40 = vpop.eup %14743  ;;  %v8013_v45 = vmul.f32 0.5, %v14742_v39  ;;  %v13380_v12 = vor.u32 %v14576_v48, %v13377_v7  ;;  %v14500_v41 = vld [vmem:[%s22336_s3 + $0x64] sm:$0xf0]  ;;  %8913 = vmatpush.bf16.msrb.mxu2 %v13092_v23  ;;  %v13057_v39 = vld [vmem:[%s22336_s3 + $0x68] sm:$0xf0] }
 0x663   :  { %14747 = vtanh.f32 %v7996_v11  ;;  %v8004_v8 = vmul.f32 0.5, %v14744_v40  ;;  %8897 = vmatpush.bf16.msrb.mxu1 %v13440_v57  ;;  %8923 = vmatpush.bf16.msrb.mxu3 %v13444_v16  ;;  %v14746_v30 = vpop.eup %14745  ;;  %v13056_v18 = vor.u32 %v14500_v41, %v13055_v29  ;;  %v13060_v57 = vor.u32 %v14496_v47, %v13057_v39  ;;  %v14572_v40 = vld [vmem:[%s22336_s3 + $0x2a4] sm:$0xf0]  ;;  %v13281_v31 = vld [vmem:[%s22336_s3 + $0x228] sm:$0xf0] }
 0x664   :  { %v8015_v24 = vadd.f32 0.5, %v8013_v45  ;;  %v7936_v52 = vpop.f32.mrf.mxu3  ;;  %v8005_v62 = vmul.f32 0.5, %v14746_v30  ;;  %v14568_v45 = vld [vmem:[%s22336_s3 + $0x28c] sm:$0xf]  ;;  %v13344_v16 = vor.u32 %v14572_v40, %v13343_v59  ;;  %v13023_v32 = vld [vmem:[%s22336_s3 + $0x8] sm:$0xf] }
 0x665   :  { %v7937_v54 = vadd.f32 %v7936_v52, %v7923_v34  ;;  %v14580_v34 = vld [vmem:[%s22336_s3 + $0x2e4] sm:$0xf0]  ;;  %v8006_v13 = vadd.f32 0.5, %v8004_v8  ;;  %8887 = vmatpush.bf16.msrb.mxu0 %v13088_v22  ;;  %v13348_v36 = vor.u32 %v14568_v45, %v13345_v27  ;;  %v13255_v39 = vld [vmem:[%s22336_s3 + $0x1d0] sm:$0xf] }
 0x666   :  { %v21756_v51 = vmul.f32 %v8015_v24, %v20995_v17  ;;  %v7925_v2 = vpop.f32.mrf.mxu2  ;;  %v7912_v56 = vpop.f32.mrf.mxu1  ;;  %v13376_v37 = vor.u32 %v14580_v34, %v13375_v0  ;;  %v8007_v14 = vadd.f32 0.5, %v8005_v62  ;;  %8914 = vmatpush.bf16.msrb.mxu2 %v13060_v57  ;;  %v13024_v24 = vor.u32 %v14492_v58, %v13023_v32  ;;  %v13279_v10 = vld [vmem:[%s22336_s3 + $0x208] sm:$0xf]  ;;  %v22393_v34 = vld [vmem:[#allocation25_spill] sm:$0xff] }
 0x667   :  { %v7997_v33 = vadd.f32 %v7937_v54, %v22392_v35  ;;  %8898 = vmatpush.bf16.msrb.mxu1 %v13408_v26  ;;  %8924 = vmatpush.bf16.msrb.mxu3 %v13412_v46  ;;  %v13311_v26 = vld [vmem:[%s22336_s3 + $0x248] sm:$0xf]  ;;  %v13313_v54 = vld [vmem:[%s22336_s3 + $0x268] sm:$0xf0]  ;;  %v14549_v57 = vld [vmem:[%s22336_s3 + $0x1ec] sm:$0xf0] }
 0x668   :  { %v13316_v46 = vor.u32 %v14560_v60, %v13313_v54  ;;  %v14556_v15 = vld [vmem:[%s22336_s3 + $0x224] sm:$0xf0]  ;;  %v14545_v40 = vld [vmem:[%s22336_s3 + $0x1d4] sm:$0xf] }
 0x669   :  { %v14748_v3 = vpop.eup %14747  ;;  %14749 = vtanh.f32 %v7997_v33  ;;  %8888 = vmatpush.bf16.msrb.mxu0 %v13056_v18  ;;  %v13280_v22 = vor.u32 %v14556_v15, %v13279_v10  ;;  %v13257_v45 = vld [vmem:[%s22336_s3 + $0x1f0] sm:$0xf0] }
 0x66a   :  { %v8028_v42 = vmul.f32 %v14748_v3, %v8006_v13  ;;  %v13260_v58 = vor.u32 %v14545_v40, %v13257_v45  ;;  %v13513_v60 = vld [vmem:[%s22336_s3 + $0x3f0] sm:$0xf0] }
 0x66b   :  { %8899 = vmatpush.bf16.msrb.mxu1 %v13376_v37  ;;  %8925 = vmatpush.bf16.msrb.mxu3 %v13380_v12  ;;  %v22394_v12 = vld [vmem:[#allocation27_spill] sm:$0xff]  ;;  %v14529_v10 = vld [vmem:[%s22336_s3 + $0x154] sm:$0xf] }
 0x66c   :  { %v8030_v53 = vadd.f32 %v8028_v42, %v21716_v38  ;;  %v7938_v11 = vpop.f32.mrf.mxu3  ;;  %v14488_v38 = vld [vmem:[%s22336_s3 + $0xc] sm:$0xf]  ;;  %v13193_v15 = vld [vmem:[%s22336_s3 + $0x170] sm:$0xf0] }
 0x66d   :  { %v13028_v8 = vor.u32 %v14488_v38, %v13025_v50  ;;  %8889 = vmatpush.bf16.msrb.mxu0 %v13024_v24  ;;  %v13223_v38 = vld [vmem:[%s22336_s3 + $0x190] sm:$0xf]  ;;  %v13225_v50 = vld [vmem:[%s22336_s3 + $0x1b0] sm:$0xf0] }
 0x66e   :  { %v21826_v49 = vsel %vm8041_vm15, %v8030_v53, %v20971_v55  ;;  %v13312_v55 = vor.u32 %v14564_v5, %v13311_v26  ;;  %v14613_v26 = vld [vmem:[%s22336_s3 + $0x3ec] sm:$0xf0]  ;;  %v14609_v5 = vld [vmem:[%s22336_s3 + $0x3d4] sm:$0xf] }
 0x66f   :  { %v14750_v20 = vpop.eup %14749  ;;  %8900 = vmatpush.bf16.msrb.mxu1 %v13344_v16  ;;  %8926 = vmatpush.bf16.msrb.mxu3 %v13348_v36  ;;  %v13256_v16 = vor.u32 %v14549_v57, %v13255_v39  ;;  %v14517_v39 = vld [vmem:[%s22336_s3 + $0xec] sm:$0xf0]  ;;  %v14513_v57 = vld [vmem:[%s22336_s3 + $0xd4] sm:$0xf] }
 0x670   :  { %v8029_v52 = vmul.f32 %v14750_v20, %v8007_v14  ;;  %8915 = vmatpush.bf16.msrb.mxu2 %v13028_v8  ;;  %v14541_v14 = vld [vmem:[%s22336_s3 + $0x1ac] sm:$0xf0] }
 0x671   :  { %v13511_v8 = vld [vmem:[%s22336_s3 + $0x3d0] sm:$0xf]  ;;  %v13224_v54 = vor.u32 %v14541_v14, %v13223_v38 }
 0x672   :  { %v8031_v2 = vadd.f32 %v8029_v52, %v21756_v51  ;;  %v14552_v51 = vld [vmem:[%s22336_s3 + $0x20c] sm:$0xf]  ;;  %v13095_v38 = vld [vmem:[%s22336_s3 + $0x90] sm:$0xf] }
 0x673   :  { %8901 = vmatpush.bf16.msrb.mxu1 %v13312_v55  ;;  %8927 = vmatpush.bf16.msrb.mxu3 %v13316_v46  ;;  %v13284_v30 = vor.u32 %v14552_v51, %v13281_v31  ;;  %v13191_v46 = vld [vmem:[%s22336_s3 + $0x150] sm:$0xf]  ;;  %v13512_v31 = vor.u32 %v14613_v26, %v13511_v8 }
 0x674   :  { %v21850_v56 = vsel %vm8041_vm15, %v8031_v2, %v20995_v17  ;;  %v14509_v14 = vld [vmem:[%s22336_s3 + $0xac] sm:$0xf0] }
 0x675   :  { %v14581_v26 = vld [vmem:[%s22336_s3 + $0x2ec] sm:$0xf0] }
 0x677   :  { %8902 = vmatpush.bf16.msrb.mxu1 %v13280_v22  ;;  %8928 = vmatpush.bf16.msrb.mxu3 %v13284_v30  ;;  %v13516_v30 = vor.u32 %v14609_v5, %v13513_v60  ;;  %v14577_v5 = vld [vmem:[%s22336_s3 + $0x2d4] sm:$0xf] }
 0x678   :  { %v7949_v28 = vpop.f32.mrf.mxu0  ;;  %v13385_v60 = vld [vmem:[%s22336_s3 + $0x2f0] sm:$0xf0] }
 0x67e   :  { %v7962_v35 = vpop.f32.mrf.mxu1  ;;  %v7975_v33 = vpop.f32.mrf.mxu2 }
 0x67f   :  { %v7963_v23 = vadd.f32 %v7962_v35, %v7949_v28  ;;  %v14533_v28 = vld [vmem:[%s22336_s3 + $0x16c] sm:$0xf0] }
 0x680   :  { %v7951_v0 = vpop.f32.mrf.mxu0  ;;  %v13479_v35 = vld [vmem:[%s22336_s3 + $0x390] sm:$0xf] }
 0x681   :  { %v7998_v48 = vadd.f32 %v7963_v23, %v22393_v34  ;;  %v13192_v0 = vor.u32 %v14533_v28, %v13191_v46  ;;  %v13196_v34 = vor.u32 %v14529_v10, %v13193_v15  ;;  %v14501_v46 = vld [vmem:[%s22336_s3 + $0x6c] sm:$0xf0]  ;;  %v14497_v28 = vld [vmem:[%s22336_s3 + $0x54] sm:$0xf] }
 0x682   :  { %v13065_v10 = vld [vmem:[%s22336_s3 + $0x70] sm:$0xf0] }
 0x683   :  { %v8018_v17 = vmul.f32 0.5, %v7998_v48  ;;  %v13159_v48 = vld [vmem:[%s22336_s3 + $0x110] sm:$0xf] }
 0x684   :  { %v7988_v13 = vpop.f32.mrf.mxu3 }
 0x685   :  { %14751 = vtanh.f32 %v8018_v17  ;;  %v7989_v37 = vadd.f32 %v7988_v13, %v7975_v33  ;;  %v14605_v33 = vld [vmem:[%s22336_s3 + $0x3ac] sm:$0xf0]  ;;  %v14521_v13 = vld [vmem:[%s22336_s3 + $0x114] sm:$0xf] }
 0x686   :  { %v7964_v7 = vpop.f32.mrf.mxu1  ;;  %v7977_v3 = vpop.f32.mrf.mxu2  ;;  %14753 = vtanh.f32 %v8030_v53  ;;  %v14525_v17 = vld [vmem:[%s22336_s3 + $0x12c] sm:$0xf0] }
 0x687   :  { %v7999_v29 = vadd.f32 %v7989_v37, %v22394_v12  ;;  %v13161_v37 = vld [vmem:[%s22336_s3 + $0x130] sm:$0xf0]  ;;  %v13480_v7 = vor.u32 %v14605_v33, %v13479_v35  ;;  %v13447_v12 = vld [vmem:[%s22336_s3 + $0x350] sm:$0xf] }
 0x688   :  { %v14569_v35 = vld [vmem:[%s22336_s3 + $0x294] sm:$0xf] }
 0x689   :  { %v8019_v41 = vmul.f32 0.5, %v7999_v29  ;;  %v14597_v29 = vld [vmem:[%s22336_s3 + $0x36c] sm:$0xf0]  ;;  %v13353_v33 = vld [vmem:[%s22336_s3 + $0x2b0] sm:$0xf0] }
 0x68a   :  { %v13448_v40 = vor.u32 %v14597_v29, %v13447_v12  ;;  %v14546_v12 = vld [vmem:[%s22336_s3 + $0x1dc] sm:$0xf] }
 0x68b   :  { %v14752_v47 = vpop.eup %14751  ;;  %14755 = vtanh.f32 %v8019_v41  ;;  %v14593_v41 = vld [vmem:[%s22336_s3 + $0x354] sm:$0xf]  ;;  %v13265_v29 = vld [vmem:[%s22336_s3 + $0x1f8] sm:$0xf0] }
 0x68c   :  { %v8022_v62 = vmul.f32 0.5, %v14752_v47  ;;  %v7990_v42 = vpop.f32.mrf.mxu3  ;;  %v14754_v59 = vpop.eup %14753  ;;  %14757 = vtanh.f32 %v8031_v2  ;;  %v13449_v47 = vld [vmem:[%s22336_s3 + $0x370] sm:$0xf0] }
 0x68d   :  { %v13164_v42 = vor.u32 %v14521_v13, %v13161_v37  ;;  %v13452_v45 = vor.u32 %v14593_v41, %v13449_v47  ;;  %v13263_v13 = vld [vmem:[%s22336_s3 + $0x1d8] sm:$0xf]  ;;  %v13319_v41 = vld [vmem:[%s22336_s3 + $0x250] sm:$0xf] }
 0x68e   :  { %v8024_v18 = vadd.f32 0.5, %v8022_v62  ;;  %v13160_v62 = vor.u32 %v14525_v17, %v13159_v48  ;;  %v14489_v48 = vld [vmem:[%s22336_s3 + $0x14] sm:$0xf]  ;;  %v14550_v37 = vld [vmem:[%s22336_s3 + $0x1f4] sm:$0xf0] }
 0x68f   :  { %v13033_v17 = vld [vmem:[%s22336_s3 + $0x30] sm:$0xf0]  ;;  %v14565_v47 = vld [vmem:[%s22336_s3 + $0x26c] sm:$0xf0] }
 0x690   :  { %v8034_v53 = vmul.f32 %v14754_v59, %v8024_v18  ;;  %v13127_v18 = vld [vmem:[%s22336_s3 + $0xd0] sm:$0xf]  ;;  %v13129_v59 = vld [vmem:[%s22336_s3 + $0xf0] sm:$0xf0] }
 0x691   :  { %v14756_v11 = vpop.eup %14755 }
 0x692   :  { %v8042_v27 = vsel %vm8041_vm15, %v8034_v53, 0.0  ;;  %v21877_v36 = vsel %vm8041_vm15, %v8034_v53, %v21024_v19  ;;  %v8023_v32 = vmul.f32 0.5, %v14756_v11  ;;  %v14537_v19 = vld [vmem:[%s22336_s3 + $0x194] sm:$0xf]  ;;  %v14758_v52 = vpop.eup %14757  ;;  %v13415_v53 = vld [vmem:[%s22336_s3 + $0x310] sm:$0xf] }
 0x693   :  { %13011 = vst [vmem:[%s22339_s5 + $0x60] sm:$0xff] %v8042_v27  ;;  %v21890_v24 = vpack.c.bf16 %v21877_v36, %v21877_v36  ;;  %v13228_v2 = vor.u32 %v14537_v19, %v13225_v50  ;;  %v14589_v11 = vld [vmem:[%s22336_s3 + $0x32c] sm:$0xf0]  ;;  %v13417_v27 = vld [vmem:[%s22336_s3 + $0x330] sm:$0xf0] }
 0x694   :  { %v8025_v20 = vadd.f32 0.5, %v8023_v32  ;;  %v13128_v32 = vor.u32 %v14517_v39, %v13127_v18  ;;  %v14505_v19 = vld [vmem:[%s22336_s3 + $0x94] sm:$0xf]  ;;  %v13036_v39 = vor.u32 %v14489_v48, %v13033_v17 }
 0x695   :  { %8838 = vmatmul.bf16.vlgmr.msra.gmra.mxu0 %v21890_v24  ;;  %8864 = vmatmul.bf16.vlgmr.msra.gmra.mxu2 %v21890_v24  ;;  %v13097_v50 = vld [vmem:[%s22336_s3 + $0xb0] sm:$0xf0] }
 0x696   :  { %v8035_v55 = vmul.f32 %v14758_v52, %v8025_v20  ;;  %8934 = vmatpush.bf16.msra.mxu0 %v13256_v16  ;;  %8960 = vmatpush.bf16.msra.mxu2 %v13260_v58  ;;  %v14585_v16 = vld [vmem:[%s22336_s3 + $0x314] sm:$0xf]  ;;  %v13132_v58 = vor.u32 %v14513_v57, %v13129_v59  ;;  %v13416_v20 = vor.u32 %v14589_v11, %v13415_v53  ;;  %v13383_v52 = vld [vmem:[%s22336_s3 + $0x2d0] sm:$0xf]  ;;  %v14538_v53 = vld [vmem:[%s22336_s3 + $0x19c] sm:$0xf] }
 0x697   :  { %v13420_v8 = vor.u32 %v14585_v16, %v13417_v27  ;;  %v13384_v15 = vor.u32 %v14581_v26, %v13383_v52  ;;  %v13264_v57 = vor.u32 %v14550_v37, %v13263_v13  ;;  %v13268_v59 = vor.u32 %v14546_v12, %v13265_v29  ;;  %v13233_v27 = vld [vmem:[%s22336_s3 + $0x1b8] sm:$0xf0]  ;;  %v13455_v13 = vld [vmem:[%s22336_s3 + $0x358] sm:$0xf] }
 0x698   :  { %v8043_v22 = vsel %vm8041_vm15, %v8035_v55, 0.0  ;;  %v21929_v51 = vsel %vm8041_vm15, %v8035_v55, %v21076_v63  ;;  %v14601_v63 = vld [vmem:[%s22336_s3 + $0x394] sm:$0xf]  ;;  %v13096_v55 = vor.u32 %v14509_v14, %v13095_v38  ;;  %v13320_v11 = vor.u32 %v14565_v47, %v13319_v41  ;;  %v14598_v37 = vld [vmem:[%s22336_s3 + $0x374] sm:$0xf0] }
 0x699   :  { %13012 = vst [vmem:[%s22339_s5 + $0x68] sm:$0xff] %v8043_v22  ;;  %v21942_v23 = vpack.c.bf16 %v21929_v51, %v21929_v51  ;;  %v13484_v3 = vor.u32 %v14601_v63, %v13481_v61  ;;  %v13388_v22 = vor.u32 %v14577_v5, %v13385_v60  ;;  %v13068_v61 = vor.u32 %v14497_v28, %v13065_v10  ;;  %v14553_v38 = vld [vmem:[%s22336_s3 + $0x214] sm:$0xf]  ;;  %v13199_v5 = vld [vmem:[%s22336_s3 + $0x158] sm:$0xf] }
 0x69a   :  { %8935 = vmatpush.bf16.msra.mxu0 %v13224_v54  ;;  %8961 = vmatpush.bf16.msra.mxu2 %v13228_v2  ;;  %v13100_v54 = vor.u32 %v14505_v19, %v13097_v50  ;;  %v13063_v2 = vld [vmem:[%s22336_s3 + $0x50] sm:$0xf]  ;;  %v13289_v14 = vld [vmem:[%s22336_s3 + $0x230] sm:$0xf0]  ;;  %v13519_v19 = vld [vmem:[%s22336_s3 + $0x3d8] sm:$0xf]  ;;  %v13236_v26 = vor.u32 %v14538_v53, %v13233_v27 }
 0x69b   :  { %8851 = vmatmul.bf16.vlgmr.msra.gmra.mxu1 %v21942_v23  ;;  %8877 = vmatmul.bf16.vlgmr.msra.gmra.mxu3 %v21942_v23  ;;  %v13064_v63 = vor.u32 %v14501_v46, %v13063_v2  ;;  %v14614_v50 = vld [vmem:[%s22336_s3 + $0x3f4] sm:$0xf0]  ;;  %v14530_v2 = vld [vmem:[%s22336_s3 + $0x15c] sm:$0xf] }
 0x69c   :  { %8947 = vmatpush.bf16.msra.mxu1 %v13512_v31  ;;  %8973 = vmatpush.bf16.msra.mxu3 %v13516_v30  ;;  %v13351_v31 = vld [vmem:[%s22336_s3 + $0x290] sm:$0xf]  ;;  %v13201_v46 = vld [vmem:[%s22336_s3 + $0x178] sm:$0xf0]  ;;  %v13520_v28 = vor.u32 %v14614_v50, %v13519_v19  ;;  %v13135_v41 = vld [vmem:[%s22336_s3 + $0xd8] sm:$0xf] }
 0x69d   :  { %v14573_v30 = vld [vmem:[%s22336_s3 + $0x2ac] sm:$0xf0]  ;;  %v14518_v47 = vld [vmem:[%s22336_s3 + $0xf4] sm:$0xf0] }
 0x69e   :  { %8936 = vmatpush.bf16.msra.mxu0 %v13192_v0  ;;  %8962 = vmatpush.bf16.msra.mxu2 %v13196_v34  ;;  %v13031_v0 = vld [vmem:[%s22336_s3 + $0x10] sm:$0xf]  ;;  %v13136_v53 = vor.u32 %v14518_v47, %v13135_v41  ;;  %v14510_v27 = vld [vmem:[%s22336_s3 + $0xb4] sm:$0xf0] }
 0x69f   :  { %v14493_v34 = vld [vmem:[%s22336_s3 + $0x2c] sm:$0xf0]  ;;  %v13391_v19 = vld [vmem:[%s22336_s3 + $0x2d8] sm:$0xf] }
 0x6a0   :  { %8948 = vmatpush.bf16.msra.mxu1 %v13480_v7  ;;  %8974 = vmatpush.bf16.msra.mxu3 %v13484_v3  ;;  %v13352_v7 = vor.u32 %v14573_v30, %v13351_v31  ;;  %v13356_v3 = vor.u32 %v14569_v35, %v13353_v33  ;;  %v13032_v18 = vor.u32 %v14493_v34, %v13031_v0  ;;  %v14602_v31 = vld [vmem:[%s22336_s3 + $0x39c] sm:$0xf]  ;;  %v14582_v50 = vld [vmem:[%s22336_s3 + $0x2f4] sm:$0xf0] }
 0x6a1   :  { %v13489_v30 = vld [vmem:[%s22336_s3 + $0x3b8] sm:$0xf0]  ;;  %v13204_v33 = vor.u32 %v14530_v2, %v13201_v46  ;;  %v13392_v2 = vor.u32 %v14582_v50, %v13391_v19  ;;  %v13295_v41 = vld [vmem:[%s22336_s3 + $0x218] sm:$0xf] }
 0x6a2   :  { %8937 = vmatpush.bf16.msra.mxu0 %v13160_v62  ;;  %8963 = vmatpush.bf16.msra.mxu2 %v13164_v42  ;;  %v14561_v62 = vld [vmem:[%s22336_s3 + $0x254] sm:$0xf]  ;;  %v14522_v0 = vld [vmem:[%s22336_s3 + $0x11c] sm:$0xf]  ;;  %v13492_v17 = vor.u32 %v14602_v31, %v13489_v30  ;;  %v14558_v47 = vld [vmem:[%s22336_s3 + $0x234] sm:$0xf0] }
 0x6a3   :  { %v13321_v42 = vld [vmem:[%s22336_s3 + $0x270] sm:$0xf0]  ;;  %v13169_v34 = vld [vmem:[%s22336_s3 + $0x138] sm:$0xf0] }
 0x6a4   :  { %8949 = vmatpush.bf16.msra.mxu1 %v13448_v40  ;;  %8975 = vmatpush.bf16.msra.mxu3 %v13452_v45  ;;  %v13231_v40 = vld [vmem:[%s22336_s3 + $0x198] sm:$0xf]  ;;  %v13324_v16 = vor.u32 %v14561_v62, %v13321_v42  ;;  %v13172_v29 = vor.u32 %v14522_v0, %v13169_v34  ;;  %v14514_v62 = vld [vmem:[%s22336_s3 + $0xdc] sm:$0xf] }
 0x6a5   :  { %8890 = vmatmul.bf16.vlgmr.msrb.gmra.mxu0 %v21890_v24  ;;  %8916 = vmatmul.bf16.vlgmr.msrb.gmra.mxu2 %v21890_v24  ;;  %v14542_v45 = vld [vmem:[%s22336_s3 + $0x1b4] sm:$0xf0]  ;;  %v13137_v42 = vld [vmem:[%s22336_s3 + $0xf8] sm:$0xf0] }
 0x6a6   :  { %8938 = vmatpush.bf16.msra.mxu0 %v13128_v32  ;;  %8964 = vmatpush.bf16.msra.mxu2 %v13132_v58  ;;  %v13287_v32 = vld [vmem:[%s22336_s3 + $0x210] sm:$0xf]  ;;  %v13232_v52 = vor.u32 %v14542_v45, %v13231_v40  ;;  %v14586_v40 = vld [vmem:[%s22336_s3 + $0x31c] sm:$0xf] }
 0x6a7   :  { %v14557_v58 = vld [vmem:[%s22336_s3 + $0x22c] sm:$0xf0]  ;;  %v13425_v45 = vld [vmem:[%s22336_s3 + $0x338] sm:$0xf0] }
 0x6a8   :  { %8950 = vmatpush.bf16.msra.mxu1 %v13416_v20  ;;  %8976 = vmatpush.bf16.msra.mxu3 %v13420_v8  ;;  %v14610_v20 = vld [vmem:[%s22336_s3 + $0x3dc] sm:$0xf]  ;;  %v13288_v60 = vor.u32 %v14557_v58, %v13287_v32 }
 0x6a9   :  { %v13521_v8 = vld [vmem:[%s22336_s3 + $0x3f8] sm:$0xf0] }
 0x6aa   :  { %8939 = vmatpush.bf16.msra.mxu0 %v13096_v55  ;;  %8965 = vmatpush.bf16.msra.mxu2 %v13100_v54  ;;  %v13292_v55 = vor.u32 %v14553_v38, %v13289_v14  ;;  %v14534_v54 = vld [vmem:[%s22336_s3 + $0x174] sm:$0xf0]  ;;  %v13524_v10 = vor.u32 %v14610_v20, %v13521_v8  ;;  %v14506_v32 = vld [vmem:[%s22336_s3 + $0x9c] sm:$0xf]  ;;  %v13428_v14 = vor.u32 %v14586_v40, %v13425_v45 }
 0x6ab   :  { %8903 = vmatmul.bf16.vlgmr.msrb.gmra.mxu1 %v21942_v23  ;;  %8929 = vmatmul.bf16.vlgmr.msrb.gmra.mxu3 %v21942_v23  ;;  %v13200_v35 = vor.u32 %v14534_v54, %v13199_v5  ;;  %v13105_v58 = vld [vmem:[%s22336_s3 + $0xb8] sm:$0xf0]  ;;  %v13071_v5 = vld [vmem:[%s22336_s3 + $0x58] sm:$0xf] }
 0x6ac   :  { %8951 = vmatpush.bf16.msra.mxu1 %v13384_v15  ;;  %8977 = vmatpush.bf16.msra.mxu3 %v13388_v22  ;;  %v13487_v15 = vld [vmem:[%s22336_s3 + $0x398] sm:$0xf]  ;;  %v14578_v20 = vld [vmem:[%s22336_s3 + $0x2dc] sm:$0xf] }
 0x6ad   :  { %v14606_v22 = vld [vmem:[%s22336_s3 + $0x3b4] sm:$0xf0]  ;;  %v13393_v8 = vld [vmem:[%s22336_s3 + $0x2f8] sm:$0xf0] }
 0x6ae   :  { %8940 = vmatpush.bf16.msra.mxu0 %v13064_v63  ;;  %8966 = vmatpush.bf16.msra.mxu2 %v13068_v61  ;;  %v13167_v63 = vld [vmem:[%s22336_s3 + $0x118] sm:$0xf]  ;;  %v13488_v48 = vor.u32 %v14606_v22, %v13487_v15  ;;  %v13073_v54 = vld [vmem:[%s22336_s3 + $0x78] sm:$0xf0]  ;;  %v13396_v46 = vor.u32 %v14578_v20, %v13393_v8 }
 0x6af   :  { %v14526_v61 = vld [vmem:[%s22336_s3 + $0x134] sm:$0xf0]  ;;  %v14570_v15 = vld [vmem:[%s22336_s3 + $0x29c] sm:$0xf] }
 0x6b0   :  { %8952 = vmatpush.bf16.msra.mxu1 %v13352_v7  ;;  %8978 = vmatpush.bf16.msra.mxu3 %v13356_v3  ;;  %v14594_v7 = vld [vmem:[%s22336_s3 + $0x35c] sm:$0xf]  ;;  %v13168_v12 = vor.u32 %v14526_v61, %v13167_v63 }
 0x6b1   :  { %v13457_v3 = vld [vmem:[%s22336_s3 + $0x378] sm:$0xf0] }
 0x6b2   :  { %8941 = vmatpush.bf16.msra.mxu0 %v13032_v18  ;;  %8967 = vmatpush.bf16.msra.mxu2 %v13036_v39  ;;  %v13456_v18 = vor.u32 %v14598_v37, %v13455_v13  ;;  %v13460_v39 = vor.u32 %v14594_v7, %v13457_v3  ;;  %v13361_v22 = vld [vmem:[%s22336_s3 + $0x2b8] sm:$0xf0] }
 0x6b3   :  { %v14490_v63 = vld [vmem:[%s22336_s3 + $0x1c] sm:$0xf]  ;;  %v13364_v34 = vor.u32 %v14570_v15, %v13361_v22 }
 0x6b4   :  { %8953 = vmatpush.bf16.msra.mxu1 %v13320_v11  ;;  %8979 = vmatpush.bf16.msra.mxu3 %v13324_v16  ;;  %v13140_v11 = vor.u32 %v14514_v62, %v13137_v42  ;;  %v13103_v16 = vld [vmem:[%s22336_s3 + $0x98] sm:$0xf]  ;;  %v13041_v61 = vld [vmem:[%s22336_s3 + $0x38] sm:$0xf0] }
 0x6b5   :  { %8942 = vmatmul.bf16.vlgmr.msra.gmra.mxu0 %v21890_v24  ;;  %8968 = vmatmul.bf16.vlgmr.msra.gmra.mxu2 %v21890_v24  ;;  %v14562_v13 = vld [vmem:[%s22336_s3 + $0x25c] sm:$0xf]  ;;  %v13044_v3 = vor.u32 %v14490_v63, %v13041_v61 }
 0x6b6   :  { %8986 = vmatpush.bf16.msrb.mxu0 %v13264_v57  ;;  %9012 = vmatpush.bf16.msrb.mxu2 %v13268_v59  ;;  %v13423_v57 = vld [vmem:[%s22336_s3 + $0x318] sm:$0xf]  ;;  %v13329_v37 = vld [vmem:[%s22336_s3 + $0x278] sm:$0xf0] }
 0x6b7   :  { %v14590_v59 = vld [vmem:[%s22336_s3 + $0x334] sm:$0xf0]  ;;  %v14554_v62 = vld [vmem:[%s22336_s3 + $0x21c] sm:$0xf] }
 0x6b8   :  { %8954 = vmatpush.bf16.msra.mxu1 %v13288_v60  ;;  %8980 = vmatpush.bf16.msra.mxu3 %v13292_v55  ;;  %v13424_v38 = vor.u32 %v14590_v59, %v13423_v57  ;;  %v14502_v60 = vld [vmem:[%s22336_s3 + $0x74] sm:$0xf0]  ;;  %v14498_v55 = vld [vmem:[%s22336_s3 + $0x5c] sm:$0xf] }
 0x6b9   :  { %v13072_v31 = vor.u32 %v14502_v60, %v13071_v5  ;;  %v13076_v30 = vor.u32 %v14498_v55, %v13073_v54  ;;  %v13297_v42 = vld [vmem:[%s22336_s3 + $0x238] sm:$0xf0] }
 0x6ba   :  { %8987 = vmatpush.bf16.msrb.mxu0 %v13232_v52  ;;  %9013 = vmatpush.bf16.msrb.mxu2 %v13236_v26  ;;  %v13104_v52 = vor.u32 %v14510_v27, %v13103_v16  ;;  %v13108_v26 = vor.u32 %v14506_v32, %v13105_v58  ;;  %v22397_v55 = vld [vmem:[#allocation14_spill] sm:$0xff] }
 0x6bb   :  { %8955 = vmatmul.bf16.vlgmr.msra.gmra.mxu1 %v21942_v23  ;;  %8981 = vmatmul.bf16.vlgmr.msra.gmra.mxu3 %v21942_v23  ;;  %v552_v54 = vadd.f32 %v22397_v55, %v15847_v44 }
 0x6bc   :  { %8999 = vmatpush.bf16.msrb.mxu1 %v13520_v28  ;;  %9025 = vmatpush.bf16.msrb.mxu3 %v13524_v10  ;;  %v13359_v28 = vld [vmem:[%s22336_s3 + $0x298] sm:$0xf] }
 0x6bd   :  { %v14574_v10 = vld [vmem:[%s22336_s3 + $0x2b4] sm:$0xf0] }
 0x6be   :  { %8988 = vmatpush.bf16.msrb.mxu0 %v13200_v35  ;;  %9014 = vmatpush.bf16.msrb.mxu2 %v13204_v33  ;;  %v13039_v35 = vld [vmem:[%s22336_s3 + $0x18] sm:$0xf]  ;;  %v13360_v0 = vor.u32 %v14574_v10, %v13359_v28 }
 0x6bf   :  { %v14494_v33 = vld [vmem:[%s22336_s3 + $0x34] sm:$0xf0] }
 0x6c0   :  { %9000 = vmatpush.bf16.msrb.mxu1 %v13488_v48  ;;  %9026 = vmatpush.bf16.msrb.mxu3 %v13492_v17  ;;  %v13327_v48 = vld [vmem:[%s22336_s3 + $0x258] sm:$0xf]  ;;  %v13040_v7 = vor.u32 %v14494_v33, %v13039_v35 }
 0x6c1   :  { %v14566_v17 = vld [vmem:[%s22336_s3 + $0x274] sm:$0xf0] }
 0x6c2   :  { %8989 = vmatpush.bf16.msrb.mxu0 %v13168_v12  ;;  %9015 = vmatpush.bf16.msrb.mxu2 %v13172_v29  ;;  %v13328_v12 = vor.u32 %v14566_v17, %v13327_v48  ;;  %v13332_v29 = vor.u32 %v14562_v13, %v13329_v37  ;;  %v22399_v17 = vld [vmem:[#allocation26_spill] sm:$0xff] }
 0x6c3   :  { %v581_v13 = vadd.f32 %v22399_v17, %v16178_v1 }
 0x6c4   :  { %9001 = vmatpush.bf16.msrb.mxu1 %v13456_v18  ;;  %9027 = vmatpush.bf16.msrb.mxu3 %v13460_v39  ;;  %v13296_v18 = vor.u32 %v14558_v47, %v13295_v41  ;;  %v13300_v39 = vor.u32 %v14554_v62, %v13297_v42 }
 0x6c6   :  { %8990 = vmatpush.bf16.msrb.mxu0 %v13136_v53  ;;  %9016 = vmatpush.bf16.msrb.mxu2 %v13140_v11 }
 0x6c8   :  { %9002 = vmatpush.bf16.msrb.mxu1 %v13424_v38  ;;  %9028 = vmatpush.bf16.msrb.mxu3 %v13428_v14  ;;  %v22395_v14 = vld [vmem:[#allocation13_spill] sm:$0xff] }
 0x6ca   :  { %8991 = vmatpush.bf16.msrb.mxu0 %v13104_v52  ;;  %9017 = vmatpush.bf16.msrb.mxu2 %v13108_v26 }
 0x6cc   :  { %9003 = vmatpush.bf16.msrb.mxu1 %v13392_v2  ;;  %9029 = vmatpush.bf16.msrb.mxu3 %v13396_v46 }
 0x6ce   :  { %8992 = vmatpush.bf16.msrb.mxu0 %v13072_v31  ;;  %9018 = vmatpush.bf16.msrb.mxu2 %v13076_v30 }
 0x6d0   :  { %9004 = vmatpush.bf16.msrb.mxu1 %v13360_v0  ;;  %9030 = vmatpush.bf16.msrb.mxu3 %v13364_v34 }
 0x6d2   :  { %8993 = vmatpush.bf16.msrb.mxu0 %v13040_v7  ;;  %9019 = vmatpush.bf16.msrb.mxu2 %v13044_v3 }
 0x6d4   :  { %9005 = vmatpush.bf16.msrb.mxu1 %v13328_v12  ;;  %9031 = vmatpush.bf16.msrb.mxu3 %v13332_v29 }
 0x6d5   :  { %8994 = vmatmul.bf16.vlgmr.msrb.gmra.mxu0 %v21890_v24  ;;  %9020 = vmatmul.bf16.vlgmr.msrb.gmra.mxu2 %v21890_v24  ;;  %v523_v24 = vadd.f32 %v22395_v14, %v15844_v43  ;;  %v22398_v43 = vld [vmem:[#allocation12_spill] sm:$0xff] }
 0x6d6   :  { %v494_v22 = vadd.f32 %v22398_v43, %v15800_v4 }
 0x6d8   :  { %9006 = vmatpush.bf16.msrb.mxu1 %v13296_v18  ;;  %9032 = vmatpush.bf16.msrb.mxu3 %v13300_v39  ;;  %v22400_v18 = vld [vmem:[#allocation28_spill] sm:$0xff] }
 0x6d9   :  { %v610_v39 = vadd.f32 %v22400_v18, %v16183_v6 }
 0x6db   :  { %9007 = vmatmul.bf16.vlgmr.msrb.gmra.mxu1 %v21942_v23  ;;  %9033 = vmatmul.bf16.vlgmr.msrb.gmra.mxu3 %v21942_v23  ;;  %v22396_v23 = vld [vmem:[#allocation10_spill] sm:$0xff] }
 0x6dc   :  { %v465_v52 = vadd.f32 %v22396_v23, %v15777_v9 }
 0x712   :  { %v8839_v57 = vpop.f32.mrf.mxu0 }
 0x718   :  { %v8852_v59 = vpop.f32.mrf.mxu1  ;;  %v8865_v40 = vpop.f32.mrf.mxu2 }
 0x719   :  { %v8853_v50 = vadd.f32 %v8852_v59, %v8839_v57 }
 0x71a   :  { %v8841_v45 = vpop.f32.mrf.mxu0 }
 0x71b   :  { %v9038_v5 = vadd.f32 %v8853_v50, %v465_v52 }
 0x71d   :  { %v9046_v31 = vmul.f32 0.5, %v9038_v5  ;;  %v22401_v5 = vld [vmem:[#allocation29_spill] sm:$0xff] }
 0x71e   :  { %v8878_v53 = vpop.f32.mrf.mxu3 }
 0x71f   :  { %v8879_v46 = vadd.f32 %v8878_v53, %v8865_v40 }
 0x720   :  { %v8854_v11 = vpop.f32.mrf.mxu1  ;;  %v8867_v16 = vpop.f32.mrf.mxu2 }
 0x721   :  { %v9039_v33 = vadd.f32 %v8879_v46, %v494_v22 }
 0x722   :  { %v8891_v27 = vpop.f32.mrf.mxu0 }
 0x723   :  { %v9047_v0 = vmul.f32 0.5, %v9039_v33 }
 0x726   :  { %v8880_v32 = vpop.f32.mrf.mxu3 }
 0x728   :  { %v8904_v58 = vpop.f32.mrf.mxu1  ;;  %v8917_v38 = vpop.f32.mrf.mxu2 }
 0x729   :  { %v8905_v19 = vadd.f32 %v8904_v58, %v8891_v27  ;;  %v9086_v27 = vpop.permute.xlu1 %9085 }
 0x72a   :  { %v8893_v20 = vpop.f32.mrf.mxu0  ;;  %vm9087_vm0 = vcmp.eq.s32.totalorder %v9086_v27, 1 }
 0x72b   :  { %v9040_v8 = vadd.f32 %v8905_v19, %v523_v24 }
 0x72d   :  { %v9054_v26 = vmul.f32 0.5, %v9040_v8 }
 0x72e   :  { %v8930_v60 = vpop.f32.mrf.mxu3 }
 0x72f   :  { %14759 = vtanh.f32 %v9054_v26  ;;  %v8931_v2 = vadd.f32 %v8930_v60, %v8917_v38 }
 0x730   :  { %v8906_v28 = vpop.f32.mrf.mxu1  ;;  %v8919_v10 = vpop.f32.mrf.mxu2 }
 0x731   :  { %v9041_v15 = vadd.f32 %v8931_v2, %v552_v54  ;;  %v22402_v28 = vld [vmem:[#allocation30_spill] sm:$0xff] }
 0x732   :  { %v8943_v30 = vpop.f32.mrf.mxu0  ;;  %v668_v10 = vadd.f32 %v22402_v28, %v16197_v25 }
 0x733   :  { %v9055_v35 = vmul.f32 0.5, %v9041_v15 }
 0x735   :  { %v14760_v9 = vpop.eup %14759  ;;  %14761 = vtanh.f32 %v9055_v35 }
 0x736   :  { %14763 = vtanh.f32 %v9046_v31  ;;  %v9058_v63 = vmul.f32 0.5, %v14760_v9  ;;  %v8932_v61 = vpop.f32.mrf.mxu3 }
 0x737   :  { %14765 = vtanh.f32 %v9047_v0 }
 0x738   :  { %v9060_v44 = vadd.f32 0.5, %v9058_v63  ;;  %v8969_v34 = vpop.f32.mrf.mxu2  ;;  %v8956_v48 = vpop.f32.mrf.mxu1 }
 0x739   :  { %v8957_v7 = vadd.f32 %v8956_v48, %v8943_v30 }
 0x73a   :  { %v9072_v37 = vmul.f32 %v9060_v44, %v21826_v49  ;;  %v8945_v4 = vpop.f32.mrf.mxu0 }
 0x73b   :  { %v14762_v3 = vpop.eup %14761  ;;  %v9042_v41 = vadd.f32 %v8957_v7, %v581_v13 }
 0x73c   :  { %v14764_v12 = vpop.eup %14763  ;;  %v9059_v29 = vmul.f32 0.5, %v14762_v3 }
 0x73d   :  { %14767 = vtanh.f32 %v9042_v41  ;;  %v9050_v62 = vmul.f32 0.5, %v14764_v12  ;;  %v14766_v45 = vpop.eup %14765 }
 0x73e   :  { %v9061_v47 = vadd.f32 0.5, %v9059_v29  ;;  %v8982_v42 = vpop.f32.mrf.mxu3  ;;  %v9051_v32 = vmul.f32 0.5, %v14766_v45 }
 0x73f   :  { %v8983_v59 = vadd.f32 %v8982_v42, %v8969_v34  ;;  %v9052_v11 = vadd.f32 0.5, %v9050_v62 }
 0x740   :  { %v9073_v57 = vmul.f32 %v9061_v47, %v21850_v56  ;;  %v8971_v1 = vpop.f32.mrf.mxu2  ;;  %v8958_v40 = vpop.f32.mrf.mxu1  ;;  %v9053_v24 = vadd.f32 0.5, %v9051_v32 }
 0x741   :  { %v9043_v53 = vadd.f32 %v8983_v59, %v610_v39 }
 0x743   :  { %v14768_v16 = vpop.eup %14767  ;;  %14769 = vtanh.f32 %v9043_v53 }
 0x744   :  { %v9074_v58 = vmul.f32 %v14768_v16, %v9052_v11 }
 0x746   :  { %v9076_v38 = vadd.f32 %v9074_v58, %v9072_v37  ;;  %v8984_v14 = vpop.f32.mrf.mxu3 }
 0x748   :  { %v9095_v6 = vsel %vm9087_vm0, %v9076_v38, %v21826_v49  ;;  %v639_v49 = vadd.f32 %v22401_v5, %v16194_v21 }
 0x749   :  { %v14770_v19 = vpop.eup %14769  ;;  %9099 = vst [vmem:[%s22340_s7] sm:$0xff] %v9095_v6 }
 0x74a   :  { %v9075_v50 = vmul.f32 %v14770_v19, %v9053_v24 }
 0x74c   :  { %v9077_v20 = vadd.f32 %v9075_v50, %v9073_v57 }
 0x74e   :  { %v9096_v8 = vsel %vm9087_vm0, %v9077_v20, %v21850_v56 }
 0x74f   :  { %9100 = vst [vmem:[%s22340_s7 + $0x8] sm:$0xff] %v9096_v8 }
 0x752   :  { %v8995_v23 = vpop.f32.mrf.mxu0 }
 0x758   :  { %v9008_v52 = vpop.f32.mrf.mxu1  ;;  %v9021_v26 = vpop.f32.mrf.mxu2 }
 0x759   :  { %v9009_v60 = vadd.f32 %v9008_v52, %v8995_v23 }
 0x75a   :  { %v8997_v55 = vpop.f32.mrf.mxu0 }
 0x75b   :  { %v9044_v54 = vadd.f32 %v9009_v60, %v639_v49 }
 0x75d   :  { %v9064_v2 = vmul.f32 0.5, %v9044_v54 }
 0x75e   :  { %v9034_v46 = vpop.f32.mrf.mxu3 }
 0x75f   :  { %14771 = vtanh.f32 %v9064_v2  ;;  %v9035_v56 = vadd.f32 %v9034_v46, %v9021_v26 }
 0x760   :  { %v9010_v15 = vpop.f32.mrf.mxu1  ;;  %v9023_v43 = vpop.f32.mrf.mxu2  ;;  %14773 = vtanh.f32 %v9076_v38 }
 0x761   :  { %v9045_v22 = vadd.f32 %v9035_v56, %v668_v10 }
 0x763   :  { %v9065_v31 = vmul.f32 0.5, %v9045_v22 }
 0x765   :  { %v14772_v30 = vpop.eup %14771  ;;  %14775 = vtanh.f32 %v9065_v31 }
 0x766   :  { %v9068_v35 = vmul.f32 0.5, %v14772_v30  ;;  %v9036_v33 = vpop.f32.mrf.mxu3  ;;  %v14774_v9 = vpop.eup %14773  ;;  %14777 = vtanh.f32 %v9077_v20 }
 0x768   :  { %v9070_v21 = vadd.f32 0.5, %v9068_v35 }
 0x76a   :  { %v9080_v63 = vmul.f32 %v14774_v9, %v9070_v21 }
 0x76b   :  { %v14776_v61 = vpop.eup %14775 }
 0x76c   :  { %v9088_v0 = vsel %vm9087_vm0, %v9080_v63, 0.0  ;;  %v9093_v25 = vsel %vm9087_vm0, %v9080_v63, %v21877_v36  ;;  %v9069_v44 = vmul.f32 0.5, %v14776_v61  ;;  %v14778_v48 = vpop.eup %14777 }
 0x76d   :  { %13525 = vst [vmem:[%s22339_s5 + $0x70] sm:$0xff] %v9088_v0 }
 0x76e   :  { %9097 = vst [vmem:[%s22341_s6] sm:$0xff] %v9093_v25  ;;  %v9071_v34 = vadd.f32 0.5, %v9069_v44 }
 0x770   :  { %v9081_v17 = vmul.f32 %v14778_v48, %v9071_v34 }
 0x772   :  { %v9089_v13 = vsel %vm9087_vm0, %v9081_v17, 0.0  ;;  %v9094_v37 = vsel %vm9087_vm0, %v9081_v17, %v21929_v51 }
 0x773   :  { %13526 = vst [vmem:[%s22339_s5 + $0x78] sm:$0xff] %v9089_v13 }
 0x774   :  { %9098 = vst [vmem:[%s22341_s6 + $0x8] sm:$0xff] %v9094_v37 }

</bundles_post_ra>
